<compile_context>
chip_gen: v7x
topology: tpu7x:2x2x1
jax: 0.10.0
libtpu: 0.0.40
codegen_flags: <defaults>
</compile_context>

<pallas_src>
import functools

import jax
import jax.numpy as jnp
from jax import lax
from jax.experimental import pallas as pl
from jax.experimental.pallas import tpu as pltpu

HEADS = 4
_CP = pltpu.CompilerParams(dimension_semantics=("parallel",))


# ----------------------------------------------------------------------------
# In-kernel helpers
# ----------------------------------------------------------------------------
def _gelu_exact(x):
    """Exact-erf GELU via A&S 7.1.26 rational erf approx (|err| < 2e-7).

    Built only from mul/add/exp/where so it is guaranteed to lower in Mosaic
    (exp runs on the EUP slot, essentially free next to the matmuls).
    """
    z = x * 0.7071067811865476
    az = jnp.abs(z)
    t = 1.0 / (1.0 + 0.3275911 * az)
    poly = ((((1.061405429 * t - 1.453152027) * t + 1.421413741) * t
             - 0.284496736) * t + 0.254829592) * t
    erf_abs = 1.0 - poly * jnp.exp(-az * az)
    erf = jnp.where(z < 0.0, -erf_abs, erf_abs)
    return 0.5 * x * (1.0 + erf)


def _dwconv3x3_flat(t, w9, pad_ref, H, W):
    """Depthwise 3x3 conv (zero padding) on a row-major flattened [N, C] map.

    t:       [N, C] activations (N = H*W, row-major y*W + x)
    w9:      [9, C] taps, row (dy+1)*3+(dx+1)
    pad_ref: VMEM scratch [N + 2*W + 2, C]
    """
    N, C = t.shape
    PAD = W + 1
    pad_ref[...] = jnp.zeros_like(pad_ref)
    pad_ref[pl.ds(PAD, N), :] = t.astype(pad_ref.dtype)
    # x position of every flattened pixel, for left/right edge masking.
    xpos = lax.broadcasted_iota(jnp.int32, (N, 1), 0) % W
    not_left = xpos != 0
    not_right = xpos != (W - 1)
    acc = jnp.zeros((N, C), jnp.float32)
    for dy in (-1, 0, 1):
        for dx in (-1, 0, 1):
            tap = (dy + 1) * 3 + (dx + 1)
            off = PAD + dy * W + dx                      # static python int >= 0
            contrib = pad_ref[pl.ds(off, N), :] * w9[tap:tap + 1, :]
            if dx == -1:
                contrib = jnp.where(not_left, contrib, 0.0)
            elif dx == 1:
                contrib = jnp.where(not_right, contrib, 0.0)
            acc = acc + contrib
    return acc


# ----------------------------------------------------------------------------
# Fused kernels (one grid step = one batch element)
# ----------------------------------------------------------------------------
def _msa_kernel(x_ref, wqkv_ref, rs_ref, pw_ref, pb_ref, pe1_ref, pe2_ref,
                out_ref, pad_ref, *, H, W, heads):
    # x_ref:    [1, N, C]
    # wqkv_ref: [C, 3C]    (x @ [Wq | Wk | Wv])
    # rs_ref:   SMEM (heads,) per-head rescale
    # pw_ref:   [C, C] output projection, pb_ref: [1, C]
    # pe1/pe2:  [9, C] depthwise 3x3 taps of the positional embedding
    # out_ref:  [1, N, C] = attn_proj + pos_emb + x   (MS_MSA(x) + x)
    x = x_ref[0]
    N, C = x.shape
    d = C // heads

    qkv = jnp.dot(x, wqkv_ref[...], preferred_element_type=jnp.float32)   # [N, 3C]
    v_inp = qkv[:, 2 * C:]
    pw = pw_ref[...]

    out_c = jnp.zeros((N, C), jnp.float32)
    for h in range(heads):
        q = qkv[:, h * d:(h + 1) * d]                                     # [N, d]
        k = qkv[:, C + h * d:C + (h + 1) * d]
        v = v_inp[:, h * d:(h + 1) * d]
        # F.normalize(dim=-1) in the [d, N] view == L2-normalize each column over N.
        q = q / jnp.maximum(jnp.sqrt(jnp.sum(q * q, axis=0, keepdims=True)), 1e-12)
        k = k / jnp.maximum(jnp.sqrt(jnp.sum(k * k, axis=0, keepdims=True)), 1e-12)
        # attn[dk, dq] = sum_n k[n, dk] q[n, dq]  (contraction over N, no transpose op)
        a = lax.dot_general(k, q, (((0,), (0,)), ((), ())),
                            preferred_element_type=jnp.float32)           # [d, d]
        a = a * rs_ref[h]
        a = a - jnp.max(a, axis=-1, keepdims=True)
        e = jnp.exp(a)
        a = e / jnp.sum(e, axis=-1, keepdims=True)
        # o[n, do] = sum_e a[do, e] v[n, e]
        o = lax.dot_general(v, a, (((1,), (1,)), ((), ())),
                            preferred_element_type=jnp.float32)           # [N, d]
        out_c = out_c + jnp.dot(o, pw[h * d:(h + 1) * d, :],
                                preferred_element_type=jnp.float32)
    out_c = out_c + pb_ref[...]

    # Positional embedding: dwconv3x3 -> GELU -> dwconv3x3 on v_inp (all in-kernel).
    pe = _dwconv3x3_flat(v_inp, pe1_ref[...], pad_ref, H, W)
    pe = _gelu_exact(pe)
    pe = _dwconv3x3_flat(pe, pe2_ref[...], pad_ref, H, W)

    out_ref[0] = (out_c + pe + x).astype(out_ref.dtype)


def _ffn_kernel(x_ref, g_ref, b_ref, w1_ref, dw_ref, w2_ref, out_ref, pad_ref,
                *, H, W):
    # x_ref: [1, N, C];  LN(eps=1e-5) -> 1x1 conv (C->4C) -> GELU -> dw3x3 -> GELU
    #        -> 1x1 conv (4C->C) -> + x
    x = x_ref[0]
    mu = jnp.mean(x, axis=-1, keepdims=True)
    var = jnp.mean((x - mu) * (x - mu), axis=-1, keepdims=True)
    y = (x - mu) * lax.rsqrt(var + 1e-5)
    y = y * g_ref[...] + b_ref[...]
    y = jnp.dot(y, w1_ref[...], preferred_element_type=jnp.float32)       # [N, 4C]
    y = _gelu_exact(y)
    y = _dwconv3x3_flat(y, dw_ref[...], pad_ref, H, W)
    y = _gelu_exact(y)
    y = jnp.dot(y, w2_ref[...], preferred_element_type=jnp.float32)       # [N, C]
    out_ref[0] = (y + x).astype(out_ref.dtype)


# ----------------------------------------------------------------------------
# pallas_call wrappers (jitted: one compile per shape)
# ----------------------------------------------------------------------------
def _bspec(shape):
    nd = len(shape)
    return pl.BlockSpec((1,) + tuple(shape[1:]),
                        lambda b, _nd=nd: (b,) + (0,) * (_nd - 1))


def _wspec(shape):
    nd = len(shape)
    return pl.BlockSpec(tuple(shape), lambda b, _nd=nd: (0,) * _nd)


@jax.jit
def msa_stage(x_nhwc, wqkv, rescale, proj_w, proj_b, pos_w1, pos_w2):
    B, H, W, C = x_nhwc.shape
    N = H * W
    xf = x_nhwc.reshape(B, N, C)
    out = pl.pallas_call(
        functools.partial(_msa_kernel, H=H, W=W, heads=HEADS),
        out_shape=jax.ShapeDtypeStruct((B, N, C), x_nhwc.dtype),
        grid=(B,),
        in_specs=[
            _bspec((B, N, C)),
            _wspec(wqkv.shape),
            pl.BlockSpec(memory_space=pltpu.MemorySpace.SMEM),   # rescale scalars
            _wspec(proj_w.shape),
            _wspec(proj_b.shape),
            _wspec(pos_w1.shape),
            _wspec(pos_w2.shape),
        ],
        out_specs=_bspec((B, N, C)),
        scratch_shapes=[pltpu.VMEM((N + 2 * W + 2, C), jnp.float32)],
        compiler_params=_CP,
    )(xf, wqkv, rescale, proj_w, proj_b, pos_w1, pos_w2)
    return out.reshape(B, H, W, C)


@jax.jit
def ffn_stage(x_nhwc, ln_g, ln_b, w1, dw, w2):
    B, H, W, C = x_nhwc.shape
    N = H * W
    Cm = w1.shape[1]
    xf = x_nhwc.reshape(B, N, C)
    out = pl.pallas_call(
        functools.partial(_ffn_kernel, H=H, W=W),
        out_shape=jax.ShapeDtypeStruct((B, N, C), x_nhwc.dtype),
        grid=(B,),
        in_specs=[
            _bspec((B, N, C)),
            _wspec(ln_g.shape), _wspec(ln_b.shape),
            _wspec(w1.shape), _wspec(dw.shape), _wspec(w2.shape),
        ],
        out_specs=_bspec((B, N, C)),
        scratch_shapes=[pltpu.VMEM((N + 2 * W + 2, Cm), jnp.float32)],
        compiler_params=_CP,
    )(xf, ln_g, ln_b, w1, dw, w2)
    return out.reshape(B, H, W, C)


# ----------------------------------------------------------------------------
# BasicBlock forward (NCHW public API; two fused kernels per MSAB block)
# ----------------------------------------------------------------------------
def basic_block_forward(x_nchw, params):
    x = jnp.transpose(x_nchw, (0, 2, 3, 1))                 # NCHW -> NHWC
    for p in params["blocks"]:
        x = msa_stage(x, p["wqkv"], p["rescale"], p["proj_w"], p["proj_b"],
                      p["pos_w1"], p["pos_w2"])             # MS_MSA(x) + x
        x = ffn_stage(x, p["ln_g"], p["ln_b"],
                      p["ffn_w1"], p["ffn_dw"], p["ffn_w2"])  # FFN(LN(x)) + x
    return jnp.transpose(x, (0, 3, 1, 2))                   # NHWC -> NCHW


# ----------------------------------------------------------------------------
# Deterministic synthetic parameters (shapes match the torch module)
# ----------------------------------------------------------------------------
def init_params(key, dim, num_blocks, heads=HEADS):
    blocks = []
    for i in range(num_blocks):
        ks = jax.random.split(jax.random.fold_in(key, i), 11)
        mk = lambda k, s, scale=0.2: (scale * jax.random.normal(k, s)).astype(jnp.float32)
        blocks.append(dict(
            # to_q/to_k/to_v (nn.Linear(dim, dim, bias=False)) fused: x @ [Wq|Wk|Wv]
            wqkv=mk(ks[0], (dim, 3 * dim)),
            rescale=(1.0 + 0.1 * jax.random.normal(ks[1], (heads,))).astype(jnp.float32),
            proj_w=mk(ks[2], (dim, dim)),        # nn.Linear(dim, dim) as x @ W
            proj_b=mk(ks[3], (1, dim)),
            pos_w1=mk(ks[4], (9, dim)),          # Conv2d(dim, dim, 3, groups=dim) taps
            pos_w2=mk(ks[5], (9, dim)),
            ln_g=(1.0 + 0.1 * jax.random.normal(ks[6], (1, dim))).astype(jnp.float32),
            ln_b=mk(ks[7], (1, dim), 0.05),
            ffn_w1=mk(ks[8], (dim, 4 * dim)),    # Conv2d(dim, 4*dim, 1, bias=False)
            ffn_dw=mk(ks[9], (9, 4 * dim)),      # Conv2d(4*dim, 4*dim, 3, groups=4*dim)
            ffn_w2=mk(ks[10], (4 * dim, dim)),   # Conv2d(4*dim, dim, 1, bias=False)
        ))
    return dict(blocks=blocks)


# ----------------------------------------------------------------------------
# Pure-JAX reference (mirrors the PyTorch forward) for validation
# ----------------------------------------------------------------------------
def _ref_dwconv(x_nhwc, w9):
    C = x_nhwc.shape[-1]
    w = w9.reshape(3, 3, 1, C)                   # HWIO, I=1, depthwise
    return lax.conv_general_dilated(
        x_nhwc, w, window_strides=(1, 1), padding="SAME",
        dimension_numbers=("NHWC", "HWIO", "NHWC"), feature_group_count=C)


def ref_forward(x_nchw, params, heads=HEADS):
    B, C, H, W = x_nchw.shape
    d = C // heads
    N = H * W
    x = jnp.transpose(x_nchw, (0, 2, 3, 1))
    for p in params["blocks"]:
        xf = x.reshape(B, N, C)
        qkv = xf @ p["wqkv"]
        q_inp, k_inp, v_inp = qkv[..., :C], qkv[..., C:2 * C], qkv[..., 2 * C:]
        split = lambda t: jnp.transpose(t.reshape(B, N, heads, d), (0, 2, 3, 1))  # b h d n
        q, k, v = split(q_inp), split(k_inp), split(v_inp)
        l2n = lambda t: t / jnp.maximum(
            jnp.sqrt(jnp.sum(t * t, axis=-1, keepdims=True)), 1e-12)
        q, k = l2n(q), l2n(k)
        attn = jnp.einsum("bhdn,bhen->bhde", k, q) * p["rescale"][None, :, None, None]
        attn = jax.nn.softmax(attn, axis=-1)
        xo = jnp.einsum("bhde,bhen->bhdn", attn, v)
        xo = jnp.transpose(xo, (0, 3, 1, 2)).reshape(B, N, C)
        out_c = xo @ p["proj_w"] + p["proj_b"]
        pe = _ref_dwconv(v_inp.reshape(B, H, W, C), p["pos_w1"])
        pe = jax.nn.gelu(pe, approximate=False)
        pe = _ref_dwconv(pe, p["pos_w2"])
        x = out_c.reshape(B, H, W, C) + pe + x
        xf = x.reshape(B, N, C)
        mu = jnp.mean(xf, -1, keepdims=True)
        var = jnp.mean((xf - mu) ** 2, -1, keepdims=True)
        y = (xf - mu) / jnp.sqrt(var + 1e-5) * p["ln_g"] + p["ln_b"]
        y = jax.nn.gelu(y @ p["ffn_w1"], approximate=False)
        y = _ref_dwconv(y.reshape(B, H, W, 4 * C), p["ffn_dw"])
        y = jax.nn.gelu(y, approximate=False)
        y = y.reshape(B, N, 4 * C) @ p["ffn_w2"]
        x = y.reshape(B, H, W, C) + x
    return jnp.transpose(x, (0, 3, 1, 2))


# ----------------------------------------------------------------------------
if __name__ == "__main__":
    key = jax.random.PRNGKey(0)
    # BasicBlock(in_ch, out_ch=16): dim=16, heads=4, dim_head=4.  num_blocks kept small.
    B, C, H, W = 2, 16, 16, 16
    num_blocks = 2
    xk, pk = jax.random.split(key)
    x = jax.random.normal(xk, (B, C, H, W), jnp.float32)
    params = init_params(pk, C, num_blocks)

    out = jax.block_until_ready(basic_block_forward(x, params))
    assert out.shape == (B, C, H, W)

    ref = jax.block_until_ready(ref_forward(x, params))
    err = float(jnp.max(jnp.abs(out - ref)))
    assert err < 5e-3, f"mismatch vs reference: {err}"
    print("KERNEL_OK")
</pallas_src>

<mosaic_0001>
module attributes {stable_mosaic.version = 11 : i64} {
  func.func @_msa_kernel(%arg0: i32, %arg1: memref<1x256x16xf32, #tpu.memory_space<vmem>>, %arg2: memref<16x48xf32, #tpu.memory_space<vmem>>, %arg3: memref<4xf32, #tpu.memory_space<smem>>, %arg4: memref<16x16xf32, #tpu.memory_space<vmem>>, %arg5: memref<1x16xf32, #tpu.memory_space<vmem>>, %arg6: memref<9x16xf32, #tpu.memory_space<vmem>>, %arg7: memref<9x16xf32, #tpu.memory_space<vmem>>, %arg8: memref<1x256x16xf32, #tpu.memory_space<vmem>>, %arg9: memref<290x16xf32, #tpu.memory_space<vmem>>) attributes {dimension_semantics = [#tpu.dimension_semantics<parallel>], iteration_bounds = array<i64: 2>, scalar_prefetch = 0 : i64, scratch_operands = 1 : i64, tpu.core_type = #tpu.core_type<tc>, window_params = [{transform_indices = @transform_0, window_bounds = array<i64: 1, 256, 16>}, {pipeline_mode = #tpu.pipeline_mode<synchronous>, transform_indices = @transform_1, window_bounds = array<i64: 16, 48>}, {transform_indices = @transform_2, window_bounds = array<i64: 4>}, {pipeline_mode = #tpu.pipeline_mode<synchronous>, transform_indices = @transform_3, window_bounds = array<i64: 16, 16>}, {pipeline_mode = #tpu.pipeline_mode<synchronous>, transform_indices = @transform_4, window_bounds = array<i64: 1, 16>}, {pipeline_mode = #tpu.pipeline_mode<synchronous>, transform_indices = @transform_5, window_bounds = array<i64: 9, 16>}, {pipeline_mode = #tpu.pipeline_mode<synchronous>, transform_indices = @transform_6, window_bounds = array<i64: 9, 16>}, {transform_indices = @transform_7, window_bounds = array<i64: 1, 256, 16>}]} {
    %c0 = arith.constant 0 : index
    %c0_0 = arith.constant 0 : index
    %c0_1 = arith.constant 0 : index
    %0 = vector.load %arg1[%c0, %c0_0, %c0_1] : memref<1x256x16xf32, #tpu.memory_space<vmem>>, vector<1x256x16xf32>
    %1 = vector.shape_cast %0 : vector<1x256x16xf32> to vector<256x16xf32>
    %c0_2 = arith.constant 0 : index
    %c0_3 = arith.constant 0 : index
    %2 = vector.load %arg2[%c0_2, %c0_3] : memref<16x48xf32, #tpu.memory_space<vmem>>, vector<16x48xf32>
    %cst = arith.constant dense<0.000000e+00> : vector<256x48xf32>
    %3 = tpu.matmul %1, %2, %cst {dimension_numbers = #tpu.dot_dimension_numbers<[1], [0], [0], [1], [0, 0, 1, 1], [], []>} : vector<256x16xf32>, vector<16x48xf32>, vector<256x48xf32> -> vector<256x48xf32>
    %4 = vector.extract_strided_slice %3 {offsets = [0, 32], sizes = [256, 16], strides = [1, 1]} : vector<256x48xf32> to vector<256x16xf32>
    %c0_4 = arith.constant 0 : index
    %c0_5 = arith.constant 0 : index
    %5 = vector.load %arg4[%c0_4, %c0_5] : memref<16x16xf32, #tpu.memory_space<vmem>>, vector<16x16xf32>
    %cst_6 = arith.constant 0.000000e+00 : f32
    %6 = vector.broadcast %cst_6 : f32 to vector<256x16xf32>
    %7 = vector.extract_strided_slice %3 {offsets = [0, 0], sizes = [256, 4], strides = [1, 1]} : vector<256x48xf32> to vector<256x4xf32>
    %8 = vector.extract_strided_slice %3 {offsets = [0, 16], sizes = [256, 4], strides = [1, 1]} : vector<256x48xf32> to vector<256x4xf32>
    %9 = vector.extract_strided_slice %4 {offsets = [0, 0], sizes = [256, 4], strides = [1, 1]} : vector<256x16xf32> to vector<256x4xf32>
    %10 = arith.mulf %7, %7 : vector<256x4xf32>
    %cst_7 = arith.constant dense<0.000000e+00> : vector<4xf32>
    %11 = vector.multi_reduction <add>, %10, %cst_7 [0] : vector<256x4xf32> to vector<4xf32>
    %12 = vector.shape_cast %11 : vector<4xf32> to vector<1x4xf32>
    %13 = math.sqrt %12 : vector<1x4xf32>
    %cst_8 = arith.constant 9.99999996E-13 : f32
    %14 = vector.broadcast %cst_8 : f32 to vector<1x4xf32>
    %15 = arith.maximumf %13, %14 : vector<1x4xf32>
    %16 = vector.broadcast %15 : vector<1x4xf32> to vector<256x4xf32>
    %17 = arith.divf %7, %16 : vector<256x4xf32>
    %18 = arith.mulf %8, %8 : vector<256x4xf32>
    %cst_9 = arith.constant dense<0.000000e+00> : vector<4xf32>
    %19 = vector.multi_reduction <add>, %18, %cst_9 [0] : vector<256x4xf32> to vector<4xf32>
    %20 = vector.shape_cast %19 : vector<4xf32> to vector<1x4xf32>
    %21 = math.sqrt %20 : vector<1x4xf32>
    %cst_10 = arith.constant 9.99999996E-13 : f32
    %22 = vector.broadcast %cst_10 : f32 to vector<1x4xf32>
    %23 = arith.maximumf %21, %22 : vector<1x4xf32>
    %24 = vector.broadcast %23 : vector<1x4xf32> to vector<256x4xf32>
    %25 = arith.divf %8, %24 : vector<256x4xf32>
    %cst_11 = arith.constant dense<0.000000e+00> : vector<4x4xf32>
    %26 = tpu.matmul %25, %17, %cst_11 {dimension_numbers = #tpu.dot_dimension_numbers<[0], [0], [1], [1], [0, 1, 1, 1], [], []>} : vector<256x4xf32>, vector<256x4xf32>, vector<4x4xf32> -> vector<4x4xf32>
    %c0_12 = arith.constant 0 : index
    %27 = memref.load %arg3[%c0_12] : memref<4xf32, #tpu.memory_space<smem>>
    %28 = vector.broadcast %27 : f32 to vector<4x4xf32>
    %29 = arith.mulf %26, %28 : vector<4x4xf32>
    %cst_13 = arith.constant dense<0xFF800000> : vector<4xf32>
    %30 = vector.multi_reduction <maximumf>, %29, %cst_13 [1] : vector<4x4xf32> to vector<4xf32>
    %31 = vector.shape_cast %30 : vector<4xf32> to vector<4x1xf32>
    %32 = vector.broadcast %31 : vector<4x1xf32> to vector<4x4xf32>
    %33 = arith.subf %29, %32 : vector<4x4xf32>
    %34 = math.exp %33 : vector<4x4xf32>
    %cst_14 = arith.constant dense<0.000000e+00> : vector<4xf32>
    %35 = vector.multi_reduction <add>, %34, %cst_14 [1] : vector<4x4xf32> to vector<4xf32>
    %36 = vector.shape_cast %35 : vector<4xf32> to vector<4x1xf32>
    %37 = vector.broadcast %36 : vector<4x1xf32> to vector<4x4xf32>
    %38 = arith.divf %34, %37 : vector<4x4xf32>
    %cst_15 = arith.constant dense<0.000000e+00> : vector<256x4xf32>
    %39 = tpu.matmul %9, %38, %cst_15 {dimension_numbers = #tpu.dot_dimension_numbers<[1], [1], [0], [0], [0, 0, 1, 0], [], []>} : vector<256x4xf32>, vector<4x4xf32>, vector<256x4xf32> -> vector<256x4xf32>
    %40 = vector.extract_strided_slice %5 {offsets = [0, 0], sizes = [4, 16], strides = [1, 1]} : vector<16x16xf32> to vector<4x16xf32>
    %cst_16 = arith.constant dense<0.000000e+00> : vector<256x16xf32>
    %41 = tpu.matmul %39, %40, %cst_16 {dimension_numbers = #tpu.dot_dimension_numbers<[1], [0], [0], [1], [0, 0, 1, 1], [], []>} : vector<256x4xf32>, vector<4x16xf32>, vector<256x16xf32> -> vector<256x16xf32>
    %42 = arith.addf %6, %41 : vector<256x16xf32>
    %43 = vector.extract_strided_slice %3 {offsets = [0, 4], sizes = [256, 4], strides = [1, 1]} : vector<256x48xf32> to vector<256x4xf32>
    %44 = vector.extract_strided_slice %3 {offsets = [0, 20], sizes = [256, 4], strides = [1, 1]} : vector<256x48xf32> to vector<256x4xf32>
    %45 = vector.extract_strided_slice %4 {offsets = [0, 4], sizes = [256, 4], strides = [1, 1]} : vector<256x16xf32> to vector<256x4xf32>
    %46 = arith.mulf %43, %43 : vector<256x4xf32>
    %cst_17 = arith.constant dense<0.000000e+00> : vector<4xf32>
    %47 = vector.multi_reduction <add>, %46, %cst_17 [0] : vector<256x4xf32> to vector<4xf32>
    %48 = vector.shape_cast %47 : vector<4xf32> to vector<1x4xf32>
    %49 = math.sqrt %48 : vector<1x4xf32>
    %cst_18 = arith.constant 9.99999996E-13 : f32
    %50 = vector.broadcast %cst_18 : f32 to vector<1x4xf32>
    %51 = arith.maximumf %49, %50 : vector<1x4xf32>
    %52 = vector.broadcast %51 : vector<1x4xf32> to vector<256x4xf32>
    %53 = arith.divf %43, %52 : vector<256x4xf32>
    %54 = arith.mulf %44, %44 : vector<256x4xf32>
    %cst_19 = arith.constant dense<0.000000e+00> : vector<4xf32>
    %55 = vector.multi_reduction <add>, %54, %cst_19 [0] : vector<256x4xf32> to vector<4xf32>
    %56 = vector.shape_cast %55 : vector<4xf32> to vector<1x4xf32>
    %57 = math.sqrt %56 : vector<1x4xf32>
    %cst_20 = arith.constant 9.99999996E-13 : f32
    %58 = vector.broadcast %cst_20 : f32 to vector<1x4xf32>
    %59 = arith.maximumf %57, %58 : vector<1x4xf32>
    %60 = vector.broadcast %59 : vector<1x4xf32> to vector<256x4xf32>
    %61 = arith.divf %44, %60 : vector<256x4xf32>
    %cst_21 = arith.constant dense<0.000000e+00> : vector<4x4xf32>
    %62 = tpu.matmul %61, %53, %cst_21 {dimension_numbers = #tpu.dot_dimension_numbers<[0], [0], [1], [1], [0, 1, 1, 1], [], []>} : vector<256x4xf32>, vector<256x4xf32>, vector<4x4xf32> -> vector<4x4xf32>
    %c1 = arith.constant 1 : index
    %63 = memref.load %arg3[%c1] : memref<4xf32, #tpu.memory_space<smem>>
    %64 = vector.broadcast %63 : f32 to vector<4x4xf32>
    %65 = arith.mulf %62, %64 : vector<4x4xf32>
    %cst_22 = arith.constant dense<0xFF800000> : vector<4xf32>
    %66 = vector.multi_reduction <maximumf>, %65, %cst_22 [1] : vector<4x4xf32> to vector<4xf32>
    %67 = vector.shape_cast %66 : vector<4xf32> to vector<4x1xf32>
    %68 = vector.broadcast %67 : vector<4x1xf32> to vector<4x4xf32>
    %69 = arith.subf %65, %68 : vector<4x4xf32>
    %70 = math.exp %69 : vector<4x4xf32>
    %cst_23 = arith.constant dense<0.000000e+00> : vector<4xf32>
    %71 = vector.multi_reduction <add>, %70, %cst_23 [1] : vector<4x4xf32> to vector<4xf32>
    %72 = vector.shape_cast %71 : vector<4xf32> to vector<4x1xf32>
    %73 = vector.broadcast %72 : vector<4x1xf32> to vector<4x4xf32>
    %74 = arith.divf %70, %73 : vector<4x4xf32>
    %cst_24 = arith.constant dense<0.000000e+00> : vector<256x4xf32>
    %75 = tpu.matmul %45, %74, %cst_24 {dimension_numbers = #tpu.dot_dimension_numbers<[1], [1], [0], [0], [0, 0, 1, 0], [], []>} : vector<256x4xf32>, vector<4x4xf32>, vector<256x4xf32> -> vector<256x4xf32>
    %76 = vector.extract_strided_slice %5 {offsets = [4, 0], sizes = [4, 16], strides = [1, 1]} : vector<16x16xf32> to vector<4x16xf32>
    %cst_25 = arith.constant dense<0.000000e+00> : vector<256x16xf32>
    %77 = tpu.matmul %75, %76, %cst_25 {dimension_numbers = #tpu.dot_dimension_numbers<[1], [0], [0], [1], [0, 0, 1, 1], [], []>} : vector<256x4xf32>, vector<4x16xf32>, vector<256x16xf32> -> vector<256x16xf32>
    %78 = arith.addf %42, %77 : vector<256x16xf32>
    %79 = vector.extract_strided_slice %3 {offsets = [0, 8], sizes = [256, 4], strides = [1, 1]} : vector<256x48xf32> to vector<256x4xf32>
    %80 = vector.extract_strided_slice %3 {offsets = [0, 24], sizes = [256, 4], strides = [1, 1]} : vector<256x48xf32> to vector<256x4xf32>
    %81 = vector.extract_strided_slice %4 {offsets = [0, 8], sizes = [256, 4], strides = [1, 1]} : vector<256x16xf32> to vector<256x4xf32>
    %82 = arith.mulf %79, %79 : vector<256x4xf32>
    %cst_26 = arith.constant dense<0.000000e+00> : vector<4xf32>
    %83 = vector.multi_reduction <add>, %82, %cst_26 [0] : vector<256x4xf32> to vector<4xf32>
    %84 = vector.shape_cast %83 : vector<4xf32> to vector<1x4xf32>
    %85 = math.sqrt %84 : vector<1x4xf32>
    %cst_27 = arith.constant 9.99999996E-13 : f32
    %86 = vector.broadcast %cst_27 : f32 to vector<1x4xf32>
    %87 = arith.maximumf %85, %86 : vector<1x4xf32>
    %88 = vector.broadcast %87 : vector<1x4xf32> to vector<256x4xf32>
    %89 = arith.divf %79, %88 : vector<256x4xf32>
    %90 = arith.mulf %80, %80 : vector<256x4xf32>
    %cst_28 = arith.constant dense<0.000000e+00> : vector<4xf32>
    %91 = vector.multi_reduction <add>, %90, %cst_28 [0] : vector<256x4xf32> to vector<4xf32>
    %92 = vector.shape_cast %91 : vector<4xf32> to vector<1x4xf32>
    %93 = math.sqrt %92 : vector<1x4xf32>
    %cst_29 = arith.constant 9.99999996E-13 : f32
    %94 = vector.broadcast %cst_29 : f32 to vector<1x4xf32>
    %95 = arith.maximumf %93, %94 : vector<1x4xf32>
    %96 = vector.broadcast %95 : vector<1x4xf32> to vector<256x4xf32>
    %97 = arith.divf %80, %96 : vector<256x4xf32>
    %cst_30 = arith.constant dense<0.000000e+00> : vector<4x4xf32>
    %98 = tpu.matmul %97, %89, %cst_30 {dimension_numbers = #tpu.dot_dimension_numbers<[0], [0], [1], [1], [0, 1, 1, 1], [], []>} : vector<256x4xf32>, vector<256x4xf32>, vector<4x4xf32> -> vector<4x4xf32>
    %c2 = arith.constant 2 : index
    %99 = memref.load %arg3[%c2] : memref<4xf32, #tpu.memory_space<smem>>
    %100 = vector.broadcast %99 : f32 to vector<4x4xf32>
    %101 = arith.mulf %98, %100 : vector<4x4xf32>
    %cst_31 = arith.constant dense<0xFF800000> : vector<4xf32>
    %102 = vector.multi_reduction <maximumf>, %101, %cst_31 [1] : vector<4x4xf32> to vector<4xf32>
    %103 = vector.shape_cast %102 : vector<4xf32> to vector<4x1xf32>
    %104 = vector.broadcast %103 : vector<4x1xf32> to vector<4x4xf32>
    %105 = arith.subf %101, %104 : vector<4x4xf32>
    %106 = math.exp %105 : vector<4x4xf32>
    %cst_32 = arith.constant dense<0.000000e+00> : vector<4xf32>
    %107 = vector.multi_reduction <add>, %106, %cst_32 [1] : vector<4x4xf32> to vector<4xf32>
    %108 = vector.shape_cast %107 : vector<4xf32> to vector<4x1xf32>
    %109 = vector.broadcast %108 : vector<4x1xf32> to vector<4x4xf32>
    %110 = arith.divf %106, %109 : vector<4x4xf32>
    %cst_33 = arith.constant dense<0.000000e+00> : vector<256x4xf32>
    %111 = tpu.matmul %81, %110, %cst_33 {dimension_numbers = #tpu.dot_dimension_numbers<[1], [1], [0], [0], [0, 0, 1, 0], [], []>} : vector<256x4xf32>, vector<4x4xf32>, vector<256x4xf32> -> vector<256x4xf32>
    %112 = vector.extract_strided_slice %5 {offsets = [8, 0], sizes = [4, 16], strides = [1, 1]} : vector<16x16xf32> to vector<4x16xf32>
    %cst_34 = arith.constant dense<0.000000e+00> : vector<256x16xf32>
    %113 = tpu.matmul %111, %112, %cst_34 {dimension_numbers = #tpu.dot_dimension_numbers<[1], [0], [0], [1], [0, 0, 1, 1], [], []>} : vector<256x4xf32>, vector<4x16xf32>, vector<256x16xf32> -> vector<256x16xf32>
    %114 = arith.addf %78, %113 : vector<256x16xf32>
    %115 = vector.extract_strided_slice %3 {offsets = [0, 12], sizes = [256, 4], strides = [1, 1]} : vector<256x48xf32> to vector<256x4xf32>
    %116 = vector.extract_strided_slice %3 {offsets = [0, 28], sizes = [256, 4], strides = [1, 1]} : vector<256x48xf32> to vector<256x4xf32>
    %117 = vector.extract_strided_slice %4 {offsets = [0, 12], sizes = [256, 4], strides = [1, 1]} : vector<256x16xf32> to vector<256x4xf32>
    %118 = arith.mulf %115, %115 : vector<256x4xf32>
    %cst_35 = arith.constant dense<0.000000e+00> : vector<4xf32>
    %119 = vector.multi_reduction <add>, %118, %cst_35 [0] : vector<256x4xf32> to vector<4xf32>
    %120 = vector.shape_cast %119 : vector<4xf32> to vector<1x4xf32>
    %121 = math.sqrt %120 : vector<1x4xf32>
    %cst_36 = arith.constant 9.99999996E-13 : f32
    %122 = vector.broadcast %cst_36 : f32 to vector<1x4xf32>
    %123 = arith.maximumf %121, %122 : vector<1x4xf32>
    %124 = vector.broadcast %123 : vector<1x4xf32> to vector<256x4xf32>
    %125 = arith.divf %115, %124 : vector<256x4xf32>
    %126 = arith.mulf %116, %116 : vector<256x4xf32>
    %cst_37 = arith.constant dense<0.000000e+00> : vector<4xf32>
    %127 = vector.multi_reduction <add>, %126, %cst_37 [0] : vector<256x4xf32> to vector<4xf32>
    %128 = vector.shape_cast %127 : vector<4xf32> to vector<1x4xf32>
    %129 = math.sqrt %128 : vector<1x4xf32>
    %cst_38 = arith.constant 9.99999996E-13 : f32
    %130 = vector.broadcast %cst_38 : f32 to vector<1x4xf32>
    %131 = arith.maximumf %129, %130 : vector<1x4xf32>
    %132 = vector.broadcast %131 : vector<1x4xf32> to vector<256x4xf32>
    %133 = arith.divf %116, %132 : vector<256x4xf32>
    %cst_39 = arith.constant dense<0.000000e+00> : vector<4x4xf32>
    %134 = tpu.matmul %133, %125, %cst_39 {dimension_numbers = #tpu.dot_dimension_numbers<[0], [0], [1], [1], [0, 1, 1, 1], [], []>} : vector<256x4xf32>, vector<256x4xf32>, vector<4x4xf32> -> vector<4x4xf32>
    %c3 = arith.constant 3 : index
    %135 = memref.load %arg3[%c3] : memref<4xf32, #tpu.memory_space<smem>>
    %136 = vector.broadcast %135 : f32 to vector<4x4xf32>
    %137 = arith.mulf %134, %136 : vector<4x4xf32>
    %cst_40 = arith.constant dense<0xFF800000> : vector<4xf32>
    %138 = vector.multi_reduction <maximumf>, %137, %cst_40 [1] : vector<4x4xf32> to vector<4xf32>
    %139 = vector.shape_cast %138 : vector<4xf32> to vector<4x1xf32>
    %140 = vector.broadcast %139 : vector<4x1xf32> to vector<4x4xf32>
    %141 = arith.subf %137, %140 : vector<4x4xf32>
    %142 = math.exp %141 : vector<4x4xf32>
    %cst_41 = arith.constant dense<0.000000e+00> : vector<4xf32>
    %143 = vector.multi_reduction <add>, %142, %cst_41 [1] : vector<4x4xf32> to vector<4xf32>
    %144 = vector.shape_cast %143 : vector<4xf32> to vector<4x1xf32>
    %145 = vector.broadcast %144 : vector<4x1xf32> to vector<4x4xf32>
    %146 = arith.divf %142, %145 : vector<4x4xf32>
    %cst_42 = arith.constant dense<0.000000e+00> : vector<256x4xf32>
    %147 = tpu.matmul %117, %146, %cst_42 {dimension_numbers = #tpu.dot_dimension_numbers<[1], [1], [0], [0], [0, 0, 1, 0], [], []>} : vector<256x4xf32>, vector<4x4xf32>, vector<256x4xf32> -> vector<256x4xf32>
    %148 = vector.extract_strided_slice %5 {offsets = [12, 0], sizes = [4, 16], strides = [1, 1]} : vector<16x16xf32> to vector<4x16xf32>
    %cst_43 = arith.constant dense<0.000000e+00> : vector<256x16xf32>
    %149 = tpu.matmul %147, %148, %cst_43 {dimension_numbers = #tpu.dot_dimension_numbers<[1], [0], [0], [1], [0, 0, 1, 1], [], []>} : vector<256x4xf32>, vector<4x16xf32>, vector<256x16xf32> -> vector<256x16xf32>
    %150 = arith.addf %114, %149 : vector<256x16xf32>
    %c0_44 = arith.constant 0 : index
    %c0_45 = arith.constant 0 : index
    %151 = vector.load %arg5[%c0_44, %c0_45] : memref<1x16xf32, #tpu.memory_space<vmem>>, vector<1x16xf32>
    %152 = vector.broadcast %151 : vector<1x16xf32> to vector<256x16xf32>
    %153 = arith.addf %150, %152 : vector<256x16xf32>
    %c0_46 = arith.constant 0 : index
    %c0_47 = arith.constant 0 : index
    %154 = vector.load %arg6[%c0_46, %c0_47] : memref<9x16xf32, #tpu.memory_space<vmem>>, vector<9x16xf32>
    %cst_48 = arith.constant 0.000000e+00 : f32
    %155 = vector.broadcast %cst_48 : f32 to vector<290x16xf32>
    %c0_49 = arith.constant 0 : index
    %c0_50 = arith.constant 0 : index
    %156 = vector.load %arg9[%c0_49, %c0_50] : memref<290x16xf32, #tpu.memory_space<vmem>>, vector<290x16xf32>
    tpu.vector_store %arg9[%c0_49, %c0_50], %155 {strides = array<i32>} : memref<290x16xf32, #tpu.memory_space<vmem>>, vector<290x16xf32>,
    %c17 = arith.constant 17 : index
    %c0_51 = arith.constant 0 : index
    %157 = vector.load %arg9[%c17, %c0_51] : memref<290x16xf32, #tpu.memory_space<vmem>>, vector<256x16xf32>
    tpu.vector_store %arg9[%c17, %c0_51], %4 {strides = array<i32>} : memref<290x16xf32, #tpu.memory_space<vmem>>, vector<256x16xf32>,
    %158 = tpu.iota {dimensions = array<i32: 0>} : vector<256x1xi32>
    %c16_i32 = arith.constant 16 : i32
    %c0_i32 = arith.constant 0 : i32
    %159 = arith.cmpi eq, %c16_i32, %c0_i32 : i32
    %c1_i32 = arith.constant 1 : i32
    %160 = arith.select %159, %c1_i32, %c16_i32 : i32
    %161 = vector.broadcast %160 : i32 to vector<256x1xi32>
    %162 = arith.remsi %158, %161 : vector<256x1xi32>
    %c0_i32_52 = arith.constant 0 : i32
    %163 = vector.broadcast %c0_i32_52 : i32 to vector<256x1xi32>
    %164 = arith.cmpi ne, %162, %163 : vector<256x1xi32>
    %c0_i32_53 = arith.constant 0 : i32
    %165 = vector.broadcast %c0_i32_53 : i32 to vector<256x1xi32>
    %166 = arith.cmpi slt, %162, %165 : vector<256x1xi32>
    %c0_i32_54 = arith.constant 0 : i32
    %167 = arith.cmpi slt, %160, %c0_i32_54 : i32
    %168 = vector.broadcast %167 : i1 to vector<256x1xi1>
    %169 = vector.broadcast %168 : vector<256x1xi1> to vector<256x1xi1>
    %170 = arith.xori %166, %169 : vector<256x1xi1>
    %171 = arith.andi %170, %164 : vector<256x1xi1>
    %172 = vector.broadcast %160 : i32 to vector<256x1xi32>
    %173 = arith.addi %162, %172 : vector<256x1xi32>
    %174 = arith.select %171, %173, %162 : vector<256x1xi1>, vector<256x1xi32>
    %c0_i32_55 = arith.constant 0 : i32
    %175 = vector.broadcast %c0_i32_55 : i32 to vector<256x1xi32>
    %176 = arith.cmpi ne, %174, %175 : vector<256x1xi32>
    %c15_i32 = arith.constant 15 : i32
    %177 = vector.broadcast %c15_i32 : i32 to vector<256x1xi32>
    %178 = arith.cmpi ne, %174, %177 : vector<256x1xi32>
    %cst_56 = arith.constant 0.000000e+00 : f32
    %179 = vector.broadcast %cst_56 : f32 to vector<256x16xf32>
    %c0_57 = arith.constant 0 : index
    %c0_58 = arith.constant 0 : index
    %180 = vector.load %arg9[%c0_57, %c0_58] : memref<290x16xf32, #tpu.memory_space<vmem>>, vector<256x16xf32>
    %181 = vector.extract_strided_slice %154 {offsets = [0, 0], sizes = [1, 16], strides = [1, 1]} : vector<9x16xf32> to vector<1x16xf32>
    %182 = vector.broadcast %181 : vector<1x16xf32> to vector<256x16xf32>
    %183 = arith.mulf %180, %182 : vector<256x16xf32>
    %cst_59 = arith.constant 0.000000e+00 : f32
    %184 = vector.shape_cast %176 : vector<256x1xi1> to vector<256x1xi1>
    %185 = vector.broadcast %184 : vector<256x1xi1> to vector<256x16xi1>
    %186 = vector.broadcast %cst_59 : f32 to vector<256x16xf32>
    %187 = arith.select %185, %183, %186 : vector<256x16xi1>, vector<256x16xf32>
    %188 = arith.addf %179, %187 : vector<256x16xf32>
    %c1_60 = arith.constant 1 : index
    %c0_61 = arith.constant 0 : index
    %189 = vector.load %arg9[%c1_60, %c0_61] : memref<290x16xf32, #tpu.memory_space<vmem>>, vector<256x16xf32>
    %190 = vector.extract_strided_slice %154 {offsets = [1, 0], sizes = [1, 16], strides = [1, 1]} : vector<9x16xf32> to vector<1x16xf32>
    %191 = vector.broadcast %190 : vector<1x16xf32> to vector<256x16xf32>
    %192 = arith.mulf %189, %191 : vector<256x16xf32>
    %193 = arith.addf %188, %192 : vector<256x16xf32>
    %c2_62 = arith.constant 2 : index
    %c0_63 = arith.constant 0 : index
    %194 = vector.load %arg9[%c2_62, %c0_63] : memref<290x16xf32, #tpu.memory_space<vmem>>, vector<256x16xf32>
    %195 = vector.extract_strided_slice %154 {offsets = [2, 0], sizes = [1, 16], strides = [1, 1]} : vector<9x16xf32> to vector<1x16xf32>
    %196 = vector.broadcast %195 : vector<1x16xf32> to vector<256x16xf32>
    %197 = arith.mulf %194, %196 : vector<256x16xf32>
    %cst_64 = arith.constant 0.000000e+00 : f32
    %198 = vector.shape_cast %178 : vector<256x1xi1> to vector<256x1xi1>
    %199 = vector.broadcast %198 : vector<256x1xi1> to vector<256x16xi1>
    %200 = vector.broadcast %cst_64 : f32 to vector<256x16xf32>
    %201 = arith.select %199, %197, %200 : vector<256x16xi1>, vector<256x16xf32>
    %202 = arith.addf %193, %201 : vector<256x16xf32>
    %c16 = arith.constant 16 : index
    %c0_65 = arith.constant 0 : index
    %203 = vector.load %arg9[%c16, %c0_65] : memref<290x16xf32, #tpu.memory_space<vmem>>, vector<256x16xf32>
    %204 = vector.extract_strided_slice %154 {offsets = [3, 0], sizes = [1, 16], strides = [1, 1]} : vector<9x16xf32> to vector<1x16xf32>
    %205 = vector.broadcast %204 : vector<1x16xf32> to vector<256x16xf32>
    %206 = arith.mulf %203, %205 : vector<256x16xf32>
    %cst_66 = arith.constant 0.000000e+00 : f32
    %207 = vector.shape_cast %176 : vector<256x1xi1> to vector<256x1xi1>
    %208 = vector.broadcast %207 : vector<256x1xi1> to vector<256x16xi1>
    %209 = vector.broadcast %cst_66 : f32 to vector<256x16xf32>
    %210 = arith.select %208, %206, %209 : vector<256x16xi1>, vector<256x16xf32>
    %211 = arith.addf %202, %210 : vector<256x16xf32>
    %c17_67 = arith.constant 17 : index
    %c0_68 = arith.constant 0 : index
    %212 = vector.load %arg9[%c17_67, %c0_68] : memref<290x16xf32, #tpu.memory_space<vmem>>, vector<256x16xf32>
    %213 = vector.extract_strided_slice %154 {offsets = [4, 0], sizes = [1, 16], strides = [1, 1]} : vector<9x16xf32> to vector<1x16xf32>
    %214 = vector.broadcast %213 : vector<1x16xf32> to vector<256x16xf32>
    %215 = arith.mulf %212, %214 : vector<256x16xf32>
    %216 = arith.addf %211, %215 : vector<256x16xf32>
    %c18 = arith.constant 18 : index
    %c0_69 = arith.constant 0 : index
    %217 = vector.load %arg9[%c18, %c0_69] : memref<290x16xf32, #tpu.memory_space<vmem>>, vector<256x16xf32>
    %218 = vector.extract_strided_slice %154 {offsets = [5, 0], sizes = [1, 16], strides = [1, 1]} : vector<9x16xf32> to vector<1x16xf32>
    %219 = vector.broadcast %218 : vector<1x16xf32> to vector<256x16xf32>
    %220 = arith.mulf %217, %219 : vector<256x16xf32>
    %cst_70 = arith.constant 0.000000e+00 : f32
    %221 = vector.shape_cast %178 : vector<256x1xi1> to vector<256x1xi1>
    %222 = vector.broadcast %221 : vector<256x1xi1> to vector<256x16xi1>
    %223 = vector.broadcast %cst_70 : f32 to vector<256x16xf32>
    %224 = arith.select %222, %220, %223 : vector<256x16xi1>, vector<256x16xf32>
    %225 = arith.addf %216, %224 : vector<256x16xf32>
    %c32 = arith.constant 32 : index
    %c0_71 = arith.constant 0 : index
    %226 = vector.load %arg9[%c32, %c0_71] : memref<290x16xf32, #tpu.memory_space<vmem>>, vector<256x16xf32>
    %227 = vector.extract_strided_slice %154 {offsets = [6, 0], sizes = [1, 16], strides = [1, 1]} : vector<9x16xf32> to vector<1x16xf32>
    %228 = vector.broadcast %227 : vector<1x16xf32> to vector<256x16xf32>
    %229 = arith.mulf %226, %228 : vector<256x16xf32>
    %cst_72 = arith.constant 0.000000e+00 : f32
    %230 = vector.shape_cast %176 : vector<256x1xi1> to vector<256x1xi1>
    %231 = vector.broadcast %230 : vector<256x1xi1> to vector<256x16xi1>
    %232 = vector.broadcast %cst_72 : f32 to vector<256x16xf32>
    %233 = arith.select %231, %229, %232 : vector<256x16xi1>, vector<256x16xf32>
    %234 = arith.addf %225, %233 : vector<256x16xf32>
    %c33 = arith.constant 33 : index
    %c0_73 = arith.constant 0 : index
    %235 = vector.load %arg9[%c33, %c0_73] : memref<290x16xf32, #tpu.memory_space<vmem>>, vector<256x16xf32>
    %236 = vector.extract_strided_slice %154 {offsets = [7, 0], sizes = [1, 16], strides = [1, 1]} : vector<9x16xf32> to vector<1x16xf32>
    %237 = vector.broadcast %236 : vector<1x16xf32> to vector<256x16xf32>
    %238 = arith.mulf %235, %237 : vector<256x16xf32>
    %239 = arith.addf %234, %238 : vector<256x16xf32>
    %c34 = arith.constant 34 : index
    %c0_74 = arith.constant 0 : index
    %240 = vector.load %arg9[%c34, %c0_74] : memref<290x16xf32, #tpu.memory_space<vmem>>, vector<256x16xf32>
    %241 = vector.extract_strided_slice %154 {offsets = [8, 0], sizes = [1, 16], strides = [1, 1]} : vector<9x16xf32> to vector<1x16xf32>
    %242 = vector.broadcast %241 : vector<1x16xf32> to vector<256x16xf32>
    %243 = arith.mulf %240, %242 : vector<256x16xf32>
    %cst_75 = arith.constant 0.000000e+00 : f32
    %244 = vector.shape_cast %178 : vector<256x1xi1> to vector<256x1xi1>
    %245 = vector.broadcast %244 : vector<256x1xi1> to vector<256x16xi1>
    %246 = vector.broadcast %cst_75 : f32 to vector<256x16xf32>
    %247 = arith.select %245, %243, %246 : vector<256x16xi1>, vector<256x16xf32>
    %248 = arith.addf %239, %247 : vector<256x16xf32>
    %cst_76 = arith.constant 0.707106769 : f32
    %249 = vector.broadcast %cst_76 : f32 to vector<256x16xf32>
    %250 = arith.mulf %248, %249 : vector<256x16xf32>
    %251 = math.absf %250 : vector<256x16xf32>
    %cst_77 = arith.constant 0.327591091 : f32
    %252 = vector.broadcast %cst_77 : f32 to vector<256x16xf32>
    %253 = arith.mulf %252, %251 : vector<256x16xf32>
    %cst_78 = arith.constant 1.000000e+00 : f32
    %254 = vector.broadcast %cst_78 : f32 to vector<256x16xf32>
    %255 = arith.addf %254, %253 : vector<256x16xf32>
    %cst_79 = arith.constant 1.000000e+00 : f32
    %256 = vector.broadcast %cst_79 : f32 to vector<256x16xf32>
    %257 = arith.divf %256, %255 : vector<256x16xf32>
    %cst_80 = arith.constant 1.06140542 : f32
    %258 = vector.broadcast %cst_80 : f32 to vector<256x16xf32>
    %259 = arith.mulf %258, %257 : vector<256x16xf32>
    %cst_81 = arith.constant 1.45315206 : f32
    %260 = vector.broadcast %cst_81 : f32 to vector<256x16xf32>
    %261 = arith.subf %259, %260 : vector<256x16xf32>
    %262 = arith.mulf %261, %257 : vector<256x16xf32>
    %cst_82 = arith.constant 1.42141378 : f32
    %263 = vector.broadcast %cst_82 : f32 to vector<256x16xf32>
    %264 = arith.addf %262, %263 : vector<256x16xf32>
    %265 = arith.mulf %264, %257 : vector<256x16xf32>
    %cst_83 = arith.constant 0.284496725 : f32
    %266 = vector.broadcast %cst_83 : f32 to vector<256x16xf32>
    %267 = arith.subf %265, %266 : vector<256x16xf32>
    %268 = arith.mulf %267, %257 : vector<256x16xf32>
    %cst_84 = arith.constant 0.254829586 : f32
    %269 = vector.broadcast %cst_84 : f32 to vector<256x16xf32>
    %270 = arith.addf %268, %269 : vector<256x16xf32>
    %271 = arith.mulf %270, %257 : vector<256x16xf32>
    %cst_85 = arith.constant 0.000000e+00 : f32
    %272 = vector.broadcast %cst_85 : f32 to vector<256x16xf32>
    %273 = arith.subf %272, %251 : vector<256x16xf32>
    %274 = arith.mulf %273, %251 : vector<256x16xf32>
    %275 = math.exp %274 : vector<256x16xf32>
    %276 = arith.mulf %271, %275 : vector<256x16xf32>
    %cst_86 = arith.constant 1.000000e+00 : f32
    %277 = vector.broadcast %cst_86 : f32 to vector<256x16xf32>
    %278 = arith.subf %277, %276 : vector<256x16xf32>
    %cst_87 = arith.constant 0.000000e+00 : f32
    %279 = vector.broadcast %cst_87 : f32 to vector<256x16xf32>
    %280 = arith.cmpf olt, %250, %279 : vector<256x16xf32>
    %cst_88 = arith.constant 0.000000e+00 : f32
    %281 = vector.broadcast %cst_88 : f32 to vector<256x16xf32>
    %282 = arith.subf %281, %278 : vector<256x16xf32>
    %283 = arith.select %280, %282, %278 : vector<256x16xi1>, vector<256x16xf32>
    %cst_89 = arith.constant 5.000000e-01 : f32
    %284 = vector.broadcast %cst_89 : f32 to vector<256x16xf32>
    %285 = arith.mulf %284, %248 : vector<256x16xf32>
    %cst_90 = arith.constant 1.000000e+00 : f32
    %286 = vector.broadcast %cst_90 : f32 to vector<256x16xf32>
    %287 = arith.addf %286, %283 : vector<256x16xf32>
    %288 = arith.mulf %285, %287 : vector<256x16xf32>
    %c0_91 = arith.constant 0 : index
    %c0_92 = arith.constant 0 : index
    %289 = vector.load %arg7[%c0_91, %c0_92] : memref<9x16xf32, #tpu.memory_space<vmem>>, vector<9x16xf32>
    %cst_93 = arith.constant 0.000000e+00 : f32
    %290 = vector.broadcast %cst_93 : f32 to vector<290x16xf32>
    %c0_94 = arith.constant 0 : index
    %c0_95 = arith.constant 0 : index
    %291 = vector.load %arg9[%c0_94, %c0_95] : memref<290x16xf32, #tpu.memory_space<vmem>>, vector<290x16xf32>
    tpu.vector_store %arg9[%c0_94, %c0_95], %290 {strides = array<i32>} : memref<290x16xf32, #tpu.memory_space<vmem>>, vector<290x16xf32>,
    %c17_96 = arith.constant 17 : index
    %c0_97 = arith.constant 0 : index
    %292 = vector.load %arg9[%c17_96, %c0_97] : memref<290x16xf32, #tpu.memory_space<vmem>>, vector<256x16xf32>
    tpu.vector_store %arg9[%c17_96, %c0_97], %288 {strides = array<i32>} : memref<290x16xf32, #tpu.memory_space<vmem>>, vector<256x16xf32>,
    %293 = tpu.iota {dimensions = array<i32: 0>} : vector<256x1xi32>
    %c16_i32_98 = arith.constant 16 : i32
    %c0_i32_99 = arith.constant 0 : i32
    %294 = arith.cmpi eq, %c16_i32_98, %c0_i32_99 : i32
    %c1_i32_100 = arith.constant 1 : i32
    %295 = arith.select %294, %c1_i32_100, %c16_i32_98 : i32
    %296 = vector.broadcast %295 : i32 to vector<256x1xi32>
    %297 = arith.remsi %293, %296 : vector<256x1xi32>
    %c0_i32_101 = arith.constant 0 : i32
    %298 = vector.broadcast %c0_i32_101 : i32 to vector<256x1xi32>
    %299 = arith.cmpi ne, %297, %298 : vector<256x1xi32>
    %c0_i32_102 = arith.constant 0 : i32
    %300 = vector.broadcast %c0_i32_102 : i32 to vector<256x1xi32>
    %301 = arith.cmpi slt, %297, %300 : vector<256x1xi32>
    %c0_i32_103 = arith.constant 0 : i32
    %302 = arith.cmpi slt, %295, %c0_i32_103 : i32
    %303 = vector.broadcast %302 : i1 to vector<256x1xi1>
    %304 = vector.broadcast %303 : vector<256x1xi1> to vector<256x1xi1>
    %305 = arith.xori %301, %304 : vector<256x1xi1>
    %306 = arith.andi %305, %299 : vector<256x1xi1>
    %307 = vector.broadcast %295 : i32 to vector<256x1xi32>
    %308 = arith.addi %297, %307 : vector<256x1xi32>
    %309 = arith.select %306, %308, %297 : vector<256x1xi1>, vector<256x1xi32>
    %c0_i32_104 = arith.constant 0 : i32
    %310 = vector.broadcast %c0_i32_104 : i32 to vector<256x1xi32>
    %311 = arith.cmpi ne, %309, %310 : vector<256x1xi32>
    %c15_i32_105 = arith.constant 15 : i32
    %312 = vector.broadcast %c15_i32_105 : i32 to vector<256x1xi32>
    %313 = arith.cmpi ne, %309, %312 : vector<256x1xi32>
    %cst_106 = arith.constant 0.000000e+00 : f32
    %314 = vector.broadcast %cst_106 : f32 to vector<256x16xf32>
    %c0_107 = arith.constant 0 : index
    %c0_108 = arith.constant 0 : index
    %315 = vector.load %arg9[%c0_107, %c0_108] : memref<290x16xf32, #tpu.memory_space<vmem>>, vector<256x16xf32>
    %316 = vector.extract_strided_slice %289 {offsets = [0, 0], sizes = [1, 16], strides = [1, 1]} : vector<9x16xf32> to vector<1x16xf32>
    %317 = vector.broadcast %316 : vector<1x16xf32> to vector<256x16xf32>
    %318 = arith.mulf %315, %317 : vector<256x16xf32>
    %cst_109 = arith.constant 0.000000e+00 : f32
    %319 = vector.shape_cast %311 : vector<256x1xi1> to vector<256x1xi1>
    %320 = vector.broadcast %319 : vector<256x1xi1> to vector<256x16xi1>
    %321 = vector.broadcast %cst_109 : f32 to vector<256x16xf32>
    %322 = arith.select %320, %318, %321 : vector<256x16xi1>, vector<256x16xf32>
    %323 = arith.addf %314, %322 : vector<256x16xf32>
    %c1_110 = arith.constant 1 : index
    %c0_111 = arith.constant 0 : index
    %324 = vector.load %arg9[%c1_110, %c0_111] : memref<290x16xf32, #tpu.memory_space<vmem>>, vector<256x16xf32>
    %325 = vector.extract_strided_slice %289 {offsets = [1, 0], sizes = [1, 16], strides = [1, 1]} : vector<9x16xf32> to vector<1x16xf32>
    %326 = vector.broadcast %325 : vector<1x16xf32> to vector<256x16xf32>
    %327 = arith.mulf %324, %326 : vector<256x16xf32>
    %328 = arith.addf %323, %327 : vector<256x16xf32>
    %c2_112 = arith.constant 2 : index
    %c0_113 = arith.constant 0 : index
    %329 = vector.load %arg9[%c2_112, %c0_113] : memref<290x16xf32, #tpu.memory_space<vmem>>, vector<256x16xf32>
    %330 = vector.extract_strided_slice %289 {offsets = [2, 0], sizes = [1, 16], strides = [1, 1]} : vector<9x16xf32> to vector<1x16xf32>
    %331 = vector.broadcast %330 : vector<1x16xf32> to vector<256x16xf32>
    %332 = arith.mulf %329, %331 : vector<256x16xf32>
    %cst_114 = arith.constant 0.000000e+00 : f32
    %333 = vector.shape_cast %313 : vector<256x1xi1> to vector<256x1xi1>
    %334 = vector.broadcast %333 : vector<256x1xi1> to vector<256x16xi1>
    %335 = vector.broadcast %cst_114 : f32 to vector<256x16xf32>
    %336 = arith.select %334, %332, %335 : vector<256x16xi1>, vector<256x16xf32>
    %337 = arith.addf %328, %336 : vector<256x16xf32>
    %c16_115 = arith.constant 16 : index
    %c0_116 = arith.constant 0 : index
    %338 = vector.load %arg9[%c16_115, %c0_116] : memref<290x16xf32, #tpu.memory_space<vmem>>, vector<256x16xf32>
    %339 = vector.extract_strided_slice %289 {offsets = [3, 0], sizes = [1, 16], strides = [1, 1]} : vector<9x16xf32> to vector<1x16xf32>
    %340 = vector.broadcast %339 : vector<1x16xf32> to vector<256x16xf32>
    %341 = arith.mulf %338, %340 : vector<256x16xf32>
    %cst_117 = arith.constant 0.000000e+00 : f32
    %342 = vector.shape_cast %311 : vector<256x1xi1> to vector<256x1xi1>
    %343 = vector.broadcast %342 : vector<256x1xi1> to vector<256x16xi1>
    %344 = vector.broadcast %cst_117 : f32 to vector<256x16xf32>
    %345 = arith.select %343, %341, %344 : vector<256x16xi1>, vector<256x16xf32>
    %346 = arith.addf %337, %345 : vector<256x16xf32>
    %c17_118 = arith.constant 17 : index
    %c0_119 = arith.constant 0 : index
    %347 = vector.load %arg9[%c17_118, %c0_119] : memref<290x16xf32, #tpu.memory_space<vmem>>, vector<256x16xf32>
    %348 = vector.extract_strided_slice %289 {offsets = [4, 0], sizes = [1, 16], strides = [1, 1]} : vector<9x16xf32> to vector<1x16xf32>
    %349 = vector.broadcast %348 : vector<1x16xf32> to vector<256x16xf32>
    %350 = arith.mulf %347, %349 : vector<256x16xf32>
    %351 = arith.addf %346, %350 : vector<256x16xf32>
    %c18_120 = arith.constant 18 : index
    %c0_121 = arith.constant 0 : index
    %352 = vector.load %arg9[%c18_120, %c0_121] : memref<290x16xf32, #tpu.memory_space<vmem>>, vector<256x16xf32>
    %353 = vector.extract_strided_slice %289 {offsets = [5, 0], sizes = [1, 16], strides = [1, 1]} : vector<9x16xf32> to vector<1x16xf32>
    %354 = vector.broadcast %353 : vector<1x16xf32> to vector<256x16xf32>
    %355 = arith.mulf %352, %354 : vector<256x16xf32>
    %cst_122 = arith.constant 0.000000e+00 : f32
    %356 = vector.shape_cast %313 : vector<256x1xi1> to vector<256x1xi1>
    %357 = vector.broadcast %356 : vector<256x1xi1> to vector<256x16xi1>
    %358 = vector.broadcast %cst_122 : f32 to vector<256x16xf32>
    %359 = arith.select %357, %355, %358 : vector<256x16xi1>, vector<256x16xf32>
    %360 = arith.addf %351, %359 : vector<256x16xf32>
    %c32_123 = arith.constant 32 : index
    %c0_124 = arith.constant 0 : index
    %361 = vector.load %arg9[%c32_123, %c0_124] : memref<290x16xf32, #tpu.memory_space<vmem>>, vector<256x16xf32>
    %362 = vector.extract_strided_slice %289 {offsets = [6, 0], sizes = [1, 16], strides = [1, 1]} : vector<9x16xf32> to vector<1x16xf32>
    %363 = vector.broadcast %362 : vector<1x16xf32> to vector<256x16xf32>
    %364 = arith.mulf %361, %363 : vector<256x16xf32>
    %cst_125 = arith.constant 0.000000e+00 : f32
    %365 = vector.shape_cast %311 : vector<256x1xi1> to vector<256x1xi1>
    %366 = vector.broadcast %365 : vector<256x1xi1> to vector<256x16xi1>
    %367 = vector.broadcast %cst_125 : f32 to vector<256x16xf32>
    %368 = arith.select %366, %364, %367 : vector<256x16xi1>, vector<256x16xf32>
    %369 = arith.addf %360, %368 : vector<256x16xf32>
    %c33_126 = arith.constant 33 : index
    %c0_127 = arith.constant 0 : index
    %370 = vector.load %arg9[%c33_126, %c0_127] : memref<290x16xf32, #tpu.memory_space<vmem>>, vector<256x16xf32>
    %371 = vector.extract_strided_slice %289 {offsets = [7, 0], sizes = [1, 16], strides = [1, 1]} : vector<9x16xf32> to vector<1x16xf32>
    %372 = vector.broadcast %371 : vector<1x16xf32> to vector<256x16xf32>
    %373 = arith.mulf %370, %372 : vector<256x16xf32>
    %374 = arith.addf %369, %373 : vector<256x16xf32>
    %c34_128 = arith.constant 34 : index
    %c0_129 = arith.constant 0 : index
    %375 = vector.load %arg9[%c34_128, %c0_129] : memref<290x16xf32, #tpu.memory_space<vmem>>, vector<256x16xf32>
    %376 = vector.extract_strided_slice %289 {offsets = [8, 0], sizes = [1, 16], strides = [1, 1]} : vector<9x16xf32> to vector<1x16xf32>
    %377 = vector.broadcast %376 : vector<1x16xf32> to vector<256x16xf32>
    %378 = arith.mulf %375, %377 : vector<256x16xf32>
    %cst_130 = arith.constant 0.000000e+00 : f32
    %379 = vector.shape_cast %313 : vector<256x1xi1> to vector<256x1xi1>
    %380 = vector.broadcast %379 : vector<256x1xi1> to vector<256x16xi1>
    %381 = vector.broadcast %cst_130 : f32 to vector<256x16xf32>
    %382 = arith.select %380, %378, %381 : vector<256x16xi1>, vector<256x16xf32>
    %383 = arith.addf %374, %382 : vector<256x16xf32>
    %384 = arith.addf %153, %383 : vector<256x16xf32>
    %385 = arith.addf %384, %1 : vector<256x16xf32>
    %c0_131 = arith.constant 0 : index
    %c0_132 = arith.constant 0 : index
    %c0_133 = arith.constant 0 : index
    %386 = vector.load %arg8[%c0_131, %c0_132, %c0_133] : memref<1x256x16xf32, #tpu.memory_space<vmem>>, vector<1x256x16xf32>
    %387 = vector.shape_cast %386 : vector<1x256x16xf32> to vector<256x16xf32>
    %388 = vector.shape_cast %385 : vector<256x16xf32> to vector<1x256x16xf32>
    tpu.vector_store %arg8[%c0_131, %c0_132, %c0_133], %388 {strides = array<i32>} : memref<1x256x16xf32, #tpu.memory_space<vmem>>, vector<1x256x16xf32>,
    return
  }
  func.func @transform_0(%arg0: i32) -> (i32, i32, i32) {
    %c0_i32 = arith.constant 0 : i32
    %c0_i32_0 = arith.constant 0 : i32
    %c0_i32_1 = arith.constant 0 : i32
    return %arg0, %c0_i32, %c0_i32_0 : i32, i32, i32
  }
  func.func @transform_1(%arg0: i32) -> (i32, i32) {
    %c0_i32 = arith.constant 0 : i32
    %c0_i32_0 = arith.constant 0 : i32
    %c0_i32_1 = arith.constant 0 : i32
    return %c0_i32, %c0_i32_0 : i32, i32
  }
  func.func @transform_2(%arg0: i32) -> i32 {
    %c0_i32 = arith.constant 0 : i32
    %c0_i32_0 = arith.constant 0 : i32
    return %c0_i32 : i32
  }
  func.func @transform_3(%arg0: i32) -> (i32, i32) {
    %c0_i32 = arith.constant 0 : i32
    %c0_i32_0 = arith.constant 0 : i32
    %c0_i32_1 = arith.constant 0 : i32
    return %c0_i32, %c0_i32_0 : i32, i32
  }
  func.func @transform_4(%arg0: i32) -> (i32, i32) {
    %c0_i32 = arith.constant 0 : i32
    %c0_i32_0 = arith.constant 0 : i32
    %c0_i32_1 = arith.constant 0 : i32
    return %c0_i32, %c0_i32_0 : i32, i32
  }
  func.func @transform_5(%arg0: i32) -> (i32, i32) {
    %c0_i32 = arith.constant 0 : i32
    %c0_i32_0 = arith.constant 0 : i32
    %c0_i32_1 = arith.constant 0 : i32
    return %c0_i32, %c0_i32_0 : i32, i32
  }
  func.func @transform_6(%arg0: i32) -> (i32, i32) {
    %c0_i32 = arith.constant 0 : i32
    %c0_i32_0 = arith.constant 0 : i32
    %c0_i32_1 = arith.constant 0 : i32
    return %c0_i32, %c0_i32_0 : i32, i32
  }
  func.func @transform_7(%arg0: i32) -> (i32, i32, i32) {
    %c0_i32 = arith.constant 0 : i32
    %c0_i32_0 = arith.constant 0 : i32
    %c0_i32_1 = arith.constant 0 : i32
    return %arg0, %c0_i32, %c0_i32_0 : i32, i32, i32
  }
}

</mosaic_0001>

<bundles_post_ra>
// kernel: msa_stage.1
= control target key start
LH: loop header
LB: loop body
LE: loop exit
PB: predicated region body
PF: predicated region fallthrough
CT: control target
= control target key end

     0   :  { %s18744_s0 = inlined_call_operand.hbm [shape: f32[2,256,16], index: 0, kind: input, shape index: {}]   ;;  %s18745_s1 = inlined_call_operand.hbm [shape: f32[16,48], index: 1, kind: input, shape index: {}]   ;;  %s18746_s2 = inlined_call_operand.vmem [shape: f32[4], index: 2, kind: input, shape index: {}]   ;;  %s18747_s3 = inlined_call_operand.hbm [shape: f32[16,16], index: 3, kind: input, shape index: {}]   ;;  %s18748_s4 = inlined_call_operand.vmem [shape: f32[1,16], index: 4, kind: input, shape index: {}]   ;;  %s18749_s5 = inlined_call_operand.vmem [shape: f32[9,16], index: 5, kind: input, shape index: {}]   ;;  %s18750_s6 = inlined_call_operand.hbm [shape: f32[9,16], index: 6, kind: input, shape index: {}]   ;;  %s18751_s7 = inlined_call_operand.hbm [shape: f32[2,256,16], index: 7, kind: output, shape index: {}]  }
   0x1   :  { %19213 = sst [smem:[#allocation241_spill]] %s18745_s1 }
   0x2   :  { %12 = vsyncpa [#allocation4], 0 }
   0x3   :  { %14 = vsyncpa [#allocation4 + $0x1], 0 }
   0x4   :  { %15 = vsyncpa [#allocation8], 0 }
   0x5   :  { %16 = vsyncpa [#allocation6], 0 }
   0x6   :  { %17 = vsyncpa [#allocation12], 0 }
   0x7   :  { %18 = vsyncpa [#allocation5], 0 }
   0x8   :  { %20 = vsyncpa [#allocation5 + $0x1], 0  ;;  %s12482_s24 = smov 0   ;;  %s12484_s25 = smov 0  }
   0x9   :  { %s12486_s26 = smov 0   ;;  %s12488_s27 = smov 0  }
   0xa LB: > { %s12503_s28 = sadd.s32 4294967295, %s12418_s27   ;;  %s9674_s29 = sadd.s32 4294967294, %s12418_s27   ;;  %s12418_s27 = sphi %s12488_s27, %s20637_s27   ;;  %s12414_s26 = sphi %s12486_s26, %s20636_s26   ;;  %s12410_s25 = sphi %s12484_s25, %s20635_s25   ;;  %s12406_s24 = sphi %s12482_s24, %s20634_s24  }
   0xb   : > { %p46_p0 = scmp.ne.s32.totalorder %s12410_s25, %s12406_s24  ;;  %p18752_p1 = scmp.eq.s32.totalorder %s12503_s28, 0 }
   0xc   : > { %p202_p3 = scmp.eq.s32.totalorder %s9674_s29, 1  ;;  %p9675_p5 = scmp.ge.s32.totalorder %s12418_s27, 1 }
   0xd   : > { %p12512_p4 = por %p18752_p1, %p46_p0  ;;  %p209_p7 = scmp.lt.s32.totalorder %s12418_s27, 3 }
   0xe   : > { %p12517_p6 = por %p202_p3, %p46_p0  ;;  %s12420_s10 = smov [#allocation7]  }
   0xf   : > { %s19214_s30 = scalar_select %p12512_p4, 1, 0 }
  0x10   : > { %s19215_s8 = scalar_select %p12517_p6, 1, 0 }
  0x11   : > { %p12522_p8 = pnand %p9675_p5, %p209_p7  ;;  %s221_s11 = sshll.u32 %s12420_s10, 4  ;;  %s12526_s11 = int_to_ptr.vmem [resolvable:$true] %s221_s11 }
  0x12   : > { %s235_s14 = sshll.u32 %s18746_s2, 4  ;;  %s12421_s16 = smov [#allocation10]   ;;  %s12540_s14 = int_to_ptr.vmem [resolvable:$true] %s235_s14 }
  0x13   : > { %s19216_s9 = scalar_select %p12522_p8, 1, 0 }
  0x14   : > { %p11204_p9 = pneg %p12522_p8  ;;  %s12542_s17 = sshll.u32 %s12421_s16, 4  ;;  %s246_s17 = int_to_ptr.vmem [resolvable:$true] %s12542_s17 }
  0x15   : > { %s19218_s1 = sld [smem:[#allocation241_spill]] }
  0x16   : > { %p12536_p11 = pnand %p11204_p9, %p18752_p1 }
  0x18   : > { %p12552_p13 = pneg %p12536_p11 }
  0x1b   : > { %s12207_s20 = scalar_lea.hbm %s19218_s1, 256 }
  0x1c   : > { %p12208_p12 = scmp.ne.s32.totalorder %s19218_s1, %s12207_s20  ;;  %p12214_p5 = scmp.lt.u32.totalorder %s12207_s20, %s19218_s1 }
  0x1e   : > { %p12210_p0 = pnand %p12552_p13, %p12208_p12 }
  0x20   : > { %p12211_p3 = pneg %p12210_p0 }
  0x22   : > { %p12216_p7 = pnand %p12214_p5, %p12211_p3 }
  0x24   : > { %12219 = shalt.err (!%p12216_p7)
}
  0x25   : > { %s12220_s12 = scalar_lea.vmem %s12526_s11, 256  ;;  %p12228_p2 = scmp.lt.s32.totalorder %s12526_s11, %s12526_s11 }
  0x26   : > { %p12221_p9 = scmp.ne.s32.totalorder %s12526_s11, %s12220_s12  ;;  %p12229_p6 = scmp.lt.s32.totalorder %s12220_s12, %s12220_s12 }
  0x28   : > { %p12223_p10 = pnand %p12221_p9, %p12552_p13  ;;  %p12230_p12 = por %p12229_p6, %p12228_p2 }
  0x2a   : > { %p12224_p1 = pneg %p12223_p10 }
  0x2c   : > { %p12231_p0 = pnand %p12230_p12, %p12224_p1 }
  0x2e   : > { %12234 = shalt.err (!%p12231_p0)
}
  0x2f   : > { %s12422_s13 = smov 128   ;;  %s12423_s16 = smov 8  }
  0x30   : > { %11207 = dma.hbm_to_vmem [thread:$0]  (!%p12536_p11), %s19218_s1, 256, %s12526_s11, [#allocation8], %s12422_s13, %s12422_s13, %s12423_s16  }
  0x31   : > { %s12235_s20 = scalar_lea.vmem %s12540_s14, 16  ;;  %p12243_p10 = scmp.lt.s32.totalorder %s12540_s14, %s12540_s14 }
  0x32   : > { %p12236_p2 = scmp.ne.s32.totalorder %s12540_s14, %s12235_s20  ;;  %p12244_p3 = scmp.lt.s32.totalorder %s12235_s20, %s12235_s20 }
  0x34   : > { %p12238_p1 = pnand %p12236_p2, %p12552_p13  ;;  %p12245_p5 = por %p12244_p3, %p12243_p10 }
  0x36   : > { %p12239_p6 = pneg %p12238_p1 }
  0x38   : > { %p12246_p7 = pnand %p12245_p5, %p12239_p6 }
  0x3a   : > { %12249 = shalt.err (!%p12246_p7)
}
  0x3b   : > { %s12424_s21 = smov [#allocation9]   ;;  %s12250_s29 = scalar_lea.hbm %s18747_s3, 256 }
  0x3c   : > { %11210 = dma.vmem_to_smem (!%p12536_p11), %s12540_s14, 16, %s12424_s21, [#allocation6]  }
  0x3d   : > { %p12251_p9 = scmp.ne.s32.totalorder %s18747_s3, %s12250_s29  ;;  %p12257_p2 = scmp.lt.u32.totalorder %s12250_s29, %s18747_s3 }
  0x3f   : > { %p12253_p12 = pnand %p12251_p9, %p12552_p13 }
  0x41   : > { %p12254_p0 = pneg %p12253_p12 }
  0x43   : > { %p12259_p1 = pnand %p12257_p2, %p12254_p0 }
  0x45   : > { %12262 = shalt.err (!%p12259_p1)
}
  0x46   : > { %s12263_s20 = scalar_lea.vmem %s246_s17, 256  ;;  %p12271_p5 = scmp.lt.s32.totalorder %s246_s17, %s246_s17 }
  0x47   : > { %p12264_p6 = scmp.ne.s32.totalorder %s246_s17, %s12263_s20  ;;  %p12272_p7 = scmp.lt.s32.totalorder %s12263_s20, %s12263_s20 }
  0x49   : > { %p12266_p10 = pnand %p12264_p6, %p12552_p13  ;;  %p12273_p4 = por %p12272_p7, %p12271_p5 }
  0x4b   : > { %p12267_p3 = pneg %p12266_p10 }
  0x4d   : > { %p12274_p8 = pnand %p12273_p4, %p12267_p3 }
  0x4f   : > { %12277 = shalt.err (!%p12274_p8)
}
  0x50   : > { %11213 = dma.hbm_to_vmem [thread:$0]  (!%p12536_p11), %s18747_s3, 256, %s246_s17, [#allocation8], %s12422_s13, %s12422_s13, %s12423_s16  }
  0x51   : > { %s12425_s11 = smov [#allocation11]   ;;  %s12278_s12 = scalar_lea.hbm %s18750_s6, 256 }
  0x52   : > { %s264_s22 = sshll.u32 %s12425_s11, 4  ;;  %p12279_p4 = scmp.ne.s32.totalorder %s18750_s6, %s12278_s12  ;;  %s265_s22 = int_to_ptr.vmem [resolvable:$true] %s264_s22 }
  0x53   : > { %p12285_p12 = scmp.lt.u32.totalorder %s12278_s12, %s18750_s6 }
  0x54   : > { %p12281_p8 = pnand %p12279_p4, %p12552_p13 }
  0x56   : > { %p12282_p9 = pneg %p12281_p8 }
  0x58   : > { %p12287_p0 = pnand %p12285_p12, %p12282_p9 }
  0x5a   : > { %12290 = shalt.err (!%p12287_p0)
}
  0x5b   : > { %s12291_s17 = scalar_lea.vmem %s265_s22, 256  ;;  %p12299_p10 = scmp.lt.s32.totalorder %s265_s22, %s265_s22 }
  0x5c   : > { %p12292_p2 = scmp.ne.s32.totalorder %s265_s22, %s12291_s17  ;;  %p12300_p3 = scmp.lt.s32.totalorder %s12291_s17, %s12291_s17 }
  0x5e   : > { %p12294_p1 = pnand %p12292_p2, %p12552_p13  ;;  %p12301_p5 = por %p12300_p3, %p12299_p10 }
  0x60   : > { %p12295_p6 = pneg %p12294_p1 }
  0x62   : > { %p12302_p7 = pnand %p12301_p5, %p12295_p6 }
  0x64   : > { %12305 = shalt.err (!%p12302_p7)
}
  0x65   : > { %11216 = dma.hbm_to_vmem [thread:$0]  (!%p12536_p11), %s18750_s6, 256, %s265_s22, [#allocation12], %s12422_s13, %s12422_s13, %s12423_s16  }
  0x66   : > { %s12629_s23 = sadd.s32 1, %s12418_s27   ;;  %s33_s15 = sadd.s32 1, %s12414_s26 }
  0x67   : > { %s30_s21 = ssub.s32 %s12418_s27, %s12629_s23  ;;  %p40_p13 = scmp.ne.s32.totalorder %s12414_s26, %s12410_s25 }
  0x68   : > { %p31_p4 = scmp.eq.s32.totalorder %s30_s21, 0  ;;  %p41_p8 = scmp.eq.s32.totalorder %s12418_s27, 0 }
  0x69   : > { %p19220_p9 = scmp.eq.s32.totalorder %s12503_s28, 1  ;;  %p11229_p0 = scmp.lt.s32.totalorder %s12418_s27, 2 }
  0x6a   : > { %s12645_s29 = scalar_select %p31_p4, %s12414_s26, %s33_s15  }
  0x6b   : > { %p12639_p12 = por %p19220_p9, %p40_p13  ;;  %p42_p2 = por %p41_p8, %p40_p13 }
  0x6c   : > { %s278_s10 = sand.u32 1, %s12414_s26   ;;  %s10062_s22 = sshll.u32 %s12418_s27, 12 }
  0x6d   : > { %s9681_s12 = sshll.u32 %s278_s10, 8  ;;  %s12652_s20 = scalar_lea.hbm %s18744_s0, %s10062_s22 }
  0x6e   : > { %s282_s17 = scalar_lea.vmem [#allocation3], %s9681_s12  ;;  %p12656_p11 = pnand %p11229_p0, %p42_p2 }
  0x6f   : > { %s289_s1 = sshll.u32 %s282_s17, 4  ;;  %s12660_s15 = scalar_lea.sflag [#allocation4], %s278_s10  ;;  %s12654_s1 = int_to_ptr.vmem [resolvable:$true] %s289_s1 }
  0x70   : > { %s12306_s21 = scalar_lea.hbm %s12652_s20, 4096  ;;  %p12308_p6 = pneg %p12656_p11 }
  0x71   : > { %p12307_p1 = scmp.ne.s32.totalorder %s12652_s20, %s12306_s21  ;;  %s12311_s18 = scalar_lea.hbm %s18744_s0, 8192 }
  0x72   : > { %p12312_p5 = scmp.lt.u32.totalorder %s12652_s20, %s18744_s0  ;;  %p12313_p7 = scmp.lt.u32.totalorder %s12311_s18, %s12306_s21 }
  0x73   : > { %p12309_p10 = pnand %p12308_p6, %p12307_p1  ;;  %p12315_p4 = scmp.lt.u32.totalorder %s12306_s21, %s12652_s20 }
  0x74   : > { %p12314_p13 = por %p12313_p7, %p12312_p5 }
  0x75   : > { %p12310_p3 = pneg %p12309_p10 }
  0x76   : > { %p12316_p8 = por %p12315_p4, %p12314_p13 }
  0x78   : > { %p12317_p9 = pnand %p12316_p8, %p12310_p3 }
  0x7a   : > { %12320 = shalt.err (!%p12317_p9)
}
  0x7b   : > { %s12321_s10 = scalar_lea.vmem %s12654_s1, 4096  ;;  %s12426_s12 = smov [#allocation3]  }
  0x7c   : > { %p12322_p0 = scmp.ne.s32.totalorder %s12654_s1, %s12321_s10  ;;  %s12326_s22 = sshll.u32 %s12426_s12, 4  ;;  %s12327_s22 = int_to_ptr.vmem [resolvable:$false] %s12326_s22 }
  0x7d   : > { %s12328_s19 = scalar_lea.vmem %s12327_s22, 8192  ;;  %p12329_p10 = scmp.lt.s32.totalorder %s12654_s1, %s12327_s22 }
  0x7e   : > { %p12324_p2 = pnand %p12322_p0, %p12308_p6  ;;  %p12330_p5 = scmp.lt.s32.totalorder %s12328_s19, %s12321_s10 }
  0x80   : > { %p12325_p1 = pneg %p12324_p2  ;;  %p12331_p7 = por %p12330_p5, %p12329_p10 }
  0x82   : > { %p12332_p13 = pnand %p12331_p7, %p12325_p1 }
  0x84   : > { %12335 = shalt.err (!%p12332_p13)
}
  0x85   : > { %11220 = dma.hbm_to_vmem [thread:$0]  (!%p12656_p11), %s12652_s20, 4096, %s12654_s1, %s12660_s15, %s12422_s13, %s12422_s13, %s12423_s16  }
  0x86   : > { %p19223_p6 = scmp.ne.s32.totalorder %s19216_s9, 0 }
  0x88   : > { %301 = sbr.rel (%p19223_p6) target bundleno = 3649 (0xe41), region = 48 }
  0x8f   : > { %s12694_s21 = sand.u32 1, %s12410_s25   ;;  %p19224_p3 = scmp.ne.s32.totalorder %s19214_s30, 0 }
  0x90   : > { %s9685_s18 = sshll.u32 %s12694_s21, 8  ;;  %s304_s17 = scalar_lea.sflag [#allocation4], %s12694_s21 }
  0x91   : > { %s12700_s14 = scalar_lea.vmem [#allocation3], %s9685_s18 }
  0x92   : > { %12381 = dma.done.wait (%p19224_p3), %s304_s17, 4096  }
  0x93   : > { %12383 = vsyncadd (%p19224_p3), %s304_s17, 4294963200  ;;  %p19225_p11 = scmp.eq.s32.totalorder %s12503_s28, 0 }
  0x95   : > { %12385 = dma.done.wait (%p19225_p11), [#allocation8], 256   ;;  %p19226_p4 = pmov %p19225_p11 }
  0x97   : > { %12387 = vsyncadd (%p19226_p4), [#allocation8], 4294967040  ;;  %p19227_p8 = pmov %p19226_p4 }
  0x98   : > { %p19228_p9 = pmov %p19226_p4 }
  0x99   : > { %12389 = dma.done.wait (%p19227_p8), [#allocation6], 16  }
  0x9a   : > { %12391 = vsyncadd (%p19228_p9), [#allocation6], 4294967280  ;;  %p19229_p0 = pmov %p19226_p4 }
  0x9c   : > { %12393 = dma.done.wait (%p19229_p0), [#allocation8], 256   ;;  %p19230_p2 = pmov %p19229_p0 }
  0x9d   : > { %p19231_p1 = pmov %p19229_p0 }
  0x9e   : > { %12395 = vsyncadd (%p19230_p2), [#allocation8], 4294967040 }
  0x9f   : > { %12397 = dma.done.wait (%p19231_p1), [#allocation12], 256   ;;  %p19232_p10 = pmov %p19229_p0 }
  0xa1   : > { %12399 = vsyncadd (%p19232_p10), [#allocation12], 4294967040 }
  0xa2   : > { %328 = sfence }
  0xa3   : > { %v387_v0 = vld [vmem:[#allocation7] sm:$0xff]  ;;  %v388_v1 = vld [vmem:[#allocation7 + $0x8] sm:$0xff]  ;;  %vm19068_vm0 = vcmask 130048   ;;  %v357_v5 = vld [vmem:[%s12700_s14 + $0x10] sm:$0xff]  ;;  %vm19067_vm1 = vcmask 31744   ;;  %vm856_vm2 = vcmask 162944  }
  0xa4   : > { %v355_v2 = vld [vmem:[%s12700_s14] sm:$0xff]  ;;  %v10954_v3 = vpack.c.bf16 %v388_v1, %v387_v0  ;;  %v356_v4 = vld [vmem:[%s12700_s14 + $0x8] sm:$0xff]  ;;  %v358_v6 = vld [vmem:[%s12700_s14 + $0x18] sm:$0xff]  ;;  %vm1632_vm3 = vcmask 64544   ;;  %vm1743_vm4 = vcmask 195744   ;;  %vm3263_vm5 = vcmask 97344  }
  0xa5   : > { %10506 = vmatprep.mubr.msk.f32.mxu0 %vm19068_vm0, %v355_v2  ;;  %v359_v7 = vld [vmem:[%s12700_s14 + $0x20] sm:$0xff]  ;;  %v360_v8 = vld [vmem:[%s12700_s14 + $0x28] sm:$0xff]  ;;  %v361_v9 = vld [vmem:[%s12700_s14 + $0x30] sm:$0xff]  ;;  %vm3374_vm6 = vcmask 228544   ;;  %vm4601_vm7 = vcmask 130144   ;;  %vm4712_vm8 = vcmask 261344  }
  0xa6   : > { %10955 = vmatprep.subr.bf16.mxu0 %v10954_v3  ;;  %v362_v10 = vld [vmem:[%s12700_s14 + $0x38] sm:$0xff]  ;;  %v363_v11 = vld [vmem:[%s12700_s14 + $0x40] sm:$0xff]  ;;  %v364_v12 = vld [vmem:[%s12700_s14 + $0x48] sm:$0xff]  ;;  %s12427_s30 = smov 112   ;;  %s12428_s9 = smov 108  }
  0xa7   : > { %10957 = vmatpush3.bf16.msra.mxu0 %v10954_v3  ;;  %v365_v13 = vld [vmem:[%s12700_s14 + $0x50] sm:$0xff]  ;;  %v366_v14 = vld [vmem:[%s12700_s14 + $0x58] sm:$0xff]  ;;  %v367_v15 = vld [vmem:[%s12700_s14 + $0x60] sm:$0xff]  ;;  %s12430_s13 = smov 96   ;;  %s12431_s16 = smov 124  }
  0xa8   : > { %v368_v16 = vld [vmem:[%s12700_s14 + $0x68] sm:$0xff]  ;;  %v369_v17 = vld [vmem:[%s12700_s14 + $0x70] sm:$0xff]  ;;  %v370_v18 = vld [vmem:[%s12700_s14 + $0x78] sm:$0xff]  ;;  %s12432_s12 = smov 104   ;;  %s12433_s22 = smov 92  }
  0xa9   : > { %v371_v19 = vld [vmem:[%s12700_s14 + $0x80] sm:$0xff]  ;;  %v372_v20 = vld [vmem:[%s12700_s14 + $0x88] sm:$0xff]  ;;  %v373_v21 = vld [vmem:[%s12700_s14 + $0x90] sm:$0xff]  ;;  %s12434_s19 = smov 120   ;;  %s12436_s20 = smov 88  }
  0xaa   : > { %10507 = vmatmul.mubr.msk.f32.vlgmr.msra.gmra.mrb[0].mxu0 %vm19068_vm0, %v356_v4  ;;  %v374_v22 = vld [vmem:[%s12700_s14 + $0x98] sm:$0xff]  ;;  %v375_v23 = vld [vmem:[%s12700_s14 + $0xa0] sm:$0xff]  ;;  %v376_v24 = vld [vmem:[%s12700_s14 + $0xa8] sm:$0xff]  ;;  %s12437_s1 = smov 116   ;;  %s9756_s15 = sld [smem:[#allocation9 + $0x1]] }
  0xab   : > { %10509 = vmatprep.mubr.msk.f32.mxu0 %vm19068_vm0, %v357_v5  ;;  %v377_v25 = vld [vmem:[%s12700_s14 + $0xb0] sm:$0xff]  ;;  %v378_v26 = vld [vmem:[%s12700_s14 + $0xb8] sm:$0xff]  ;;  %v379_v27 = vld [vmem:[%s12700_s14 + $0xc0] sm:$0xff]  ;;  %s9923_s17 = sld [smem:[#allocation9 + $0x3]] }
  0xac   : > { %v380_v28 = vld [vmem:[%s12700_s14 + $0xc8] sm:$0xff]  ;;  %v381_v29 = vld [vmem:[%s12700_s14 + $0xd0] sm:$0xff]  ;;  %v382_v30 = vld [vmem:[%s12700_s14 + $0xd8] sm:$0xff] }
  0xad   : > { %v383_v31 = vld [vmem:[%s12700_s14 + $0xe0] sm:$0xff]  ;;  %v384_v32 = vld [vmem:[%s12700_s14 + $0xe8] sm:$0xff]  ;;  %v385_v33 = vld [vmem:[%s12700_s14 + $0xf0] sm:$0xff] }
  0xae   : > { %10510 = vmatmul.mubr.msk.f32.gmra.mrb[2].mxu0 %vm19068_vm0, %v358_v6  ;;  %v386_v34 = vld [vmem:[%s12700_s14 + $0xf8] sm:$0xff] }
  0xaf   : > { %10512 = vmatprep.mubr.msk.f32.mxu0 %vm19068_vm0, %v359_v7 }
  0xb2   : > { %10513 = vmatmul.mubr.msk.f32.gmra.mrb[4].mxu0 %vm19068_vm0, %v360_v8 }
  0xb3   : > { %10515 = vmatprep.mubr.msk.f32.mxu0 %vm19068_vm0, %v361_v9 }
  0xb6   : > { %10516 = vmatmul.mubr.msk.f32.gmra.mrb[6].mxu0 %vm19068_vm0, %v362_v10 }
  0xb7   : > { %10518 = vmatprep.mubr.msk.f32.mxu0 %vm19068_vm0, %v363_v11 }
  0xba   : > { %10519 = vmatmul.mubr.msk.f32.gmra.mrb[8].mxu0 %vm19068_vm0, %v364_v12 }
  0xbb   : > { %10521 = vmatprep.mubr.msk.f32.mxu0 %vm19068_vm0, %v365_v13 }
  0xbe   : > { %10522 = vmatmul.mubr.msk.f32.gmra.mrb[10].mxu0 %vm19068_vm0, %v366_v14 }
  0xbf   : > { %10524 = vmatprep.mubr.msk.f32.mxu0 %vm19068_vm0, %v367_v15 }
  0xc2   : > { %10525 = vmatmul.mubr.msk.f32.gmra.mrb[12].mxu0 %vm19068_vm0, %v368_v16 }
  0xc3   : > { %10527 = vmatprep.mubr.msk.f32.mxu0 %vm19068_vm0, %v369_v17 }
  0xc6   : > { %10528 = vmatmul.mubr.msk.f32.gmra.mrb[14].mxu0 %vm19068_vm0, %v370_v18 }
  0xc7   : > { %10530 = vmatprep.mubr.msk.f32.mxu0 %vm19068_vm0, %v371_v19 }
  0xca   : > { %10531 = vmatmul.mubr.msk.f32.gmra.mrb[16].mxu0 %vm19068_vm0, %v372_v20 }
  0xcb   : > { %10533 = vmatprep.mubr.msk.f32.mxu0 %vm19068_vm0, %v373_v21 }
  0xce   : > { %10534 = vmatmul.mubr.msk.f32.gmra.mrb[18].mxu0 %vm19068_vm0, %v374_v22 }
  0xcf   : > { %10536 = vmatprep.mubr.msk.f32.mxu0 %vm19068_vm0, %v375_v23 }
  0xd2   : > { %10537 = vmatmul.mubr.msk.f32.gmra.mrb[20].mxu0 %vm19068_vm0, %v376_v24 }
  0xd3   : > { %10539 = vmatprep.mubr.msk.f32.mxu0 %vm19068_vm0, %v377_v25 }
  0xd6   : > { %10540 = vmatmul.mubr.msk.f32.gmra.mrb[22].mxu0 %vm19068_vm0, %v378_v26 }
  0xd7   : > { %10542 = vmatprep.mubr.msk.f32.mxu0 %vm19068_vm0, %v379_v27 }
  0xda   : > { %10543 = vmatmul.mubr.msk.f32.gmra.mrb[24].mxu0 %vm19068_vm0, %v380_v28 }
  0xdb   : > { %10545 = vmatprep.mubr.msk.f32.mxu0 %vm19068_vm0, %v381_v29 }
  0xde   : > { %10546 = vmatmul.mubr.msk.f32.gmra.mrb[26].mxu0 %vm19068_vm0, %v382_v30 }
  0xdf   : > { %10548 = vmatprep.mubr.msk.f32.mxu0 %vm19068_vm0, %v383_v31 }
  0xe2   : > { %10549 = vmatmul.mubr.msk.f32.gmra.mrb[28].mxu0 %vm19068_vm0, %v384_v32 }
  0xe3   : > { %10551 = vmatprep.mubr.msk.f32.mxu0 %vm19068_vm0, %v385_v33 }
  0xe6   : > { %10552 = vmatmul.mubr.msk.f32.gmra.mrb[30].mxu0 %vm19068_vm0, %v386_v34 }
 0x17d   : > { %v12786_v35 = vpop.f32.mrb[0].mxu0 }
 0x17e   : > { %19233 = vst [vmem:[#allocation20_spill] sm:$0xff] %v12786_v35  ;;  %v714_v36 = vmul.f32 %v12786_v35, %v12786_v35  ;;  %v12790_v37 = vpop.f32.mrb[1].mxu0 }
 0x17f   : > { %19234 = vst [vmem:[#allocation21_spill] sm:$0xff] %v12790_v37  ;;  %v713_v38 = vmul.f32 %v12790_v37, %v12790_v37 }
 0x180   : > { %v747_v39 = vsel %vm19067_vm1, %v714_v36, 0.0  ;;  %v858_v40 = vsel %vm856_vm2, %v714_v36, 0.0  ;;  %v1634_v41 = vsel %vm1632_vm3, %v714_v36, 0.0  ;;  %v1745_v42 = vsel %vm1743_vm4, %v714_v36, 0.0 }
 0x181   : > { %v3265_v43 = vsel %vm3263_vm5, %v714_v36, 0.0  ;;  %v3376_v44 = vsel %vm3374_vm6, %v714_v36, 0.0  ;;  %v4603_v45 = vsel %vm4601_vm7, %v714_v36, 0.0  ;;  %v4714_v46 = vsel %vm4712_vm8, %v714_v36, 0.0  ;;  %v12802_v47 = vpop.f32.mrb[2].mxu0 }
 0x182   : > { %19235 = vst [vmem:[#allocation22_spill] sm:$0xff] %v12802_v47  ;;  %v746_v48 = vsel %vm19067_vm1, %v713_v38, 0.0  ;;  %v857_v49 = vsel %vm856_vm2, %v713_v38, 0.0  ;;  %v1633_v50 = vsel %vm1632_vm3, %v713_v38, 0.0  ;;  %v1744_v51 = vsel %vm1743_vm4, %v713_v38, 0.0  ;;  %v12808_v52 = vpop.f32.mrb[3].mxu0 }
 0x183   : > { %19236 = vst [vmem:[#allocation23_spill] sm:$0xff] %v12808_v52  ;;  %v748_v53 = vadd.f32 %v747_v39, %v746_v48  ;;  %v859_v54 = vadd.f32 %v858_v40, %v857_v49  ;;  %v1635_v55 = vadd.f32 %v1634_v41, %v1633_v50  ;;  %v1746_v56 = vadd.f32 %v1745_v42, %v1744_v51 }
 0x184   : > { %v3264_v57 = vsel %vm3263_vm5, %v713_v38, 0.0  ;;  %v3375_v58 = vsel %vm3374_vm6, %v713_v38, 0.0  ;;  %v4602_v59 = vsel %vm4601_vm7, %v713_v38, 0.0  ;;  %v4713_v60 = vsel %vm4712_vm8, %v713_v38, 0.0 }
 0x185   : > { %v3266_v61 = vadd.f32 %v3265_v43, %v3264_v57  ;;  %v3377_v62 = vadd.f32 %v3376_v44, %v3375_v58  ;;  %v4604_v63 = vadd.f32 %v4603_v45, %v4602_v59  ;;  %v4715_v0 = vadd.f32 %v4714_v46, %v4713_v60  ;;  %v12814_v1 = vpop.f32.mrb[4].mxu0 }
 0x186   : > { %19237 = vst [vmem:[#allocation24_spill] sm:$0xff] %v12814_v1  ;;  %v716_v2 = vmul.f32 %v12802_v47, %v12802_v47  ;;  %v715_v3 = vmul.f32 %v12808_v52, %v12808_v52  ;;  %v12820_v4 = vpop.f32.mrb[5].mxu0  ;;  %v718_v5 = vmul.f32 %v12814_v1, %v12814_v1 }
 0x187   : > { %19238 = vst [vmem:[#allocation25_spill] sm:$0xff] %v12820_v4  ;;  %v717_v6 = vmul.f32 %v12820_v4, %v12820_v4 }
 0x188   : > { %v751_v7 = vsel %vm19067_vm1, %v716_v2, 0.0  ;;  %v862_v8 = vsel %vm856_vm2, %v716_v2, 0.0  ;;  %v1638_v9 = vsel %vm1632_vm3, %v716_v2, 0.0  ;;  %v1749_v10 = vsel %vm1743_vm4, %v716_v2, 0.0 }
 0x189   : > { %v3269_v11 = vsel %vm3263_vm5, %v716_v2, 0.0  ;;  %v3380_v12 = vsel %vm3374_vm6, %v716_v2, 0.0  ;;  %v4607_v13 = vsel %vm4601_vm7, %v716_v2, 0.0  ;;  %v4718_v14 = vsel %vm4712_vm8, %v716_v2, 0.0  ;;  %v12834_v15 = vpop.f32.mrb[6].mxu0 }
 0x18a   : > { %19239 = vst [vmem:[#allocation26_spill] sm:$0xff] %v12834_v15  ;;  %v749_v16 = vsel %vm19067_vm1, %v715_v3, 0.0  ;;  %v860_v17 = vsel %vm856_vm2, %v715_v3, 0.0  ;;  %v1636_v18 = vsel %vm1632_vm3, %v715_v3, 0.0  ;;  %v1747_v19 = vsel %vm1743_vm4, %v715_v3, 0.0  ;;  %v12840_v20 = vpop.f32.mrb[7].mxu0 }
 0x18b   : > { %19240 = vst [vmem:[#allocation27_spill] sm:$0xff] %v12840_v20  ;;  %v750_v21 = vadd.f32 %v749_v16, %v748_v53  ;;  %v861_v22 = vadd.f32 %v860_v17, %v859_v54  ;;  %v1637_v23 = vadd.f32 %v1636_v18, %v1635_v55  ;;  %v1748_v24 = vadd.f32 %v1747_v19, %v1746_v56 }
 0x18c   : > { %v3267_v25 = vsel %vm3263_vm5, %v715_v3, 0.0  ;;  %v3378_v26 = vsel %vm3374_vm6, %v715_v3, 0.0  ;;  %v4605_v27 = vsel %vm4601_vm7, %v715_v3, 0.0  ;;  %v4716_v28 = vsel %vm4712_vm8, %v715_v3, 0.0 }
 0x18d   : > { %v3268_v29 = vadd.f32 %v3267_v25, %v3266_v61  ;;  %v3379_v30 = vadd.f32 %v3378_v26, %v3377_v62  ;;  %v4606_v31 = vadd.f32 %v4605_v27, %v4604_v63  ;;  %v4717_v32 = vadd.f32 %v4716_v28, %v4715_v0  ;;  %v12846_v33 = vpop.f32.mrb[8].mxu0 }
 0x18e   : > { %19241 = vst [vmem:[#allocation28_spill] sm:$0xff] %v12846_v33  ;;  %v755_v34 = vsel %vm19067_vm1, %v718_v5, 0.0  ;;  %v866_v36 = vsel %vm856_vm2, %v718_v5, 0.0  ;;  %v1642_v38 = vsel %vm1632_vm3, %v718_v5, 0.0  ;;  %v1753_v39 = vsel %vm1743_vm4, %v718_v5, 0.0  ;;  %v12852_v40 = vpop.f32.mrb[9].mxu0 }
 0x18f   : > { %19242 = vst [vmem:[#allocation29_spill] sm:$0xff] %v12852_v40  ;;  %v3273_v41 = vsel %vm3263_vm5, %v718_v5, 0.0  ;;  %v3384_v42 = vsel %vm3374_vm6, %v718_v5, 0.0  ;;  %v4611_v43 = vsel %vm4601_vm7, %v718_v5, 0.0  ;;  %v4722_v44 = vsel %vm4712_vm8, %v718_v5, 0.0 }
 0x190   : > { %v752_v45 = vadd.f32 %v751_v7, %v750_v21  ;;  %v753_v46 = vsel %vm19067_vm1, %v717_v6, 0.0  ;;  %v863_v48 = vadd.f32 %v862_v8, %v861_v22  ;;  %v864_v49 = vsel %vm856_vm2, %v717_v6, 0.0 }
 0x191   : > { %v1639_v50 = vadd.f32 %v1638_v9, %v1637_v23  ;;  %v1640_v51 = vsel %vm1632_vm3, %v717_v6, 0.0  ;;  %v1750_v53 = vadd.f32 %v1749_v10, %v1748_v24  ;;  %v1751_v54 = vsel %vm1743_vm4, %v717_v6, 0.0  ;;  %v12862_v55 = vpop.f32.mrb[10].mxu0 }
 0x192   : > { %19243 = vst [vmem:[#allocation30_spill] sm:$0xff] %v12862_v55  ;;  %v754_v56 = vadd.f32 %v753_v46, %v752_v45  ;;  %v865_v57 = vadd.f32 %v864_v49, %v863_v48  ;;  %v3270_v58 = vadd.f32 %v3269_v11, %v3268_v29  ;;  %v3271_v59 = vsel %vm3263_vm5, %v717_v6, 0.0  ;;  %v12865_v60 = vpop.f32.mrb[11].mxu0 }
 0x193   : > { %19244 = vst [vmem:[#allocation31_spill] sm:$0xff] %v12865_v60  ;;  %v1641_v61 = vadd.f32 %v1640_v51, %v1639_v50  ;;  %v1752_v62 = vadd.f32 %v1751_v54, %v1750_v53  ;;  %v3381_v63 = vadd.f32 %v3380_v12, %v3379_v30  ;;  %v3382_v0 = vsel %vm3374_vm6, %v717_v6, 0.0 }
 0x194   : > { %v3272_v2 = vadd.f32 %v3271_v59, %v3270_v58  ;;  %v4608_v3 = vadd.f32 %v4607_v13, %v4606_v31  ;;  %v4609_v5 = vsel %vm4601_vm7, %v717_v6, 0.0  ;;  %v4719_v7 = vadd.f32 %v4718_v14, %v4717_v32 }
 0x195   : > { %v3383_v8 = vadd.f32 %v3382_v0, %v3381_v63  ;;  %v4720_v9 = vsel %vm4712_vm8, %v717_v6, 0.0  ;;  %v720_v10 = vmul.f32 %v12834_v15, %v12834_v15  ;;  %v719_v11 = vmul.f32 %v12840_v20, %v12840_v20  ;;  %v12874_v16 = vpop.f32.mrb[12].mxu0 }
 0x196   : > { %19245 = vst [vmem:[#allocation32_spill] sm:$0xff] %v12874_v16  ;;  %v4610_v17 = vadd.f32 %v4609_v5, %v4608_v3  ;;  %v4721_v12 = vadd.f32 %v4720_v9, %v4719_v7  ;;  %v756_v18 = vadd.f32 %v755_v34, %v754_v56  ;;  %v867_v19 = vadd.f32 %v866_v36, %v865_v57  ;;  %v12876_v21 = vpop.f32.mrb[13].mxu0 }
 0x197   : > { %19246 = vst [vmem:[#allocation33_spill] sm:$0xff] %v12876_v21  ;;  %v759_v13 = vsel %vm19067_vm1, %v720_v10, 0.0  ;;  %v870_v14 = vsel %vm856_vm2, %v720_v10, 0.0  ;;  %v1646_v6 = vsel %vm1632_vm3, %v720_v10, 0.0  ;;  %v1757_v22 = vsel %vm1743_vm4, %v720_v10, 0.0 }
 0x198   : > { %v3277_v23 = vsel %vm3263_vm5, %v720_v10, 0.0  ;;  %v3388_v24 = vsel %vm3374_vm6, %v720_v10, 0.0  ;;  %v4615_v25 = vsel %vm4601_vm7, %v720_v10, 0.0  ;;  %v4726_v26 = vsel %vm4712_vm8, %v720_v10, 0.0 }
 0x199   : > { %v757_v27 = vsel %vm19067_vm1, %v719_v11, 0.0  ;;  %v868_v28 = vsel %vm856_vm2, %v719_v11, 0.0  ;;  %v1643_v29 = vadd.f32 %v1642_v38, %v1641_v61  ;;  %v1644_v30 = vsel %vm1632_vm3, %v719_v11, 0.0  ;;  %v12889_v31 = vpop.f32.mrb[14].mxu0 }
 0x19a   : > { %19247 = vst [vmem:[#allocation34_spill] sm:$0xff] %v12889_v31  ;;  %v758_v32 = vadd.f32 %v757_v27, %v756_v18  ;;  %v869_v34 = vadd.f32 %v868_v28, %v867_v19  ;;  %v1754_v36 = vadd.f32 %v1753_v39, %v1752_v62  ;;  %v1755_v45 = vsel %vm1743_vm4, %v719_v11, 0.0  ;;  %v12892_v46 = vpop.f32.mrb[15].mxu0 }
 0x19b   : > { %19248 = vst [vmem:[#allocation35_spill] sm:$0xff] %v12892_v46  ;;  %v1645_v48 = vadd.f32 %v1644_v30, %v1643_v29  ;;  %v3274_v49 = vadd.f32 %v3273_v41, %v3272_v2  ;;  %v3275_v50 = vsel %vm3263_vm5, %v719_v11, 0.0  ;;  %v3385_v51 = vadd.f32 %v3384_v42, %v3383_v8 }
 0x19c   : > { %v1756_v53 = vadd.f32 %v1755_v45, %v1754_v36  ;;  %v3386_v54 = vsel %vm3374_vm6, %v719_v11, 0.0  ;;  %v4612_v38 = vadd.f32 %v4611_v43, %v4610_v17  ;;  %v4613_v56 = vsel %vm4601_vm7, %v719_v11, 0.0 }
 0x19d   : > { %v3276_v57 = vadd.f32 %v3275_v50, %v3274_v49  ;;  %v3387_v58 = vadd.f32 %v3386_v54, %v3385_v51  ;;  %v4723_v59 = vadd.f32 %v4722_v44, %v4721_v12  ;;  %v4724_v39 = vsel %vm4712_vm8, %v719_v11, 0.0  ;;  %v12898_v61 = vpop.f32.mrb[16].mxu0 }
 0x19e   : > { %19249 = vst [vmem:[#allocation36_spill] sm:$0xff] %v12898_v61  ;;  %v4614_v62 = vadd.f32 %v4613_v56, %v4612_v38  ;;  %v722_v41 = vmul.f32 %v12846_v33, %v12846_v33  ;;  %v721_v42 = vmul.f32 %v12852_v40, %v12852_v40  ;;  %v760_v63 = vadd.f32 %v759_v13, %v758_v32  ;;  %v12904_v0 = vpop.f32.mrb[17].mxu0 }
 0x19f   : > { %19250 = vst [vmem:[#allocation37_spill] sm:$0xff] %v12904_v0  ;;  %v4725_v43 = vadd.f32 %v4724_v39, %v4723_v59  ;;  %v871_v2 = vadd.f32 %v870_v14, %v869_v34  ;;  %v1647_v3 = vadd.f32 %v1646_v6, %v1645_v48  ;;  %v1758_v5 = vadd.f32 %v1757_v22, %v1756_v53 }
 0x1a0   : > { %v763_v44 = vsel %vm19067_vm1, %v722_v41, 0.0  ;;  %v874_v7 = vsel %vm856_vm2, %v722_v41, 0.0  ;;  %v1650_v8 = vsel %vm1632_vm3, %v722_v41, 0.0  ;;  %v1761_v9 = vsel %vm1743_vm4, %v722_v41, 0.0 }
 0x1a1   : > { %v3281_v10 = vsel %vm3263_vm5, %v722_v41, 0.0  ;;  %v3392_v11 = vsel %vm3374_vm6, %v722_v41, 0.0  ;;  %v4619_v17 = vsel %vm4601_vm7, %v722_v41, 0.0  ;;  %v4730_v12 = vsel %vm4712_vm8, %v722_v41, 0.0  ;;  %v12914_v18 = vpop.f32.mrb[18].mxu0 }
 0x1a2   : > { %19251 = vst [vmem:[#allocation38_spill] sm:$0xff] %v12914_v18  ;;  %v761_v19 = vsel %vm19067_vm1, %v721_v42, 0.0  ;;  %v872_v13 = vsel %vm856_vm2, %v721_v42, 0.0  ;;  %v1648_v14 = vsel %vm1632_vm3, %v721_v42, 0.0  ;;  %v1759_v6 = vsel %vm1743_vm4, %v721_v42, 0.0  ;;  %v12920_v22 = vpop.f32.mrb[19].mxu0 }
 0x1a3   : > { %19252 = vst [vmem:[#allocation39_spill] sm:$0xff] %v12920_v22  ;;  %v762_v27 = vadd.f32 %v761_v19, %v760_v63  ;;  %v873_v28 = vadd.f32 %v872_v13, %v871_v2  ;;  %v1649_v29 = vadd.f32 %v1648_v14, %v1647_v3  ;;  %v1760_v30 = vadd.f32 %v1759_v6, %v1758_v5 }
 0x1a4   : > { %v3278_v32 = vadd.f32 %v3277_v23, %v3276_v57  ;;  %v3279_v34 = vsel %vm3263_vm5, %v721_v42, 0.0  ;;  %v3389_v36 = vadd.f32 %v3388_v24, %v3387_v58  ;;  %v3390_v45 = vsel %vm3374_vm6, %v721_v42, 0.0 }
 0x1a5   : > { %v4616_v48 = vadd.f32 %v4615_v25, %v4614_v62  ;;  %v4617_v49 = vsel %vm4601_vm7, %v721_v42, 0.0  ;;  %v4727_v50 = vadd.f32 %v4726_v26, %v4725_v43  ;;  %v4728_v51 = vsel %vm4712_vm8, %v721_v42, 0.0  ;;  %v12926_v53 = vpop.f32.mrb[20].mxu0 }
 0x1a6   : > { %19253 = vst [vmem:[#allocation40_spill] sm:$0xff] %v12926_v53  ;;  %v3280_v54 = vadd.f32 %v3279_v34, %v3278_v32  ;;  %v3391_v38 = vadd.f32 %v3390_v45, %v3389_v36  ;;  %v724_v56 = vmul.f32 %v12862_v55, %v12862_v55  ;;  %v723_v23 = vmul.f32 %v12865_v60, %v12865_v60  ;;  %v12932_v57 = vpop.f32.mrb[21].mxu0 }
 0x1a7   : > { %19254 = vst [vmem:[#allocation41_spill] sm:$0xff] %v12932_v57  ;;  %v4618_v24 = vadd.f32 %v4617_v49, %v4616_v48  ;;  %v4729_v58 = vadd.f32 %v4728_v51, %v4727_v50  ;;  %v764_v25 = vadd.f32 %v763_v44, %v762_v27  ;;  %v875_v59 = vadd.f32 %v874_v7, %v873_v28 }
 0x1a8   : > { %v767_v26 = vsel %vm19067_vm1, %v724_v56, 0.0  ;;  %v878_v39 = vsel %vm856_vm2, %v724_v56, 0.0  ;;  %v1654_v62 = vsel %vm1632_vm3, %v724_v56, 0.0  ;;  %v1765_v41 = vsel %vm1743_vm4, %v724_v56, 0.0 }
 0x1a9   : > { %v3285_v42 = vsel %vm3263_vm5, %v724_v56, 0.0  ;;  %v3396_v63 = vsel %vm3374_vm6, %v724_v56, 0.0  ;;  %v4623_v43 = vsel %vm4601_vm7, %v724_v56, 0.0  ;;  %v4734_v2 = vsel %vm4712_vm8, %v724_v56, 0.0  ;;  %v12942_v3 = vpop.f32.mrb[22].mxu0 }
 0x1aa   : > { %19255 = vst [vmem:[#allocation42_spill] sm:$0xff] %v12942_v3  ;;  %v765_v5 = vsel %vm19067_vm1, %v723_v23, 0.0  ;;  %v876_v44 = vsel %vm856_vm2, %v723_v23, 0.0  ;;  %v1651_v7 = vadd.f32 %v1650_v8, %v1649_v29  ;;  %v1652_v19 = vsel %vm1632_vm3, %v723_v23, 0.0  ;;  %v12947_v13 = vpop.f32.mrb[23].mxu0 }
 0x1ab   : > { %19256 = vst [vmem:[#allocation43_spill] sm:$0xff] %v12947_v13  ;;  %v766_v14 = vadd.f32 %v765_v5, %v764_v25  ;;  %v877_v6 = vadd.f32 %v876_v44, %v875_v59  ;;  %v1762_v27 = vadd.f32 %v1761_v9, %v1760_v30  ;;  %v1763_v28 = vsel %vm1743_vm4, %v723_v23, 0.0 }
 0x1ac   : > { %v1653_v32 = vadd.f32 %v1652_v19, %v1651_v7  ;;  %v3282_v34 = vadd.f32 %v3281_v10, %v3280_v54  ;;  %v3283_v36 = vsel %vm3263_vm5, %v723_v23, 0.0  ;;  %v3393_v45 = vadd.f32 %v3392_v11, %v3391_v38 }
 0x1ad   : > { %v1764_v48 = vadd.f32 %v1763_v28, %v1762_v27  ;;  %v3394_v49 = vsel %vm3374_vm6, %v723_v23, 0.0  ;;  %v4620_v50 = vadd.f32 %v4619_v17, %v4618_v24  ;;  %v4621_v8 = vsel %vm4601_vm7, %v723_v23, 0.0  ;;  %v12953_v29 = vpop.f32.mrb[24].mxu0 }
 0x1ae   : > { %19257 = vst [vmem:[#allocation44_spill] sm:$0xff] %v12953_v29  ;;  %v3284_v51 = vadd.f32 %v3283_v36, %v3282_v34  ;;  %v3395_v56 = vadd.f32 %v3394_v49, %v3393_v45  ;;  %v4731_v25 = vadd.f32 %v4730_v12, %v4729_v58  ;;  %v4732_v9 = vsel %vm4712_vm8, %v723_v23, 0.0  ;;  %v12956_v30 = vpop.f32.mrb[25].mxu0 }
 0x1af   : > { %19258 = vst [vmem:[#allocation45_spill] sm:$0xff] %v12956_v30  ;;  %v4622_v59 = vadd.f32 %v4621_v8, %v4620_v50  ;;  %v726_v10 = vmul.f32 %v12874_v16, %v12874_v16  ;;  %v725_v11 = vmul.f32 %v12876_v21, %v12876_v21  ;;  %v768_v54 = vadd.f32 %v767_v26, %v766_v14 }
 0x1b0   : > { %v4733_v17 = vadd.f32 %v4732_v9, %v4731_v25  ;;  %v879_v38 = vadd.f32 %v878_v39, %v877_v6  ;;  %v1655_v24 = vadd.f32 %v1654_v62, %v1653_v32  ;;  %v1766_v5 = vadd.f32 %v1765_v41, %v1764_v48 }
 0x1b1   : > { %v771_v44 = vsel %vm19067_vm1, %v726_v10, 0.0  ;;  %v882_v12 = vsel %vm856_vm2, %v726_v10, 0.0  ;;  %v1658_v23 = vsel %vm1632_vm3, %v726_v10, 0.0  ;;  %v1769_v58 = vsel %vm1743_vm4, %v726_v10, 0.0  ;;  %v12966_v7 = vpop.f32.mrb[26].mxu0 }
 0x1b2   : > { %19259 = vst [vmem:[#allocation46_spill] sm:$0xff] %v12966_v7  ;;  %v3289_v19 = vsel %vm3263_vm5, %v726_v10, 0.0  ;;  %v3400_v27 = vsel %vm3374_vm6, %v726_v10, 0.0  ;;  %v4627_v26 = vsel %vm4601_vm7, %v726_v10, 0.0  ;;  %v4738_v39 = vsel %vm4712_vm8, %v726_v10, 0.0  ;;  %v12972_v62 = vpop.f32.mrb[27].mxu0 }
 0x1b3   : > { %19260 = vst [vmem:[#allocation47_spill] sm:$0xff] %v12972_v62  ;;  %v769_v41 = vsel %vm19067_vm1, %v725_v11, 0.0  ;;  %v880_v14 = vsel %vm856_vm2, %v725_v11, 0.0  ;;  %v1656_v6 = vsel %vm1632_vm3, %v725_v11, 0.0  ;;  %v1767_v28 = vsel %vm1743_vm4, %v725_v11, 0.0 }
 0x1b4   : > { %v770_v32 = vadd.f32 %v769_v41, %v768_v54  ;;  %v881_v34 = vadd.f32 %v880_v14, %v879_v38  ;;  %v1657_v36 = vadd.f32 %v1656_v6, %v1655_v24  ;;  %v1768_v45 = vadd.f32 %v1767_v28, %v1766_v5 }
 0x1b5   : > { %v3286_v48 = vadd.f32 %v3285_v42, %v3284_v51  ;;  %v3287_v49 = vsel %vm3263_vm5, %v725_v11, 0.0  ;;  %v3397_v50 = vadd.f32 %v3396_v63, %v3395_v56  ;;  %v3398_v8 = vsel %vm3374_vm6, %v725_v11, 0.0  ;;  %v12980_v25 = vpop.f32.mrb[28].mxu0 }
 0x1b6   : > { %19261 = vst [vmem:[#allocation48_spill] sm:$0xff] %v12980_v25  ;;  %v4624_v9 = vadd.f32 %v4623_v43, %v4622_v59  ;;  %v4625_v10 = vsel %vm4601_vm7, %v725_v11, 0.0  ;;  %v4735_v21 = vadd.f32 %v4734_v2, %v4733_v17  ;;  %v4736_v16 = vsel %vm4712_vm8, %v725_v11, 0.0  ;;  %v12984_v60 = vpop.f32.mrb[29].mxu0 }
 0x1b7   : > { %19262 = vst [vmem:[#allocation49_spill] sm:$0xff] %v12984_v60  ;;  %v3288_v54 = vadd.f32 %v3287_v49, %v3286_v48  ;;  %v3399_v38 = vadd.f32 %v3398_v8, %v3397_v50  ;;  %v728_v42 = vmul.f32 %v12889_v31, %v12889_v31  ;;  %v727_v63 = vmul.f32 %v12892_v46, %v12892_v46 }
 0x1b8   : > { %v4626_v51 = vadd.f32 %v4625_v10, %v4624_v9  ;;  %v4737_v56 = vadd.f32 %v4736_v16, %v4735_v21  ;;  %v772_v24 = vadd.f32 %v771_v44, %v770_v32  ;;  %v883_v5 = vadd.f32 %v882_v12, %v881_v34 }
 0x1b9   : > { %v775_v43 = vsel %vm19067_vm1, %v728_v42, 0.0  ;;  %v886_v2 = vsel %vm856_vm2, %v728_v42, 0.0  ;;  %v1662_v59 = vsel %vm1632_vm3, %v728_v42, 0.0  ;;  %v1773_v11 = vsel %vm1743_vm4, %v728_v42, 0.0  ;;  %v12994_v17 = vpop.f32.mrb[30].mxu0 }
 0x1ba   : > { %19263 = vst [vmem:[#allocation50_spill] sm:$0xff] %v12994_v17  ;;  %v3293_v41 = vsel %vm3263_vm5, %v728_v42, 0.0  ;;  %v3404_v14 = vsel %vm3374_vm6, %v728_v42, 0.0  ;;  %v4631_v6 = vsel %vm4601_vm7, %v728_v42, 0.0  ;;  %v4742_v16 = vsel %vm4712_vm8, %v728_v42, 0.0  ;;  %v13000_v21 = vpop.f32.mrb[31].mxu0 }
 0x1bb   : > { %19264 = vst [vmem:[#allocation51_spill] sm:$0xff] %v13000_v21  ;;  %v773_v44 = vsel %vm19067_vm1, %v727_v63, 0.0  ;;  %v884_v12 = vsel %vm856_vm2, %v727_v63, 0.0  ;;  %v1659_v28 = vadd.f32 %v1658_v23, %v1657_v36  ;;  %v1660_v32 = vsel %vm1632_vm3, %v727_v63, 0.0 }
 0x1bc   : > { %v774_v34 = vadd.f32 %v773_v44, %v772_v24  ;;  %v885_v48 = vadd.f32 %v884_v12, %v883_v5  ;;  %v1770_v49 = vadd.f32 %v1769_v58, %v1768_v45  ;;  %v1771_v50 = vsel %vm1743_vm4, %v727_v63, 0.0 }
 0x1bd   : > { %v1661_v8 = vadd.f32 %v1660_v32, %v1659_v28  ;;  %v3290_v9 = vadd.f32 %v3289_v19, %v3288_v54  ;;  %v3291_v10 = vsel %vm3263_vm5, %v727_v63, 0.0  ;;  %v3401_v46 = vadd.f32 %v3400_v27, %v3399_v38 }
 0x1be   : > { %v1772_v42 = vadd.f32 %v1771_v50, %v1770_v49  ;;  %v3402_v31 = vsel %vm3374_vm6, %v727_v63, 0.0  ;;  %v4628_v55 = vadd.f32 %v4627_v26, %v4626_v51  ;;  %v4629_v40 = vsel %vm4601_vm7, %v727_v63, 0.0 }
 0x1bf   : > { %v3292_v33 = vadd.f32 %v3291_v10, %v3290_v9  ;;  %v3403_v23 = vadd.f32 %v3402_v31, %v3401_v46  ;;  %v4739_v36 = vadd.f32 %v4738_v39, %v4737_v56  ;;  %v4740_v24 = vsel %vm4712_vm8, %v727_v63, 0.0 }
 0x1c0   : > { %v4630_v5 = vadd.f32 %v4629_v40, %v4628_v55  ;;  %v730_v58 = vmul.f32 %v12898_v61, %v12898_v61  ;;  %v729_v19 = vmul.f32 %v12904_v0, %v12904_v0  ;;  %v776_v45 = vadd.f32 %v775_v43, %v774_v34 }
 0x1c1   : > { %v4741_v27 = vadd.f32 %v4740_v24, %v4739_v36  ;;  %v887_v54 = vadd.f32 %v886_v2, %v885_v48  ;;  %v1663_v38 = vadd.f32 %v1662_v59, %v1661_v8  ;;  %v1774_v44 = vadd.f32 %v1773_v11, %v1772_v42 }
 0x1c2   : > { %v779_v26 = vsel %vm19067_vm1, %v730_v58, 0.0  ;;  %v890_v51 = vsel %vm856_vm2, %v730_v58, 0.0  ;;  %v1666_v31 = vsel %vm1632_vm3, %v730_v58, 0.0  ;;  %v1777_v46 = vsel %vm1743_vm4, %v730_v58, 0.0 }
 0x1c3   : > { %v3297_v40 = vsel %vm3263_vm5, %v730_v58, 0.0  ;;  %v3408_v55 = vsel %vm3374_vm6, %v730_v58, 0.0  ;;  %v4635_v39 = vsel %vm4601_vm7, %v730_v58, 0.0  ;;  %v4746_v63 = vsel %vm4712_vm8, %v730_v58, 0.0 }
 0x1c4   : > { %v777_v56 = vsel %vm19067_vm1, %v729_v19, 0.0  ;;  %v888_v43 = vsel %vm856_vm2, %v729_v19, 0.0  ;;  %v1664_v2 = vsel %vm1632_vm3, %v729_v19, 0.0  ;;  %v1775_v59 = vsel %vm1743_vm4, %v729_v19, 0.0 }
 0x1c5   : > { %v778_v11 = vadd.f32 %v777_v56, %v776_v45  ;;  %v889_v12 = vadd.f32 %v888_v43, %v887_v54  ;;  %v1665_v28 = vadd.f32 %v1664_v2, %v1663_v38  ;;  %v1776_v32 = vadd.f32 %v1775_v59, %v1774_v44 }
 0x1c6   : > { %v3294_v34 = vadd.f32 %v3293_v41, %v3292_v33  ;;  %v3295_v48 = vsel %vm3263_vm5, %v729_v19, 0.0  ;;  %v3405_v49 = vadd.f32 %v3404_v14, %v3403_v23  ;;  %v3406_v50 = vsel %vm3374_vm6, %v729_v19, 0.0 }
 0x1c7   : > { %v4632_v8 = vadd.f32 %v4631_v6, %v4630_v5  ;;  %v4633_v9 = vsel %vm4601_vm7, %v729_v19, 0.0  ;;  %v4743_v10 = vadd.f32 %v4742_v16, %v4741_v27  ;;  %v4744_v42 = vsel %vm4712_vm8, %v729_v19, 0.0 }
 0x1c8   : > { %v3296_v36 = vadd.f32 %v3295_v48, %v3294_v34  ;;  %v3407_v24 = vadd.f32 %v3406_v50, %v3405_v49  ;;  %v732_v58 = vmul.f32 %v12914_v18, %v12914_v18  ;;  %v731_v45 = vmul.f32 %v12920_v22, %v12920_v22 }
 0x1c9   : > { %v4634_v33 = vadd.f32 %v4633_v9, %v4632_v8  ;;  %v4745_v41 = vadd.f32 %v4744_v42, %v4743_v10  ;;  %v780_v54 = vadd.f32 %v779_v26, %v778_v11  ;;  %v891_v14 = vadd.f32 %v890_v51, %v889_v12 }
 0x1ca   : > { %v783_v23 = vsel %vm19067_vm1, %v732_v58, 0.0  ;;  %v894_v6 = vsel %vm856_vm2, %v732_v58, 0.0  ;;  %v1670_v16 = vsel %vm1632_vm3, %v732_v58, 0.0  ;;  %v1781_v5 = vsel %vm1743_vm4, %v732_v58, 0.0 }
 0x1cb   : > { %v3301_v19 = vsel %vm3263_vm5, %v732_v58, 0.0  ;;  %v3412_v27 = vsel %vm3374_vm6, %v732_v58, 0.0  ;;  %v4639_v38 = vsel %vm4601_vm7, %v732_v58, 0.0  ;;  %v4750_v44 = vsel %vm4712_vm8, %v732_v58, 0.0 }
 0x1cc   : > { %v781_v56 = vsel %vm19067_vm1, %v731_v45, 0.0  ;;  %v892_v26 = vsel %vm856_vm2, %v731_v45, 0.0  ;;  %v1667_v51 = vadd.f32 %v1666_v31, %v1665_v28  ;;  %v1668_v43 = vsel %vm1632_vm3, %v731_v45, 0.0 }
 0x1cd   : > { %v782_v2 = vadd.f32 %v781_v56, %v780_v54  ;;  %v893_v59 = vadd.f32 %v892_v26, %v891_v14  ;;  %v1778_v11 = vadd.f32 %v1777_v46, %v1776_v32  ;;  %v1779_v12 = vsel %vm1743_vm4, %v731_v45, 0.0 }
 0x1ce   : > { %v1669_v34 = vadd.f32 %v1668_v43, %v1667_v51  ;;  %v3298_v48 = vadd.f32 %v3297_v40, %v3296_v36  ;;  %v3299_v49 = vsel %vm3263_vm5, %v731_v45, 0.0  ;;  %v3409_v50 = vadd.f32 %v3408_v55, %v3407_v24 }
 0x1cf   : > { %v1780_v8 = vadd.f32 %v1779_v12, %v1778_v11  ;;  %v3410_v9 = vsel %vm3374_vm6, %v731_v45, 0.0  ;;  %v4636_v10 = vadd.f32 %v4635_v39, %v4634_v33  ;;  %v4637_v42 = vsel %vm4601_vm7, %v731_v45, 0.0 }
 0x1d0   : > { %v3300_v58 = vadd.f32 %v3299_v49, %v3298_v48  ;;  %v3411_v31 = vadd.f32 %v3410_v9, %v3409_v50  ;;  %v4747_v28 = vadd.f32 %v4746_v63, %v4745_v41  ;;  %v4748_v54 = vsel %vm4712_vm8, %v731_v45, 0.0 }
 0x1d1   : > { %v4638_v14 = vadd.f32 %v4637_v42, %v4636_v10  ;;  %v734_v46 = vmul.f32 %v12926_v53, %v12926_v53  ;;  %v733_v40 = vmul.f32 %v12932_v57, %v12932_v57  ;;  %v784_v32 = vadd.f32 %v783_v23, %v782_v2 }
 0x1d2   : > { %v4749_v55 = vadd.f32 %v4748_v54, %v4747_v28  ;;  %v895_v36 = vadd.f32 %v894_v6, %v893_v59  ;;  %v1671_v24 = vadd.f32 %v1670_v16, %v1669_v34  ;;  %v1782_v56 = vadd.f32 %v1781_v5, %v1780_v8 }
 0x1d3   : > { %v787_v39 = vsel %vm19067_vm1, %v734_v46, 0.0  ;;  %v898_v33 = vsel %vm856_vm2, %v734_v46, 0.0  ;;  %v1674_v63 = vsel %vm1632_vm3, %v734_v46, 0.0  ;;  %v1785_v45 = vsel %vm1743_vm4, %v734_v46, 0.0 }
 0x1d4   : > { %v3305_v41 = vsel %vm3263_vm5, %v734_v46, 0.0  ;;  %v3416_v26 = vsel %vm3374_vm6, %v734_v46, 0.0  ;;  %v4643_v51 = vsel %vm4601_vm7, %v734_v46, 0.0  ;;  %v4754_v23 = vsel %vm4712_vm8, %v734_v46, 0.0 }
 0x1d5   : > { %v785_v6 = vsel %vm19067_vm1, %v733_v40, 0.0  ;;  %v896_v16 = vsel %vm856_vm2, %v733_v40, 0.0  ;;  %v1672_v5 = vsel %vm1632_vm3, %v733_v40, 0.0  ;;  %v1783_v43 = vsel %vm1743_vm4, %v733_v40, 0.0 }
 0x1d6   : > { %v786_v2 = vadd.f32 %v785_v6, %v784_v32  ;;  %v897_v59 = vadd.f32 %v896_v16, %v895_v36  ;;  %v1673_v11 = vadd.f32 %v1672_v5, %v1671_v24  ;;  %v1784_v12 = vadd.f32 %v1783_v43, %v1782_v56 }
 0x1d7   : > { %v3302_v34 = vadd.f32 %v3301_v19, %v3300_v58  ;;  %v3303_v48 = vsel %vm3263_vm5, %v733_v40, 0.0  ;;  %v3413_v49 = vadd.f32 %v3412_v27, %v3411_v31  ;;  %v3414_v50 = vsel %vm3374_vm6, %v733_v40, 0.0 }
 0x1d8   : > { %v4640_v8 = vadd.f32 %v4639_v38, %v4638_v14  ;;  %v4641_v9 = vsel %vm4601_vm7, %v733_v40, 0.0  ;;  %v4751_v10 = vadd.f32 %v4750_v44, %v4749_v55  ;;  %v4752_v42 = vsel %vm4712_vm8, %v733_v40, 0.0 }
 0x1d9   : > { %v3304_v28 = vadd.f32 %v3303_v48, %v3302_v34  ;;  %v3415_v54 = vadd.f32 %v3414_v50, %v3413_v49  ;;  %v736_v46 = vmul.f32 %v12942_v3, %v12942_v3  ;;  %v735_v32 = vmul.f32 %v12947_v13, %v12947_v13 }
 0x1da   : > { %v4642_v19 = vadd.f32 %v4641_v9, %v4640_v8  ;;  %v4753_v58 = vadd.f32 %v4752_v42, %v4751_v10  ;;  %v788_v36 = vadd.f32 %v787_v39, %v786_v2  ;;  %v899_v27 = vadd.f32 %v898_v33, %v897_v59 }
 0x1db   : > { %v791_v31 = vsel %vm19067_vm1, %v736_v46, 0.0  ;;  %v902_v38 = vsel %vm856_vm2, %v736_v46, 0.0  ;;  %v1678_v44 = vsel %vm1632_vm3, %v736_v46, 0.0  ;;  %v1789_v14 = vsel %vm1743_vm4, %v736_v46, 0.0 }
 0x1dc   : > { %v3309_v40 = vsel %vm3263_vm5, %v736_v46, 0.0  ;;  %v3420_v55 = vsel %vm3374_vm6, %v736_v46, 0.0  ;;  %v4647_v24 = vsel %vm4601_vm7, %v736_v46, 0.0  ;;  %v4758_v56 = vsel %vm4712_vm8, %v736_v46, 0.0 }
 0x1dd   : > { %v789_v6 = vsel %vm19067_vm1, %v735_v32, 0.0  ;;  %v900_v39 = vsel %vm856_vm2, %v735_v32, 0.0  ;;  %v1675_v33 = vadd.f32 %v1674_v63, %v1673_v11  ;;  %v1676_v16 = vsel %vm1632_vm3, %v735_v32, 0.0 }
 0x1de   : > { %v790_v5 = vadd.f32 %v789_v6, %v788_v36  ;;  %v901_v43 = vadd.f32 %v900_v39, %v899_v27  ;;  %v1786_v2 = vadd.f32 %v1785_v45, %v1784_v12  ;;  %v1787_v59 = vsel %vm1743_vm4, %v735_v32, 0.0 }
 0x1df   : > { %v1677_v34 = vadd.f32 %v1676_v16, %v1675_v33  ;;  %v3306_v48 = vadd.f32 %v3305_v41, %v3304_v28  ;;  %v3307_v49 = vsel %vm3263_vm5, %v735_v32, 0.0  ;;  %v3417_v50 = vadd.f32 %v3416_v26, %v3415_v54 }
 0x1e0   : > { %v1788_v8 = vadd.f32 %v1787_v59, %v1786_v2  ;;  %v3418_v9 = vsel %vm3374_vm6, %v735_v32, 0.0  ;;  %v4644_v10 = vadd.f32 %v4643_v51, %v4642_v19  ;;  %v4645_v42 = vsel %vm4601_vm7, %v735_v32, 0.0 }
 0x1e1   : > { %v3308_v46 = vadd.f32 %v3307_v49, %v3306_v48  ;;  %v3419_v63 = vadd.f32 %v3418_v9, %v3417_v50  ;;  %v4755_v11 = vadd.f32 %v4754_v23, %v4753_v58  ;;  %v4756_v36 = vsel %vm4712_vm8, %v735_v32, 0.0 }
 0x1e2   : > { %v4646_v27 = vadd.f32 %v4645_v42, %v4644_v10  ;;  %v738_v45 = vmul.f32 %v12953_v29, %v12953_v29  ;;  %v737_v41 = vmul.f32 %v12956_v30, %v12956_v30  ;;  %v792_v12 = vadd.f32 %v791_v31, %v790_v5 }
 0x1e3   : > { %v4757_v26 = vadd.f32 %v4756_v36, %v4755_v11  ;;  %v903_v28 = vadd.f32 %v902_v38, %v901_v43  ;;  %v1679_v54 = vadd.f32 %v1678_v44, %v1677_v34  ;;  %v1790_v6 = vadd.f32 %v1789_v14, %v1788_v8 }
 0x1e4   : > { %v795_v51 = vsel %vm19067_vm1, %v738_v45, 0.0  ;;  %v906_v19 = vsel %vm856_vm2, %v738_v45, 0.0  ;;  %v1682_v23 = vsel %vm1632_vm3, %v738_v45, 0.0  ;;  %v1793_v32 = vsel %vm1743_vm4, %v738_v45, 0.0 }
 0x1e5   : > { %v3313_v58 = vsel %vm3263_vm5, %v738_v45, 0.0  ;;  %v3424_v39 = vsel %vm3374_vm6, %v738_v45, 0.0  ;;  %v4651_v33 = vsel %vm4601_vm7, %v738_v45, 0.0  ;;  %v4762_v31 = vsel %vm4712_vm8, %v738_v45, 0.0 }
 0x1e6   : > { %v793_v38 = vsel %vm19067_vm1, %v737_v41, 0.0  ;;  %v904_v44 = vsel %vm856_vm2, %v737_v41, 0.0  ;;  %v1680_v14 = vsel %vm1632_vm3, %v737_v41, 0.0  ;;  %v1791_v16 = vsel %vm1743_vm4, %v737_v41, 0.0 }
 0x1e7   : > { %v794_v5 = vadd.f32 %v793_v38, %v792_v12  ;;  %v905_v43 = vadd.f32 %v904_v44, %v903_v28  ;;  %v1681_v2 = vadd.f32 %v1680_v14, %v1679_v54  ;;  %v1792_v59 = vadd.f32 %v1791_v16, %v1790_v6 }
 0x1e8   : > { %v3310_v34 = vadd.f32 %v3309_v40, %v3308_v46  ;;  %v3311_v48 = vsel %vm3263_vm5, %v737_v41, 0.0  ;;  %v3421_v49 = vadd.f32 %v3420_v55, %v3419_v63  ;;  %v3422_v50 = vsel %vm3374_vm6, %v737_v41, 0.0 }
 0x1e9   : > { %v4648_v8 = vadd.f32 %v4647_v24, %v4646_v27  ;;  %v4649_v9 = vsel %vm4601_vm7, %v737_v41, 0.0  ;;  %v4759_v10 = vadd.f32 %v4758_v56, %v4757_v26  ;;  %v4760_v42 = vsel %vm4712_vm8, %v737_v41, 0.0 }
 0x1ea   : > { %v3312_v11 = vadd.f32 %v3311_v48, %v3310_v34  ;;  %v3423_v36 = vadd.f32 %v3422_v50, %v3421_v49  ;;  %v740_v45 = vmul.f32 %v12966_v7, %v12966_v7  ;;  %v739_v12 = vmul.f32 %v12972_v62, %v12972_v62 }
 0x1eb   : > { %v4650_v40 = vadd.f32 %v4649_v9, %v4648_v8  ;;  %v4761_v46 = vadd.f32 %v4760_v42, %v4759_v10  ;;  %v796_v28 = vadd.f32 %v795_v51, %v794_v5  ;;  %v907_v55 = vadd.f32 %v906_v19, %v905_v43 }
 0x1ec   : > { %v799_v63 = vsel %vm19067_vm1, %v740_v45, 0.0  ;;  %v910_v24 = vsel %vm856_vm2, %v740_v45, 0.0  ;;  %v1686_v56 = vsel %vm1632_vm3, %v740_v45, 0.0  ;;  %v1797_v27 = vsel %vm1743_vm4, %v740_v45, 0.0 }
 0x1ed   : > { %v3317_v41 = vsel %vm3263_vm5, %v740_v45, 0.0  ;;  %v3428_v26 = vsel %vm3374_vm6, %v740_v45, 0.0  ;;  %v4655_v54 = vsel %vm4601_vm7, %v740_v45, 0.0  ;;  %v4766_v6 = vsel %vm4712_vm8, %v740_v45, 0.0 }
 0x1ee   : > { %v797_v38 = vsel %vm19067_vm1, %v739_v12, 0.0  ;;  %v908_v51 = vsel %vm856_vm2, %v739_v12, 0.0  ;;  %v1683_v19 = vadd.f32 %v1682_v23, %v1681_v2  ;;  %v1684_v44 = vsel %vm1632_vm3, %v739_v12, 0.0 }
 0x1ef   : > { %v798_v14 = vadd.f32 %v797_v38, %v796_v28  ;;  %v909_v16 = vadd.f32 %v908_v51, %v907_v55  ;;  %v1794_v5 = vadd.f32 %v1793_v32, %v1792_v59  ;;  %v1795_v43 = vsel %vm1743_vm4, %v739_v12, 0.0 }
 0x1f0   : > { %v1685_v34 = vadd.f32 %v1684_v44, %v1683_v19  ;;  %v3314_v48 = vadd.f32 %v3313_v58, %v3312_v11  ;;  %v3315_v49 = vsel %vm3263_vm5, %v739_v12, 0.0  ;;  %v3425_v50 = vadd.f32 %v3424_v39, %v3423_v36 }
 0x1f1   : > { %v1796_v8 = vadd.f32 %v1795_v43, %v1794_v5  ;;  %v3426_v9 = vsel %vm3374_vm6, %v739_v12, 0.0  ;;  %v4652_v10 = vadd.f32 %v4651_v33, %v4650_v40  ;;  %v4653_v42 = vsel %vm4601_vm7, %v739_v12, 0.0 }
 0x1f2   : > { %v3316_v45 = vadd.f32 %v3315_v49, %v3314_v48  ;;  %v3427_v23 = vadd.f32 %v3426_v9, %v3425_v50  ;;  %v4763_v2 = vadd.f32 %v4762_v31, %v4761_v46  ;;  %v4764_v28 = vsel %vm4712_vm8, %v739_v12, 0.0 }
 0x1f3   : > { %v4654_v55 = vadd.f32 %v4653_v42, %v4652_v10  ;;  %v742_v32 = vmul.f32 %v12980_v25, %v12980_v25  ;;  %v741_v58 = vmul.f32 %v12984_v60, %v12984_v60  ;;  %v800_v59 = vadd.f32 %v799_v63, %v798_v14 }
 0x1f4   : > { %v4765_v39 = vadd.f32 %v4764_v28, %v4763_v2  ;;  %v911_v11 = vadd.f32 %v910_v24, %v909_v16  ;;  %v1687_v36 = vadd.f32 %v1686_v56, %v1685_v34  ;;  %v1798_v38 = vadd.f32 %v1797_v27, %v1796_v8 }
 0x1f5   : > { %v803_v33 = vsel %vm19067_vm1, %v742_v32, 0.0  ;;  %v914_v40 = vsel %vm856_vm2, %v742_v32, 0.0  ;;  %v1690_v31 = vsel %vm1632_vm3, %v742_v32, 0.0  ;;  %v1801_v12 = vsel %vm1743_vm4, %v742_v32, 0.0 }
 0x1f6   : > { %v3321_v46 = vsel %vm3263_vm5, %v742_v32, 0.0  ;;  %v3432_v51 = vsel %vm3374_vm6, %v742_v32, 0.0  ;;  %v4659_v19 = vsel %vm4601_vm7, %v742_v32, 0.0  ;;  %v13142_v63 = vsel %vm4712_vm8, %v742_v32, 0.0 }
 0x1f7   : > { %v801_v24 = vsel %vm19067_vm1, %v741_v58, 0.0  ;;  %v912_v56 = vsel %vm856_vm2, %v741_v58, 0.0  ;;  %v1688_v27 = vsel %vm1632_vm3, %v741_v58, 0.0  ;;  %v1799_v44 = vsel %vm1743_vm4, %v741_v58, 0.0 }
 0x1f8   : > { %v802_v14 = vadd.f32 %v801_v24, %v800_v59  ;;  %v913_v16 = vadd.f32 %v912_v56, %v911_v11  ;;  %v1689_v5 = vadd.f32 %v1688_v27, %v1687_v36  ;;  %v1800_v43 = vadd.f32 %v1799_v44, %v1798_v38 }
 0x1f9   : > { %v3318_v34 = vadd.f32 %v3317_v41, %v3316_v45  ;;  %v3319_v48 = vsel %vm3263_vm5, %v741_v58, 0.0  ;;  %v3429_v49 = vadd.f32 %v3428_v26, %v3427_v23  ;;  %v3430_v50 = vsel %vm3374_vm6, %v741_v58, 0.0 }
 0x1fa   : > { %v4656_v8 = vadd.f32 %v4655_v54, %v4654_v55  ;;  %v4657_v9 = vsel %vm4601_vm7, %v741_v58, 0.0  ;;  %v4767_v10 = vadd.f32 %v4766_v6, %v4765_v39  ;;  %v4768_v42 = vsel %vm4712_vm8, %v741_v58, 0.0 }
 0x1fb   : > { %v3320_v2 = vadd.f32 %v3319_v48, %v3318_v34  ;;  %v3431_v28 = vadd.f32 %v3430_v50, %v3429_v49  ;;  %v744_v32 = vmul.f32 %v12994_v17, %v12994_v17  ;;  %v743_v59 = vmul.f32 %v13000_v21, %v13000_v21 }
 0x1fc   : > { %v4658_v41 = vadd.f32 %v4657_v9, %v4656_v8  ;;  %v4769_v45 = vadd.f32 %v4768_v42, %v4767_v10  ;;  %v804_v11 = vadd.f32 %v803_v33, %v802_v14  ;;  %v915_v26 = vadd.f32 %v914_v40, %v913_v16 }
 0x1fd   : > { %v807_v23 = vsel %vm19067_vm1, %v744_v32, 0.0  ;;  %v918_v54 = vsel %vm856_vm2, %v744_v32, 0.0  ;;  %v1694_v6 = vsel %vm1632_vm3, %v744_v32, 0.0  ;;  %v1805_v55 = vsel %vm1743_vm4, %v744_v32, 0.0 }
 0x1fe   : > { %v3325_v58 = vsel %vm3263_vm5, %v744_v32, 0.0  ;;  %v3436_v39 = vsel %vm3374_vm6, %v744_v32, 0.0  ;;  %v4663_v36 = vsel %vm4601_vm7, %v744_v32, 0.0  ;;  %v4774_v38 = vsel %vm4712_vm8, %v744_v32, 0.0 }
 0x1ff   : > { %v805_v24 = vsel %vm19067_vm1, %v743_v59, 0.0  ;;  %v916_v33 = vsel %vm856_vm2, %v743_v59, 0.0  ;;  %v1691_v40 = vadd.f32 %v1690_v31, %v1689_v5  ;;  %v1692_v56 = vsel %vm1632_vm3, %v743_v59, 0.0 }
 0x200   : > { %v806_v27 = vadd.f32 %v805_v24, %v804_v11  ;;  %v917_v44 = vadd.f32 %v916_v33, %v915_v26  ;;  %v1802_v14 = vadd.f32 %v1801_v12, %v1800_v43  ;;  %v1803_v16 = vsel %vm1743_vm4, %v743_v59, 0.0 }
 0x201   : > { %v1693_v34 = vadd.f32 %v1692_v56, %v1691_v40  ;;  %v3322_v48 = vadd.f32 %v3321_v46, %v3320_v2  ;;  %v3323_v49 = vsel %vm3263_vm5, %v743_v59, 0.0  ;;  %v3433_v50 = vadd.f32 %v3432_v51, %v3431_v28 }
 0x202   : > { %v808_v8 = vadd.f32 %v807_v23, %v806_v27  ;;  %v919_v9 = vadd.f32 %v918_v54, %v917_v44  ;;  %v1804_v10 = vadd.f32 %v1803_v16, %v1802_v14  ;;  %v3434_v42 = vsel %vm3374_vm6, %v743_v59, 0.0 }
 0x203   : > { %v1695_v32 = vadd.f32 %v1694_v6, %v1693_v34  ;;  %v3324_v17 = vadd.f32 %v3323_v49, %v3322_v48  ;;  %v3435_v31 = vadd.f32 %v3434_v42, %v3433_v50  ;;  %v4660_v5 = vadd.f32 %v4659_v19, %v4658_v41 }
 0x204   : > { %v809_v21 = vrot.slane %v808_v8, 4  ;;  %v920_v11 = vrot.slane %v919_v9, 4  ;;  %v1806_v26 = vadd.f32 %v1805_v55, %v1804_v10  ;;  %v4661_v12 = vsel %vm4601_vm7, %v743_v59, 0.0 }
 0x205   : > { %v1696_v43 = vrot.slane %v1695_v32, 4  ;;  %v3326_v24 = vadd.f32 %v3325_v58, %v3324_v17  ;;  %v3437_v46 = vadd.f32 %v3436_v39, %v3435_v31  ;;  %v4662_v2 = vadd.f32 %v4661_v12, %v4660_v5 }
 0x206   : > { %v810_v33 = vadd.f32 %v809_v21, %v808_v8  ;;  %v921_v51 = vadd.f32 %v920_v11, %v919_v9  ;;  %v1807_v28 = vrot.slane %v1806_v26, 4  ;;  %v4771_v23 = vadd.f32 %v13142_v63, %v4769_v45 }
 0x207   : > { %v1697_v54 = vadd.f32 %v1696_v43, %v1695_v32  ;;  %v3327_v40 = vrot.slane %v3326_v24, 4  ;;  %v3438_v6 = vrot.slane %v3437_v46, 4  ;;  %v4664_v56 = vadd.f32 %v4663_v36, %v4662_v2 }
 0x208   : > { %v811_v27 = vrot.slane %v810_v33, 2  ;;  %v922_v19 = vrot.slane %v921_v51, 2  ;;  %v1808_v41 = vadd.f32 %v1807_v28, %v1806_v26  ;;  %v4772_v55 = vsel %vm4712_vm8, %v743_v59, 0.0 }
 0x209   : > { %v1698_v44 = vrot.slane %v1697_v54, 2  ;;  %v3328_v14 = vadd.f32 %v3327_v40, %v3326_v24  ;;  %v3439_v16 = vadd.f32 %v3438_v6, %v3437_v46  ;;  %v4665_v17 = vrot.slane %v4664_v56, 4 }
 0x20a   : > { %v812_v58 = vadd.f32 %v811_v27, %v810_v33  ;;  %v923_v39 = vadd.f32 %v922_v19, %v921_v51  ;;  %v1809_v21 = vrot.slane %v1808_v41, 2  ;;  %v4773_v34 = vadd.f32 %v4772_v55, %v4771_v23 }
 0x20b   : > { %v1699_v48 = vadd.f32 %v1698_v44, %v1697_v54  ;;  %v3329_v49 = vrot.slane %v3328_v14, 2  ;;  %v3440_v63 = vrot.slane %v3439_v16, 2  ;;  %v4666_v45 = vadd.f32 %v4665_v17, %v4664_v56 }
 0x20c   : > { %v813_v50 = vrot.slane %v812_v58, 1  ;;  %v924_v8 = vrot.slane %v923_v39, 1  ;;  %v1810_v36 = vadd.f32 %v1809_v21, %v1808_v41  ;;  %v4775_v9 = vadd.f32 %v4774_v38, %v4773_v34 }
 0x20d   : > { %v1700_v10 = vrot.slane %v1699_v48, 1  ;;  %v3330_v42 = vadd.f32 %v3329_v49, %v3328_v14  ;;  %v3441_v32 = vadd.f32 %v3440_v63, %v3439_v16  ;;  %v4667_v59 = vrot.slane %v4666_v45, 2 }
 0x20e   : > { %v814_v31 = vadd.f32 %v813_v50, %v812_v58  ;;  %v925_v5 = vadd.f32 %v924_v8, %v923_v39  ;;  %v1811_v26 = vrot.slane %v1810_v36, 1  ;;  %v4776_v46 = vrot.slane %v4775_v9, 4 }
 0x20f   : > { %v1701_v11 = vadd.f32 %v1700_v10, %v1699_v48  ;;  %v3331_v12 = vrot.slane %v3330_v42, 1  ;;  %v3442_v43 = vrot.slane %v3441_v32, 1  ;;  %v4668_v24 = vadd.f32 %v4667_v59, %v4666_v45 }
 0x210   : > { %11995 = vrsqrt.f32 %v814_v31  ;;  %v1812_v2 = vadd.f32 %v1811_v26, %v1810_v36  ;;  %v4777_v28 = vadd.f32 %v4776_v46, %v4775_v9  ;;  %vm817_vm9 = vcmp.eq.f32.partialorder %v814_v31, inf }
 0x211   : > { %11997 = vrsqrt.f32 %v925_v5  ;;  %v13173_v33 = vadd.f32 %v3331_v12, %v3330_v42  ;;  %v13175_v51 = vadd.f32 %v3442_v43, %v3441_v32  ;;  %v4669_v38 = vrot.slane %v4668_v24, 1 }
 0x212   : > { %11999 = vrsqrt.f32 %v1701_v11  ;;  %v4778_v54 = vrot.slane %v4777_v28, 2  ;;  %vm819_vm10 = vcmp.eq.f32.partialorder %v814_v31, 0.0  ;;  %v820_v41 = vand.u32 2147483648, %v814_v31 }
 0x213   : > { %12001 = vrsqrt.f32 %v1812_v2  ;;  %v13179_v23 = vadd.f32 %v4669_v38, %v4668_v24  ;;  %vm928_vm11 = vcmp.eq.f32.partialorder %v925_v5, inf  ;;  %v931_v14 = vand.u32 2147483648, %v925_v5 }
 0x214   : > { %12003 = vrsqrt.f32 %v13173_v33  ;;  %v4779_v27 = vadd.f32 %v4778_v54, %v4777_v28  ;;  %vm930_vm12 = vcmp.eq.f32.partialorder %v925_v5, 0.0  ;;  %vm1704_vm13 = vcmp.eq.f32.partialorder %v1701_v11, inf }
 0x215   : > { %12005 = vrsqrt.f32 %v13175_v51  ;;  %v1707_v36 = vand.u32 2147483648, %v1701_v11  ;;  %vm1706_vm14 = vcmp.eq.f32.partialorder %v1701_v11, 0.0  ;;  %vm1815_vm15 = vcmp.eq.f32.partialorder %v1812_v2, inf }
 0x216   : > { %12007 = vrsqrt.f32 %v13179_v23  ;;  %v4780_v17 = vrot.slane %v4779_v27, 1  ;;  %vm1817_vm2 = vcmp.eq.f32.partialorder %v1812_v2, 0.0  ;;  %v1818_v26 = vand.u32 2147483648, %v1812_v2 }
 0x217   : > { %vm3335_vm3 = vcmp.eq.f32.partialorder %v13173_v33, inf  ;;  %vm3337_vm4 = vcmp.eq.f32.partialorder %v13173_v33, 0.0  ;;  %v3338_v12 = vand.u32 2147483648, %v13173_v33  ;;  %vm3446_vm5 = vcmp.eq.f32.partialorder %v13175_v51, inf }
 0x218   : > { %v13182_v50 = vadd.f32 %v4780_v17, %v4779_v27  ;;  %vm3448_vm6 = vcmp.eq.f32.partialorder %v13175_v51, 0.0  ;;  %v3449_v38 = vand.u32 2147483648, %v13175_v51  ;;  %vm4673_vm7 = vcmp.eq.f32.partialorder %v13179_v23, inf }
 0x219   : > { %vm4675_vm8 = vcmp.eq.f32.partialorder %v13179_v23, 0.0 }
 0x21a   : > { %v11996_v40 = vpop.eup %11995  ;;  %v4787_v28 = vand.u32 2147483648, %v13182_v50 }
 0x21b   : > { %v11998_v6 = vpop.eup %11997  ;;  %v816_v56 = vmul.f32 %v11996_v40, %v814_v31 }
 0x21c   : > { %v12000_v19 = vpop.eup %11999  ;;  %v927_v55 = vmul.f32 %v11998_v6, %v925_v5 }
 0x21d   : > { %v818_v44 = vsel %vm817_vm9, %v814_v31, %v816_v56  ;;  %v1703_v16 = vmul.f32 %v12000_v19, %v1701_v11  ;;  %v12002_v21 = vpop.eup %12001  ;;  %vm4784_vm9 = vcmp.eq.f32.partialorder %v13182_v50, inf }
 0x21e   : > { %v821_v58 = vsel %vm819_vm10, %v820_v41, %v818_v44  ;;  %v929_v39 = vsel %vm928_vm11, %v925_v5, %v927_v55  ;;  %v12004_v49 = vpop.eup %12003  ;;  %v1814_v9 = vmul.f32 %v12002_v21, %v1812_v2  ;;  %vm4786_vm10 = vcmp.eq.f32.partialorder %v13182_v50, 0.0 }
 0x21f   : > { %v822_v34 = vmax.f32 %v821_v58, 1e-12  ;;  %v932_v48 = vsel %vm930_vm12, %v931_v14, %v929_v39  ;;  %v1705_v45 = vsel %vm1704_vm13, %v1701_v11, %v1703_v16  ;;  %v12006_v8 = vpop.eup %12005  ;;  %v3334_v32 = vmul.f32 %v12004_v49, %v13173_v33 }
 0x220   : > { %v933_v63 = vmax.f32 %v932_v48, 1e-12  ;;  %v1708_v10 = vsel %vm1706_vm14, %v1707_v36, %v1705_v45  ;;  %v12008_v42 = vpop.eup %12007  ;;  %v3445_v59 = vmul.f32 %v12006_v8, %v13175_v51  ;;  %v1816_v31 = vsel %vm1815_vm15, %v1812_v2, %v1814_v9 }
 0x221   : > { %12009 = vrcp.f32 %v822_v34  ;;  %v1709_v5 = vmax.f32 %v1708_v10, 1e-12  ;;  %v4672_v11 = vmul.f32 %v12008_v42, %v13179_v23  ;;  %v1819_v43 = vsel %vm1817_vm2, %v1818_v26, %v1816_v31 }
 0x222   : > { %12011 = vrcp.f32 %v933_v63  ;;  %v3336_v24 = vsel %vm3335_vm3, %v13173_v33, %v3334_v32  ;;  %v3447_v46 = vsel %vm3446_vm5, %v13175_v51, %v3445_v59  ;;  %v4676_v2 = vand.u32 2147483648, %v13179_v23 }
 0x223   : > { %12013 = vrsqrt.f32 %v13182_v50  ;;  %v1820_v40 = vmax.f32 %v1819_v43, 1e-12  ;;  %v13206_v6 = vsel %vm3337_vm4, %v3338_v12, %v3336_v24  ;;  %v13208_v51 = vsel %vm3448_vm6, %v3449_v38, %v3447_v46 }
 0x224   : > { %12015 = vrcp.f32 %v1709_v5  ;;  %v4674_v56 = vsel %vm4673_vm7, %v13179_v23, %v4672_v11  ;;  %v3340_v32 = vmax.f32 %v13206_v6, 1e-12 }
 0x225   : > { %v13254_v26 = vsel %vm4675_vm8, %v4676_v2, %v4674_v56  ;;  %12017 = vrcp.f32 %v1820_v40 }
 0x226   : > { %12019 = vrcp.f32 %v3340_v32 }
 0x22b   : > { %v13202_v54 = vpop.eup %12009 }
 0x22c   : > { %v13211_v27 = vpop.eup %12011  ;;  %v840_v19 = vmul.f32 %v13202_v54, %v12904_v0  ;;  %v841_v41 = vmul.f32 %v13202_v54, %v12898_v61  ;;  %v824_v55 = vmul.f32 %v13202_v54, %v12790_v37  ;;  %v825_v33 = vmul.f32 %v13202_v54, %v12786_v35 }
 0x22d   : > { %v937_v44 = vmul.f32 %v13211_v27, %v12808_v52  ;;  %v953_v14 = vmul.f32 %v13211_v27, %v12920_v22  ;;  %v935_v16 = vmul.f32 %v13211_v27, %v12790_v37  ;;  %v951_v17 = vmul.f32 %v13211_v27, %v12904_v0  ;;  %v12014_v58 = vpop.eup %12013 }
 0x22e   : > { %v10958_v39 = vpack.c.bf16 %v841_v41, %v840_v19  ;;  %v10960_v21 = vpack.c.bf16 %v825_v33, %v824_v55  ;;  %v842_v34 = vmul.f32 %v13202_v54, %v12920_v22  ;;  %v843_v48 = vmul.f32 %v13202_v54, %v12914_v18  ;;  %v13266_v2 = vpop.eup %12015 }
 0x22f   : > { %v4783_v49 = vmul.f32 %v12014_v58, %v13182_v50  ;;  %v11297_v63 = vpack.i.bf16 %v937_v44, %v953_v14  ;;  %v11287_v45 = vpack.i.bf16 %v935_v16, %v951_v17  ;;  %v938_v8 = vmul.f32 %v13211_v27, %v12802_v47 }
 0x230   : > { %10959 = vmatprep.subr.bf16.mxu1 %v10958_v39  ;;  %v10962_v36 = vpack.c.bf16 %v843_v48, %v842_v34  ;;  %v954_v9 = vmul.f32 %v13211_v27, %v12914_v18  ;;  %v936_v10 = vmul.f32 %v13211_v27, %v12786_v35  ;;  %v952_v42 = vmul.f32 %v13211_v27, %v12898_v61 }
 0x231   : > { %v4785_v59 = vsel %vm4784_vm9, %v13182_v50, %v4783_v49  ;;  %11298 = vrot.lane.b32.xlu1 %v11297_v63, %s12427_s30  ;;  %11288 = vrot.lane.b32.xlu0 %v11287_v45, %s12427_s30  ;;  %v826_v31 = vmul.f32 %v13202_v54, %v12808_v52  ;;  %v827_v5 = vmul.f32 %v13202_v54, %v12802_v47  ;;  %v3451_v63 = vmax.f32 %v13208_v51, 1e-12 }
 0x232   : > { %10961 = vmatpush3.bf16.msra.mxu1 %v10960_v21  ;;  %v11302_v12 = vpack.i.bf16 %v938_v8, %v954_v9  ;;  %v11292_v11 = vpack.i.bf16 %v936_v10, %v952_v42  ;;  %v844_v43 = vmul.f32 %v13202_v54, %v12932_v57  ;;  %v13260_v24 = vsel %vm4786_vm10, %v4787_v28, %v4785_v59  ;;  %v19265_v10 = vld [vmem:[#allocation28_spill] sm:$0xff] }
 0x233   : > { %10963 = vmatprep.subr.bf16.mxu1 %v10962_v36  ;;  %v10964_v46 = vpack.c.bf16 %v827_v5, %v826_v31  ;;  %v845_v38 = vmul.f32 %v13202_v54, %v12926_v53  ;;  %v940_v23 = vmul.f32 %v13211_v27, %v12814_v1  ;;  %v956_v6 = vmul.f32 %v13211_v27, %v12926_v53  ;;  %v19266_v31 = vld [vmem:[#allocation29_spill] sm:$0xff] }
 0x234   : > { %v939_v56 = vmul.f32 %v13211_v27, %v12820_v4  ;;  %v955_v50 = vmul.f32 %v13211_v27, %v12932_v57  ;;  %v828_v28 = vmul.f32 %v13202_v54, %v12820_v4  ;;  %v829_v41 = vmul.f32 %v13202_v54, %v12814_v1 }
 0x235   : > { %11303 = vrot.lane.b32.xlu1 %v11302_v12, %s12427_s30  ;;  %11293 = vrot.lane.b32.xlu0 %v11292_v11, %s12427_s30  ;;  %v10966_v19 = vpack.c.bf16 %v845_v38, %v844_v43  ;;  %v846_v55 = vmul.f32 %v13202_v54, %v12947_v13  ;;  %v11312_v33 = vpack.i.bf16 %v940_v23, %v956_v6  ;;  %v19267_v6 = vld [vmem:[#allocation30_spill] sm:$0xff]  ;;  %12021 = vrcp.f32 %v3451_v63 }
 0x236   : > { %10965 = vmatpush3.bf16.msra.mxu1 %v10964_v46  ;;  %v11307_v44 = vpack.i.bf16 %v939_v56, %v955_v50  ;;  %v847_v14 = vmul.f32 %v13202_v54, %v12942_v3  ;;  %v942_v40 = vmul.f32 %v13211_v27, %v12834_v15  ;;  %v10968_v16 = vpack.c.bf16 %v829_v41, %v828_v28 }
 0x237   : > { %10967 = vmatprep.subr.bf16.mxu1 %v10966_v19  ;;  %v958_v17 = vmul.f32 %v13211_v27, %v12942_v3  ;;  %v941_v58 = vmul.f32 %v13211_v27, %v12840_v20  ;;  %v957_v39 = vmul.f32 %v13211_v27, %v12947_v13  ;;  %v830_v34 = vmul.f32 %v13202_v54, %v12840_v20 }
 0x238   : > { %v10970_v21 = vpack.c.bf16 %v847_v14, %v846_v55  ;;  %v831_v48 = vmul.f32 %v13202_v54, %v12834_v15  ;;  %v848_v49 = vmul.f32 %v13202_v54, %v12956_v30  ;;  %v849_v36 = vmul.f32 %v13202_v54, %v12953_v29  ;;  %v19268_v55 = vld [vmem:[#allocation31_spill] sm:$0xff]  ;;  %v13331_v14 = vpop.eup %12017 }
 0x239   : > { %11313 = vrot.lane.b32.xlu1 %v11312_v33, %s12427_s30  ;;  %11308 = vrot.lane.b32.xlu0 %v11307_v44, %s12427_s30  ;;  %v11322_v45 = vpack.i.bf16 %v942_v40, %v958_v17  ;;  %v11317_v8 = vpack.i.bf16 %v941_v58, %v957_v39  ;;  %v944_v42 = vmul.f32 %v13211_v27, %v19265_v10 }
 0x23a   : > { %10969 = vmatpush3.bf16.msra.mxu1 %v10968_v16  ;;  %v10972_v9 = vpack.c.bf16 %v831_v48, %v830_v34  ;;  %v960_v59 = vmul.f32 %v13211_v27, %v12953_v29  ;;  %v943_v51 = vmul.f32 %v13211_v27, %v19266_v31  ;;  %v10974_v5 = vpack.c.bf16 %v849_v36, %v848_v49  ;;  %v19270_v49 = vld [vmem:[#allocation33_spill] sm:$0xff] }
 0x23b   : > { %10971 = vmatprep.subr.bf16.mxu1 %v10970_v21  ;;  %v959_v12 = vmul.f32 %v13211_v27, %v12956_v30  ;;  %v832_v11 = vmul.f32 %v13202_v54, %v19266_v31  ;;  %v833_v43 = vmul.f32 %v13202_v54, %v19265_v10  ;;  %v850_v38 = vmul.f32 %v13202_v54, %v12972_v62  ;;  %v19269_v21 = vld [vmem:[#allocation32_spill] sm:$0xff] }
 0x23c   : > { %v11332_v46 = vpack.i.bf16 %v944_v42, %v960_v59  ;;  %v851_v23 = vmul.f32 %v13202_v54, %v12966_v7  ;;  %v946_v56 = vmul.f32 %v13211_v27, %v19267_v6  ;;  %v962_v19 = vmul.f32 %v13211_v27, %v12966_v7 }
 0x23d   : > { %11323 = vrot.lane.b32.xlu1 %v11322_v45, %s12427_s30  ;;  %11318 = vrot.lane.b32.xlu0 %v11317_v8, %s12427_s30  ;;  %v11327_v50 = vpack.i.bf16 %v943_v51, %v959_v12  ;;  %v10976_v28 = vpack.c.bf16 %v833_v43, %v832_v11  ;;  %v945_v33 = vmul.f32 %v13211_v27, %v19268_v55  ;;  %v19272_v11 = vld [vmem:[#allocation50_spill] sm:$0xff] }
 0x23e   : > { %10973 = vmatpush3.bf16.msra.mxu1 %v10972_v9  ;;  %v10978_v41 = vpack.c.bf16 %v851_v23, %v850_v38  ;;  %v961_v44 = vmul.f32 %v13211_v27, %v12972_v62  ;;  %v834_v32 = vmul.f32 %v13202_v54, %v19268_v55  ;;  %v11342_v40 = vpack.i.bf16 %v946_v56, %v962_v19 }
 0x23f   : > { %10975 = vmatprep.subr.bf16.mxu1 %v10974_v5  ;;  %v835_v16 = vmul.f32 %v13202_v54, %v19267_v6  ;;  %v852_v17 = vmul.f32 %v13202_v54, %v12984_v60  ;;  %v853_v58 = vmul.f32 %v13202_v54, %v12980_v25  ;;  %v948_v34 = vmul.f32 %v13211_v27, %v19269_v21  ;;  %v19271_v5 = vld [vmem:[#allocation51_spill] sm:$0xff] }
 0x240   : > { %v11337_v39 = vpack.i.bf16 %v945_v33, %v961_v44  ;;  %v964_v48 = vmul.f32 %v13211_v27, %v12980_v25  ;;  %v947_v45 = vmul.f32 %v13211_v27, %v19270_v49  ;;  %v963_v9 = vmul.f32 %v13211_v27, %v12984_v60 }
 0x241   : > { %11333 = vrot.lane.b32.xlu1 %v11332_v46, %s12427_s30  ;;  %11328 = vrot.lane.b32.xlu0 %v11327_v50, %s12427_s30  ;;  %v10980_v8 = vpack.c.bf16 %v835_v16, %v834_v32  ;;  %v10982_v36 = vpack.c.bf16 %v853_v58, %v852_v17  ;;  %v836_v59 = vmul.f32 %v13202_v54, %v19270_v49  ;;  %v19273_v46 = vld [vmem:[#allocation34_spill] sm:$0xff]  ;;  %v19274_v50 = vld [vmem:[#allocation35_spill] sm:$0xff] }
 0x242   : > { %10977 = vmatpush3.bf16.msra.mxu1 %v10976_v28  ;;  %v11352_v42 = vpack.i.bf16 %v948_v34, %v964_v48  ;;  %v837_v51 = vmul.f32 %v13202_v54, %v19269_v21  ;;  %v854_v63 = vmul.f32 %v13202_v54, %v19271_v5  ;;  %v11347_v12 = vpack.i.bf16 %v947_v45, %v963_v9 }
 0x243   : > { %10979 = vmatprep.subr.bf16.mxu1 %v10978_v41  ;;  %v855_v43 = vmul.f32 %v13202_v54, %v19272_v11  ;;  %v950_v38 = vmul.f32 %v13211_v27, %v19273_v46  ;;  %v966_v23 = vmul.f32 %v13211_v27, %v19272_v11  ;;  %v949_v28 = vmul.f32 %v13211_v27, %v19274_v50 }
 0x244   : > { %v10984_v56 = vpack.c.bf16 %v837_v51, %v836_v59  ;;  %v965_v19 = vmul.f32 %v13211_v27, %v19271_v5  ;;  %v838_v41 = vmul.f32 %v13202_v54, %v19274_v50  ;;  %v839_v16 = vmul.f32 %v13202_v54, %v19273_v46 }
 0x245   : > { %11343 = vrot.lane.b32.xlu1 %v11342_v40, %s12427_s30  ;;  %11338 = vrot.lane.b32.xlu0 %v11337_v39, %s12427_s30  ;;  %v10986_v44 = vpack.c.bf16 %v855_v43, %v854_v63  ;;  %v11362_v32 = vpack.i.bf16 %v950_v38, %v966_v23  ;;  %v1822_v58 = vmul.f32 %v13331_v14, %v12790_v37  ;;  %v13380_v40 = vpop.eup %12019  ;;  %v4789_v51 = vmax.f32 %v13260_v24, 1e-12 }
 0x246   : > { %10981 = vmatpush3.bf16.msra.mxu1 %v10980_v8  ;;  %v11357_v17 = vpack.i.bf16 %v949_v28, %v965_v19  ;;  %v1838_v27 = vmul.f32 %v13331_v14, %v12904_v0  ;;  %v13378_v34 = vmul.f32 %v13331_v14, %v12786_v35  ;;  %v10988_v39 = vpack.c.bf16 %v839_v16, %v838_v41  ;;  %v13431_v28 = vpop.eup %12021 }
 0x247   : > { %10983 = vmatprep.subr.bf16.mxu1 %v10982_v36  ;;  %v13384_v48 = vmul.f32 %v13331_v14, %v12898_v61  ;;  %v13388_v54 = vmul.f32 %v13331_v14, %v12808_v52  ;;  %v13392_v45 = vmul.f32 %v13331_v14, %v12920_v22  ;;  %v13396_v9 = vmul.f32 %v13331_v14, %v12802_v47 }
 0x248   : > { %v11404_v8 = vpack.i.bf16 %v1822_v58, %v1838_v27  ;;  %v13400_v36 = vmul.f32 %v13331_v14, %v12914_v18  ;;  %v13404_v59 = vmul.f32 %v13331_v14, %v12820_v4  ;;  %v13415_v38 = vmul.f32 %v13331_v14, %v12932_v57 }
 0x249   : > { %11353 = vrot.lane.b32.xlu1 %v11352_v42, %s12427_s30  ;;  %11348 = vrot.lane.b32.xlu0 %v11347_v12, %s12427_s30  ;;  %v11409_v63 = vpack.i.bf16 %v13378_v34, %v13384_v48  ;;  %v13421_v24 = vmul.f32 %v13331_v14, %v12814_v1  ;;  %v13425_v42 = vmul.f32 %v13331_v14, %v12926_v53  ;;  %12023 = vrcp.f32 %v4789_v51 }
 0x24a   : > { %10985 = vmatpush3.bf16.msra.mxu1 %v10984_v56  ;;  %v13429_v12 = vmul.f32 %v13331_v14, %v12840_v20  ;;  %v13437_v19 = vmul.f32 %v13331_v14, %v12947_v13  ;;  %v13441_v41 = vmul.f32 %v13331_v14, %v12834_v15  ;;  %v13445_v16 = vmul.f32 %v13331_v14, %v12942_v3 }
 0x24b   : > { %10987 = vmatprep.subr.bf16.mxu1 %v10986_v44  ;;  %v13451_v44 = vmul.f32 %v13331_v14, %v19266_v31  ;;  %v13455_v27 = vmul.f32 %v13331_v14, %v12956_v30  ;;  %v13459_v34 = vmul.f32 %v13331_v14, %v19265_v10  ;;  %v13469_v58 = vmul.f32 %v13331_v14, %v12953_v29 }
 0x24c   : > { %v13475_v51 = vmul.f32 %v13331_v14, %v19267_v6  ;;  %v13493_v56 = vmul.f32 %v13331_v14, %v19269_v21  ;;  %v13497_v48 = vmul.f32 %v13331_v14, %v12980_v25  ;;  %v13503_v43 = vmul.f32 %v13331_v14, %v19274_v50 }
 0x24d   : > { %19275 = vst [vmem:[#allocation52_spill] sm:$0xff] %v13455_v27  ;;  %19276 = vst [vmem:[#allocation53_spill] sm:$0xff] %v13459_v34  ;;  %11363 = vrot.lane.b32.xlu1 %v11362_v32, %s12427_s30  ;;  %11358 = vrot.lane.b32.xlu0 %v11357_v17, %s12427_s30  ;;  %v13479_v32 = vmul.f32 %v13331_v14, %v12966_v7  ;;  %v13483_v17 = vmul.f32 %v13331_v14, %v19270_v49 }
 0x24e   : > { %19277 = vst [vmem:[#allocation54_spill] sm:$0xff] %v13469_v58  ;;  %10989 = vmatpush3.bf16.msra.mxu1 %v10988_v39  ;;  %19278 = vst [vmem:[#allocation55_spill] sm:$0xff] %v13475_v51  ;;  %v13489_v39 = vmul.f32 %v13331_v14, %v12984_v60  ;;  %v13507_v33 = vmul.f32 %v13331_v14, %v19271_v5  ;;  %v13511_v58 = vmul.f32 %v13331_v14, %v19273_v46 }
 0x24f   : > { %19279 = vst [vmem:[#allocation56_spill] sm:$0xff] %v13479_v32  ;;  %19280 = vst [vmem:[#allocation57_spill] sm:$0xff] %v13483_v17  ;;  %v13520_v32 = vmul.f32 %v13331_v14, %v19272_v11  ;;  %v13524_v51 = vmul.f32 %v13266_v2, %v12904_v0  ;;  %v13534_v34 = vmul.f32 %v13266_v2, %v12790_v37 }
 0x250   : > { %19281 = vst [vmem:[#allocation58_spill] sm:$0xff] %v13489_v39  ;;  %19282 = vst [vmem:[#allocation59_spill] sm:$0xff] %v13493_v56  ;;  %v13538_v23 = vmul.f32 %v13266_v2, %v12786_v35  ;;  %v13544_v56 = vmul.f32 %v13266_v2, %v12920_v22  ;;  %v13548_v27 = vmul.f32 %v13266_v2, %v12914_v18 }
 0x251   : > { %19283 = vst [vmem:[#allocation60_spill] sm:$0xff] %v13497_v48  ;;  %19284 = vst [vmem:[#allocation61_spill] sm:$0xff] %v13503_v43  ;;  %11405 = vrot.lane.b32.xlu1 %v11404_v8, %s12428_s9  ;;  %v13530_v8 = vmul.f32 %v13266_v2, %v12898_v61  ;;  %v13560_v48 = vmul.f32 %v13266_v2, %v12802_v47  ;;  %v13571_v17 = vmul.f32 %v13266_v2, %v12926_v53 }
 0x252   : > { %19285 = vst [vmem:[#allocation62_spill] sm:$0xff] %v13507_v33  ;;  %19286 = vst [vmem:[#allocation63_spill] sm:$0xff] %v13511_v58  ;;  %v13552_v33 = vmul.f32 %v13266_v2, %v12808_v52  ;;  %v13575_v39 = vmul.f32 %v13266_v2, %v12820_v4  ;;  %v13579_v43 = vmul.f32 %v13266_v2, %v12814_v1 }
 0x253   : > { %19287 = vst [vmem:[#allocation64_spill] sm:$0xff] %v13520_v32  ;;  %19288 = vst [vmem:[#allocation65_spill] sm:$0xff] %v13524_v51  ;;  %v13564_v32 = vmul.f32 %v13266_v2, %v12932_v57  ;;  %v13589_v58 = vmul.f32 %v13266_v2, %v12942_v3  ;;  %v13657_v51 = vmul.f32 %v13431_v28, %v12898_v61 }
 0x254   : > { %19289 = vst [vmem:[#allocation66_spill] sm:$0xff] %v13530_v8  ;;  %19290 = vst [vmem:[#allocation67_spill] sm:$0xff] %v13534_v34  ;;  %v13613_v8 = vmul.f32 %v13266_v2, %v12953_v29  ;;  %v13621_v34 = vmul.f32 %v13266_v2, %v19265_v10 }
 0x255   : > { %19291 = vst [vmem:[#allocation68_spill] sm:$0xff] %v13538_v23  ;;  %19292 = vst [vmem:[#allocation69_spill] sm:$0xff] %v13544_v56  ;;  %11410 = vrot.lane.b32.xlu1 %v11409_v63, %s12428_s9  ;;  %v13585_v63 = vmul.f32 %v13266_v2, %v12947_v13  ;;  %v13593_v56 = vmul.f32 %v13266_v2, %v12840_v20  ;;  %v13617_v23 = vmul.f32 %v13266_v2, %v19266_v31 }
 0x256   : > { %19293 = vst [vmem:[#allocation70_spill] sm:$0xff] %v13548_v27  ;;  %19294 = vst [vmem:[#allocation71_spill] sm:$0xff] %v13552_v33  ;;  %v13595_v27 = vpop.eup %12023  ;;  %v13603_v33 = vmul.f32 %v13266_v2, %v12834_v15 }
 0x257   : > { %19295 = vst [vmem:[#allocation72_spill] sm:$0xff] %v13560_v48  ;;  %19296 = vst [vmem:[#allocation73_spill] sm:$0xff] %v13564_v32  ;;  %v13607_v48 = vmul.f32 %v13266_v2, %v12956_v30  ;;  %v13661_v32 = vmul.f32 %v13431_v28, %v12808_v52 }
 0x258   : > { %19297 = vst [vmem:[#allocation74_spill] sm:$0xff] %v13575_v39  ;;  %19298 = vst [vmem:[#allocation75_spill] sm:$0xff] %v13579_v43  ;;  %v19305_v39 = vpack.i.bf16 %v13388_v54, %v13392_v45  ;;  %v13639_v43 = vmul.f32 %v13431_v28, %v12790_v37  ;;  %v13647_v45 = vmul.f32 %v13431_v28, %v12904_v0 }
 0x259   : > { %19299 = vst [vmem:[#allocation76_spill] sm:$0xff] %v13585_v63  ;;  %19300 = vst [vmem:[#allocation77_spill] sm:$0xff] %v13589_v58  ;;  %v13631_v63 = vmul.f32 %v13331_v14, %v19268_v55  ;;  %v13635_v58 = vmul.f32 %v13331_v14, %v12972_v62  ;;  %v13665_v54 = vmul.f32 %v13431_v28, %v12920_v22 }
 0x25a   : > { %19301 = vst [vmem:[#allocation78_spill] sm:$0xff] %v13607_v48  ;;  %19302 = vst [vmem:[#allocation79_spill] sm:$0xff] %v13613_v8  ;;  %11415 = vrot.lane.b32.xlu1 %v19305_v39, %s12428_s9  ;;  %v13651_v39 = vmul.f32 %v13431_v28, %v12786_v35  ;;  %v13675_v14 = vmul.f32 %v13431_v28, %v12914_v18  ;;  %v13695_v48 = vmul.f32 %v13431_v28, %v12814_v1 }
 0x25b   : > { %19303 = vst [vmem:[#allocation80_spill] sm:$0xff] %v13617_v23  ;;  %19304 = vst [vmem:[#allocation81_spill] sm:$0xff] %v13621_v34  ;;  %v13671_v34 = vmul.f32 %v13431_v28, %v12802_v47  ;;  %v13715_v23 = vmul.f32 %v13431_v28, %v19266_v31  ;;  %v13719_v8 = vmul.f32 %v13431_v28, %v12956_v30 }
 0x25c   : > { %19306 = vst [vmem:[#allocation82_spill] sm:$0xff] %v13631_v63  ;;  %19307 = vst [vmem:[#allocation83_spill] sm:$0xff] %v13635_v58  ;;  %v13679_v58 = vmul.f32 %v13431_v28, %v12820_v4  ;;  %v19315_v63 = vpack.i.bf16 %v13396_v9, %v13400_v36  ;;  %v13701_v9 = vmul.f32 %v13431_v28, %v12926_v53 }
 0x25d   : > { %19308 = vst [vmem:[#allocation84_spill] sm:$0xff] %v13639_v43  ;;  %19309 = vst [vmem:[#allocation85_spill] sm:$0xff] %v13647_v45  ;;  %v13691_v43 = vmul.f32 %v13431_v28, %v12932_v57  ;;  %v13705_v36 = vmul.f32 %v13431_v28, %v12834_v15  ;;  %v13731_v45 = vmul.f32 %v13431_v28, %v12953_v29 }
 0x25e   : > { %19310 = vst [vmem:[#allocation86_spill] sm:$0xff] %v13661_v32  ;;  %19311 = vst [vmem:[#allocation87_spill] sm:$0xff] %v13665_v54  ;;  %11420 = vrot.lane.b32.xlu1 %v19315_v63, %s12428_s9  ;;  %v13709_v63 = vmul.f32 %v13431_v28, %v12942_v3  ;;  %v13749_v54 = vmul.f32 %v13431_v28, %v19270_v49  ;;  %v13789_v32 = vmul.f32 %v13380_v40, %v12920_v22 }
 0x25f   : > { %19312 = vst [vmem:[#allocation88_spill] sm:$0xff] %v13671_v34  ;;  %19313 = vst [vmem:[#allocation89_spill] sm:$0xff] %v13675_v14  ;;  %v13723_v14 = vmul.f32 %v13431_v28, %v19265_v10  ;;  %v13745_v34 = vmul.f32 %v13431_v28, %v12972_v62 }
 0x260   : > { %19314 = vst [vmem:[#allocation90_spill] sm:$0xff] %v13679_v58  ;;  %19316 = vst [vmem:[#allocation91_spill] sm:$0xff] %v13691_v43  ;;  %v13735_v43 = vmul.f32 %v13431_v28, %v19268_v55  ;;  %v19323_v58 = vpack.i.bf16 %v13404_v59, %v13415_v38  ;;  %v13759_v59 = vmul.f32 %v13431_v28, %v19274_v50 }
 0x261   : > { %19317 = vst [vmem:[#allocation92_spill] sm:$0xff] %v13705_v36  ;;  %19318 = vst [vmem:[#allocation93_spill] sm:$0xff] %v13709_v63  ;;  %v13753_v63 = vmul.f32 %v13431_v28, %v12984_v60  ;;  %v13763_v38 = vmul.f32 %v13431_v28, %v19271_v5  ;;  %v13775_v36 = vmul.f32 %v13380_v40, %v12898_v61 }
 0x262   : > { %19319 = vst [vmem:[#allocation94_spill] sm:$0xff] %v13715_v23  ;;  %19320 = vst [vmem:[#allocation95_spill] sm:$0xff] %v13719_v8  ;;  %11425 = vrot.lane.b32.xlu1 %v19323_v58, %s12428_s9  ;;  %v13767_v58 = vmul.f32 %v13380_v40, %v12904_v0  ;;  %v13785_v23 = vmul.f32 %v13380_v40, %v12786_v35  ;;  %v13793_v8 = vmul.f32 %v13380_v40, %v12914_v18 }
 0x263   : > { %19321 = vst [vmem:[#allocation96_spill] sm:$0xff] %v13723_v14  ;;  %19322 = vst [vmem:[#allocation97_spill] sm:$0xff] %v13731_v45  ;;  %v13779_v45 = vmul.f32 %v13380_v40, %v12790_v37  ;;  %v13847_v14 = vmul.f32 %v13266_v2, %v19267_v6 }
 0x264   : > { %19324 = vst [vmem:[#allocation98_spill] sm:$0xff] %v13745_v34  ;;  %19325 = vst [vmem:[#allocation99_spill] sm:$0xff] %v13749_v54  ;;  %v13811_v54 = vmul.f32 %v13380_v40, %v12932_v57  ;;  %v13833_v34 = vmul.f32 %v13266_v2, %v12972_v62 }
 0x265   : > { %19326 = vst [vmem:[#allocation100_spill] sm:$0xff] %v13753_v63  ;;  %19327 = vst [vmem:[#allocation101_spill] sm:$0xff] %v13759_v59  ;;  %v19334_v63 = vpack.i.bf16 %v13421_v24, %v13425_v42  ;;  %v13807_v59 = vmul.f32 %v13380_v40, %v12802_v47  ;;  %v13819_v42 = vmul.f32 %v13380_v40, %v12926_v53 }
 0x266   : > { %19328 = vst [vmem:[#allocation102_spill] sm:$0xff] %v13763_v38  ;;  %19329 = vst [vmem:[#allocation103_spill] sm:$0xff] %v13767_v58  ;;  %v13803_v38 = vmul.f32 %v13380_v40, %v12808_v52  ;;  %v13829_v58 = vmul.f32 %v13380_v40, %v12814_v1  ;;  %v13837_v24 = vmul.f32 %v13266_v2, %v12966_v7 }
 0x267   : > { %19330 = vst [vmem:[#allocation104_spill] sm:$0xff] %v13779_v45  ;;  %19331 = vst [vmem:[#allocation105_spill] sm:$0xff] %v13785_v23  ;;  %11430 = vrot.lane.b32.xlu1 %v19334_v63, %s12428_s9  ;;  %v13823_v63 = vmul.f32 %v13380_v40, %v12820_v4  ;;  %v13867_v45 = vmul.f32 %v13266_v2, %v19270_v49  ;;  %v13891_v23 = vmul.f32 %v13266_v2, %v19273_v46 }
 0x268   : > { %19332 = vst [vmem:[#allocation106_spill] sm:$0xff] %v13789_v32  ;;  %19333 = vst [vmem:[#allocation107_spill] sm:$0xff] %v13793_v8  ;;  %v13843_v8 = vmul.f32 %v13266_v2, %v19268_v55  ;;  %v13887_v32 = vmul.f32 %v13266_v2, %v19274_v50 }
 0x269   : > { %19335 = vst [vmem:[#allocation108_spill] sm:$0xff] %v13803_v38  ;;  %19336 = vst [vmem:[#allocation109_spill] sm:$0xff] %v13807_v59  ;;  %v13851_v38 = vmul.f32 %v13266_v2, %v12984_v60  ;;  %v19345_v59 = vpack.i.bf16 %v13429_v12, %v13437_v19  ;;  %v13873_v12 = vmul.f32 %v13266_v2, %v19269_v21 }
 0x26a   : > { %19337 = vst [vmem:[#allocation110_spill] sm:$0xff] %v13811_v54  ;;  %19338 = vst [vmem:[#allocation111_spill] sm:$0xff] %v13819_v42  ;;  %v13863_v42 = vmul.f32 %v13266_v2, %v12980_v25  ;;  %v13877_v19 = vmul.f32 %v13266_v2, %v19271_v5  ;;  %v13903_v54 = vmul.f32 %v13431_v28, %v12947_v13 }
 0x26b   : > { %19339 = vst [vmem:[#allocation112_spill] sm:$0xff] %v13823_v63  ;;  %19340 = vst [vmem:[#allocation113_spill] sm:$0xff] %v13833_v34  ;;  %11435 = vrot.lane.b32.xlu1 %v19345_v59, %s12428_s9  ;;  %v13881_v59 = vmul.f32 %v13266_v2, %v19272_v11  ;;  %v19356_v2 = vpack.i.bf16 %v13441_v41, %v13445_v16  ;;  %v13921_v34 = vmul.f32 %v13431_v28, %v19269_v21 }
 0x26c   : > { %19341 = vst [vmem:[#allocation114_spill] sm:$0xff] %v13837_v24  ;;  %19342 = vst [vmem:[#allocation115_spill] sm:$0xff] %v13843_v8  ;;  %v13895_v8 = vmul.f32 %v13431_v28, %v12840_v20  ;;  %v13931_v41 = vmul.f32 %v13431_v28, %v19273_v46  ;;  %v13935_v16 = vmul.f32 %v13431_v28, %v19272_v11 }
 0x26d   : > { %19343 = vst [vmem:[#allocation116_spill] sm:$0xff] %v13847_v14  ;;  %19344 = vst [vmem:[#allocation117_spill] sm:$0xff] %v13851_v38  ;;  %v13907_v38 = vmul.f32 %v13431_v28, %v19267_v6  ;;  %v13917_v14 = vmul.f32 %v13431_v28, %v12966_v7  ;;  %v14153_v63 = vmul.f32 %v13595_v27, %v19270_v49 }
 0x26e   : > { %19346 = vst [vmem:[#allocation118_spill] sm:$0xff] %v13863_v42  ;;  %19347 = vst [vmem:[#allocation119_spill] sm:$0xff] %v13867_v45  ;;  %v13959_v42 = vmul.f32 %v13595_v27, %v12898_v61  ;;  %v19395_v45 = vld [vmem:[#allocation58_spill] sm:$0xff] }
 0x26f   : > { %19348 = vst [vmem:[#allocation120_spill] sm:$0xff] %v13873_v12  ;;  %19349 = vst [vmem:[#allocation121_spill] sm:$0xff] %v13877_v19  ;;  %11440 = vrot.lane.b32.xlu1 %v19356_v2, %s12428_s9  ;;  %v13925_v19 = vmul.f32 %v13431_v28, %v12980_v25  ;;  %v13939_v2 = vmul.f32 %v13595_v27, %v12790_v37  ;;  %v19365_v28 = vmax.f32 %v13254_v26, 1e-12 }
 0x270   : > { %19350 = vst [vmem:[#allocation122_spill] sm:$0xff] %v13881_v59  ;;  %19351 = vst [vmem:[#allocation123_spill] sm:$0xff] %v13887_v32  ;;  %v13947_v59 = vmul.f32 %v13595_v27, %v12904_v0  ;;  %v19367_v32 = vld [vmem:[#allocation52_spill] sm:$0xff]  ;;  %v14059_v26 = vmul.f32 %v13595_v27, %v12820_v4 }
 0x271   : > { %19352 = vst [vmem:[#allocation124_spill] sm:$0xff] %v13891_v23  ;;  %19353 = vst [vmem:[#allocation125_spill] sm:$0xff] %v13895_v8  ;;  %12025 = vrcp.f32 %v19365_v28  ;;  %v14055_v8 = vmul.f32 %v13595_v27, %v12914_v18  ;;  %v14073_v28 = vmul.f32 %v13595_v27, %v12926_v53  ;;  %v14093_v23 = vmul.f32 %v13595_v27, %v12840_v20 }
 0x272   : > { %19354 = vst [vmem:[#allocation126_spill] sm:$0xff] %v13903_v54  ;;  %19355 = vst [vmem:[#allocation127_spill] sm:$0xff] %v13907_v38  ;;  %v13951_v54 = vmul.f32 %v13595_v27, %v12786_v35 }
 0x273   : > { %19357 = vst [vmem:[#allocation128_spill] sm:$0xff] %v13917_v14  ;;  %19358 = vst [vmem:[#allocation129_spill] sm:$0xff] %v13921_v34  ;;  %v18847_v34 = vmov 0.0  }
 0x274   : > { %19359 = vst [vmem:[#allocation130_spill] sm:$0xff] %v13925_v19  ;;  %19360 = vst [vmem:[#allocation131_spill] sm:$0xff] %v13931_v41  ;;  %v19368_v19 = vpack.i.bf16 %v13451_v44, %v19367_v32  ;;  %v14041_v44 = vmul.f32 %v13595_v27, %v12808_v52  ;;  %v14045_v32 = vmul.f32 %v13595_v27, %v12920_v22 }
 0x275   : > { %19361 = vst [vmem:[#allocation132_spill] sm:$0xff] %v13935_v16  ;;  %19362 = vst [vmem:[#allocation133_spill] sm:$0xff] %v13939_v2  ;;  %v14069_v2 = vmul.f32 %v13595_v27, %v12814_v1 }
 0x276   : > { %19363 = vst [vmem:[#allocation134_spill] sm:$0xff] %v13947_v59  ;;  %19364 = vst [vmem:[#allocation135_spill] sm:$0xff] %v13951_v54  ;;  %11445 = vrot.lane.b32.xlu1 %v19368_v19, %s12428_s9  ;;  %v14049_v19 = vmul.f32 %v13595_v27, %v12802_v47  ;;  %v14065_v59 = vmul.f32 %v13595_v27, %v12932_v57  ;;  %v19378_v54 = vld [vmem:[#allocation54_spill] sm:$0xff] }
 0x277   : > { %19366 = vst [vmem:[#allocation136_spill] sm:$0xff] %v13959_v42  ;;  %5980 = vst.msk [vmem:[#allocation2] sm:$0xff] %vm19068_vm0, %v18847_v34  ;;  %v19377_v42 = vld [vmem:[#allocation53_spill] sm:$0xff] }
 0x278   : > { %5981 = vst.msk [vmem:[#allocation2 + $0x8] sm:$0xff] %vm19068_vm0, %v18847_v34  ;;  %5982 = vst.msk [vmem:[#allocation2 + $0x10] sm:$0xff] %vm19068_vm0, %v18847_v34  ;;  %v19379_v16 = vpack.i.bf16 %v19377_v42, %v19378_v54  ;;  %v14097_v54 = vmul.f32 %v13595_v27, %v12947_v13  ;;  %v19382_v42 = vld [vmem:[#allocation55_spill] sm:$0xff] }
 0x279   : > { %5983 = vst.msk [vmem:[#allocation2 + $0x18] sm:$0xff] %vm19068_vm0, %v18847_v34  ;;  %5984 = vst.msk [vmem:[#allocation2 + $0x20] sm:$0xff] %vm19068_vm0, %v18847_v34 }
 0x27a   : > { %5985 = vst.msk [vmem:[#allocation2 + $0x28] sm:$0xff] %vm19068_vm0, %v18847_v34  ;;  %5986 = vst.msk [vmem:[#allocation2 + $0x30] sm:$0xff] %vm19068_vm0, %v18847_v34  ;;  %11450 = vrot.lane.b32.xlu1 %v19379_v16, %s12428_s9  ;;  %v19383_v16 = vld [vmem:[#allocation56_spill] sm:$0xff] }
 0x27b   : > { %5987 = vst.msk [vmem:[#allocation2 + $0x38] sm:$0xff] %vm19068_vm0, %v18847_v34  ;;  %5988 = vst.msk [vmem:[#allocation2 + $0x40] sm:$0xff] %vm19068_vm0, %v18847_v34  ;;  %v14109_v38 = vpop.eup %12025 }
 0x27c   : > { %5989 = vst.msk [vmem:[#allocation2 + $0x48] sm:$0xff] %vm19068_vm0, %v18847_v34  ;;  %5990 = vst.msk [vmem:[#allocation2 + $0x50] sm:$0xff] %vm19068_vm0, %v18847_v34  ;;  %v14177_v24 = vmul.f32 %v14109_v38, %v12898_v61 }
 0x27d   : > { %5991 = vst.msk [vmem:[#allocation2 + $0x58] sm:$0xff] %vm19068_vm0, %v18847_v34  ;;  %5992 = vst.msk [vmem:[#allocation2 + $0x60] sm:$0xff] %vm19068_vm0, %v18847_v34 }
 0x27e   : > { %5993 = vst.msk [vmem:[#allocation2 + $0x68] sm:$0xff] %vm19068_vm0, %v18847_v34  ;;  %5994 = vst.msk [vmem:[#allocation2 + $0x70] sm:$0xff] %vm19068_vm0, %v18847_v34 }
 0x27f   : > { %5995 = vst.msk [vmem:[#allocation2 + $0x78] sm:$0xff] %vm19068_vm0, %v18847_v34  ;;  %5996 = vst.msk [vmem:[#allocation2 + $0x80] sm:$0xff] %vm19068_vm0, %v18847_v34  ;;  %v14085_v41 = vld [vmem:[#allocation2 + $0x1] sm:$0xff] }
 0x280   : > { %5997 = vst.msk [vmem:[#allocation2 + $0x88] sm:$0xff] %vm19068_vm0, %v18847_v34  ;;  %5998 = vst.msk [vmem:[#allocation2 + $0x90] sm:$0xff] %vm19068_vm0, %v18847_v34  ;;  %v14087_v14 = vld [vmem:[#allocation2 + $0x2] sm:$0xff] }
 0x281   : > { %5999 = vst.msk [vmem:[#allocation2 + $0x98] sm:$0xff] %vm19068_vm0, %v18847_v34  ;;  %6000 = vst.msk [vmem:[#allocation2 + $0xa0] sm:$0xff] %vm19068_vm0, %v18847_v34 }
 0x282   : > { %6001 = vst.msk [vmem:[#allocation2 + $0xa8] sm:$0xff] %vm19068_vm0, %v18847_v34  ;;  %6002 = vst.msk [vmem:[#allocation2 + $0xb0] sm:$0xff] %vm19068_vm0, %v18847_v34 }
 0x283   : > { %6003 = vst.msk [vmem:[#allocation2 + $0xb8] sm:$0xff] %vm19068_vm0, %v18847_v34  ;;  %6004 = vst.msk [vmem:[#allocation2 + $0xc0] sm:$0xff] %vm19068_vm0, %v18847_v34 }
 0x284   : > { %6005 = vst.msk [vmem:[#allocation2 + $0xc8] sm:$0xff] %vm19068_vm0, %v18847_v34  ;;  %6006 = vst.msk [vmem:[#allocation2 + $0xd0] sm:$0xff] %vm19068_vm0, %v18847_v34 }
 0x285   : > { %6007 = vst.msk [vmem:[#allocation2 + $0xd8] sm:$0xff] %vm19068_vm0, %v18847_v34  ;;  %6008 = vst.msk [vmem:[#allocation2 + $0xe0] sm:$0xff] %vm19068_vm0, %v18847_v34 }
 0x286   : > { %6009 = vst.msk [vmem:[#allocation2 + $0xe8] sm:$0xff] %vm19068_vm0, %v18847_v34  ;;  %6010 = vst.msk [vmem:[#allocation2 + $0xf0] sm:$0xff] %vm19068_vm0, %v18847_v34 }
 0x287   : > { %6011 = vst.msk [vmem:[#allocation2 + $0xf8] sm:$0xff] %vm19068_vm0, %v18847_v34  ;;  %6012 = vst.msk [vmem:[#allocation2 + $0x100] sm:$0xff] %vm19068_vm0, %v18847_v34 }
 0x288   : > { %6013 = vst.msk [vmem:[#allocation2 + $0x108] sm:$0xff] %vm19068_vm0, %v18847_v34  ;;  %6014 = vst.msk [vmem:[#allocation2 + $0x110] sm:$0xff] %vm19068_vm0, %v18847_v34 }
 0x289   : > { %6015 = vst.msk [vmem:[#allocation2 + $0x118] sm:$0xff] %vm19068_vm0, %v18847_v34  ;;  %19369 = vst [vmem:[#allocation52_spill] sm:$0xff] %v14041_v44  ;;  %v14083_v44 = vld [vmem:[#allocation2] sm:$0xff]  ;;  %v19385_v34 = vmov 0.0  }
 0x28a   : > { %19370 = vst [vmem:[#allocation137_spill] sm:$0xff] %v14045_v32  ;;  %19371 = vst [vmem:[#allocation138_spill] sm:$0xff] %v14049_v19  ;;  %v19384_v32 = vpack.i.bf16 %v19382_v42, %v19383_v16  ;;  %v14119_v42 = vmul.f32 %v13595_v27, %v19266_v31  ;;  %v14127_v16 = vmul.f32 %v13595_v27, %v19265_v10  ;;  %v19394_v19 = vld [vmem:[#allocation57_spill] sm:$0xff] }
 0x28b   : > { %19372 = vst [vmem:[#allocation139_spill] sm:$0xff] %v14055_v8  ;;  %19373 = vst [vmem:[#allocation140_spill] sm:$0xff] %v14059_v26  ;;  %v14131_v26 = vmul.f32 %v13595_v27, %v12953_v29  ;;  %v14143_v8 = vmul.f32 %v13595_v27, %v12972_v62  ;;  %v19396_v12 = vpack.i.bf16 %v19394_v19, %v19395_v45 }
 0x28c   : > { %19374 = vst [vmem:[#allocation141_spill] sm:$0xff] %v14065_v59  ;;  %19375 = vst [vmem:[#allocation142_spill] sm:$0xff] %v14069_v2  ;;  %11460 = vrot.lane.b32.xlu1 %v19384_v32, %s12428_s9  ;;  %v14107_v59 = vmul.f32 %v13595_v27, %v12834_v15  ;;  %v14115_v2 = vmul.f32 %v13595_v27, %v12942_v3  ;;  %v14123_v32 = vmul.f32 %v13595_v27, %v12956_v30 }
 0x28d   : > { %19376 = vst [vmem:[#allocation143_spill] sm:$0xff] %v14073_v28  ;;  %19380 = vst [vmem:[#allocation53_spill] sm:$0xff] %v14093_v23  ;;  %v14135_v28 = vmul.f32 %v13595_v27, %v19268_v55  ;;  %v14161_v23 = vmul.f32 %v13595_v27, %v19274_v50  ;;  %v14167_v45 = vmul.f32 %v13595_v27, %v19271_v5 }
 0x28e   : > { %19381 = vst [vmem:[#allocation54_spill] sm:$0xff] %v14097_v54  ;;  %8469 = vst.msk [vmem:[#allocation2] sm:$0xff] %vm19068_vm0, %v19385_v34  ;;  %v14157_v54 = vmul.f32 %v13595_v27, %v12984_v60  ;;  %v14195_v19 = vmul.f32 %v14109_v38, %v12914_v18 }
 0x28f   : > { %19386 = vst [vmem:[#allocation55_spill] sm:$0xff] %v14107_v59  ;;  %19387 = vst [vmem:[#allocation56_spill] sm:$0xff] %v14115_v2  ;;  %v19424_v2 = vld [vmem:[#allocation60_spill] sm:$0xff] }
 0x290   : > { %19388 = vst [vmem:[#allocation144_spill] sm:$0xff] %v14119_v42  ;;  %19389 = vst [vmem:[#allocation145_spill] sm:$0xff] %v14123_v32  ;;  %11465 = vrot.lane.b32.xlu1 %v19396_v12, %s12428_s9  ;;  %v14171_v12 = vmul.f32 %v14109_v38, %v12904_v0  ;;  %v14185_v32 = vmul.f32 %v14109_v38, %v12786_v35  ;;  %v14219_v42 = vmul.f32 %v14109_v38, %v12926_v53 }
 0x291   : > { %19390 = vst [vmem:[#allocation146_spill] sm:$0xff] %v14127_v16  ;;  %19391 = vst [vmem:[#allocation147_spill] sm:$0xff] %v14131_v26  ;;  %v14181_v26 = vmul.f32 %v14109_v38, %v12790_v37  ;;  %v14215_v16 = vmul.f32 %v14109_v38, %v12932_v57  ;;  %v14315_v53 = vmul.f32 %v13380_v40, %v19265_v10 }
 0x292   : > { %19392 = vst [vmem:[#allocation148_spill] sm:$0xff] %v14135_v28  ;;  %19393 = vst [vmem:[#allocation149_spill] sm:$0xff] %v14143_v8  ;;  %v14191_v28 = vmul.f32 %v14109_v38, %v12920_v22  ;;  %v14243_v8 = vmul.f32 %v14109_v38, %v12942_v3 }
 0x293   : > { %19397 = vst [vmem:[#allocation57_spill] sm:$0xff] %v14153_v63  ;;  %19398 = vst [vmem:[#allocation58_spill] sm:$0xff] %v14157_v54  ;;  %v14199_v54 = vmul.f32 %v14109_v38, %v12808_v52  ;;  %v14263_v63 = vmul.f32 %v14109_v38, %v19266_v31 }
 0x294   : > { %19399 = vst [vmem:[#allocation150_spill] sm:$0xff] %v14161_v23  ;;  %19400 = vst [vmem:[#allocation151_spill] sm:$0xff] %v14167_v45  ;;  %1276 = vrot.lane.b32.xlu1 %v12790_v37, %s12430_s13  ;;  %v14211_v23 = vmul.f32 %v14109_v38, %v12802_v47  ;;  %v14227_v45 = vmul.f32 %v14109_v38, %v12820_v4 }
 0x295   : > { %19401 = vst [vmem:[#allocation152_spill] sm:$0xff] %v14171_v12  ;;  %19402 = vst [vmem:[#allocation153_spill] sm:$0xff] %v14177_v24  ;;  %v14279_v12 = vmul.f32 %v13380_v40, %v12942_v3  ;;  %v19423_v24 = vld [vmem:[#allocation59_spill] sm:$0xff] }
 0x296   : > { %19403 = vst [vmem:[#allocation154_spill] sm:$0xff] %v14181_v26  ;;  %19404 = vst [vmem:[#allocation155_spill] sm:$0xff] %v14185_v32  ;;  %v14275_v32 = vmul.f32 %v13380_v40, %v12947_v13  ;;  %v19425_v59 = vpack.i.bf16 %v19423_v24, %v19424_v2  ;;  %v14291_v26 = vmul.f32 %v13380_v40, %v12840_v20 }
 0x297   : > { %19405 = vst [vmem:[#allocation156_spill] sm:$0xff] %v14191_v28  ;;  %19406 = vst [vmem:[#allocation157_spill] sm:$0xff] %v14195_v19  ;;  %v14231_v28 = vmul.f32 %v14109_v38, %v12814_v1  ;;  %v14237_v19 = vmul.f32 %v14109_v38, %v12947_v13  ;;  %v14301_v24 = vmul.f32 %v13380_v40, %v12956_v30 }
 0x298   : > { %19407 = vst [vmem:[#allocation158_spill] sm:$0xff] %v14199_v54  ;;  %19408 = vst [vmem:[#allocation159_spill] sm:$0xff] %v14211_v23  ;;  %1278 = vrot.lane.b32.xlu1 %v12786_v35, %s12430_s13  ;;  %v14255_v54 = vmul.f32 %v14109_v38, %v12956_v30  ;;  %v14259_v23 = vmul.f32 %v14109_v38, %v12953_v29  ;;  %v14309_v2 = vmul.f32 %v13380_v40, %v19266_v31 }
 0x299   : > { %19409 = vst [vmem:[#allocation160_spill] sm:$0xff] %v14215_v16  ;;  %19410 = vst [vmem:[#allocation161_spill] sm:$0xff] %v14219_v42  ;;  %v14247_v16 = vmul.f32 %v14109_v38, %v12840_v20  ;;  %v14251_v42 = vmul.f32 %v14109_v38, %v12834_v15 }
 0x29a   : > { %19411 = vst [vmem:[#allocation162_spill] sm:$0xff] %v14227_v45  ;;  %19412 = vst [vmem:[#allocation163_spill] sm:$0xff] %v14231_v28  ;;  %v14267_v45 = vmul.f32 %v14109_v38, %v19265_v10  ;;  %v14333_v28 = vmul.f32 %v13380_v40, %v19267_v6 }
 0x29b   : > { %19413 = vst [vmem:[#allocation164_spill] sm:$0xff] %v14237_v19  ;;  %19414 = vst [vmem:[#allocation165_spill] sm:$0xff] %v14243_v8  ;;  %v14377_v19 = vmul.f32 %v13380_v40, %v19273_v46 }
 0x29c   : > { %19415 = vst [vmem:[#allocation166_spill] sm:$0xff] %v14247_v16  ;;  %19416 = vst [vmem:[#allocation167_spill] sm:$0xff] %v14251_v42  ;;  %11470 = vrot.lane.b32.xlu1 %v19425_v59, %s12428_s9  ;;  %v14295_v16 = vmul.f32 %v13380_v40, %v12834_v15  ;;  %v14305_v59 = vmul.f32 %v13380_v40, %v12953_v29  ;;  %v14319_v42 = vmul.f32 %v13380_v40, %v12972_v62 }
 0x29d   : > { %19417 = vst [vmem:[#allocation168_spill] sm:$0xff] %v14255_v54  ;;  %19418 = vst [vmem:[#allocation169_spill] sm:$0xff] %v14259_v23  ;;  %v14353_v23 = vmul.f32 %v13380_v40, %v19270_v49 }
 0x29e   : > { %19419 = vst [vmem:[#allocation170_spill] sm:$0xff] %v14263_v63  ;;  %19420 = vst [vmem:[#allocation171_spill] sm:$0xff] %v14267_v45  ;;  %v14329_v63 = vmul.f32 %v13380_v40, %v19268_v55  ;;  %v19438_v45 = vld [vmem:[#allocation62_spill] sm:$0xff] }
 0x29f   : > { %19421 = vst [vmem:[#allocation172_spill] sm:$0xff] %v14275_v32  ;;  %19422 = vst [vmem:[#allocation173_spill] sm:$0xff] %v14279_v12  ;;  %v14323_v32 = vmul.f32 %v13380_v40, %v12966_v7  ;;  %v14373_v12 = vmul.f32 %v13380_v40, %v19274_v50 }
 0x2a0   : > { %19426 = vst [vmem:[#allocation59_spill] sm:$0xff] %v14291_v26  ;;  %19427 = vst [vmem:[#allocation60_spill] sm:$0xff] %v14295_v16  ;;  %v14337_v26 = vmul.f32 %v13380_v40, %v12984_v60  ;;  %v19437_v16 = vld [vmem:[#allocation61_spill] sm:$0xff] }
 0x2a1   : > { %19428 = vst [vmem:[#allocation174_spill] sm:$0xff] %v14301_v24  ;;  %19429 = vst [vmem:[#allocation175_spill] sm:$0xff] %v14305_v59  ;;  %v19439_v54 = vpack.i.bf16 %v19437_v16, %v19438_v45  ;;  %v14349_v59 = vmul.f32 %v13380_v40, %v12980_v25  ;;  %v14363_v16 = vmul.f32 %v13380_v40, %v19271_v5 }
 0x2a2   : > { %19430 = vst [vmem:[#allocation176_spill] sm:$0xff] %v14309_v2  ;;  %19431 = vst [vmem:[#allocation177_spill] sm:$0xff] %v14315_v53  ;;  %v14367_v45 = vmul.f32 %v13380_v40, %v19272_v11  ;;  %v14389_v24 = vmul.f32 %v13595_v27, %v12966_v7 }
 0x2a3   : > { %19432 = vst [vmem:[#allocation178_spill] sm:$0xff] %v14319_v42  ;;  %19433 = vst [vmem:[#allocation179_spill] sm:$0xff] %v14323_v32  ;;  %11475 = vrot.lane.b32.xlu1 %v19439_v54, %s12428_s9  ;;  %v14359_v54 = vmul.f32 %v13380_v40, %v19269_v21  ;;  %v14405_v42 = vmul.f32 %v13595_v27, %v19273_v46  ;;  %v14419_v40 = vmul.f32 %v14109_v38, %v12966_v7 }
 0x2a4   : > { %19434 = vst [vmem:[#allocation180_spill] sm:$0xff] %v14329_v63  ;;  %19435 = vst [vmem:[#allocation181_spill] sm:$0xff] %v14333_v28  ;;  %v14381_v63 = vmul.f32 %v13595_v27, %v19267_v6  ;;  %v14401_v28 = vmul.f32 %v13595_v27, %v12980_v25 }
 0x2a5   : > { %19436 = vst [vmem:[#allocation182_spill] sm:$0xff] %v14337_v26  ;;  %19440 = vst [vmem:[#allocation61_spill] sm:$0xff] %v14349_v59  ;;  %v14393_v26 = vmul.f32 %v13595_v27, %v19269_v21  ;;  %v19466_v59 = vld [vmem:[#allocation64_spill] sm:$0xff] }
 0x2a6   : > { %19441 = vst [vmem:[#allocation62_spill] sm:$0xff] %v14353_v23  ;;  %19442 = vst [vmem:[#allocation183_spill] sm:$0xff] %v14359_v54  ;;  %v14415_v23 = vmul.f32 %v14109_v38, %v12972_v62  ;;  %v14441_v54 = vmul.f32 %v14109_v38, %v12980_v25 }
 0x2a7   : > { %19443 = vst [vmem:[#allocation184_spill] sm:$0xff] %v14363_v16  ;;  %19444 = vst [vmem:[#allocation185_spill] sm:$0xff] %v14367_v45  ;;  %1280 = vrot.lane.b32.xlu1 %v12808_v52, %s12430_s13  ;;  %v14409_v16 = vmul.f32 %v13595_v27, %v19272_v11  ;;  %v14431_v45 = vmul.f32 %v14109_v38, %v19267_v6  ;;  %v14449_v27 = vmul.f32 %v14109_v38, %v19269_v21 }
 0x2a8   : > { %19445 = vst [vmem:[#allocation186_spill] sm:$0xff] %v14373_v12  ;;  %19446 = vst [vmem:[#allocation187_spill] sm:$0xff] %v14377_v19  ;;  %v14423_v12 = vmul.f32 %v14109_v38, %v19268_v55  ;;  %v14445_v19 = vmul.f32 %v14109_v38, %v19270_v49 }
 0x2a9   : > { %19447 = vst [vmem:[#allocation188_spill] sm:$0xff] %v14381_v63  ;;  %19448 = vst [vmem:[#allocation189_spill] sm:$0xff] %v14389_v24  ;;  %v14435_v24 = vmul.f32 %v14109_v38, %v12984_v60  ;;  %v14457_v63 = vmul.f32 %v14109_v38, %v19271_v5 }
 0x2aa   : > { %19449 = vst [vmem:[#allocation190_spill] sm:$0xff] %v14393_v26  ;;  %19450 = vst [vmem:[#allocation191_spill] sm:$0xff] %v14401_v28  ;;  %v19465_v26 = vld [vmem:[#allocation63_spill] sm:$0xff] }
 0x2ab   : > { %19451 = vst [vmem:[#allocation192_spill] sm:$0xff] %v14405_v42  ;;  %19452 = vst [vmem:[#allocation193_spill] sm:$0xff] %v14409_v16  ;;  %1282 = vrot.lane.b32.xlu1 %v12802_v47, %s12430_s13  ;;  %v14473_v16 = vmul.f32 %v14109_v38, %v19273_v46  ;;  %v19467_v32 = vpack.i.bf16 %v19465_v26, %v19466_v59  ;;  %v19468_v42 = vld [vmem:[#allocation66_spill] sm:$0xff]  ;;  %v19477_v59 = vld [vmem:[#allocation72_spill] sm:$0xff] }
 0x2ac   : > { %19453 = vst [vmem:[#allocation194_spill] sm:$0xff] %v14415_v23  ;;  %19454 = vst [vmem:[#allocation195_spill] sm:$0xff] %v14419_v40  ;;  %v14461_v23 = vmul.f32 %v14109_v38, %v19272_v11  ;;  %v14465_v40 = vmul.f32 %v14109_v38, %v19274_v50  ;;  %v19471_v38 = vld [vmem:[#allocation68_spill] sm:$0xff] }
 0x2ad   : > { %19455 = vst [vmem:[#allocation196_spill] sm:$0xff] %v14423_v12  ;;  %19456 = vst [vmem:[#allocation197_spill] sm:$0xff] %v14431_v45  ;;  %v11299_v12 = vpop.permute.xlu1 %11298  ;;  %v19474_v45 = vld [vmem:[#allocation70_spill] sm:$0xff] }
 0x2ae   : > { %19457 = vst [vmem:[#allocation198_spill] sm:$0xff] %v14435_v24  ;;  %19458 = vst [vmem:[#allocation199_spill] sm:$0xff] %v14441_v54  ;;  %v19469_v24 = vld [vmem:[#allocation65_spill] sm:$0xff] }
 0x2af   : > { %19459 = vst [vmem:[#allocation200_spill] sm:$0xff] %v14445_v19  ;;  %19460 = vst [vmem:[#allocation201_spill] sm:$0xff] %v14449_v27  ;;  %11480 = vrot.lane.b32.xlu1 %v19467_v32, %s12428_s9  ;;  %v19470_v28 = vpack.i.bf16 %v19468_v42, %v19469_v24  ;;  %v19472_v19 = vld [vmem:[#allocation67_spill] sm:$0xff] }
 0x2b0   : > { %19461 = vst [vmem:[#allocation202_spill] sm:$0xff] %v14457_v63  ;;  %19462 = vst [vmem:[#allocation203_spill] sm:$0xff] %v14461_v23  ;;  %v19473_v27 = vpack.i.bf16 %v19471_v38, %v19472_v19  ;;  %v11289_v63 = vpop.permute.xlu0 %11288  ;;  %v19478_v23 = vld [vmem:[#allocation71_spill] sm:$0xff]  ;;  %v19480_v19 = vld [vmem:[#allocation73_spill] sm:$0xff] }
 0x2b1   : > { %19463 = vst [vmem:[#allocation204_spill] sm:$0xff] %v14465_v40  ;;  %19464 = vst [vmem:[#allocation205_spill] sm:$0xff] %v14473_v16  ;;  %v19475_v40 = vld [vmem:[#allocation69_spill] sm:$0xff]  ;;  %v11304_v26 = vpop.permute.xlu1 %11303  ;;  %11368 = vxpose.xlu0.b32.start [1/16] (narrow) %v11289_v63, 8  ;;  %v19479_v42 = vpack.i.bf16 %v19477_v59, %v19478_v23  ;;  %v19481_v24 = vpack.i.bf16 %v13571_v17, %v19480_v19  ;;  %v19486_v59 = vld [vmem:[#allocation76_spill] sm:$0xff]  ;;  %v19488_v17 = vpack.i.bf16 %v13603_v33, %v13593_v56 }
 0x2b2   : > { %v19476_v16 = vpack.i.bf16 %v19474_v45, %v19475_v40  ;;  %v19483_v45 = vld [vmem:[#allocation74_spill] sm:$0xff]  ;;  %v19485_v23 = vld [vmem:[#allocation77_spill] sm:$0xff]  ;;  %v19489_v19 = vld [vmem:[#allocation79_spill] sm:$0xff] }
 0x2b3   : > { %11485 = vrot.lane.b32.xlu1 %v19470_v28, %s12431_s16 }
 0x2b4   : > { %v11294_v32 = vpop.permute.xlu0 %11293 }
 0x2b5   : > { %v11314_v28 = vpop.permute.xlu1 %11313  ;;  %11370 = vxpose.xlu0.b32.cont [2/16] (narrow) %v11294_v32, 8 }
 0x2b7   : > { %11490 = vrot.lane.b32.xlu1 %v19473_v27, %s12431_s16 }
 0x2b8   : > { %v11309_v27 = vpop.permute.xlu0 %11308 }
 0x2b9   : > { %v11324_v38 = vpop.permute.xlu1 %11323  ;;  %11372 = vxpose.xlu0.b32.cont [3/16] (narrow) %v11299_v12, 8 }
 0x2bb   : > { %11495 = vrot.lane.b32.xlu1 %v19476_v16, %s12431_s16  ;;  %v19482_v16 = vld [vmem:[#allocation75_spill] sm:$0xff] }
 0x2bc   : > { %v19484_v40 = vpack.i.bf16 %v19482_v16, %v19483_v45  ;;  %v11319_v32 = vpop.permute.xlu0 %11318 }
 0x2bd   : > { %v11334_v63 = vpop.permute.xlu1 %11333  ;;  %11374 = vxpose.xlu0.b32.cont [4/16] (narrow) %v11304_v26, 8 }
 0x2bf   : > { %11500 = vrot.lane.b32.xlu1 %v19479_v42, %s12431_s16  ;;  %v19487_v42 = vpack.i.bf16 %v19485_v23, %v19486_v59  ;;  %v19493_v23 = vld [vmem:[#allocation80_spill] sm:$0xff] }
 0x2c0   : > { %v11329_v26 = vpop.permute.xlu0 %11328 }
 0x2c1   : > { %v11344_v54 = vpop.permute.xlu1 %11343  ;;  %11376 = vxpose.xlu0.b32.cont [5/16] (narrow) %v11309_v27, 8 }
 0x2c3   : > { %11505 = vrot.lane.b32.xlu1 %v19481_v24, %s12431_s16  ;;  %v19490_v24 = vld [vmem:[#allocation78_spill] sm:$0xff] }
 0x2c4   : > { %v19491_v16 = vpack.i.bf16 %v19489_v19, %v19490_v24  ;;  %v11339_v33 = vpop.permute.xlu0 %11338  ;;  %v6082_v19 = vlaneseq }
 0x2c5   : > { %v11354_v12 = vpop.permute.xlu1 %11353  ;;  %11378 = vxpose.xlu0.b32.cont [6/16] (narrow) %v11314_v28, 8 }
 0x2c7   : > { %11510 = vrot.lane.b32.xlu1 %v19484_v40, %s12431_s16  ;;  %v19492_v40 = vld [vmem:[#allocation81_spill] sm:$0xff] }
 0x2c8   : > { %v19494_v59 = vpack.i.bf16 %v19492_v40, %v19493_v23  ;;  %v14545_v23 = vld [vmem:[%s18749_s5] sm:$0xff] }
 0x2c9   : > { %v11364_v45 = vpop.permute.xlu1 %11363  ;;  %11380 = vxpose.xlu0.b32.cont [7/16] (narrow) %v11319_v32, 8 }
 0x2cb   : > { %11515 = vrot.lane.b32.xlu1 %v19487_v42, %s12431_s16  ;;  %v11349_v42 = vpop.permute.xlu0 %11348 }
 0x2cd   : > { %v14523_v27 = vpop.permute.xlu1 %11405  ;;  %11382 = vxpose.xlu0.b32.cont [8/16] (narrow) %v11324_v38, 8  ;;  %v14535_v38 = vshrl.u32 %v6082_v19, 7  ;;  %v6760_v19 = vld [vmem:[#allocation2 + $0x9] sm:$0xff] }
 0x2ce   : > { %19495 = vst [vmem:[#allocation63_spill] sm:$0xff] %v14523_v27 }
 0x2cf   : > { %11520 = vrot.lane.b32.xlu1 %v19488_v17, %s12431_s16  ;;  %v11359_v24 = vpop.permute.xlu0 %11358  ;;  %19501 = vst [vmem:[#allocation70_spill] sm:$0xff] %v14535_v38  ;;  %v6119_v5 = vand.u32 15, %v14535_v38 }
 0x2d1   : > { %v14525_v56 = vpop.permute.xlu1 %11410  ;;  %11384 = vxpose.xlu0.b32.cont [9/16] (narrow) %v11329_v26, 8  ;;  %v18945_v26 = vsub.s32 0, %v14535_v38  ;;  %vm14575_vm11 = vcmp.ne.s32.totalorder %v6119_v5, 0 }
 0x2d2   : > { %19496 = vst [vmem:[#allocation64_spill] sm:$0xff] %v14525_v56 }
 0x2d3   : > { %11525 = vrot.lane.b32.xlu1 %v19491_v16, %s12431_s16 }
 0x2d5   : > { %v14527_v28 = vpop.permute.xlu1 %11415  ;;  %11386 = vxpose.xlu0.b32.cont [10/16] (narrow) %v11334_v63, 8 }
 0x2d6   : > { %19497 = vst [vmem:[#allocation66_spill] sm:$0xff] %v14527_v28 }
 0x2d7   : > { %11530 = vrot.lane.b32.xlu1 %v19494_v59, %s12431_s16  ;;  %v14551_v59 = vrot.slane %v14545_v23, %v18945_v26 }
 0x2d9   : > { %v14529_v17 = vpop.permute.xlu1 %11420  ;;  %11388 = vxpose.xlu0.b32.cont [11/16] (narrow) %v11339_v33, 8  ;;  %19504 = vst [vmem:[#allocation71_spill] sm:$0xff] %v14551_v59 }
 0x2da   : > { %19498 = vst [vmem:[#allocation65_spill] sm:$0xff] %v14529_v17 }
 0x2dd   : > { %v14531_v32 = vpop.permute.xlu1 %11425  ;;  %11390 = vxpose.xlu0.b32.cont [12/16] (narrow) %v11344_v54, 8  ;;  %v18949_v54 = vsub.s32 1, %v14535_v38 }
 0x2de   : > { %19499 = vst [vmem:[#allocation68_spill] sm:$0xff] %v14531_v32 }
 0x2e1   : > { %v14533_v16 = vpop.permute.xlu1 %11430  ;;  %11392 = vxpose.xlu0.b32.cont [13/16] (narrow) %v11349_v42, 8  ;;  %v6564_v42 = vld [vmem:[#allocation2 + $0x8] sm:$0xff] }
 0x2e2   : > { %19500 = vst [vmem:[#allocation67_spill] sm:$0xff] %v14533_v16  ;;  %v6600_v2 = vmul.f32 %v14551_v59, %v6564_v42  ;;  %v18960_v42 = vsub.s32 2, %v14535_v38 }
 0x2e4   : > { %v14589_v7 = vrot.slane %v14545_v23, %v18960_v42 }
 0x2e5   : > { %v14537_v40 = vpop.permute.xlu1 %11435  ;;  %11394 = vxpose.xlu0.b32.cont [14/16] (narrow) %v11354_v12, 8  ;;  %v14558_v12 = vrot.slane %v14545_v23, %v18949_v54 }
 0x2e6   : > { %19502 = vst [vmem:[#allocation69_spill] sm:$0xff] %v14537_v40  ;;  %19514 = vst [vmem:[#allocation81_spill] sm:$0xff] %v14589_v7 }
 0x2e7   : > { %19506 = vst [vmem:[#allocation75_spill] sm:$0xff] %v14558_v12  ;;  %v6796_v53 = vmul.f32 %v14558_v12, %v6760_v19  ;;  %v6599_v19 = vmul.f32 %v14551_v59, %v14083_v44  ;;  %v6085_v44 = vadd.s32 16, %v14535_v38 }
 0x2e9   : > { %v14540_v63 = vpop.permute.xlu1 %11440  ;;  %11396 = vxpose.xlu0.b32.cont [15/16] (narrow) %v11359_v24, 8  ;;  %v6828_v8 = vadd.f32 %v6796_v53, %v6600_v2  ;;  %v19510_v53 = vmov 0  ;;  %v18965_v2 = vsub.s32 3, %v14535_v38  ;;  %v6695_v5 = vsel %vm14575_vm11, %v6599_v19, 0.0 }
 0x2ea   : > { %19503 = vst [vmem:[#allocation72_spill] sm:$0xff] %v14540_v63  ;;  %v19511_v53 = vsel %vm14575_vm11, 4294967295, %v19510_v53  ;;  %v6895_v19 = vmul.f32 %v14589_v7, %v14087_v14  ;;  %v6133_v13 = vand.u32 15, %v6085_v44 }
 0x2eb   : > { %19512 = vst [vmem:[#allocation79_spill] sm:$0xff] %v19511_v53  ;;  %v14597_v62 = vrot.slane %v14545_v23, %v18965_v2 }
 0x2ec   : > { %vm14624_vm13 = vcmp.ne.s32.totalorder %v6133_v13, 0 }
 0x2ed   : > { %v14553_v33 = vpop.permute.xlu1 %11445  ;;  %11398 = vxpose.xlu0.b32.end [16/16] (narrow) %v11364_v45, 8  ;;  %v6084_v45 = vadd.s32 8, %v14535_v38  ;;  %19515 = vst [vmem:[#allocation80_spill] sm:$0xff] %v14597_v62 }
 0x2ee   : > { %19505 = vst [vmem:[#allocation73_spill] sm:$0xff] %v14553_v33 }
 0x2ef   : > { %v6126_v60 = vand.u32 15, %v6084_v45 }
 0x2f1   : > { %v14562_v24 = vpop.permute.xlu1 %11450  ;;  %vm14601_vm12 = vcmp.ne.s32.totalorder %v6126_v60, 15 }
 0x2f2   : > { %19507 = vst [vmem:[#allocation74_spill] sm:$0xff] %v14562_v24  ;;  %v19525_v24 = vsub.s32 4, %v14535_v38 }
 0x2fe   : > { %v14564_v11 = vpop.permute.xlu1 %11460 }
 0x2ff   : > { %19508 = vst [vmem:[#allocation77_spill] sm:$0xff] %v14564_v11 }
 0x302   : > { %v14566_v26 = vpop.permute.xlu1 %11465 }
 0x303   : > { %19509 = vst [vmem:[#allocation76_spill] sm:$0xff] %v14566_v26 }
 0x306   : > { %v1277_v25 = vpop.permute.xlu1 %1276 }
 0x307   : > { %6050 = vst.msk [vmem:[#allocation2 + $0x11] sm:$0xff] %vm19068_vm0, %v1277_v25  ;;  %10556 = vmatprep.mubr.msk.f32.mxu0 %vm19067_vm1, %v1277_v25  ;;  %v6795_v25 = vmul.f32 %v14558_v12, %v14085_v41  ;;  %v19517_v41 = vmov 0  ;;  %vm19677_vm1 = vcmask 130048  }
 0x308   : > { %v19518_v41 = vsel %vm14601_vm12, 4294967295, %v19517_v41 }
 0x309   : > { %19519 = vst [vmem:[#allocation207_spill] sm:$0xff] %v19518_v41  ;;  %v6827_v42 = vadd.f32 %v6795_v25, %v6695_v5  ;;  %v18969_v5 = vsub.s32 5, %v14535_v38 }
 0x30a   : > { %v14580_v54 = vpop.permute.xlu1 %1278 }
 0x30b   : > { %19513 = vst [vmem:[#allocation78_spill] sm:$0xff] %v14580_v54  ;;  %6051 = vst.msk [vmem:[#allocation2 + $0x19] sm:$0xff] %vm19068_vm0, %v14580_v54  ;;  %v7023_v14 = vadd.f32 %v6895_v19, %v6827_v42  ;;  %v14635_v42 = vrot.slane %v14545_v23, %v19525_v24  ;;  %v14648_v19 = vrot.slane %v14545_v23, %v18969_v5 }
 0x30d   : > { %19526 = vst [vmem:[#allocation211_spill] sm:$0xff] %v14635_v42  ;;  %19527 = vst [vmem:[#allocation212_spill] sm:$0xff] %v14648_v19 }
 0x30e   : > { %v14599_v29 = vpop.permute.xlu1 %11470  ;;  %v6860_v45 = vld [vmem:[#allocation2 + $0xa] sm:$0xff] }
 0x30f   : > { %19516 = vst [vmem:[#allocation206_spill] sm:$0xff] %v14599_v29  ;;  %v6565_v30 = vld [vmem:[#allocation2 + $0x10] sm:$0xff]  ;;  %8470 = vst.msk [vmem:[#allocation2 + $0x8] sm:$0xff] %vm19068_vm0, %v19385_v34  ;;  %v6896_v3 = vmul.f32 %v14589_v7, %v6860_v45 }
 0x310   : > { %v6761_v2 = vld [vmem:[#allocation2 + $0x11] sm:$0xff]  ;;  %v7061_v57 = vmul.f32 %v14597_v62, %v6565_v30  ;;  %v6601_v25 = vmul.f32 %v14551_v59, %v6565_v30 }
 0x311   : > { %v6992_v26 = vsel %vm14601_vm12, %v6896_v3, 0.0  ;;  %v6797_v13 = vmul.f32 %v14558_v12, %v6761_v2  ;;  %v7163_v33 = vmul.f32 %v14635_v42, %v6761_v2 }
 0x312   : > { %v6861_v54 = vld [vmem:[#allocation2 + $0x12] sm:$0xff]  ;;  %v7024_v44 = vadd.f32 %v6992_v26, %v6828_v8  ;;  %v7093_v3 = vsel %vm14575_vm11, %v7061_v57, 0.0  ;;  %v6697_v26 = vsel %vm14624_vm13, %v6601_v25, 0.0  ;;  %v19529_v25 = vsub.s32 6, %v14535_v38 }
 0x313   : > { %v14613_v60 = vld [vmem:[#allocation2 + $0x18] sm:$0xff]  ;;  %8471 = vst.msk [vmem:[#allocation2 + $0x10] sm:$0xff] %vm19068_vm0, %v19385_v34  ;;  %v7125_v57 = vadd.f32 %v7093_v3, %v7023_v14  ;;  %v6897_v8 = vmul.f32 %v14589_v7, %v6861_v54  ;;  %v7233_v5 = vmul.f32 %v14648_v19, %v6861_v54 }
 0x314   : > { %v7062_v45 = vmul.f32 %v14597_v62, %v14613_v60  ;;  %v14660_v14 = vrot.slane %v14545_v23, %v19529_v25  ;;  %v14665_v63 = vld [vmem:[#allocation2 + $0x19] sm:$0xff]  ;;  %v14685_v25 = vld [vmem:[%s18749_s5 + $0x8] ss:$0 sm:$0xff] }
 0x315   : > { %v14611_v29 = vpop.permute.xlu1 %11475  ;;  %v7195_v3 = vadd.f32 %v7163_v33, %v7125_v57 }
 0x316   : > { %19520 = vst [vmem:[#allocation208_spill] sm:$0xff] %v14611_v29  ;;  %v19521_v29 = vmov 0  ;;  %v14639_v30 = vadd.f32 %v7062_v45, %v7024_v44  ;;  %v18971_v44 = vsub.s32 7, %v14535_v38  ;;  %v6829_v45 = vadd.f32 %v6797_v13, %v6697_v26  ;;  %19530 = vst [vmem:[#allocation214_spill] sm:$0xff] %v14660_v14 }
 0x317   : > { %v19522_v29 = vsel %vm14624_vm13, 4294967295, %v19521_v29  ;;  %v7297_v40 = vadd.f32 %v7233_v5, %v7195_v3 }
 0x318   : > { %19523 = vst [vmem:[#allocation209_spill] sm:$0xff] %v19522_v29  ;;  %v14672_v13 = vrot.slane %v14545_v23, %v18971_v44  ;;  %v7025_v33 = vadd.f32 %v6897_v8, %v6829_v45  ;;  %v19532_v23 = vld [vmem:[#allocation82_spill] sm:$0xff]  ;;  %v19533_v44 = vld [vmem:[#allocation83_spill] sm:$0xff] }
 0x319   : > { %v14630_v11 = vpop.permute.xlu1 %1280 }
 0x31a   : > { %19524 = vst [vmem:[#allocation210_spill] sm:$0xff] %v14630_v11  ;;  %6052 = vst.msk [vmem:[#allocation2 + $0x21] sm:$0xff] %vm19068_vm0, %v14630_v11 }
 0x31b   : > { %19531 = vst [vmem:[#allocation215_spill] sm:$0xff] %v14672_v13 }
 0x31d   : > { %v14650_v24 = vpop.permute.xlu1 %1282 }
 0x31e   : > { %19528 = vst [vmem:[#allocation213_spill] sm:$0xff] %v14650_v24  ;;  %6053 = vst.msk [vmem:[#allocation2 + $0x29] sm:$0xff] %vm19068_vm0, %v14650_v24  ;;  %v19534_v24 = vpack.i.bf16 %v19532_v23, %v19533_v44 }
 0x320   : > { %11455 = vrot.lane.b32.xlu0 %v19534_v24, %s12428_s9  ;;  %s15468_s9 = sld [smem:[#allocation9]] }
 0x321   : > { %v14663_v11 = vld [vmem:[#allocation2 + $0x20] sm:$0xff] }
 0x322   : > { %v14667_v2 = vld [vmem:[#allocation2 + $0x1a] sm:$0xff]  ;;  %v7063_v26 = vmul.f32 %v14597_v62, %v14663_v11  ;;  %v7335_v54 = vmul.f32 %v14660_v14, %v14663_v11 }
 0x323   : > { %8472 = vst.msk [vmem:[#allocation2 + $0x18] sm:$0xff] %vm19068_vm0, %v19385_v34  ;;  %v14678_v57 = vld [vmem:[#allocation2 + $0x21] sm:$0xff] }
 0x324   : > { %v7095_v16 = vsel %vm14624_vm13, %v7063_v26, 0.0  ;;  %v7367_v45 = vsel %vm14575_vm11, %v7335_v54, 0.0  ;;  %v7437_v28 = vmul.f32 %v14672_v13, %v14678_v57  ;;  %1284 = vrot.lane.b32.xlu0 %v12820_v4, %s12430_s13 }
 0x325   : > { %v14693_v8 = vadd.f32 %v7095_v16, %v7025_v33  ;;  %v14697_v32 = vld [vmem:[#allocation2 + $0x22] sm:$0xff]  ;;  %v7399_v17 = vadd.f32 %v7367_v45, %v7297_v40 }
 0x326   : > { %v7507_v56 = vmul.f32 %v14685_v25, %v14697_v32  ;;  %8473 = vst.msk [vmem:[#allocation2 + $0x20] sm:$0xff] %vm19068_vm0, %v19385_v34 }
 0x327   : > { %v7469_v16 = vadd.f32 %v7437_v28, %v7399_v17 }
 0x328   : > { %1286 = vrot.lane.b32.xlu0 %v12814_v1, %s12430_s13 }
 0x329   : > { %v7571_v5 = vadd.f32 %v7507_v56, %v7469_v16 }
 0x32b   : > { %v7603_v24 = vmul.f32 0.70710677, %v7571_v5 }
 0x32c   : > { %1288 = vrot.lane.b32.xlu0 %v12840_v20, %s12430_s13 }
 0x32d   : > { %v7635_v44 = vand.u32 2147483647, %v7603_v24  ;;  %vm8275_vm14 = vcmp.lt.f32.partialorder %v7603_v24, 0.0  ;;  %v19535_v24 = vld [vmem:[#allocation84_spill] sm:$0xff] }
 0x32f   : > { %v7667_v40 = vmul.f32 0.3275911, %v7635_v44  ;;  %v8083_v26 = vsub.f32 0.0, %v7635_v44 }
 0x330   : > { %1290 = vrot.lane.b32.xlu0 %v12834_v15, %s12430_s13 }
 0x331   : > { %v7699_v3 = vadd.f32 1.0, %v7667_v40  ;;  %v8115_v28 = vmul.f32 %v8083_v26, %v7635_v44  ;;  %v11399_v17 = vpop.trf.xlu0 }
 0x332   : > { %v11400_v54 = vunpack.i.l.bf16 %v11399_v17  ;;  %v11403_v23 = vunpack.i.h.bf16 %v11399_v17 }
 0x333   : > { %12027 = vrcp.f32 %v7699_v3  ;;  %v8147_v16 = vmul.f32 1.442695, %v8115_v28 }
 0x334   : > { %1292 = vrot.lane.b32.xlu0 %v19266_v31, %s12430_s13  ;;  %1223 = vmatprep.mubr.f32.mxu1 %v11400_v54 }
 0x335   : > { %1224 = vmatmul.mubr.f32.vlgmr.msra.gmra.mrb[0].mxu1 %v11403_v23  ;;  %12029 = vpow2.f32 %v8147_v16 }
 0x338   : > { %1294 = vrot.lane.b32.xlu0 %v19265_v10, %s12430_s13 }
 0x33c   : > { %1296 = vrot.lane.b32.xlu0 %v19268_v55, %s12430_s13 }
 0x33d   : > { %v12028_v56 = vpop.eup %12027 }
 0x33e   : > { %v7795_v33 = vmul.f32 1.0614054, %v12028_v56 }
 0x33f   : > { %v12030_v28 = vpop.eup %12029 }
 0x340   : > { %v9992_v45 = vadd.f32 -1.4531521, %v7795_v33  ;;  %1298 = vrot.lane.b32.xlu0 %v19267_v6, %s12430_s13 }
 0x342   : > { %v7859_v40 = vmul.f32 %v12028_v56, %v9992_v45 }
 0x344   : > { %v7891_v3 = vadd.f32 1.4214138, %v7859_v40  ;;  %1300 = vrot.lane.b32.xlu0 %v19270_v49, %s12430_s13 }
 0x346   : > { %v7923_v53 = vmul.f32 %v12028_v56, %v7891_v3 }
 0x348   : > { %v10024_v44 = vadd.f32 -0.28449672, %v7923_v53  ;;  %1302 = vrot.lane.b32.xlu0 %v19269_v21, %s12430_s13  ;;  %v8371_v53 = vmul.f32 0.5, %v7571_v5  ;;  %v19538_v5 = vpack.i.bf16 %v13651_v39, %v13657_v51  ;;  %v19546_v51 = vld [vmem:[#allocation91_spill] sm:$0xff] }
 0x34a   : > { %v7987_v26 = vmul.f32 %v12028_v56, %v10024_v44 }
 0x34c   : > { %v8019_v17 = vadd.f32 0.2548296, %v7987_v26  ;;  %1304 = vrot.lane.b32.xlu0 %v19274_v50, %s12430_s13  ;;  %v19539_v26 = vld [vmem:[#allocation86_spill] sm:$0xff] }
 0x34e   : > { %v8051_v33 = vmul.f32 %v12028_v56, %v8019_v17  ;;  %v19536_v56 = vld [vmem:[#allocation85_spill] sm:$0xff]  ;;  %v19540_v17 = vld [vmem:[#allocation87_spill] sm:$0xff] }
 0x34f   : > { %v19537_v44 = vpack.i.bf16 %v19535_v24, %v19536_v56  ;;  %v6086_v24 = vadd.s32 24, %v14535_v38  ;;  %v6603_v56 = vmul.f32 %v14551_v59, %v14663_v11 }
 0x350   : > { %v8211_v54 = vmul.f32 %v12030_v28, %v8051_v33  ;;  %1306 = vrot.lane.b32.xlu0 %v19273_v46, %s12430_s13  ;;  %v19541_v33 = vpack.i.bf16 %v19539_v26, %v19540_v17  ;;  %v19542_v28 = vld [vmem:[#allocation88_spill] sm:$0xff] }
 0x352   : > { %v8243_v23 = vsub.f32 1.0, %v8211_v54  ;;  %v19543_v54 = vld [vmem:[#allocation89_spill] sm:$0xff] }
 0x354   : > { %v8307_v45 = vsub.f32 0.0, %v8243_v23  ;;  %1308 = vrot.lane.b32.xlu0 %v12904_v0, %s12430_s13 }
 0x356   : > { %v8339_v16 = vsel %vm8275_vm14, %v8307_v45, %v8243_v23  ;;  %v19544_v23 = vpack.i.bf16 %v19542_v28, %v19543_v54  ;;  %v19545_v45 = vld [vmem:[#allocation90_spill] sm:$0xff]  ;;  %v6602_v28 = vmul.f32 %v14551_v59, %v14613_v60  ;;  %v6798_v54 = vmul.f32 %v14558_v12, %v14665_v63 }
 0x357   : > { %v8403_v40 = vadd.f32 1.0, %v8339_v16  ;;  %v19547_v39 = vpack.i.bf16 %v19545_v45, %v19546_v51  ;;  %v6087_v16 = vadd.s32 32, %v14535_v38  ;;  %v7165_v45 = vmul.f32 %v14635_v42, %v14678_v57 }
 0x358   : > { %1310 = vrot.lane.b32.xlu0 %v12898_v61, %s12430_s13  ;;  %v19555_v51 = vmov 0  ;;  %v6899_v60 = vmul.f32 %v14589_v7, %v14697_v32 }
 0x359   : > { %v8435_v3 = vmul.f32 %v8403_v40, %v8371_v53  ;;  %v19548_v53 = vpack.i.bf16 %v13695_v48, %v13701_v9  ;;  %v6147_v40 = vand.u32 15, %v6087_v16  ;;  %v6140_v48 = vand.u32 15, %v6086_v24  ;;  %v19558_v16 = vld [vmem:[#allocation92_spill] sm:$0xff]  ;;  %v14819_v24 = vld [vmem:[#allocation2 + $0x28] sm:$0xff] }
 0x35a   : > { %v6799_v9 = vmul.f32 %v14558_v12, %v14678_v57  ;;  %v7197_v57 = vadd.f32 %v7165_v45, %v14693_v8 }
 0x35b   : > { %8506 = vst.msk [vmem:[#allocation2 + $0x11] sm:$0xff] %vm19068_vm0, %v8435_v3  ;;  %vm14782_vm15 = vcmp.ne.s32.totalorder %v6147_v40, 0  ;;  %vm14809_vm2 = vcmp.ne.s32.totalorder %v6140_v48, 15  ;;  %v19562_v48 = vmov 0 }
 0x35c   : > { %1312 = vrot.lane.b32.xlu0 %v12920_v22, %s12430_s13  ;;  %v6699_v11 = vsel %vm14782_vm15, %v6603_v56, 0.0  ;;  %v19556_v51 = vsel %vm14809_vm2, 4294967295, %v19555_v51  ;;  %v14822_v56 = vld [vmem:[#allocation2 + $0x29] sm:$0xff] }
 0x35d   : > { %19557 = vst [vmem:[#allocation86_spill] sm:$0xff] %v19556_v51  ;;  %19561 = vst [vmem:[#allocation87_spill] sm:$0xff] %v14822_v56 }
 0x360   : > { %1314 = vrot.lane.b32.xlu0 %v12914_v18, %s12430_s13 }
 0x364   : > { %11602 = vrot.lane.b32.xlu0 %v19537_v44, %s12432_s12  ;;  %v19550_v44 = vmov 0 }
 0x365   : > { %v19551_v44 = vsel %vm14782_vm15, 4294967295, %v19550_v44 }
 0x366   : > { %19552 = vst [vmem:[#allocation83_spill] sm:$0xff] %v19551_v44  ;;  %v14946_v44 = vmul.f32 %v14660_v14, %v14819_v24 }
 0x368   : > { %2258 = vrot.lane.b32.xlu0 %v12790_v37, %s12433_s22 }
 0x36c   : > { %2260 = vrot.lane.b32.xlu0 %v12786_v35, %s12433_s22 }
 0x370   : > { %11607 = vrot.lane.b32.xlu0 %v19538_v5, %s12432_s12  ;;  %v6089_v5 = vadd.s32 48, %v14535_v38 }
 0x372   : > { %v6161_v17 = vand.u32 15, %v6089_v5  ;;  %v7235_v5 = vmul.f32 %v14648_v19, %v14697_v32 }
 0x374   : > { %11612 = vrot.lane.b32.xlu0 %v19541_v33, %s12432_s12  ;;  %vm14826_vm3 = vcmp.ne.s32.totalorder %v6161_v17, 0  ;;  %v6604_v17 = vmul.f32 %v14551_v59, %v14819_v24  ;;  %v7299_v35 = vadd.f32 %v7235_v5, %v7197_v57 }
 0x375   : > { %v19563_v48 = vsel %vm14826_vm3, 4294967295, %v19562_v48 }
 0x376   : > { %19564 = vst [vmem:[#allocation88_spill] sm:$0xff] %v19563_v48 }
 0x378   : > { %2262 = vrot.lane.b32.xlu0 %v12808_v52, %s12433_s22  ;;  %v6800_v52 = vmul.f32 %v14558_v12, %v14822_v56 }
 0x37a   : > { %v14887_v29 = vadd.f32 %v6800_v52, %v6604_v17 }
 0x37c   : > { %2264 = vrot.lane.b32.xlu0 %v12802_v47, %s12433_s22 }
 0x380   : > { %11617 = vrot.lane.b32.xlu0 %v19544_v23, %s12432_s12  ;;  %v6898_v23 = vmul.f32 %v14589_v7, %v14667_v2 }
 0x382   : > { %v6994_v8 = vsel %vm14809_vm2, %v6898_v23, 0.0 }
 0x384   : > { %11622 = vrot.lane.b32.xlu0 %v19547_v39, %s12432_s12  ;;  %v6831_v39 = vadd.f32 %v6799_v9, %v6699_v11 }
 0x388   : > { %2266 = vrot.lane.b32.xlu0 %v12820_v4, %s12433_s22  ;;  %v19568_v4 = vld [vmem:[#allocation95_spill] sm:$0xff] }
 0x38c   : > { %2268 = vrot.lane.b32.xlu0 %v12814_v1, %s12433_s22 }
 0x390   : > { %11627 = vrot.lane.b32.xlu0 %v19548_v53, %s12432_s12  ;;  %v19559_v53 = vld [vmem:[#allocation93_spill] sm:$0xff] }
 0x391   : > { %v19560_v40 = vpack.i.bf16 %v19558_v16, %v19559_v53  ;;  %v6091_v16 = vadd.s32 64, %v14535_v38 }
 0x392   : > { %v14775_v3 = vpop.permute.xlu0 %11455 }
 0x393   : > { %19549 = vst [vmem:[#allocation82_spill] sm:$0xff] %v14775_v3  ;;  %v6175_v22 = vand.u32 15, %v6091_v16 }
 0x394   : > { %2270 = vrot.lane.b32.xlu0 %v12840_v20, %s12433_s22  ;;  %v19567_v20 = vld [vmem:[#allocation94_spill] sm:$0xff] }
 0x395   : > { %v19569_v47 = vpack.i.bf16 %v19567_v20, %v19568_v4  ;;  %vm14894_vm4 = vcmp.ne.s32.totalorder %v6175_v22, 0 }
 0x396   : > { %v14787_v26 = vpop.permute.xlu0 %1284 }
 0x397   : > { %19553 = vst [vmem:[#allocation84_spill] sm:$0xff] %v14787_v26  ;;  %6054 = vst.msk [vmem:[#allocation2 + $0x31] sm:$0xff] %vm19068_vm0, %v14787_v26 }
 0x398   : > { %2272 = vrot.lane.b32.xlu0 %v12834_v15, %s12433_s22  ;;  %v7164_v15 = vmul.f32 %v14635_v42, %v14665_v63 }
 0x39a   : > { %v14797_v33 = vpop.permute.xlu0 %1286 }
 0x39b   : > { %19554 = vst [vmem:[#allocation85_spill] sm:$0xff] %v14797_v33  ;;  %6055 = vst.msk [vmem:[#allocation2 + $0x39] sm:$0xff] %vm19068_vm0, %v14797_v33 }
 0x39c   : > { %11637 = vrot.lane.b32.xlu0 %v19560_v40, %s12432_s12  ;;  %v6830_v40 = vadd.f32 %v6798_v54, %v6602_v28  ;;  %v7027_v28 = vadd.f32 %v6899_v60, %v6831_v39 }
 0x39e   : > { %v6569_v9 = vld [vmem:[#allocation2 + $0x30] sm:$0xff]  ;;  %v14833_v53 = vpop.permute.xlu0 %1288  ;;  %v7026_v39 = vadd.f32 %v6994_v8, %v6830_v40  ;;  %v6093_v40 = vadd.s32 80, %v14535_v38 }
 0x39f   : > { %v6765_v11 = vld [vmem:[#allocation2 + $0x31] sm:$0xff]  ;;  %19566 = vst [vmem:[#allocation90_spill] sm:$0xff] %v14833_v53  ;;  %v6605_v45 = vmul.f32 %v14551_v59, %v6569_v9  ;;  %v7065_v32 = vmul.f32 %v14597_v62, %v6569_v9  ;;  %6056 = vst.msk [vmem:[#allocation2 + $0x41] sm:$0xff] %vm19068_vm0, %v14833_v53  ;;  %v7337_v23 = vmul.f32 %v14660_v14, %v6569_v9 }
 0x3a0   : > { %v14830_v1 = vld [vmem:[#allocation2 + $0x2a] sm:$0xff]  ;;  %v6801_v54 = vmul.f32 %v14558_v12, %v6765_v11  ;;  %11642 = vrot.lane.b32.xlu0 %v19569_v47, %s12432_s12  ;;  %v7064_v47 = vmul.f32 %v14597_v62, %v14819_v24  ;;  %v7167_v4 = vmul.f32 %v14635_v42, %v6765_v11  ;;  %v7439_v57 = vmul.f32 %v14672_v13, %v6765_v11 }
 0x3a1   : > { %19565 = vst [vmem:[#allocation89_spill] sm:$0xff] %v14830_v1  ;;  %8474 = vst.msk [vmem:[#allocation2 + $0x28] sm:$0xff] %vm19068_vm0, %v19385_v34  ;;  %v6701_v63 = vsel %vm14826_vm3, %v6605_v45, 0.0  ;;  %v7097_v37 = vsel %vm14782_vm15, %v7065_v32, 0.0  ;;  %v7369_v9 = vsel %vm14624_vm13, %v7337_v23, 0.0 }
 0x3a2   : > { %v7129_v60 = vadd.f32 %v7097_v37, %v7027_v28  ;;  %v6865_v18 = vld [vmem:[#allocation2 + $0x32] sm:$0xff]  ;;  %v14861_v61 = vpop.permute.xlu0 %1290  ;;  %v7401_v20 = vadd.f32 %v7369_v9, %v7299_v35  ;;  %v6833_v37 = vadd.f32 %v6801_v54, %v6701_v63  ;;  %v7234_v35 = vmul.f32 %v14648_v19, %v14667_v2 }
 0x3a3   : > { %19570 = vst [vmem:[#allocation91_spill] sm:$0xff] %v14861_v61  ;;  %v7509_v5 = vmul.f32 %v14685_v25, %v6865_v18  ;;  %8475 = vst.msk [vmem:[#allocation2 + $0x30] sm:$0xff] %vm19068_vm0, %v19385_v34  ;;  %v6901_v16 = vmul.f32 %v14589_v7, %v6865_v18  ;;  %v14878_v45 = vld [vmem:[#allocation2 + $0x38] sm:$0xff]  ;;  %v7237_v28 = vmul.f32 %v14648_v19, %v6865_v18 }
 0x3a4   : > { %6057 = vst.msk [vmem:[#allocation2 + $0x49] sm:$0xff] %vm19068_vm0, %v14861_v61  ;;  %2274 = vrot.lane.b32.xlu0 %v19266_v31, %s12433_s22  ;;  %v7199_v11 = vadd.f32 %v7167_v4, %v7129_v60  ;;  %v7471_v8 = vadd.f32 %v7439_v57, %v7401_v20  ;;  %v14880_v32 = vld [vmem:[#allocation2 + $0x39] sm:$0xff]  ;;  %v14889_v31 = vadd.f32 %v7064_v47, %v7026_v39  ;;  %v19573_v4 = vmov 0 }
 0x3a5   : > { %v7196_v2 = vadd.f32 %v7164_v15, %v14639_v30  ;;  %v19574_v4 = vsel %vm14894_vm4, 4294967295, %v19573_v4  ;;  %v7029_v52 = vadd.f32 %v6901_v16, %v6833_v37  ;;  %v6189_v15 = vand.u32 15, %v6093_v40 }
 0x3a6   : > { %v6571_v23 = vld [vmem:[#allocation2 + $0x40] sm:$0xff]  ;;  %v14885_v9 = vpop.permute.xlu0 %1292  ;;  %19572 = vst [vmem:[#allocation93_spill] sm:$0xff] %v14889_v31  ;;  %v14892_v60 = vadd.f32 %v7509_v5, %v7471_v8  ;;  %19575 = vst [vmem:[#allocation94_spill] sm:$0xff] %v19574_v4  ;;  %v7266_v22 = vsel %vm14601_vm12, %v7234_v35, 0.0  ;;  %v7301_v39 = vadd.f32 %v7237_v28, %v7199_v11  ;;  %v14922_v35 = vadd.s32 96, %v14535_v38 }
 0x3a7   : > { %v6767_v54 = vld [vmem:[#allocation2 + $0x41] sm:$0xff]  ;;  %19571 = vst [vmem:[#allocation92_spill] sm:$0xff] %v14885_v9  ;;  %v6607_v18 = vmul.f32 %v14551_v59, %v6571_v23  ;;  %v7067_v20 = vmul.f32 %v14597_v62, %v6571_v23  ;;  %6058 = vst.msk [vmem:[#allocation2 + $0x51] sm:$0xff] %vm19068_vm0, %v14885_v9  ;;  %v7339_v17 = vmul.f32 %v14660_v14, %v6571_v23  ;;  %vm14954_vm5 = vcmp.ne.s32.totalorder %v6189_v15, 0 }
 0x3a8   : > { %v14883_v63 = vld [vmem:[#allocation2 + $0x3a] sm:$0xff]  ;;  %2276 = vrot.lane.b32.xlu0 %v19265_v10, %s12433_s22  ;;  %v14910_v30 = vmul.f32 0.70710677, %v14892_v60  ;;  %v6803_v47 = vmul.f32 %v14558_v12, %v6767_v54  ;;  %v7441_v23 = vmul.f32 %v14672_v13, %v6767_v54  ;;  %v6088_v15 = vadd.s32 40, %v14535_v38 }
 0x3a9   : > { %8476 = vst.msk [vmem:[#allocation2 + $0x38] sm:$0xff] %vm19068_vm0, %v19385_v34  ;;  %v7099_v57 = vsel %vm14826_vm3, %v7067_v20, 0.0  ;;  %v6703_v5 = vsel %vm14894_vm4, %v6607_v18, 0.0  ;;  %v7371_v16 = vsel %vm14782_vm15, %v7339_v17, 0.0  ;;  %v7169_v18 = vmul.f32 %v14635_v42, %v6767_v54  ;;  %v19578_v17 = vld [vmem:[#allocation97_spill] sm:$0xff] }
 0x3aa   : > { %v7131_v37 = vadd.f32 %v7099_v57, %v7029_v52  ;;  %v14919_v8 = vpop.permute.xlu0 %1294  ;;  %v14925_v11 = vand.u32 2147483647, %v14910_v30  ;;  %v7403_v28 = vadd.f32 %v7371_v16, %v7301_v39  ;;  %v19577_v52 = vld [vmem:[#allocation96_spill] sm:$0xff]  ;;  %v14940_v39 = vmul.f32 %v14635_v42, %v14822_v56 }
 0x3ab   : > { %v6867_v40 = vld [vmem:[#allocation2 + $0x42] sm:$0xff]  ;;  %19576 = vst [vmem:[#allocation95_spill] sm:$0xff] %v14919_v8  ;;  %6059 = vst.msk [vmem:[#allocation2 + $0x59] sm:$0xff] %vm19068_vm0, %v14919_v8  ;;  %v19579_v57 = vpack.i.bf16 %v19577_v52, %v19578_v17  ;;  %v14942_v16 = vadd.f32 %v7266_v22, %v7196_v2  ;;  %v6835_v8 = vadd.f32 %v6803_v47, %v6703_v5  ;;  %v6203_v47 = vand.u32 15, %v14922_v35 }
 0x3ac   : > { %v7511_v20 = vmul.f32 %v14685_v25, %v6867_v40  ;;  %8477 = vst.msk [vmem:[#allocation2 + $0x40] sm:$0xff] %vm19068_vm0, %v19385_v34  ;;  %19580 = vst [vmem:[#allocation96_spill] sm:$0xff] %v14940_v39  ;;  %v7669_v10 = vmul.f32 0.3275911, %v14925_v11  ;;  %v7473_v9 = vadd.f32 %v7441_v23, %v7403_v28  ;;  %v14949_v54 = vld [vmem:[#allocation2 + $0x48] sm:$0xff]  ;;  %v6903_v52 = vmul.f32 %v14589_v7, %v6867_v40 }
 0x3ad   : > { %11647 = vrot.lane.b32.xlu0 %v19579_v57, %s12432_s12  ;;  %19581 = vst [vmem:[#allocation97_spill] sm:$0xff] %v14949_v54  ;;  %v14951_v61 = vld [vmem:[#allocation2 + $0x49] sm:$0xff]  ;;  %v7201_v17 = vadd.f32 %v7169_v18, %v7131_v37  ;;  %v19583_v57 = vmov 0  ;;  %v7239_v2 = vmul.f32 %v14648_v19, %v6867_v40  ;;  %v8085_v48 = vsub.f32 0.0, %v14925_v11 }
 0x3ae   : > { %19582 = vst [vmem:[#allocation216_spill] sm:$0xff] %v14951_v61  ;;  %v19584_v57 = vsel %vm14954_vm5, 4294967295, %v19583_v57  ;;  %v6573_v22 = vld [vmem:[#allocation2 + $0x50] sm:$0xff]  ;;  %v14962_v5 = vpop.permute.xlu0 %1296  ;;  %v7701_v28 = vadd.f32 1.0, %v7669_v10  ;;  %v14964_v23 = vadd.f32 %v7511_v20, %v7473_v9  ;;  %v19588_v35 = vld [vmem:[#allocation98_spill] sm:$0xff]  ;;  %v14979_v9 = vadd.s32 112, %v14535_v38 }
 0x3af   : > { %19585 = vst [vmem:[#allocation217_spill] sm:$0xff] %v19584_v57  ;;  %v6769_v24 = vld [vmem:[#allocation2 + $0x51] sm:$0xff]  ;;  %19587 = vst [vmem:[#allocation219_spill] sm:$0xff] %v14962_v5  ;;  %v6609_v53 = vmul.f32 %v14551_v59, %v6573_v22  ;;  %v7069_v37 = vmul.f32 %v14597_v62, %v6573_v22  ;;  %v7341_v40 = vmul.f32 %v14660_v14, %v6573_v22  ;;  %v14982_v20 = vadd.s32 128, %v14535_v38 }
 0x3b0   : > { %v14959_v0 = vld [vmem:[#allocation2 + $0x4a] sm:$0xff]  ;;  %6060 = vst.msk [vmem:[#allocation2 + $0x61] sm:$0xff] %vm19068_vm0, %v14962_v5  ;;  %v19589_v10 = vpack.i.bf16 %v13735_v43, %v19588_v35  ;;  %12031 = vrcp.f32 %v7701_v28  ;;  %v14985_v18 = vmul.f32 0.70710677, %v14964_v23  ;;  %v7031_v5 = vadd.f32 %v6903_v52, %v6835_v8 }
 0x3b1   : > { %19586 = vst [vmem:[#allocation218_spill] sm:$0xff] %v14959_v0  ;;  %8478 = vst.msk [vmem:[#allocation2 + $0x48] sm:$0xff] %vm19068_vm0, %v19385_v34  ;;  %v6805_v33 = vmul.f32 %v14558_v12, %v6769_v24  ;;  %v7303_v26 = vadd.f32 %v7239_v2, %v7201_v17  ;;  %v6705_v22 = vsel %vm14954_vm5, %v6609_v53, 0.0  ;;  %v7101_v43 = vsel %vm14894_vm4, %v7069_v37, 0.0 }
 0x3b2   : > { %11652 = vrot.lane.b32.xlu0 %v19589_v10, %s12432_s12  ;;  %v7373_v35 = vsel %vm14826_vm3, %v7341_v40, 0.0  ;;  %v6869_v10 = vld [vmem:[#allocation2 + $0x52] sm:$0xff]  ;;  %v14994_v50 = vpop.permute.xlu0 %1298  ;;  %v14997_v28 = vand.u32 2147483647, %v14985_v18  ;;  %v7171_v8 = vmul.f32 %v14635_v42, %v6769_v24  ;;  %v15005_v53 = vadd.s32 144, %v14535_v38 }
 0x3b3   : > { %19590 = vst [vmem:[#allocation98_spill] sm:$0xff] %v14994_v50  ;;  %8479 = vst.msk [vmem:[#allocation2 + $0x50] sm:$0xff] %vm19068_vm0, %v19385_v34  ;;  %v6154_v52 = vand.u32 15, %v6088_v15  ;;  %v7133_v17 = vadd.f32 %v7101_v43, %v7031_v5  ;;  %v7405_v2 = vadd.f32 %v7373_v35, %v7303_v26  ;;  %v7443_v37 = vmul.f32 %v14672_v13, %v6769_v24  ;;  %v15013_v3 = vld [vmem:[#allocation2 + $0x58] sm:$0xff] }
 0x3b4   : > { %6061 = vst.msk [vmem:[#allocation2 + $0x69] sm:$0xff] %vm19068_vm0, %v14994_v50  ;;  %v7513_v40 = vmul.f32 %v14685_v25, %v6869_v10  ;;  %v7671_v49 = vmul.f32 0.3275911, %v14997_v28  ;;  %v6837_v55 = vadd.f32 %v6805_v33, %v6705_v22  ;;  %19591 = vst [vmem:[#allocation220_spill] sm:$0xff] %v15013_v3  ;;  %v6905_v50 = vmul.f32 %v14589_v7, %v6869_v10  ;;  %v15016_v5 = vld [vmem:[#allocation2 + $0x59] sm:$0xff] }
 0x3b5   : > { %v7203_v27 = vadd.f32 %v7171_v8, %v7133_v17  ;;  %v7475_v15 = vadd.f32 %v7443_v37, %v7405_v2  ;;  %19592 = vst [vmem:[#allocation221_spill] sm:$0xff] %v15016_v5  ;;  %vm15018_vm6 = vcmp.ne.s32.totalorder %v6203_v47, 0  ;;  %v19593_v26 = vmov 0  ;;  %v19598_v2 = vld [vmem:[#allocation99_spill] sm:$0xff]  ;;  %v19599_v37 = vld [vmem:[#allocation100_spill] sm:$0xff] }
 0x3b6   : > { %2280 = vrot.lane.b32.xlu0 %v19267_v6, %s12433_s22  ;;  %v19594_v26 = vsel %vm15018_vm6, 4294967295, %v19593_v26  ;;  %v7241_v24 = vmul.f32 %v14648_v19, %v6869_v10  ;;  %v15025_v6 = vpop.permute.xlu0 %1300  ;;  %v7703_v33 = vadd.f32 1.0, %v7671_v49  ;;  %v6217_v22 = vand.u32 15, %v14979_v9 }
 0x3b7   : > { %19595 = vst [vmem:[#allocation222_spill] sm:$0xff] %v19594_v26  ;;  %v6575_v43 = vld [vmem:[#allocation2 + $0x60] sm:$0xff]  ;;  %19597 = vst [vmem:[#allocation224_spill] sm:$0xff] %v15025_v6  ;;  %v15034_v17 = vadd.f32 %v7513_v40, %v7475_v15  ;;  %v19600_v49 = vpack.i.bf16 %v19598_v2, %v19599_v37  ;;  %vm15041_vm7 = vcmp.ne.s32.totalorder %v6154_v52, 15  ;;  %v19601_v5 = vmov 0 }
 0x3b8   : > { %v15023_v35 = vld [vmem:[#allocation2 + $0x5a] sm:$0xff]  ;;  %6062 = vst.msk [vmem:[#allocation2 + $0x71] sm:$0xff] %vm19068_vm0, %v15025_v6  ;;  %v7071_v10 = vmul.f32 %v14597_v62, %v6575_v43  ;;  %v19602_v5 = vsel %vm15041_vm7, 4294967295, %v19601_v5  ;;  %v15047_v9 = vmul.f32 %v14589_v7, %v14830_v1  ;;  %v8117_v47 = vmul.f32 %v8085_v48, %v14925_v11 }
 0x3b9   : > { %19596 = vst [vmem:[#allocation223_spill] sm:$0xff] %v15023_v35  ;;  %8480 = vst.msk [vmem:[#allocation2 + $0x58] sm:$0xff] %vm19068_vm0, %v19385_v34  ;;  %12033 = vrcp.f32 %v7703_v33  ;;  %v7033_v40 = vadd.f32 %v6905_v50, %v6837_v55  ;;  %v6771_v15 = vld [vmem:[#allocation2 + $0x61] sm:$0xff]  ;;  %v7343_v8 = vmul.f32 %v14660_v14, %v6575_v43  ;;  %v15052_v6 = vmul.f32 0.70710677, %v15034_v17 }
 0x3ba   : > { %11662 = vrot.lane.b32.xlu0 %v19600_v49, %s12432_s12  ;;  %19603 = vst [vmem:[#allocation99_spill] sm:$0xff] %v19602_v5  ;;  %v7305_v2 = vadd.f32 %v7241_v24, %v7203_v27  ;;  %v6611_v52 = vmul.f32 %v14551_v59, %v6575_v43  ;;  %v7103_v37 = vsel %vm14954_vm5, %v7071_v10, 0.0  ;;  %v15057_v49 = vpop.permute.xlu0 %1302  ;;  %v15059_v35 = vpop.eup %12031  ;;  %v8087_v48 = vsub.f32 0.0, %v14997_v28 }
 0x3bb   : > { %19604 = vst [vmem:[#allocation100_spill] sm:$0xff] %v15057_v49  ;;  %v7135_v11 = vadd.f32 %v7103_v37, %v7033_v40  ;;  %v7375_v55 = vsel %vm14894_vm4, %v7343_v8, 0.0  ;;  %v6871_v50 = vld [vmem:[#allocation2 + $0x62] sm:$0xff]  ;;  %6063 = vst.msk [vmem:[#allocation2 + $0x79] sm:$0xff] %vm19068_vm0, %v15057_v49  ;;  %v15068_v27 = vmul.f32 %v14648_v19, %v14830_v1  ;;  %v7797_v24 = vmul.f32 1.0614054, %v15059_v35 }
 0x3bc   : > { %v7641_v43 = vand.u32 2147483647, %v15052_v6  ;;  %v7407_v33 = vadd.f32 %v7375_v55, %v7305_v2  ;;  %v7445_v10 = vmul.f32 %v14672_v13, %v6771_v15  ;;  %8481 = vst.msk [vmem:[#allocation2 + $0x60] sm:$0xff] %vm19068_vm0, %v19385_v34  ;;  %vm15075_vm8 = vcmp.ne.s32.totalorder %v6217_v22, 0 }
 0x3bd   : > { %19605 = vst [vmem:[#allocation225_spill] sm:$0xff] %v15068_v27  ;;  %v19606_v8 = vmov 0  ;;  %v8151_v40 = vmul.f32 1.442695, %v8117_v47  ;;  %v6807_v37 = vmul.f32 %v14558_v12, %v6771_v15  ;;  %v7173_v4 = vmul.f32 %v14635_v42, %v6771_v15  ;;  %v15091_v47 = vld [vmem:[#allocation2 + $0x69] sm:$0xff] }
 0x3be   : > { %v19607_v8 = vsel %vm15075_vm8, 4294967295, %v19606_v8  ;;  %2284 = vrot.lane.b32.xlu0 %v19269_v21, %s12433_s22  ;;  %v7515_v49 = vmul.f32 %v14685_v25, %v6871_v50  ;;  %v9994_v2 = vadd.f32 -1.4531521, %v7797_v24  ;;  %v7673_v55 = vmul.f32 0.3275911, %v7641_v43  ;;  %v15086_v0 = vpop.permute.xlu0 %1304  ;;  %v15089_v21 = vld [vmem:[#allocation2 + $0x68] sm:$0xff] }
 0x3bf   : > { %19608 = vst [vmem:[#allocation226_spill] sm:$0xff] %v19607_v8  ;;  %v6707_v3 = vsel %vm15018_vm6, %v6611_v52, 0.0  ;;  %v7477_v38 = vadd.f32 %v7445_v10, %v7407_v33  ;;  %v6577_v22 = vld [vmem:[#allocation2 + $0x70] sm:$0xff]  ;;  %19609 = vst [vmem:[#allocation227_spill] sm:$0xff] %v15086_v0  ;;  %v8119_v61 = vmul.f32 %v8087_v48, %v14997_v28  ;;  %v7205_v41 = vadd.f32 %v7173_v4, %v7135_v11  ;;  %v19613_v48 = vld [vmem:[#allocation101_spill] sm:$0xff] }
 0x3c0   : > { %19610 = vst [vmem:[#allocation228_spill] sm:$0xff] %v15089_v21  ;;  %19611 = vst [vmem:[#allocation229_spill] sm:$0xff] %v15091_v47  ;;  %v7243_v15 = vmul.f32 %v14648_v19, %v6871_v50  ;;  %v15094_v54 = vld [vmem:[#allocation2 + $0x6a] sm:$0xff]  ;;  %v7861_v24 = vmul.f32 %v15059_v35, %v9994_v2  ;;  %v7705_v33 = vadd.f32 1.0, %v7673_v55  ;;  %v7073_v4 = vmul.f32 %v14597_v62, %v6577_v22 }
 0x3c1   : > { %19612 = vst [vmem:[#allocation230_spill] sm:$0xff] %v15094_v54  ;;  %6064 = vst.msk [vmem:[#allocation2 + $0x81] sm:$0xff] %vm19068_vm0, %v15086_v0  ;;  %v15102_v28 = vadd.f32 %v7515_v49, %v7477_v38  ;;  %v19614_v11 = vld [vmem:[#allocation102_spill] sm:$0xff]  ;;  %12035 = vpow2.f32 %v8151_v40  ;;  %v8089_v0 = vsub.f32 0.0, %v7641_v43  ;;  %v6839_v47 = vadd.f32 %v6807_v37, %v6707_v3  ;;  %v6773_v49 = vld [vmem:[#allocation2 + $0x71] sm:$0xff] }
 0x3c2   : > { %8482 = vst.msk [vmem:[#allocation2 + $0x68] sm:$0xff] %vm19068_vm0, %v19385_v34  ;;  %v19615_v10 = vpack.i.bf16 %v19613_v48, %v19614_v11  ;;  %v6907_v52 = vmul.f32 %v14589_v7, %v6871_v50  ;;  %v7893_v54 = vadd.f32 1.4214138, %v7861_v24  ;;  %v15113_v2 = vmul.f32 0.5, %v14892_v60  ;;  %v15118_v55 = vpop.permute.xlu0 %1306  ;;  %v6873_v50 = vld [vmem:[#allocation2 + $0x72] sm:$0xff] }
 0x3c3   : > { %12037 = vrcp.f32 %v7705_v33  ;;  %v15116_v38 = vmul.f32 0.70710677, %v15102_v28  ;;  %19616 = vst [vmem:[#allocation101_spill] sm:$0xff] %v15118_v55  ;;  %v15120_v21 = vpop.eup %12033  ;;  %v8155_v48 = vmul.f32 1.442695, %v8119_v61  ;;  %v7307_v11 = vadd.f32 %v7243_v15, %v7205_v41  ;;  %6065 = vst.msk [vmem:[#allocation2 + $0x89] sm:$0xff] %vm19068_vm0, %v15118_v55 }
 0x3c4   : > { %11672 = vrot.lane.b32.xlu0 %v19615_v10, %s12432_s12  ;;  %v6613_v40 = vmul.f32 %v14551_v59, %v6577_v22  ;;  %v7345_v3 = vmul.f32 %v14660_v14, %v6577_v22  ;;  %v7925_v60 = vmul.f32 %v15059_v35, %v7893_v54  ;;  %v7799_v37 = vmul.f32 1.0614054, %v15120_v21  ;;  %8483 = vst.msk [vmem:[#allocation2 + $0x70] sm:$0xff] %vm19068_vm0, %v19385_v34 }
 0x3c5   : > { %v7643_v24 = vand.u32 2147483647, %v15116_v38  ;;  %v7105_v33 = vsel %vm15018_vm6, %v7073_v4, 0.0  ;;  %v8121_v61 = vmul.f32 %v8089_v0, %v7641_v43  ;;  %v7035_v41 = vadd.f32 %v6907_v52, %v6839_v47  ;;  %v15149_v52 = vld [vmem:[#allocation2 + $0x78] sm:$0xff] }
 0x3c6   : > { %v7377_v22 = vsel %vm14954_vm5, %v7345_v3, 0.0  ;;  %v7447_v54 = vmul.f32 %v14672_v13, %v6773_v49  ;;  %v19617_v15 = vand.u32 15, %v14982_v20  ;;  %v19618_v10 = vmov 0  ;;  %v15144_v39 = vpop.permute.xlu0 %1308  ;;  %19622 = vst [vmem:[#allocation232_spill] sm:$0xff] %v15149_v52  ;;  %v15151_v3 = vld [vmem:[#allocation2 + $0x79] sm:$0xff] }
 0x3c7   : > { %v10026_v4 = vadd.f32 -0.28449672, %v7925_v60  ;;  %v9996_v55 = vadd.f32 -1.4531521, %v7799_v37  ;;  %v7675_v1 = vmul.f32 0.3275911, %v7643_v24  ;;  %v7409_v56 = vadd.f32 %v7377_v22, %v7307_v11 }
 0x3c8   : > { %2288 = vrot.lane.b32.xlu0 %v19273_v46, %s12433_s22  ;;  %vm15140_vm9 = vcmp.ne.s32.totalorder %v19617_v15, 0  ;;  %19621 = vst [vmem:[#allocation231_spill] sm:$0xff] %v15144_v39  ;;  %v6709_v0 = vsel %vm15075_vm8, %v6613_v40, 0.0  ;;  %v6809_v43 = vmul.f32 %v14558_v12, %v6773_v49  ;;  %v7137_v47 = vadd.f32 %v7105_v33, %v7035_v41  ;;  %19623 = vst [vmem:[#allocation233_spill] sm:$0xff] %v15151_v3  ;;  %v15154_v15 = vld [vmem:[#allocation2 + $0x7a] sm:$0xff]  ;;  %v19625_v33 = vld [vmem:[#allocation103_spill] sm:$0xff] }
 0x3c9   : > { %v19619_v10 = vsel %vm15140_vm9, 4294967295, %v19618_v10  ;;  %v7517_v20 = vmul.f32 %v14685_v25, %v6873_v50  ;;  %19624 = vst [vmem:[#allocation234_spill] sm:$0xff] %v15154_v15  ;;  %6066 = vst.msk [vmem:[#allocation2 + $0x91] sm:$0xff] %vm19068_vm0, %v15144_v39  ;;  %v7989_v11 = vmul.f32 %v15059_v35, %v10026_v4  ;;  %v7863_v60 = vmul.f32 %v15120_v21, %v9996_v55  ;;  %v6579_v39 = vld [vmem:[#allocation2 + $0x80] sm:$0xff] }
 0x3ca   : > { %19620 = vst [vmem:[#allocation102_spill] sm:$0xff] %v19619_v10  ;;  %v7707_v37 = vadd.f32 1.0, %v7675_v1  ;;  %v7479_v40 = vadd.f32 %v7447_v54, %v7409_v56  ;;  %8484 = vst.msk [vmem:[#allocation2 + $0x78] sm:$0xff] %vm19068_vm0, %v19385_v34  ;;  %v19626_v41 = vpack.i.bf16 %v13775_v36, %v19625_v33  ;;  %12039 = vpow2.f32 %v8155_v48  ;;  %v15169_v56 = vpop.permute.xlu0 %1310 }
 0x3cb   : > { %v8159_v22 = vmul.f32 1.442695, %v8121_v61  ;;  %v8091_v57 = vsub.f32 0.0, %v7643_v24  ;;  %v7175_v46 = vmul.f32 %v14635_v42, %v6773_v49  ;;  %v8021_v4 = vadd.f32 0.2548296, %v7989_v11  ;;  %19628 = vst [vmem:[#allocation235_spill] sm:$0xff] %v15169_v56  ;;  %v12036_v55 = vpop.eup %12035 }
 0x3cc   : > { %11682 = vrot.lane.b32.xlu0 %v19626_v41, %s12434_s19  ;;  %v7895_v3 = vadd.f32 1.4214138, %v7863_v60  ;;  %12041 = vrcp.f32 %v7707_v37  ;;  %v15167_v1 = vadd.f32 %v7517_v20, %v7479_v40  ;;  %vm8277_vm10 = vcmp.lt.f32.partialorder %v14910_v30, 0.0  ;;  %v15174_v61 = vld [vmem:[#allocation2 + $0x81] sm:$0xff]  ;;  %6067 = vst.msk [vmem:[#allocation2 + $0x99] sm:$0xff] %vm19068_vm0, %v15169_v56 }
 0x3cd   : > { %v6841_v54 = vadd.f32 %v6809_v43, %v6709_v0  ;;  %v7207_v15 = vadd.f32 %v7175_v46, %v7137_v47  ;;  %v6909_v36 = vmul.f32 %v14589_v7, %v6873_v50  ;;  %v7245_v48 = vmul.f32 %v14648_v19, %v6873_v50  ;;  %v15176_v49 = vld [vmem:[#allocation2 + $0x82] sm:$0xff]  ;;  %v15180_v20 = vpop.eup %12037  ;;  %v19631_v43 = vld [vmem:[#allocation104_spill] sm:$0xff] }
 0x3ce   : > { %19627 = vst [vmem:[#allocation103_spill] sm:$0xff] %v15167_v1  ;;  %v8053_v11 = vmul.f32 %v15059_v35, %v8021_v4  ;;  %v7927_v60 = vmul.f32 %v15120_v21, %v7895_v3  ;;  %v15185_v0 = vmul.f32 0.70710677, %v15167_v1  ;;  %v15188_v46 = vmul.f32 %v14551_v59, %v6579_v39  ;;  %8485 = vst.msk [vmem:[#allocation2 + $0x80] sm:$0xff] %vm19068_vm0, %v19385_v34  ;;  %v19630_v50 = vld [vmem:[#allocation105_spill] sm:$0xff]  ;;  %v15202_v56 = vpop.permute.xlu0 %1312 }
 0x3cf   : > { %v19632_v47 = vpack.i.bf16 %v19630_v50, %v19631_v43  ;;  %v15197_v37 = vmul.f32 0.5, %v14964_v23  ;;  %v7801_v35 = vmul.f32 1.0614054, %v15180_v20  ;;  %12043 = vpow2.f32 %v8159_v22  ;;  %19633 = vst [vmem:[#allocation105_spill] sm:$0xff] %v15202_v56  ;;  %v15205_v43 = vld [vmem:[#allocation2 + $0x88] sm:$0xff]  ;;  %6068 = vst.msk [vmem:[#allocation2 + $0xa1] sm:$0xff] %vm19068_vm0, %v15202_v56 }
 0x3d0   : > { %19629 = vst [vmem:[#allocation236_spill] sm:$0xff] %v15185_v0  ;;  %v7075_v3 = vmul.f32 %v14597_v62, %v6579_v39  ;;  %v8213_v40 = vmul.f32 %v12036_v55, %v8053_v11  ;;  %v10028_v33 = vadd.f32 -0.28449672, %v7927_v60  ;;  %v8123_v41 = vmul.f32 %v8091_v57, %v7643_v24  ;;  %19634 = vst [vmem:[#allocation104_spill] sm:$0xff] %v15205_v43  ;;  %v15207_v23 = vld [vmem:[#allocation2 + $0x89] sm:$0xff] }
 0x3d1   : > { %11687 = vrot.lane.b32.xlu0 %v19632_v47, %s12434_s19  ;;  %v7645_v4 = vand.u32 2147483647, %v15185_v0  ;;  %v9998_v52 = vadd.f32 -1.4531521, %v7801_v35  ;;  %v7037_v1 = vadd.f32 %v6909_v36, %v6841_v54  ;;  %v7309_v31 = vadd.f32 %v7245_v48, %v7207_v15  ;;  %19635 = vst [vmem:[#allocation237_spill] sm:$0xff] %v15207_v23  ;;  %v15209_v47 = vld [vmem:[#allocation2 + $0x8a] sm:$0xff] }
 0x3d2   : > { %v7347_v50 = vmul.f32 %v14660_v14, %v6579_v39  ;;  %19636 = vst [vmem:[#allocation238_spill] sm:$0xff] %v15209_v47  ;;  %v8245_v22 = vsub.f32 1.0, %v8213_v40  ;;  %v7991_v57 = vmul.f32 %v15120_v21, %v10028_v33  ;;  %v6711_v55 = vsel %vm15140_vm9, %v15188_v46, 0.0  ;;  %8486 = vst.msk [vmem:[#allocation2 + $0x88] sm:$0xff] %vm19068_vm0, %v19385_v34  ;;  %v19637_v39 = vld [vmem:[#allocation107_spill] sm:$0xff]  ;;  %v19638_v15 = vld [vmem:[#allocation106_spill] sm:$0xff]  ;;  %v15230_v56 = vpop.permute.xlu0 %1314 }
 0x3d3   : > { %v7677_v24 = vmul.f32 0.3275911, %v7645_v4  ;;  %v19639_v54 = vpack.i.bf16 %v19637_v39, %v19638_v15  ;;  %v7865_v36 = vmul.f32 %v15180_v20, %v9998_v52  ;;  %v6811_v48 = vmul.f32 %v14558_v12, %v15174_v61  ;;  %19640 = vst [vmem:[#allocation107_spill] sm:$0xff] %v15230_v56  ;;  %v6581_v47 = vld [vmem:[#allocation2 + $0x90] sm:$0xff]  ;;  %6069 = vst.msk [vmem:[#allocation2 + $0xa9] sm:$0xff] %vm19068_vm0, %v15230_v56 }
 0x3d4   : > { %v7107_v11 = vsel %vm15075_vm8, %v7075_v3, 0.0  ;;  %v7379_v60 = vsel %vm15018_vm6, %v7347_v50, 0.0  ;;  %v8309_v46 = vsub.f32 0.0, %v8245_v22  ;;  %v8023_v35 = vadd.f32 0.2548296, %v7991_v57  ;;  %v12040_v23 = vpop.eup %12039  ;;  %v15236_v3 = vld [vmem:[#allocation2 + $0x91] sm:$0xff] }
 0x3d5   : > { %11692 = vrot.lane.b32.xlu0 %v19639_v54, %s12434_s19  ;;  %v7709_v40 = vadd.f32 1.0, %v7677_v24  ;;  %v8093_v33 = vsub.f32 0.0, %v7645_v4  ;;  %v7897_v39 = vadd.f32 1.4214138, %v7865_v36  ;;  %v7411_v15 = vadd.f32 %v7379_v60, %v7309_v31  ;;  %v15238_v26 = vld [vmem:[#allocation2 + $0x92] sm:$0xff]  ;;  %v19641_v36 = vld [vmem:[#allocation109_spill] sm:$0xff] }
 0x3d6   : > { %v7449_v52 = vmul.f32 %v14672_v13, %v15174_v61  ;;  %v7519_v54 = vmul.f32 %v14685_v25, %v15176_v49  ;;  %v15242_v50 = vpop.eup %12041  ;;  %v8341_v57 = vsel %vm8277_vm10, %v8309_v46, %v8245_v22  ;;  %v8055_v31 = vmul.f32 %v15120_v21, %v8023_v35  ;;  %8487 = vst.msk [vmem:[#allocation2 + $0x90] sm:$0xff] %vm19068_vm0, %v19385_v34  ;;  %v19642_v60 = vld [vmem:[#allocation108_spill] sm:$0xff] }
 0x3d7   : > { %12045 = vrcp.f32 %v7709_v40  ;;  %v7139_v24 = vadd.f32 %v7107_v11, %v7037_v1  ;;  %v19643_v43 = vpack.i.bf16 %v19641_v36, %v19642_v60  ;;  %v8405_v0 = vadd.f32 1.0, %v8341_v57  ;;  %v15263_v35 = vld [vmem:[#allocation2 + $0x98] sm:$0xff]  ;;  %v15290_v36 = vld [vmem:[#allocation2 + $0xa0] sm:$0xff] }
 0x3d8   : > { %v7929_v56 = vmul.f32 %v15180_v20, %v7897_v39  ;;  %v7803_v51 = vmul.f32 1.0614054, %v15242_v50  ;;  %v7481_v27 = vadd.f32 %v7449_v52, %v7411_v15  ;;  %v19644_v30 = vand.u32 15, %v15005_v53  ;;  %19648 = vst [vmem:[#allocation109_spill] sm:$0xff] %v15263_v35  ;;  %v15267_v40 = vld [vmem:[#allocation2 + $0x9a] sm:$0xff] }
 0x3d9   : > { %11697 = vrot.lane.b32.xlu0 %v19643_v43, %s12434_s19  ;;  %v19645_v21 = vmov 0  ;;  %v8215_v1 = vmul.f32 %v12040_v23, %v8055_v31  ;;  %v8163_v22 = vmul.f32 1.442695, %v8123_v41  ;;  %v8125_v11 = vmul.f32 %v8093_v33, %v7645_v4  ;;  %v15265_v43 = vld [vmem:[#allocation2 + $0x99] sm:$0xff]  ;;  %19650 = vst [vmem:[#allocation239_spill] sm:$0xff] %v15267_v40  ;;  %v12044_v39 = vpop.eup %12043  ;;  %v19651_v23 = vld [vmem:[#allocation111_spill] sm:$0xff] }
 0x3da   : > { %vm15257_vm14 = vcmp.ne.s32.totalorder %v19644_v30, 0  ;;  %v7177_v46 = vmul.f32 %v14635_v42, %v15174_v61  ;;  %19649 = vst [vmem:[#allocation108_spill] sm:$0xff] %v15265_v43  ;;  %v8437_v15 = vmul.f32 %v8405_v0, %v15113_v2  ;;  %v10030_v53 = vadd.f32 -0.28449672, %v7929_v56  ;;  %8488 = vst.msk [vmem:[#allocation2 + $0x98] sm:$0xff] %vm19068_vm0, %v19385_v34  ;;  %v19652_v33 = vld [vmem:[#allocation110_spill] sm:$0xff] }
 0x3db   : > { %v19646_v21 = vsel %vm15257_vm14, 4294967295, %v19645_v21  ;;  %v10000_v52 = vadd.f32 -1.4531521, %v7803_v51  ;;  %v15270_v57 = vadd.f32 %v7519_v54, %v7481_v27  ;;  %v8247_v41 = vsub.f32 1.0, %v8215_v1  ;;  %19654 = vst [vmem:[#allocation111_spill] sm:$0xff] %v15290_v36  ;;  %v15292_v60 = vld [vmem:[#allocation2 + $0xa1] sm:$0xff] }
 0x3dc   : > { %19647 = vst [vmem:[#allocation106_spill] sm:$0xff] %v19646_v21  ;;  %vm8279_vm10 = vcmp.lt.f32.partialorder %v14985_v18, 0.0  ;;  %v6843_v61 = vadd.f32 %v6811_v48, %v6711_v55  ;;  %v6911_v4 = vmul.f32 %v14589_v7, %v15176_v49  ;;  %v19653_v31 = vpack.i.bf16 %v19651_v23, %v19652_v33  ;;  %8508 = vst.msk [vmem:[#allocation2 + $0x21] sm:$0xff] %vm19068_vm0, %v8437_v15  ;;  %v15294_v30 = vld [vmem:[#allocation2 + $0xa2] sm:$0xff] }
 0x3dd   : > { %v7993_v2 = vmul.f32 %v15180_v20, %v10030_v53  ;;  %v7867_v51 = vmul.f32 %v15242_v50, %v10000_v52  ;;  %v7209_v27 = vadd.f32 %v7177_v46, %v7139_v24  ;;  %v15284_v56 = vmul.f32 0.70710677, %v15270_v57  ;;  %19655 = vst [vmem:[#allocation110_spill] sm:$0xff] %v15292_v60  ;;  %19656 = vst [vmem:[#allocation240_spill] sm:$0xff] %v15294_v30  ;;  %v19657_v52 = vld [vmem:[#allocation112_spill] sm:$0xff]  ;;  %v19925_v21 = vld [vmem:[#allocation177_spill] sm:$0xff] }
 0x3de   : > { %11702 = vrot.lane.b32.xlu0 %v19653_v31, %s12434_s19  ;;  %v8311_v0 = vsub.f32 0.0, %v8247_v41  ;;  %v8167_v55 = vmul.f32 1.442695, %v8125_v11  ;;  %v7247_v48 = vmul.f32 %v14648_v19, %v15176_v49  ;;  %v7077_v54 = vmul.f32 %v14597_v62, %v6581_v47  ;;  %8489 = vst.msk [vmem:[#allocation2 + $0xa0] sm:$0xff] %vm19068_vm0, %v19385_v34 }
 0x3df   : > { %v8025_v1 = vadd.f32 0.2548296, %v7993_v2  ;;  %v7899_v24 = vadd.f32 1.4214138, %v7867_v51  ;;  %12047 = vpow2.f32 %v8163_v22  ;;  %v15297_v46 = vand.u32 2147483647, %v15284_v56 }
 0x3e0   : > { %v8343_v49 = vsel %vm8279_vm10, %v8311_v0, %v8247_v41  ;;  %v7039_v11 = vadd.f32 %v6911_v4, %v6843_v61  ;;  %v6617_v15 = vmul.f32 %v14551_v59, %v6581_v47  ;;  %v7349_v53 = vmul.f32 %v14660_v14, %v6581_v47 }
 0x3e1   : > { %v19658_v23 = vpack.i.bf16 %v13829_v58, %v19657_v52  ;;  %v8407_v22 = vadd.f32 1.0, %v8343_v49  ;;  %v8057_v33 = vmul.f32 %v15180_v20, %v8025_v1  ;;  %v7931_v31 = vmul.f32 %v15242_v50, %v7899_v24  ;;  %v15312_v51 = vpop.eup %12045 }
 0x3e2   : > { %v7679_v2 = vmul.f32 0.3275911, %v15297_v46  ;;  %v7311_v18 = vadd.f32 %v7247_v48, %v7209_v27  ;;  %v6813_v41 = vmul.f32 %v14558_v12, %v15236_v3  ;;  %v7109_v47 = vsel %vm15140_vm9, %v7077_v54, 0.0 }
 0x3e3   : > { %11707 = vrot.lane.b32.xlu0 %v19658_v23, %s12434_s19  ;;  %v7381_v58 = vsel %vm15075_vm8, %v7349_v53, 0.0  ;;  %v8439_v61 = vmul.f32 %v8407_v22, %v15197_v37  ;;  %v8217_v4 = vmul.f32 %v12044_v39, %v8057_v33  ;;  %v10032_v20 = vadd.f32 -0.28449672, %v7931_v31 }
 0x3e4   : > { %v7805_v0 = vmul.f32 1.0614054, %v15312_v51  ;;  %v7711_v1 = vadd.f32 1.0, %v7679_v2  ;;  %v6713_v24 = vsel %vm15257_vm14, %v6617_v15, 0.0  ;;  %v7413_v27 = vadd.f32 %v7381_v58, %v7311_v18 }
 0x3e5   : > { %v7451_v48 = vmul.f32 %v14672_v13, %v15236_v3  ;;  %8510 = vst.msk [vmem:[#allocation2 + $0x31] sm:$0xff] %vm19068_vm0, %v8439_v61  ;;  %v8249_v54 = vsub.f32 1.0, %v8217_v4  ;;  %v7995_v49 = vmul.f32 %v15242_v50, %v10032_v20  ;;  %v7521_v37 = vmul.f32 %v14685_v25, %v15238_v26 }
 0x3e6   : > { %v10002_v53 = vadd.f32 -1.4531521, %v7805_v0  ;;  %v8377_v39 = vmul.f32 0.5, %v15034_v17  ;;  %12049 = vrcp.f32 %v7711_v1  ;;  %v7141_v52 = vadd.f32 %v7109_v47, %v7039_v11 }
 0x3e7   : > { %v7483_v23 = vadd.f32 %v7451_v48, %v7413_v27  ;;  %vm8281_vm10 = vcmp.lt.f32.partialorder %v15052_v6, 0.0  ;;  %v8313_v15 = vsub.f32 0.0, %v8249_v54  ;;  %v8027_v22 = vadd.f32 0.2548296, %v7995_v49 }
 0x3e8   : > { %v7869_v33 = vmul.f32 %v15312_v51, %v10002_v53  ;;  %v6845_v31 = vadd.f32 %v6813_v41, %v6713_v24  ;;  %v7179_v2 = vmul.f32 %v14635_v42, %v15236_v3  ;;  %v6913_v25 = vmul.f32 %v14589_v7, %v15238_v26 }
 0x3e9   : > { %v15335_v18 = vadd.f32 %v7521_v37, %v7483_v23  ;;  %v12048_v58 = vpop.eup %12047  ;;  %v8345_v17 = vsel %vm8281_vm10, %v8313_v15, %v8249_v54  ;;  %v8059_v11 = vmul.f32 %v15242_v50, %v8027_v22  ;;  %12051 = vpow2.f32 %v8167_v55 }
 0x3ea   : > { %v7901_v47 = vadd.f32 1.4214138, %v7869_v33  ;;  %v8409_v6 = vadd.f32 1.0, %v8345_v17  ;;  %v8095_v61 = vsub.f32 0.0, %v15297_v46  ;;  %v7211_v4 = vadd.f32 %v7179_v2, %v7141_v52  ;;  %v15376_v2 = vld [vmem:[%s18749_s5 + $0x8] ss:$0 sm:$0xff] }
 0x3eb   : > { %v15342_v41 = vmul.f32 0.70710677, %v15335_v18  ;;  %v8219_v20 = vmul.f32 %v12048_v58, %v8059_v11  ;;  %v7249_v0 = vmul.f32 %v14648_v19, %v15238_v26  ;;  %v7079_v1 = vmul.f32 %v14597_v62, %v15290_v36 }
 0x3ec   : > { %v7933_v3 = vmul.f32 %v15312_v51, %v7901_v47  ;;  %v8441_v24 = vmul.f32 %v8409_v6, %v8377_v39  ;;  %v7041_v55 = vadd.f32 %v6913_v25, %v6845_v31  ;;  %v19659_v27 = vsel %vm15041_vm7, %v15047_v9, 0.0 }
 0x3ed   : > { %v7649_v50 = vand.u32 2147483647, %v15342_v41  ;;  %v7028_v48 = vadd.f32 %v19659_v27, %v14887_v29  ;;  %v8251_v54 = vsub.f32 1.0, %v8219_v20  ;;  %v7111_v53 = vsel %vm15257_vm14, %v7079_v1, 0.0 }
 0x3ee   : > { %v10034_v49 = vadd.f32 -0.28449672, %v7933_v3  ;;  %v7066_v26 = vmul.f32 %v14597_v62, %v14878_v45  ;;  %8512 = vst.msk [vmem:[#allocation2 + $0x41] sm:$0xff] %vm19068_vm0, %v8441_v24  ;;  %vm8283_vm10 = vcmp.lt.f32.partialorder %v15116_v38, 0.0  ;;  %v15361_v39 = vadd.f32 %v7111_v53, %v7041_v55  ;;  %v19661_v53 = vld [vmem:[#allocation225_spill] sm:$0xff] }
 0x3ef   : > { %v7681_v37 = vmul.f32 0.3275911, %v7649_v50  ;;  %v7351_v52 = vmul.f32 %v14660_v14, %v15290_v36  ;;  %v8315_v9 = vsub.f32 0.0, %v8251_v54  ;;  %v8127_v23 = vmul.f32 %v8095_v61, %v15297_v46 }
 0x3f0   : > { %19660 = vst [vmem:[#allocation112_spill] sm:$0xff] %v15361_v39  ;;  %v7997_v29 = vmul.f32 %v15312_v51, %v10034_v49  ;;  %v7313_v15 = vadd.f32 %v7249_v0, %v7211_v4  ;;  %v15367_v22 = vpop.eup %12049  ;;  %v7453_v38 = vmul.f32 %v14672_v13, %v15292_v60  ;;  %v7523_v25 = vmul.f32 %v15376_v2, %v15294_v30 }
 0x3f1   : > { %v7713_v33 = vadd.f32 1.0, %v7681_v37  ;;  %v7383_v31 = vsel %vm15140_vm9, %v7351_v52, 0.0  ;;  %v8347_v58 = vsel %vm8283_vm10, %v8315_v9, %v8251_v54  ;;  %v7807_v17 = vmul.f32 1.0614054, %v15367_v22  ;;  %v19663_v52 = vld [vmem:[#allocation93_spill] sm:$0xff]  ;;  %v19664_v9 = vld [vmem:[#allocation96_spill] sm:$0xff] }
 0x3f2   : > { %v8029_v46 = vadd.f32 0.2548296, %v7997_v29  ;;  %v7415_v11 = vadd.f32 %v7383_v31, %v7313_v15  ;;  %v8379_v47 = vmul.f32 0.5, %v15102_v28  ;;  %v8411_v6 = vadd.f32 1.0, %v8347_v58  ;;  %v19665_v15 = vld [vmem:[#allocation87_spill] sm:$0xff] }
 0x3f3   : > { %12053 = vrcp.f32 %v7713_v33  ;;  %v7130_v61 = vadd.f32 %v7066_v26, %v7028_v48  ;;  %v12052_v4 = vpop.eup %12051  ;;  %v10004_v3 = vadd.f32 -1.4531521, %v7807_v17  ;;  %v7238_v1 = vmul.f32 %v14648_v19, %v14883_v63 }
 0x3f4   : > { %v8061_v20 = vmul.f32 %v15312_v51, %v8029_v46  ;;  %v7485_v0 = vadd.f32 %v7453_v38, %v7415_v11  ;;  %v8443_v24 = vmul.f32 %v8411_v6, %v8379_v47  ;;  %v8171_v55 = vmul.f32 1.442695, %v8127_v23  ;;  %v19666_v6 = vld [vmem:[#allocation89_spill] sm:$0xff] }
 0x3f5   : > { %v7168_v27 = vmul.f32 %v14635_v42, %v14880_v32  ;;  %v7400_v54 = vadd.f32 %v14946_v44, %v14942_v16  ;;  %v7871_v49 = vmul.f32 %v15367_v22, %v10004_v3  ;;  %v7268_v26 = vsel %vm14809_vm2, %v19661_v53, 0.0  ;;  %v19669_v53 = vld [vmem:[#allocation103_spill] sm:$0xff] }
 0x3f6   : > { %v8221_v28 = vmul.f32 %v12052_v4, %v8061_v20  ;;  %v15390_v48 = vadd.f32 %v7523_v25, %v7485_v0  ;;  %8514 = vst.msk [vmem:[#allocation2 + $0x51] sm:$0xff] %vm19068_vm0, %v8443_v24  ;;  %v8097_v37 = vsub.f32 0.0, %v7649_v50  ;;  %v7198_v29 = vadd.f32 %v19664_v9, %v19663_v52  ;;  %v19667_v4 = vld [vmem:[#allocation236_spill] sm:$0xff]  ;;  %v19668_v0 = vld [vmem:[#allocation97_spill] sm:$0xff] }
 0x3f7   : > { %v7200_v23 = vadd.f32 %v7168_v27, %v7130_v61  ;;  %v7438_v33 = vmul.f32 %v14672_v13, %v19665_v15  ;;  %v7903_v16 = vadd.f32 1.4214138, %v7871_v49  ;;  %v7270_v38 = vsel %vm15041_vm7, %v7238_v1, 0.0 }
 0x3f8   : > { %v8253_v44 = vsub.f32 1.0, %v8221_v28  ;;  %v15401_v31 = vmul.f32 0.70710677, %v15390_v48  ;;  %v7338_v25 = vmul.f32 %v14660_v14, %v14878_v45  ;;  %12055 = vpow2.f32 %v8171_v55 }
 0x3f9   : > { %v7300_v58 = vadd.f32 %v7268_v26, %v7198_v29  ;;  %v7470_v46 = vadd.f32 %v7438_v33, %v7400_v54  ;;  %v7935_v11 = vmul.f32 %v15367_v22, %v7903_v16  ;;  %v7508_v61 = vmul.f32 %v15376_v2, %v19666_v6 }
 0x3fa   : > { %v8317_v17 = vsub.f32 0.0, %v8253_v44  ;;  %v7651_v47 = vand.u32 2147483647, %v15401_v31  ;;  %vm8285_vm10 = vcmp.lt.f32.partialorder %v19667_v4, 0.0  ;;  %v8129_v20 = vmul.f32 %v8097_v37, %v7649_v50 }
 0x3fb   : > { %v7302_v3 = vadd.f32 %v7270_v38, %v7200_v23  ;;  %v7340_v1 = vmul.f32 %v14660_v14, %v19668_v0  ;;  %v7440_v24 = vmul.f32 %v14672_v13, %v14880_v32  ;;  %v10036_v27 = vadd.f32 -0.28449672, %v7935_v11  ;;  %v19671_v38 = vld [vmem:[#allocation216_spill] sm:$0xff] }
 0x3fc   : > { %v8349_v55 = vsel %vm8285_vm10, %v8317_v17, %v8253_v44  ;;  %v7683_v54 = vmul.f32 0.3275911, %v7651_v47  ;;  %v7510_v49 = vmul.f32 %v15376_v2, %v14883_v63  ;;  %v8381_v26 = vmul.f32 0.5, %v19669_v53 }
 0x3fd   : > { %v15416_v28 = vpop.eup %12053  ;;  %v8413_v52 = vadd.f32 1.0, %v8349_v55  ;;  %v7402_v9 = vadd.f32 %v7338_v25, %v7300_v58  ;;  %v7999_v50 = vmul.f32 %v15367_v22, %v10036_v27  ;;  %v7540_v15 = vsel %vm14601_vm12, %v7508_v61, 0.0  ;;  %v19672_v55 = vld [vmem:[#allocation218_spill] sm:$0xff] }
 0x3fe   : > { %v7809_v37 = vmul.f32 1.0614054, %v15416_v28  ;;  %v7715_v29 = vadd.f32 1.0, %v7683_v54  ;;  %v8175_v44 = vmul.f32 1.442695, %v8129_v20  ;;  %v7404_v16 = vadd.f32 %v7340_v1, %v7302_v3 }
 0x3ff   : > { %v8445_v33 = vmul.f32 %v8413_v52, %v8381_v26  ;;  %v7442_v17 = vmul.f32 %v14672_v13, %v19671_v38  ;;  %v8031_v11 = vadd.f32 0.2548296, %v7999_v50  ;;  %v8099_v4 = vsub.f32 0.0, %v7651_v47 }
 0x400   : > { %v10006_v6 = vadd.f32 -1.4531521, %v7809_v37  ;;  %12057 = vrcp.f32 %v7715_v29  ;;  %v7472_v25 = vadd.f32 %v7440_v24, %v7402_v9  ;;  %v7512_v27 = vmul.f32 %v15376_v2, %v19672_v55  ;;  %v19673_v24 = vld [vmem:[#allocation70_spill] sm:$0xff] }
 0x401   : > { %8516 = vst.msk [vmem:[#allocation2 + $0x61] sm:$0xff] %vm19068_vm0, %v8445_v33  ;;  %v7474_v58 = vadd.f32 %v7442_v17, %v7404_v16  ;;  %v7542_v61 = vsel %vm14809_vm2, %v7510_v49, 0.0  ;;  %v8063_v20 = vmul.f32 %v15367_v22, %v8031_v11  ;;  %v15434_v1 = vadd.f32 %v7540_v15, %v7470_v46 }
 0x402   : > { %v7873_v3 = vmul.f32 %v15416_v28, %v10006_v6  ;;  %v12056_v54 = vpop.eup %12055  ;;  %v7544_v53 = vsel %vm15041_vm7, %v7512_v27, 0.0  ;;  %v15438_v26 = vadd.f32 %v7542_v61, %v7472_v25  ;;  %v6090_v52 = vadd.s32 56, %v19673_v24 }
 0x403   : > { %v8223_v9 = vmul.f32 %v12056_v54, %v8063_v20  ;;  %v15441_v37 = vadd.f32 %v7544_v53, %v7474_v58  ;;  %v15444_v49 = vmul.f32 0.70710677, %v15434_v1  ;;  %12059 = vpow2.f32 %v8175_v44 }
 0x404   : > { %v7905_v50 = vadd.f32 1.4214138, %v7873_v3  ;;  %v8131_v22 = vmul.f32 %v8099_v4, %v7651_v47  ;;  %v15447_v46 = vmul.f32 0.70710677, %v15438_v26  ;;  %v6168_v11 = vand.u32 15, %v6090_v52 }
 0x405   : > { %v8255_v29 = vsub.f32 1.0, %v8223_v9  ;;  %v15451_v33 = vmul.f32 0.70710677, %v15441_v37  ;;  %v7636_v16 = vand.u32 2147483647, %v15444_v49  ;;  %vm8287_vm10 = vcmp.lt.f32.partialorder %v15284_v56, 0.0 }
 0x406   : > { %v7937_v15 = vmul.f32 %v15416_v28, %v7905_v50  ;;  %v7638_v17 = vand.u32 2147483647, %v15447_v46  ;;  %v8383_v44 = vmul.f32 0.5, %v15270_v57  ;;  %v8179_v3 = vmul.f32 1.442695, %v8131_v22 }
 0x407   : > { %v8319_v6 = vsub.f32 0.0, %v8255_v29  ;;  %v7640_v4 = vand.u32 2147483647, %v15451_v33  ;;  %v7668_v25 = vmul.f32 0.3275911, %v7636_v16  ;;  %v8084_v54 = vsub.f32 0.0, %v7636_v16 }
 0x408   : > { %v10038_v47 = vadd.f32 -0.28449672, %v7937_v15  ;;  %v7670_v58 = vmul.f32 0.3275911, %v7638_v17  ;;  %v8086_v57 = vsub.f32 0.0, %v7638_v17  ;;  %vm8278_vm9 = vcmp.lt.f32.partialorder %v15447_v46, 0.0 }
 0x409   : > { %v8351_v61 = vsel %vm8287_vm10, %v8319_v6, %v8255_v29  ;;  %v7672_v9 = vmul.f32 0.3275911, %v7640_v4  ;;  %v7700_v56 = vadd.f32 1.0, %v7668_v25  ;;  %v8088_v15 = vsub.f32 0.0, %v7640_v4 }
 0x40a   : > { %v15458_v27 = vpop.eup %12057  ;;  %v8001_v20 = vmul.f32 %v15416_v28, %v10038_v47  ;;  %v8415_v53 = vadd.f32 1.0, %v8351_v61  ;;  %v7702_v10 = vadd.f32 1.0, %v7670_v58  ;;  %v8116_v29 = vmul.f32 %v8084_v54, %v7636_v16 }
 0x40b   : > { %v7811_v52 = vmul.f32 1.0614054, %v15458_v27  ;;  %v7704_v51 = vadd.f32 1.0, %v7672_v9  ;;  %12061 = vrcp.f32 %v7700_v56  ;;  %v15466_v47 = vadd.s32 72, %v19673_v24  ;;  %v10130_v56 = vpop.f32.mrb[0].mxu1 }
 0x40c   : > { %v8033_v50 = vadd.f32 0.2548296, %v8001_v20  ;;  %v8447_v8 = vmul.f32 %v8415_v53, %v8383_v44  ;;  %12063 = vrcp.f32 %v7702_v10  ;;  %v8118_v44 = vmul.f32 %v8086_v57, %v7638_v17 }
 0x40d   : > { %v10008_v5 = vadd.f32 -1.4531521, %v7811_v52  ;;  %v12060_v6 = vpop.eup %12059  ;;  %12065 = vrcp.f32 %v7704_v51  ;;  %vm15470_vm10 = vcmp.ne.s32.totalorder %v6168_v11, 15  ;;  %v19674_v58 = vmov 0 }
 0x40e   : > { %v8065_v23 = vmul.f32 %v15416_v28, %v8033_v50  ;;  %8518 = vst.msk [vmem:[#allocation2 + $0x71] sm:$0xff] %vm19068_vm0, %v8447_v8  ;;  %v19675_v58 = vsel %vm15470_vm10, 4294967295, %v19674_v58  ;;  %12067 = vpow2.f32 %v8179_v3  ;;  %v8120_v10 = vmul.f32 %v8088_v15, %v7640_v4  ;;  %v10131_v15 = vpop.f32.mrb[1].mxu1 }
 0x40f   : > { %v7875_v22 = vmul.f32 %v15458_v27, %v10008_v5  ;;  %19676 = vst [vmem:[#allocation225_spill] sm:$0xff] %v19675_v58  ;;  %v6606_v8 = vmul.f32 %v14551_v59, %v14878_v45  ;;  %v8149_v5 = vmul.f32 1.442695, %v8116_v29  ;;  %v6802_v51 = vmul.f32 %v14558_v12, %v14880_v32  ;;  %v19869_v58 = vld [vmem:[#allocation154_spill] sm:$0xff] }
 0x410   : > { %v8225_v25 = vmul.f32 %v12060_v6, %v8065_v23  ;;  %v6902_v23 = vmul.f32 %v14589_v7, %v14883_v63  ;;  %v6182_v11 = vand.u32 15, %v15466_v47  ;;  %v8385_v20 = vmul.f32 0.5, %v15335_v18 }
 0x411   : > { %v7907_v28 = vadd.f32 1.4214138, %v7875_v22  ;;  %v8153_v4 = vmul.f32 1.442695, %v8118_v44  ;;  %vm8289_vm0 = vcmp.lt.f32.partialorder %v15342_v41, 0.0  ;;  %v6834_v3 = vadd.f32 %v6802_v51, %v6606_v8 }
 0x412   : > { %v8257_v16 = vsub.f32 1.0, %v8225_v25  ;;  %v6998_v32 = vsel %vm15470_vm10, %v6902_v23, 0.0  ;;  %12069 = vpow2.f32 %v8149_v5  ;;  %v8157_v63 = vmul.f32 1.442695, %v8120_v10 }
 0x413   : > { %v7939_v17 = vmul.f32 %v15458_v27, %v7907_v28  ;;  %v7068_v53 = vmul.f32 %v14597_v62, %v19668_v0  ;;  %v7030_v50 = vadd.f32 %v6998_v32, %v6834_v3  ;;  %v7240_v41 = vmul.f32 %v14648_v19, %v19672_v55  ;;  %v19678_v32 = vld [vmem:[#allocation220_spill] sm:$0xff] }
 0x414   : > { %v8321_v61 = vsub.f32 0.0, %v8257_v16  ;;  %v1230_v29 = vstv %s15468_s9  ;;  %12071 = vpow2.f32 %v8153_v4  ;;  %v7170_v22 = vmul.f32 %v14635_v42, %v19671_v38 }
 0x415   : > { %v10040_v45 = vadd.f32 -0.28449672, %v7939_v17  ;;  %v15488_v52 = vpop.eup %12061  ;;  %v10132_v28 = vadd.f32 %v10131_v15, %v10130_v56  ;;  %12073 = vpow2.f32 %v8157_v63  ;;  %v7132_v5 = vadd.f32 %v7068_v53, %v7030_v50  ;;  %v19681_v15 = vld [vmem:[#allocation221_spill] sm:$0xff] }
 0x416   : > { %v8353_v54 = vsel %vm8289_vm0, %v8321_v61, %v8257_v16  ;;  %v15493_v57 = vpop.eup %12063  ;;  %v7796_v6 = vmul.f32 1.0614054, %v15488_v52  ;;  %vm19679_vm0 = vcmask 27648   ;;  %vm8280_vm8 = vcmp.lt.f32.partialorder %v15451_v33, 0.0 }
 0x417   : > { %v8417_v9 = vadd.f32 1.0, %v8353_v54  ;;  %v8003_v18 = vmul.f32 %v15458_v27, %v10040_v45  ;;  %v15499_v47 = vpop.eup %12065  ;;  %v7798_v10 = vmul.f32 1.0614054, %v15493_v57  ;;  %v15506_v17 = vmul.f32 %v10132_v28, %v1230_v29 }
 0x418   : > { %v7800_v8 = vmul.f32 1.0614054, %v15499_v47  ;;  %v9993_v16 = vadd.f32 -1.4531521, %v7796_v6  ;;  %v12068_v51 = vpop.eup %12067  ;;  %v7202_v3 = vadd.f32 %v7170_v22, %v7132_v5  ;;  %v7342_v54 = vmul.f32 %v14660_v14, %v19678_v32 }
 0x419   : > { %v8449_v25 = vmul.f32 %v8417_v9, %v8385_v20  ;;  %v8035_v44 = vadd.f32 0.2548296, %v8003_v18  ;;  %v9995_v61 = vadd.f32 -1.4531521, %v7798_v10  ;;  %v7272_v20 = vsel %vm15470_vm10, %v7240_v41, 0.0 }
 0x41a   : > { %v9997_v4 = vadd.f32 -1.4531521, %v7800_v8  ;;  %v7860_v45 = vmul.f32 %v15488_v52, %v9993_v16  ;;  %v1233_v53 = vsel %vm19679_vm0, %v15506_v17, -inf  ;;  %v7304_v41 = vadd.f32 %v7272_v20, %v7202_v3 }
 0x41b   : > { %8520 = vst.msk [vmem:[#allocation2 + $0x81] sm:$0xff] %vm19677_vm1, %v8449_v25  ;;  %v8067_v23 = vmul.f32 %v15458_v27, %v8035_v44  ;;  %v7862_v9 = vmul.f32 %v15493_v57, %v9995_v61  ;;  %v19680_v27 = vld [vmem:[#allocation223_spill] sm:$0xff]  ;;  %1234 = vmax.xlane.f32.xlu1 %v1233_v53  ;;  %v7444_v29 = vmul.f32 %v14672_v13, %v19681_v15  ;;  %vm15521_vm1 = vcmp.ne.s32.totalorder %v6182_v11, 15 }
 0x41c   : > { %v7514_v18 = vmul.f32 %v15376_v2, %v19680_v27  ;;  %v7864_v56 = vmul.f32 %v15499_v47, %v9997_v4  ;;  %v7892_v50 = vadd.f32 1.4214138, %v7860_v45  ;;  %v19682_v25 = vmov 0  ;;  %v12070_v28 = vpop.eup %12069 }
 0x41d   : > { %v8227_v63 = vmul.f32 %v12068_v51, %v8067_v23  ;;  %v7894_v22 = vadd.f32 1.4214138, %v7862_v9  ;;  %v19683_v25 = vsel %vm15521_vm1, 4294967295, %v19682_v25  ;;  %v6608_v44 = vmul.f32 %v14551_v59, %v19668_v0 }
 0x41e   : > { %19684 = vst [vmem:[#allocation93_spill] sm:$0xff] %v19683_v25  ;;  %v7896_v10 = vadd.f32 1.4214138, %v7864_v56  ;;  %v7924_v8 = vmul.f32 %v15488_v52, %v7892_v50  ;;  %v7406_v16 = vadd.f32 %v7342_v54, %v7304_v41  ;;  %v6804_v5 = vmul.f32 %v14558_v12, %v19671_v38  ;;  %v12072_v20 = vpop.eup %12071  ;;  %v19868_v25 = vld [vmem:[#allocation155_spill] sm:$0xff] }
 0x41f   : > { %v8259_v6 = vsub.f32 1.0, %v8227_v63  ;;  %v7926_v23 = vmul.f32 %v15493_v57, %v7894_v22  ;;  %v7546_v11 = vsel %vm15470_vm10, %v7514_v18, 0.0  ;;  %v6904_v61 = vmul.f32 %v14589_v7, %v19672_v55  ;;  %v12074_v9 = vpop.eup %12073 }
 0x420   : > { %v7928_v0 = vmul.f32 %v15499_v47, %v7896_v10  ;;  %v10025_v4 = vadd.f32 -0.28449672, %v7924_v8  ;;  %v7476_v45 = vadd.f32 %v7444_v29, %v7406_v16  ;;  %v7070_v3 = vmul.f32 %v14597_v62, %v19678_v32 }
 0x421   : > { %v8323_v51 = vsub.f32 0.0, %v8259_v6  ;;  %vm19685_vm0 = vcmp.lt.f32.partialorder %v15401_v31, 0.0  ;;  %v10027_v54 = vadd.f32 -0.28449672, %v7926_v23  ;;  %v6836_v63 = vadd.f32 %v6804_v5, %v6608_v44 }
 0x422   : > { %v7000_v53 = vsel %vm15521_vm1, %v6904_v61, 0.0  ;;  %v8387_v18 = vmul.f32 0.5, %v15390_v48  ;;  %v10029_v56 = vadd.f32 -0.28449672, %v7928_v0  ;;  %v7988_v50 = vmul.f32 %v15488_v52, %v10025_v4 }
 0x423   : > { %v8355_v38 = vsel %vm19685_vm0, %v8323_v51, %v8259_v6  ;;  %v7990_v41 = vmul.f32 %v15493_v57, %v10027_v54  ;;  %v15545_v29 = vadd.f32 %v7546_v11, %v7476_v45  ;;  %v7032_v22 = vadd.f32 %v7000_v53, %v6836_v63 }
 0x424   : > { %v8419_v55 = vadd.f32 1.0, %v8355_v38  ;;  %v7992_v31 = vmul.f32 %v15499_v47, %v10029_v56  ;;  %v7242_v6 = vmul.f32 %v14648_v19, %v19680_v27  ;;  %v8020_v44 = vadd.f32 0.2548296, %v7988_v50 }
 0x425   : > { %v8022_v8 = vadd.f32 0.2548296, %v7990_v41  ;;  %v15551_v16 = vmul.f32 0.70710677, %v15545_v29  ;;  %v7134_v48 = vadd.f32 %v7070_v3, %v7032_v22  ;;  %vm19686_vm0 = vcmask 130048   ;;  %v19689_v22 = vld [vmem:[#allocation113_spill] sm:$0xff] }
 0x426   : > { %v8451_v10 = vmul.f32 %v8419_v55, %v8387_v18  ;;  %v8024_v5 = vadd.f32 0.2548296, %v7992_v31  ;;  %v7172_v51 = vmul.f32 %v14635_v42, %v19681_v15  ;;  %v8052_v23 = vmul.f32 %v15488_v52, %v8020_v44  ;;  %v19687_v18 = vld [vmem:[#allocation228_spill] sm:$0xff] }
 0x427   : > { %v8054_v11 = vmul.f32 %v15493_v57, %v8022_v8  ;;  %v7642_v61 = vand.u32 2147483647, %v15551_v16  ;;  %v7274_v45 = vsel %vm15521_vm1, %v7242_v6, 0.0  ;;  %v7344_v55 = vmul.f32 %v14660_v14, %v19687_v18  ;;  %v19692_v8 = vld [vmem:[#allocation229_spill] sm:$0xff] }
 0x428   : > { %8522 = vst.msk [vmem:[#allocation2 + $0x91] sm:$0xff] %vm19686_vm0, %v8451_v10  ;;  %v8056_v0 = vmul.f32 %v15499_v47, %v8024_v5  ;;  %v7204_v4 = vadd.f32 %v7172_v51, %v7134_v48  ;;  %v8212_v38 = vmul.f32 %v12070_v28, %v8052_v23  ;;  %v8372_v57 = vmul.f32 0.5, %v15434_v1  ;;  %v19688_v47 = vld [vmem:[#allocation114_spill] sm:$0xff] }
 0x429   : > { %v8214_v3 = vmul.f32 %v12072_v20, %v8054_v11  ;;  %v7674_v63 = vmul.f32 0.3275911, %v7642_v61  ;;  %v19690_v10 = vpack.i.bf16 %v19688_v47, %v19689_v22  ;;  %vm8276_vm0 = vcmp.lt.f32.partialorder %v15444_v49, 0.0 }
 0x42a   : > { %v8216_v54 = vmul.f32 %v12074_v9, %v8056_v0  ;;  %v7306_v53 = vadd.f32 %v7274_v45, %v7204_v4  ;;  %v8244_v56 = vsub.f32 1.0, %v8212_v38  ;;  %v19691_v9 = vld [vmem:[#allocation230_spill] sm:$0xff]  ;;  %v7446_v1 = vmul.f32 %v14672_v13, %v19692_v8  ;;  %v19693_v4 = vld [vmem:[#allocation116_spill] sm:$0xff]  ;;  %v19694_v45 = vld [vmem:[#allocation115_spill] sm:$0xff] }
 0x42b   : > { %v8246_v52 = vsub.f32 1.0, %v8214_v3  ;;  %v7516_v31 = vmul.f32 %v15376_v2, %v19691_v9  ;;  %v7706_v44 = vadd.f32 1.0, %v7674_v63  ;;  %v8374_v51 = vmul.f32 0.5, %v15438_v26 }
 0x42c   : > { %v8248_v50 = vsub.f32 1.0, %v8216_v54  ;;  %v7408_v41 = vadd.f32 %v7344_v55, %v7306_v53  ;;  %11535 = vrot.lane.b32.xlu1 %v19690_v10, %s12431_s16  ;;  %v8308_v28 = vsub.f32 0.0, %v8244_v56  ;;  %v19695_v38 = vpack.i.bf16 %v19693_v4, %v19694_v45  ;;  %v19698_v55 = vld [vmem:[#allocation118_spill] sm:$0xff] }
 0x42d   : > { %v8310_v20 = vsub.f32 0.0, %v8246_v52  ;;  %v8376_v46 = vmul.f32 0.5, %v15441_v37  ;;  %v7548_v54 = vsel %vm15521_vm1, %v7516_v31, 0.0  ;;  %12075 = vrcp.f32 %v7706_v44  ;;  %v19705_v10 = vld [vmem:[#allocation122_spill] sm:$0xff] }
 0x42e   : > { %v8312_v6 = vsub.f32 0.0, %v8248_v50  ;;  %v8340_v48 = vsel %vm8276_vm0, %v8308_v28, %v8244_v56  ;;  %v7478_v0 = vadd.f32 %v7446_v1, %v7408_v41  ;;  %v19699_v56 = vld [vmem:[#allocation117_spill] sm:$0xff]  ;;  %v8090_v31 = vsub.f32 0.0, %v7642_v61  ;;  %v19708_v1 = vld [vmem:[#allocation124_spill] sm:$0xff] }
 0x42f   : > { %v8342_v5 = vsel %vm8278_vm9, %v8310_v20, %v8246_v52  ;;  %v8404_v49 = vadd.f32 1.0, %v8340_v48  ;;  %vm19696_vm9 = vcmask 130048   ;;  %v19700_v52 = vpack.i.bf16 %v19698_v55, %v19699_v56  ;;  %v19706_v28 = vld [vmem:[#allocation121_spill] sm:$0xff]  ;;  %v19709_v48 = vld [vmem:[#allocation123_spill] sm:$0xff] }
 0x430   : > { %v8344_v23 = vsel %vm8280_vm8, %v8312_v6, %v8248_v50  ;;  %v8406_v11 = vadd.f32 1.0, %v8342_v5  ;;  %11540 = vrot.lane.b32.xlu1 %v19695_v38, %s12431_s16  ;;  %vm19697_vm8 = vmmov %vm19696_vm9  ;;  %v15586_v26 = vadd.f32 %v7548_v54, %v7478_v0  ;;  %v19702_v50 = vld [vmem:[#allocation120_spill] sm:$0xff]  ;;  %v19707_v20 = vpack.i.bf16 %v19705_v10, %v19706_v28 }
 0x431   : > { %v8408_v3 = vadd.f32 1.0, %v8344_v23  ;;  %v8436_v33 = vmul.f32 %v8404_v49, %v8372_v57  ;;  %vm19701_vm0 = vmmov %vm19697_vm8  ;;  %v19703_v57 = vld [vmem:[#allocation119_spill] sm:$0xff]  ;;  %v19710_v5 = vpack.i.bf16 %v19708_v1, %v19709_v48  ;;  %v19711_v54 = vmov 0 }
 0x432   : > { %v8438_v63 = vmul.f32 %v8406_v11, %v8374_v51  ;;  %v15594_v37 = vmul.f32 0.70710677, %v15586_v26  ;;  %v19704_v41 = vpack.i.bf16 %v19702_v50, %v19703_v57  ;;  %v8122_v51 = vmul.f32 %v8090_v31, %v7642_v61 }
 0x433   : > { %v8440_v53 = vmul.f32 %v8408_v3, %v8376_v46  ;;  %8507 = vst.msk [vmem:[#allocation2 + $0x19] sm:$0xff] %vm19696_vm9, %v8436_v33  ;;  %v6094_v11 = vadd.s32 88, %v19673_v24  ;;  %v6906_v3 = vmul.f32 %v14589_v7, %v19680_v27  ;;  %v6610_v61 = vmul.f32 %v14551_v59, %v19678_v32 }
 0x434   : > { %8509 = vst.msk [vmem:[#allocation2 + $0x29] sm:$0xff] %vm19697_vm8, %v8438_v63  ;;  %11545 = vrot.lane.b32.xlu1 %v19700_v52, %s12431_s16  ;;  %v7644_v22 = vand.u32 2147483647, %v15594_v37  ;;  %v8161_v0 = vmul.f32 1.442695, %v8122_v51  ;;  %v6806_v33 = vmul.f32 %v14558_v12, %v19681_v15  ;;  %v7244_v15 = vmul.f32 %v14648_v19, %v19691_v9 }
 0x435   : > { %8511 = vst.msk [vmem:[#allocation2 + $0x39] sm:$0xff] %vm19701_vm0, %v8440_v53  ;;  %v6196_v45 = vand.u32 15, %v6094_v11  ;;  %vm8282_vm8 = vcmp.lt.f32.partialorder %v15551_v16, 0.0  ;;  %v19716_v16 = vld [vmem:[#allocation233_spill] sm:$0xff]  ;;  %vm19721_vm6 = vcmask 130048  }
 0x436   : > { %v7676_v44 = vmul.f32 0.3275911, %v7644_v22  ;;  %v8092_v56 = vsub.f32 0.0, %v7644_v22  ;;  %v6838_v52 = vadd.f32 %v6806_v33, %v6610_v61 }
 0x437   : > { %v12076_v47 = vpop.eup %12075  ;;  %vm15612_vm9 = vcmp.ne.s32.totalorder %v6196_v45, 15  ;;  %v19715_v45 = vld [vmem:[#allocation234_spill] sm:$0xff] }
 0x438   : > { %11550 = vrot.lane.b32.xlu1 %v19704_v41, %s12431_s16  ;;  %v7802_v6 = vmul.f32 1.0614054, %v12076_v47  ;;  %v7708_v49 = vadd.f32 1.0, %v7676_v44  ;;  %v19712_v54 = vsel %vm15612_vm9, 4294967295, %v19711_v54  ;;  %v7002_v55 = vsel %vm15612_vm9, %v6906_v3, 0.0 }
 0x439   : > { %19713 = vst [vmem:[#allocation96_spill] sm:$0xff] %v19712_v54  ;;  %v7034_v27 = vadd.f32 %v7002_v55, %v6838_v52  ;;  %v7072_v41 = vmul.f32 %v14597_v62, %v19687_v18  ;;  %v19860_v54 = vld [vmem:[#allocation32_spill] sm:$0xff] }
 0x43a   : > { %v9999_v23 = vadd.f32 -1.4531521, %v7802_v6  ;;  %12077 = vrcp.f32 %v7708_v49  ;;  %v7276_v49 = vsel %vm15612_vm9, %v7244_v15, 0.0 }
 0x43b   : > { %12079 = vpow2.f32 %v8161_v0  ;;  %v7136_v6 = vadd.f32 %v7072_v41, %v7034_v27  ;;  %v6908_v41 = vmul.f32 %v14589_v7, %v19691_v9 }
 0x43c   : > { %11555 = vrot.lane.b32.xlu1 %v19707_v20, %s12431_s16  ;;  %v7866_v4 = vmul.f32 %v12076_v47, %v9999_v23  ;;  %v8124_v20 = vmul.f32 %v8092_v56, %v7644_v22  ;;  %v19714_v22 = vld [vmem:[#allocation232_spill] sm:$0xff]  ;;  %v7448_v56 = vmul.f32 %v14672_v13, %v19716_v16 }
 0x43d   : > { %v7346_v11 = vmul.f32 %v14660_v14, %v19714_v22 }
 0x43e   : > { %v7898_v38 = vadd.f32 1.4214138, %v7866_v4  ;;  %v8165_v48 = vmul.f32 1.442695, %v8124_v20 }
 0x440   : > { %11560 = vrot.lane.b32.xlu1 %v19710_v5, %s12431_s16  ;;  %v7930_v46 = vmul.f32 %v12076_v47, %v7898_v38  ;;  %v7174_v5 = vmul.f32 %v14635_v42, %v19692_v8  ;;  %v7518_v38 = vmul.f32 %v15376_v2, %v19715_v45  ;;  %12081 = vpow2.f32 %v8165_v48  ;;  %s12435_s16 = smov 100  }
 0x442   : > { %v10031_v63 = vadd.f32 -0.28449672, %v7930_v46  ;;  %v8378_v46 = vmul.f32 0.5, %v15545_v29 }
 0x444   : > { %v7994_v53 = vmul.f32 %v12076_v47, %v10031_v63  ;;  %v12078_v57 = vpop.eup %12077  ;;  %v6096_v63 = vadd.s32 104, %v19673_v24 }
 0x445   : > { %v12080_v28 = vpop.eup %12079  ;;  %v7804_v31 = vmul.f32 1.0614054, %v12078_v57 }
 0x446   : > { %v8026_v50 = vadd.f32 0.2548296, %v7994_v53  ;;  %v6210_v27 = vand.u32 15, %v6096_v63 }
 0x447   : > { %v10001_v1 = vadd.f32 -1.4531521, %v7804_v31 }
 0x448   : > { %v8058_v10 = vmul.f32 %v12076_v47, %v8026_v50  ;;  %v7206_v47 = vadd.f32 %v7174_v5, %v7136_v6  ;;  %v7550_v50 = vsel %vm15612_vm9, %v7518_v38, 0.0 }
 0x449   : > { %v7868_v23 = vmul.f32 %v12078_v57, %v10001_v1 }
 0x44a   : > { %v8218_v32 = vmul.f32 %v12080_v28, %v8058_v10  ;;  %v7308_v61 = vadd.f32 %v7276_v49, %v7206_v47  ;;  %v6612_v10 = vmul.f32 %v14551_v59, %v19687_v18  ;;  %v6808_v28 = vmul.f32 %v14558_v12, %v19692_v8  ;;  %v12082_v18 = vpop.eup %12081 }
 0x44b   : > { %v7900_v4 = vadd.f32 1.4214138, %v7868_v23  ;;  %v7074_v8 = vmul.f32 %v14597_v62, %v19714_v22  ;;  %v15662_v23 = vpop.permute.xlu1 %11480 }
 0x44c   : > { %v8250_v44 = vsub.f32 1.0, %v8218_v32  ;;  %v7410_v55 = vadd.f32 %v7346_v11, %v7308_v61  ;;  %v19717_v32 = vmov 0 }
 0x44d   : > { %v7932_v33 = vmul.f32 %v12078_v57, %v7900_v4 }
 0x44e   : > { %v8314_v51 = vsub.f32 0.0, %v8250_v44  ;;  %v7480_v29 = vadd.f32 %v7448_v56, %v7410_v55  ;;  %v19720_v56 = vld [vmem:[#allocation104_spill] sm:$0xff] }
 0x44f   : > { %v10033_v52 = vadd.f32 -0.28449672, %v7932_v33  ;;  %v15670_v63 = vpop.permute.xlu1 %11485 }
 0x450   : > { %v8346_v0 = vsel %vm8282_vm8, %v8314_v51, %v8250_v44  ;;  %vm15648_vm8 = vcmp.ne.s32.totalorder %v6210_v27, 15  ;;  %v15652_v31 = vadd.f32 %v7550_v50, %v7480_v29  ;;  %v6840_v44 = vadd.f32 %v6808_v28, %v6612_v10  ;;  %v19722_v50 = vld [vmem:[#allocation238_spill] sm:$0xff]  ;;  %v19723_v29 = vld [vmem:[#allocation237_spill] sm:$0xff] }
 0x451   : > { %v8410_v3 = vadd.f32 1.0, %v8346_v0  ;;  %v7996_v20 = vmul.f32 %v12078_v57, %v10033_v52  ;;  %v19718_v32 = vsel %vm15648_vm8, 4294967295, %v19717_v32  ;;  %v7004_v9 = vsel %vm15648_vm8, %v6908_v41, 0.0 }
 0x452   : > { %19719 = vst [vmem:[#allocation87_spill] sm:$0xff] %v19718_v32  ;;  %v15657_v6 = vmul.f32 0.70710677, %v15652_v31  ;;  %v7036_v48 = vadd.f32 %v7004_v9, %v6840_v44  ;;  %v7246_v0 = vmul.f32 %v14648_v19, %v19715_v45  ;;  %v7520_v27 = vmul.f32 %v15376_v2, %v19722_v50 }
 0x453   : > { %v8442_v53 = vmul.f32 %v8410_v3, %v8378_v46  ;;  %v8028_v15 = vadd.f32 0.2548296, %v7996_v20  ;;  %v8380_v46 = vmul.f32 0.5, %v15586_v26  ;;  %v6098_v26 = vadd.s32 120, %v19673_v24  ;;  %v15682_v28 = vpop.permute.xlu1 %11490 }
 0x454   : > { %v7646_v51 = vand.u32 2147483647, %v15657_v6  ;;  %v7138_v47 = vadd.f32 %v7074_v8, %v7036_v48  ;;  %v7450_v10 = vmul.f32 %v14672_v13, %v19723_v29  ;;  %v7552_v9 = vsel %vm15648_vm8, %v7520_v27, 0.0 }
 0x455   : > { %8513 = vst.msk [vmem:[#allocation2 + $0x49] sm:$0xff] %vm19701_vm0, %v8442_v53  ;;  %v8060_v1 = vmul.f32 %v12078_v57, %v8028_v15  ;;  %vm8284_vm0 = vcmp.lt.f32.partialorder %v15594_v37, 0.0  ;;  %v7176_v57 = vmul.f32 %v14635_v42, %v19716_v16  ;;  %v7278_v53 = vsel %vm15648_vm8, %v7246_v0, 0.0 }
 0x456   : > { %v7678_v4 = vmul.f32 0.3275911, %v7646_v51  ;;  %v7348_v37 = vmul.f32 %v14660_v14, %v19720_v56  ;;  %v8094_v20 = vsub.f32 0.0, %v7646_v51  ;;  %v6224_v44 = vand.u32 15, %v6098_v26 }
 0x457   : > { %v8220_v5 = vmul.f32 %v12082_v18, %v8060_v1  ;;  %v7208_v33 = vadd.f32 %v7176_v57, %v7138_v47  ;;  %v6910_v8 = vmul.f32 %v14589_v7, %v19715_v45  ;;  %v19724_v47 = vmov 0 }
 0x458   : > { %v7710_v61 = vadd.f32 1.0, %v7678_v4  ;;  %v8126_v18 = vmul.f32 %v8094_v20, %v7646_v51  ;;  %v6810_v0 = vmul.f32 %v14558_v12, %v19716_v16 }
 0x459   : > { %v8252_v49 = vsub.f32 1.0, %v8220_v5  ;;  %v7310_v52 = vadd.f32 %v7278_v53, %v7208_v33  ;;  %v15690_v5 = vpop.permute.xlu1 %11495 }
 0x45a   : > { %12083 = vrcp.f32 %v7710_v61  ;;  %v8169_v51 = vmul.f32 1.442695, %v8126_v18  ;;  %v7522_v18 = vmul.f32 %v15376_v2, %v15267_v40 }
 0x45b   : > { %v8316_v11 = vsub.f32 0.0, %v8252_v49  ;;  %v7412_v41 = vadd.f32 %v7348_v37, %v7310_v52 }
 0x45c   : > { %12085 = vpow2.f32 %v8169_v51 }
 0x45d   : > { %v8348_v38 = vsel %vm8284_vm0, %v8316_v11, %v8252_v49  ;;  %v7482_v15 = vadd.f32 %v7450_v10, %v7412_v41  ;;  %v6614_v11 = vmul.f32 %v14551_v59, %v19714_v22  ;;  %v15706_v61 = vpop.permute.xlu1 %11500  ;;  %v7076_v22 = vmul.f32 %v14597_v62, %v19720_v56 }
 0x45e   : > { %v8412_v3 = vadd.f32 1.0, %v8348_v38  ;;  %v7178_v41 = vmul.f32 %v14635_v42, %v19723_v29  ;;  %vm8286_vm0 = vcmp.lt.f32.partialorder %v15657_v6, 0.0  ;;  %v19917_v29 = vld [vmem:[#allocation172_spill] sm:$0xff] }
 0x45f   : > { %v15686_v48 = vadd.f32 %v7552_v9, %v7482_v15 }
 0x460   : > { %v8444_v55 = vmul.f32 %v8412_v3, %v8380_v46  ;;  %v6842_v46 = vadd.f32 %v6810_v0, %v6614_v11 }
 0x461   : > { %v15701_v57 = vmul.f32 0.70710677, %v15686_v48  ;;  %v15716_v20 = vpop.permute.xlu1 %11505 }
 0x462   : > { %8515 = vst.msk [vmem:[#allocation2 + $0x59] sm:$0xff] %vm19721_vm6, %v8444_v55  ;;  %vm15692_vm6 = vcmp.ne.s32.totalorder %v6224_v44, 15  ;;  %v7248_v55 = vmul.f32 %v14648_v19, %v19722_v50  ;;  %v7350_v44 = vmul.f32 %v14660_v14, %v15263_v35  ;;  %v19919_v50 = vld [vmem:[#allocation60_spill] sm:$0xff] }
 0x463   : > { %v19725_v47 = vsel %vm15692_vm6, 4294967295, %v19724_v47  ;;  %v7006_v45 = vsel %vm15692_vm6, %v6910_v8, 0.0  ;;  %v7648_v3 = vand.u32 2147483647, %v15701_v57  ;;  %v19926_v14 = vld [vmem:[#allocation176_spill] sm:$0xff] }
 0x464   : > { %v12084_v1 = vpop.eup %12083  ;;  %19726 = vst [vmem:[#allocation89_spill] sm:$0xff] %v19725_v47  ;;  %v7038_v53 = vadd.f32 %v7006_v45, %v6842_v46  ;;  %v7280_v10 = vsel %vm15692_vm6, %v7248_v55, 0.0  ;;  %v19853_v47 = vld [vmem:[#allocation148_spill] sm:$0xff]  ;;  %v19927_v34 = vpack.i.bf16 %v19925_v21, %v19926_v14  ;;  %v19938_v21 = vld [vmem:[#allocation62_spill] sm:$0xff] }
 0x465   : > { %v7806_v49 = vmul.f32 1.0614054, %v12084_v1  ;;  %v7680_v16 = vmul.f32 0.3275911, %v7648_v3  ;;  %v8096_v45 = vsub.f32 0.0, %v7648_v3  ;;  %v15726_v46 = vpop.permute.xlu1 %11510 }
 0x466   : > { %v7140_v26 = vadd.f32 %v7076_v22, %v7038_v53  ;;  %v12086_v51 = vpop.eup %12085 }
 0x467   : > { %v10003_v4 = vadd.f32 -1.4531521, %v7806_v49  ;;  %v7712_v52 = vadd.f32 1.0, %v7680_v16  ;;  %v8128_v55 = vmul.f32 %v8096_v45, %v7648_v3 }
 0x468   : > { %v7210_v9 = vadd.f32 %v7178_v41, %v7140_v26 }
 0x469   : > { %v7870_v38 = vmul.f32 %v12084_v1, %v10003_v4  ;;  %12087 = vrcp.f32 %v7712_v52  ;;  %v7452_v4 = vmul.f32 %v14672_v13, %v15265_v43  ;;  %v19920_v13 = vld [vmem:[#allocation59_spill] sm:$0xff] }
 0x46a   : > { %v7312_v49 = vadd.f32 %v7280_v10, %v7210_v9 }
 0x46b   : > { %v7902_v33 = vadd.f32 1.4214138, %v7870_v38  ;;  %v7554_v38 = vsel %vm15692_vm6, %v7522_v18, 0.0  ;;  %vm19727_vm6 = vcmask 130048  }
 0x46c   : > { %v7414_v0 = vadd.f32 %v7350_v44, %v7312_v49  ;;  %v8173_v44 = vmul.f32 1.442695, %v8128_v55 }
 0x46d   : > { %v7934_v37 = vmul.f32 %v12084_v1, %v7902_v33 }
 0x46e   : > { %v7484_v53 = vadd.f32 %v7452_v4, %v7414_v0  ;;  %12089 = vpow2.f32 %v8173_v44 }
 0x46f   : > { %v10035_v27 = vadd.f32 -0.28449672, %v7934_v37 }
 0x470   : > { %v15728_v16 = vadd.f32 %v7554_v38, %v7484_v53 }
 0x471   : > { %v7998_v15 = vmul.f32 %v12084_v1, %v10035_v27  ;;  %v15734_v27 = vpop.permute.xlu1 %11515 }
 0x472   : > { %v15731_v52 = vmul.f32 0.70710677, %v15728_v16 }
 0x473   : > { %v8030_v8 = vadd.f32 0.2548296, %v7998_v15  ;;  %v12088_v2 = vpop.eup %12087  ;;  %v8382_v15 = vmul.f32 0.5, %v15652_v31 }
 0x474   : > { %v7650_v10 = vand.u32 2147483647, %v15731_v52  ;;  %vm8290_vm8 = vcmp.lt.f32.partialorder %v15731_v52, 0.0  ;;  %v19736_v52 = vld [vmem:[#allocation69_spill] sm:$0xff] }
 0x475   : > { %v8062_v11 = vmul.f32 %v12084_v1, %v8030_v8  ;;  %v7808_v1 = vmul.f32 1.0614054, %v12088_v2  ;;  %v15739_v0 = vpop.permute.xlu1 %11520 }
 0x476   : > { %v7682_v8 = vmul.f32 0.3275911, %v7650_v10  ;;  %v8098_v31 = vsub.f32 0.0, %v7650_v10 }
 0x477   : > { %v8222_v33 = vmul.f32 %v12086_v51, %v8062_v11  ;;  %v10005_v41 = vadd.f32 -1.4531521, %v7808_v1 }
 0x478   : > { %v7714_v11 = vadd.f32 1.0, %v7682_v8  ;;  %v12090_v53 = vpop.eup %12089 }
 0x479   : > { %v8254_v22 = vsub.f32 1.0, %v8222_v33  ;;  %v7872_v18 = vmul.f32 %v12088_v2, %v10005_v41  ;;  %v15741_v45 = vpop.permute.xlu1 %11525 }
 0x47a   : > { %12091 = vrcp.f32 %v7714_v11 }
 0x47b   : > { %v8318_v37 = vsub.f32 0.0, %v8254_v22  ;;  %v7904_v49 = vadd.f32 1.4214138, %v7872_v18 }
 0x47d   : > { %v8350_v26 = vsel %vm8286_vm0, %v8318_v37, %v8254_v22  ;;  %v7936_v6 = vmul.f32 %v12088_v2, %v7904_v49  ;;  %v8130_v37 = vmul.f32 %v8098_v31, %v7650_v10  ;;  %vm19728_vm0 = vcmask 130048  }
 0x47e   : > { %v8414_v9 = vadd.f32 1.0, %v8350_v26  ;;  %v15743_v26 = vpop.permute.xlu1 %11530 }
 0x47f   : > { %v10037_v4 = vadd.f32 -0.28449672, %v7936_v6  ;;  %v8177_v44 = vmul.f32 1.442695, %v8130_v37 }
 0x480   : > { %v8446_v3 = vmul.f32 %v8414_v9, %v8382_v15 }
 0x481   : > { %v8000_v51 = vmul.f32 %v12088_v2, %v10037_v4  ;;  %12093 = vpow2.f32 %v8177_v44 }
 0x482   : > { %8517 = vst.msk [vmem:[#allocation2 + $0x69] sm:$0xff] %vm19727_vm6, %v8446_v3  ;;  %vm8288_vm6 = vcmp.lt.f32.partialorder %v15701_v57, 0.0 }
 0x483   : > { %v8032_v38 = vadd.f32 0.2548296, %v8000_v51 }
 0x484   : > { %v12092_v22 = vpop.eup %12091 }
 0x485   : > { %v8064_v33 = vmul.f32 %v12088_v2, %v8032_v38  ;;  %v7810_v1 = vmul.f32 1.0614054, %v12092_v22  ;;  %v8384_v2 = vmul.f32 0.5, %v15686_v48 }
 0x487   : > { %v8224_v55 = vmul.f32 %v12090_v53, %v8064_v33  ;;  %v10007_v15 = vadd.f32 -1.4531521, %v7810_v1 }
 0x489   : > { %v8256_v41 = vsub.f32 1.0, %v8224_v55  ;;  %v7874_v18 = vmul.f32 %v12092_v22, %v10007_v15  ;;  %v8386_v15 = vmul.f32 0.5, %v15728_v16  ;;  %v19738_v16 = vld [vmem:[#allocation73_spill] sm:$0xff] }
 0x48b   : > { %v8320_v9 = vsub.f32 0.0, %v8256_v41  ;;  %v7906_v6 = vadd.f32 1.4214138, %v7874_v18  ;;  %v12094_v53 = vpop.eup %12093  ;;  %v19730_v18 = vld [vmem:[#allocation63_spill] sm:$0xff] }
 0x48d   : > { %v8352_v3 = vsel %vm8288_vm6, %v8320_v9, %v8256_v41  ;;  %v7938_v51 = vmul.f32 %v12092_v22, %v7906_v6  ;;  %vm19729_vm6 = vcmask 27648   ;;  %v19739_v6 = vld [vmem:[#allocation74_spill] sm:$0xff] }
 0x48e   : > { %v8416_v11 = vadd.f32 1.0, %v8352_v3  ;;  %v19733_v3 = vld [vmem:[#allocation65_spill] sm:$0xff] }
 0x48f   : > { %v10039_v38 = vadd.f32 -0.28449672, %v7938_v51  ;;  %v19742_v51 = vld [vmem:[#allocation76_spill] sm:$0xff] }
 0x490   : > { %v8448_v4 = vmul.f32 %v8416_v11, %v8384_v2  ;;  %v19735_v2 = vld [vmem:[#allocation67_spill] sm:$0xff]  ;;  %v19737_v11 = vld [vmem:[#allocation72_spill] sm:$0xff] }
 0x491   : > { %v8002_v31 = vmul.f32 %v12092_v22, %v10039_v38  ;;  %v19743_v38 = vld [vmem:[#allocation206_spill] sm:$0xff] }
 0x492   : > { %8519 = vst.msk [vmem:[#allocation2 + $0x79] sm:$0xff] %vm19728_vm0, %v8448_v4  ;;  %v19741_v4 = vld [vmem:[#allocation77_spill] sm:$0xff] }
 0x493   : > { %v8034_v33 = vadd.f32 0.2548296, %v8002_v31 }
 0x495   : > { %v8066_v57 = vmul.f32 %v12092_v22, %v8034_v33  ;;  %v19731_v22 = vld [vmem:[#allocation64_spill] sm:$0xff] }
 0x496   : > { %v19744_v33 = vld [vmem:[#allocation208_spill] sm:$0xff] }
 0x497   : > { %v8226_v55 = vmul.f32 %v12094_v53, %v8066_v57 }
 0x499   : > { %v8258_v1 = vsub.f32 1.0, %v8226_v55 }
 0x49b   : > { %v8322_v48 = vsub.f32 0.0, %v8258_v1 }
 0x49d   : > { %v8354_v41 = vsel %vm8290_vm8, %v8322_v48, %v8258_v1  ;;  %v19745_v48 = vld [vmem:[#allocation125_spill] sm:$0xff]  ;;  %vm19753_vm8 = vcmask 31744  }
 0x49e   : > { %v8418_v9 = vadd.f32 1.0, %v8354_v41  ;;  %v19746_v41 = vld [vmem:[#allocation126_spill] sm:$0xff] }
 0x4a0   : > { %v8450_v44 = vmul.f32 %v8418_v9, %v8386_v15  ;;  %v19747_v15 = vpack.i.bf16 %v19745_v48, %v19746_v41  ;;  %v11507_v48 = vunpack.i.l.bf16 %v15716_v20  ;;  %v19760_v41 = vld [vmem:[#allocation78_spill] sm:$0xff] }
 0x4a2   : > { %8521 = vst.msk [vmem:[#allocation2 + $0x89] sm:$0xff] %vm19728_vm0, %v8450_v44  ;;  %v19748_v44 = vld [vmem:[#allocation31_spill] sm:$0xff] }
 0x4a8   : > { %v1235_v8 = vpop.xlane.xlu1 %1234 }
 0x4a9   : > { %v1236_v49 = vsub.f32 %v15506_v17, %v1235_v8  ;;  %v19732_v8 = vld [vmem:[#allocation66_spill] sm:$0xff] }
 0x4ab   : > { %v1237_v10 = vmul.f32 1.442695, %v1236_v49  ;;  %v19734_v49 = vld [vmem:[#allocation68_spill] sm:$0xff] }
 0x4ac   : > { %v15767_v31 = vpop.permute.xlu1 %11535 }
 0x4ad   : > { %12095 = vpow2.f32 %v1237_v10  ;;  %v19740_v10 = vld [vmem:[#allocation82_spill] sm:$0xff] }
 0x4b0   : > { %v15771_v57 = vpop.permute.xlu1 %11540 }
 0x4b4   : > { %v15773_v53 = vpop.permute.xlu1 %11545 }
 0x4b7   : > { %v12096_v37 = vpop.eup %12095 }
 0x4b8   : > { %v1239_v17 = vsel %vm19729_vm6, %v12096_v37, 0.0  ;;  %v15775_v55 = vpop.permute.xlu1 %11550  ;;  %vm19754_vm6 = vmmov %vm19753_vm8 }
 0x4b9   : > { %1240 = vadd.xlane.f32.xlu1 %v1239_v17  ;;  %vm19755_vm0 = vmmov %vm19754_vm6 }
 0x4ba   : > { %vm19756_vm9 = vmmov %vm19755_vm0 }
 0x4bb   : > { %vm19972_vm5 = vmmov %vm19755_vm0 }
 0x4bc   : > { %v15777_v1 = vpop.permute.xlu1 %11555  ;;  %vm19978_vm1 = vmmov %vm19755_vm0 }
 0x4c0   : > { %v15779_v17 = vpop.permute.xlu1 %11560 }
 0x4ec   : > { %11565 = vxpose.xlu1.b32.start [1/16] (narrow) %v19730_v18, 8  ;;  %v19750_v18 = vld [vmem:[#allocation128_spill] sm:$0xff] }
 0x4f0   : > { %11567 = vxpose.xlu1.b32.cont [2/16] (narrow) %v19731_v22, 8 }
 0x4f4   : > { %11569 = vxpose.xlu1.b32.cont [3/16] (narrow) %v19732_v8, 8  ;;  %v11488_v8 = vunpack.i.h.bf16 %v15670_v63 }
 0x4f8   : > { %11571 = vxpose.xlu1.b32.cont [4/16] (narrow) %v19733_v3, 8  ;;  %v11487_v3 = vunpack.i.l.bf16 %v15670_v63  ;;  %v19757_v63 = vld [vmem:[#allocation129_spill] sm:$0xff] }
 0x4fc   : > { %11573 = vxpose.xlu1.b32.cont [5/16] (narrow) %v19734_v49, 8 }
 0x500   : > { %11575 = vxpose.xlu1.b32.cont [6/16] (narrow) %v19735_v2, 8  ;;  %v19752_v2 = vld [vmem:[#allocation33_spill] sm:$0xff] }
 0x504   : > { %11577 = vxpose.xlu1.b32.cont [7/16] (narrow) %v19736_v52, 8 }
 0x508   : > { %11579 = vxpose.xlu1.b32.cont [8/16] (narrow) %v19737_v11, 8  ;;  %v11493_v11 = vunpack.i.h.bf16 %v15682_v28 }
 0x50c   : > { %11581 = vxpose.xlu1.b32.cont [9/16] (narrow) %v19738_v16, 8  ;;  %v11492_v16 = vunpack.i.l.bf16 %v15682_v28 }
 0x50e   : > { %v10992_v28 = vpack.c.bf16 %v11493_v11, %v11492_v16  ;;  %v19768_v11 = vld [vmem:[#allocation131_spill] sm:$0xff]  ;;  %v19769_v16 = vld [vmem:[#allocation132_spill] sm:$0xff] }
 0x510   : > { %11583 = vxpose.xlu1.b32.cont [10/16] (narrow) %v19739_v6, 8  ;;  %v11498_v6 = vunpack.i.h.bf16 %v15690_v5 }
 0x514   : > { %11585 = vxpose.xlu1.b32.cont [11/16] (narrow) %v19740_v10, 8  ;;  %v11497_v10 = vunpack.i.l.bf16 %v15690_v5  ;;  %v11502_v5 = vunpack.i.l.bf16 %v15706_v61 }
 0x518   : > { %11587 = vxpose.xlu1.b32.cont [12/16] (narrow) %v19741_v4, 8  ;;  %v10990_v4 = vpack.c.bf16 %v11488_v8, %v11487_v3  ;;  %v11518_v8 = vunpack.i.h.bf16 %v15734_v27  ;;  %v19765_v3 = vld [vmem:[#allocation213_spill] sm:$0xff] }
 0x51c   : > { %11589 = vxpose.xlu1.b32.cont [13/16] (narrow) %v19742_v51, 8 }
 0x520   : > { %11591 = vxpose.xlu1.b32.cont [14/16] (narrow) %v19743_v38, 8  ;;  %v11503_v38 = vunpack.i.h.bf16 %v15706_v61  ;;  %v11512_v61 = vunpack.i.l.bf16 %v15726_v46 }
 0x524   : > { %11593 = vxpose.xlu1.b32.cont [15/16] (narrow) %v19744_v33, 8  ;;  %v11508_v33 = vunpack.i.h.bf16 %v15716_v20  ;;  %v11517_v20 = vunpack.i.l.bf16 %v15734_v27  ;;  %v11528_v27 = vunpack.i.h.bf16 %v15741_v45 }
 0x528   : > { %11595 = vxpose.xlu1.b32.end [16/16] (narrow) %v15662_v23, 8  ;;  %v19749_v23 = vld [vmem:[#allocation127_spill] sm:$0xff] }
 0x529   : > { %v19751_v22 = vpack.i.bf16 %v19749_v23, %v19750_v18  ;;  %v19764_v23 = vld [vmem:[#allocation35_spill] sm:$0xff]  ;;  %v10996_v18 = vpack.c.bf16 %v11503_v38, %v11502_v5  ;;  %v19775_v38 = vld [vmem:[#allocation37_spill] sm:$0xff] }
 0x546   : > { %11632 = vrot.lane.b32.xlu1 %v19747_v15, %s12432_s12  ;;  %v1241_v9 = vpop.xlane.xlu1 %1240  ;;  %v10994_v15 = vpack.c.bf16 %v11498_v6, %v11497_v10  ;;  %v19770_v6 = vpack.i.bf16 %v19768_v11, %v19769_v16  ;;  %v11553_v16 = vunpack.i.h.bf16 %v15775_v55 }
 0x547   : > { %12097 = vrcp.f32 %v1241_v9  ;;  %v19762_v9 = vld [vmem:[#allocation210_spill] sm:$0xff] }
 0x54a   : > { %2278 = vrot.lane.b32.xlu1 %v19748_v44, %s12433_s22 }
 0x54e   : > { %11657 = vrot.lane.b32.xlu1 %v19751_v22, %s12432_s12  ;;  %v11513_v22 = vunpack.i.h.bf16 %v15726_v46  ;;  %v11523_v46 = vunpack.i.h.bf16 %v15739_v0 }
 0x550   : > { %v11000_v10 = vpack.c.bf16 %v11513_v22, %v11512_v61  ;;  %v11543_v61 = vunpack.i.h.bf16 %v15771_v57 }
 0x551   : > { %v12098_v49 = vpop.eup %12097 }
 0x552   : > { %2282 = vrot.lane.b32.xlu1 %v19752_v2, %s12433_s22  ;;  %v1243_v52 = vmul.f32 %v12098_v49, %v12096_v37  ;;  %v19758_v37 = vld [vmem:[#allocation130_spill] sm:$0xff]  ;;  %v10998_v49 = vpack.c.bf16 %v11508_v33, %v11507_v48  ;;  %v11533_v33 = vunpack.i.h.bf16 %v15743_v26  ;;  %v11538_v48 = vunpack.i.h.bf16 %v15767_v31 }
 0x553   : > { %v19759_v51 = vpack.i.bf16 %v19757_v63, %v19758_v37  ;;  %v11527_v63 = vunpack.i.l.bf16 %v15741_v45  ;;  %v19771_v37 = vld [vmem:[#allocation85_spill] sm:$0xff]  ;;  %v11537_v45 = vunpack.i.l.bf16 %v15767_v31  ;;  %v11547_v31 = vunpack.i.l.bf16 %v15773_v53 }
 0x554   : > { %10554 = vmatprep.subr.msk.mxu0 %vm19753_vm8, %v1243_v52  ;;  %11086 = vmatprep.subr.msk.mxu1 %vm19754_vm6, %v1243_v52  ;;  %vm19761_vm8 = vmmov %vm19755_vm0 }
 0x555   : > { %10555 = vmatpush3.xpose.msk.msra.mxu0 %vm19755_vm0, %v1243_v52  ;;  %11087 = vmatpush3.xpose.msk.msra.mxu1 %vm19756_vm9, %v1243_v52  ;;  %vm19763_vm9 = vmmov %vm19755_vm0  ;;  %v19767_v52 = vld [vmem:[#allocation84_spill] sm:$0xff] }
 0x556   : > { %11667 = vrot.lane.b32.xlu1 %v19759_v51, %s12432_s12  ;;  %10991 = vmatprep.subr.bf16.mxu0 %v10990_v4  ;;  %vm19766_vm6 = vmmov %vm19755_vm0  ;;  %v11522_v4 = vunpack.i.l.bf16 %v15739_v0  ;;  %v11002_v51 = vpack.c.bf16 %v11518_v8, %v11517_v20  ;;  %v11532_v0 = vunpack.i.l.bf16 %v15743_v26  ;;  %v11542_v26 = vunpack.i.l.bf16 %v15771_v57  ;;  %v19780_v20 = vld [vmem:[#allocation95_spill] sm:$0xff] }
 0x557   : > { %v11548_v8 = vunpack.i.h.bf16 %v15773_v53  ;;  %v11552_v57 = vunpack.i.l.bf16 %v15775_v55  ;;  %v11557_v53 = vunpack.i.l.bf16 %v15777_v1  ;;  %v11563_v55 = vunpack.i.h.bf16 %v15779_v17 }
 0x558   : > { %10557 = vmatmul.mubr.msk.f32.vlgmr.msra.gmra.mrb[32].mxu0 %vm19761_vm8, %v19760_v41  ;;  %vm19772_vm8 = vmmov %vm19755_vm0  ;;  %v11004_v5 = vpack.c.bf16 %v11523_v46, %v11522_v4  ;;  %v19776_v41 = vld [vmem:[#allocation91_spill] sm:$0xff]  ;;  %v11008_v22 = vpack.c.bf16 %v11533_v33, %v11532_v0  ;;  %v11012_v11 = vpack.c.bf16 %v11543_v61, %v11542_v26  ;;  %v19793_v33 = vld [vmem:[#allocation41_spill] sm:$0xff] }
 0x559   : > { %10559 = vmatprep.mubr.msk.f32.mxu0 %vm19763_vm9, %v19762_v9  ;;  %10993 = vmatpush3.bf16.msra.mxu0 %v10992_v28  ;;  %v19773_v28 = vld [vmem:[#allocation90_spill] sm:$0xff]  ;;  %vm19774_vm9 = vmmov %vm19755_vm0  ;;  %v19778_v9 = vld [vmem:[#allocation92_spill] sm:$0xff]  ;;  %v11014_v46 = vpack.c.bf16 %v11548_v8, %v11547_v31 }
 0x55a   : > { %2286 = vrot.lane.b32.xlu1 %v19764_v23, %s12433_s22  ;;  %10995 = vmatprep.subr.bf16.mxu0 %v10994_v15  ;;  %v11006_v15 = vpack.c.bf16 %v11528_v27, %v11527_v63  ;;  %v19787_v27 = vld [vmem:[#allocation224_spill] sm:$0xff]  ;;  %v19788_v63 = vld [vmem:[#allocation38_spill] sm:$0xff]  ;;  %v19802_v61 = vld [vmem:[#allocation43_spill] sm:$0xff] }
 0x55b   : > { %v19803_v26 = vld [vmem:[#allocation107_spill] sm:$0xff]  ;;  %v19805_v31 = vld [vmem:[#allocation42_spill] sm:$0xff] }
 0x55c   : > { %10560 = vmatmul.mubr.msk.f32.gmra.mrb[34].mxu0 %vm19766_vm6, %v19765_v3  ;;  %vm19777_vm6 = vmmov %vm19755_vm0  ;;  %v11010_v3 = vpack.c.bf16 %v11538_v48, %v11537_v45  ;;  %v19794_v48 = vld [vmem:[#allocation101_spill] sm:$0xff]  ;;  %v19796_v45 = vld [vmem:[#allocation231_spill] sm:$0xff] }
 0x55d   : > { %10562 = vmatprep.mubr.msk.f32.mxu0 %vm19755_vm0, %v19767_v52  ;;  %10997 = vmatpush3.bf16.msra.mxu0 %v10996_v18  ;;  %v19779_v18 = vld [vmem:[#allocation36_spill] sm:$0xff]  ;;  %v19784_v52 = vld [vmem:[#allocation39_spill] sm:$0xff] }
 0x55e   : > { %11677 = vrot.lane.b32.xlu1 %v19770_v6, %s12432_s12  ;;  %10999 = vmatprep.subr.bf16.mxu0 %v10998_v49  ;;  %v19782_v49 = vld [vmem:[#allocation219_spill] sm:$0xff]  ;;  %v11558_v6 = vunpack.i.h.bf16 %v15777_v1 }
 0x560   : > { %10563 = vmatmul.mubr.msk.f32.gmra.mrb[36].mxu0 %vm19772_vm8, %v19771_v37  ;;  %vm19781_vm8 = vmmov %vm19755_vm0  ;;  %v11016_v37 = vpack.c.bf16 %v11553_v16, %v11552_v57  ;;  %v11018_v1 = vpack.c.bf16 %v11558_v6, %v11557_v53  ;;  %v19809_v16 = vld [vmem:[#allocation46_spill] sm:$0xff]  ;;  %v19810_v57 = vld [vmem:[#allocation49_spill] sm:$0xff] }
 0x561   : > { %10565 = vmatprep.mubr.msk.f32.mxu0 %vm19774_vm9, %v19773_v28  ;;  %11001 = vmatpush3.bf16.msra.mxu0 %v11000_v10  ;;  %vm19783_vm9 = vmmov %vm19755_vm0  ;;  %v19785_v10 = vld [vmem:[#allocation98_spill] sm:$0xff]  ;;  %v19789_v28 = vld [vmem:[#allocation100_spill] sm:$0xff] }
 0x562   : > { %2290 = vrot.lane.b32.xlu1 %v19775_v38, %s12433_s22  ;;  %11003 = vmatprep.subr.bf16.mxu0 %v11002_v51  ;;  %v11562_v51 = vunpack.i.l.bf16 %v15779_v17  ;;  %v19797_v17 = vld [vmem:[#allocation40_spill] sm:$0xff]  ;;  %v19812_v53 = vld [vmem:[#allocation51_spill] sm:$0xff] }
 0x563   : > { %v19811_v6 = vld [vmem:[#allocation48_spill] sm:$0xff] }
 0x564   : > { %10566 = vmatmul.mubr.msk.f32.gmra.mrb[38].mxu0 %vm19777_vm6, %v19776_v41  ;;  %vm19786_vm6 = vmmov %vm19755_vm0  ;;  %v11020_v0 = vpack.c.bf16 %v11563_v55, %v11562_v51  ;;  %v19798_v41 = vld [vmem:[#allocation235_spill] sm:$0xff]  ;;  %v19818_v55 = vld [vmem:[#allocation20_spill] sm:$0xff] }
 0x565   : > { %10568 = vmatprep.mubr.msk.f32.mxu0 %vm19755_vm0, %v19778_v9  ;;  %11005 = vmatpush3.bf16.msra.mxu0 %v11004_v5  ;;  %v19791_v5 = vld [vmem:[#allocation227_spill] sm:$0xff] }
 0x566   : > { %2292 = vrot.lane.b32.xlu1 %v19779_v18, %s12433_s22  ;;  %11007 = vmatprep.subr.bf16.mxu0 %v11006_v15  ;;  %v19800_v15 = vld [vmem:[#allocation105_spill] sm:$0xff]  ;;  %v19819_v51 = vld [vmem:[#allocation135_spill] sm:$0xff] }
 0x568   : > { %10569 = vmatmul.mubr.msk.f32.gmra.mrb[40].mxu0 %vm19781_vm8, %v19780_v20  ;;  %vm19790_vm8 = vmmov %vm19755_vm0 }
 0x569   : > { %10571 = vmatprep.mubr.msk.f32.mxu0 %vm19783_vm9, %v19782_v49  ;;  %11009 = vmatpush3.bf16.msra.mxu0 %v11008_v22  ;;  %vm19792_vm9 = vmmov %vm19755_vm0  ;;  %v15887_v22 = vpop.permute.xlu0 %11602  ;;  %v19807_v49 = vld [vmem:[#allocation44_spill] sm:$0xff] }
 0x56a   : > { %2294 = vrot.lane.b32.xlu1 %v19784_v52, %s12433_s22  ;;  %11011 = vmatprep.subr.bf16.mxu0 %v11010_v3  ;;  %v19806_v3 = vld [vmem:[#allocation45_spill] sm:$0xff] }
 0x56c   : > { %10572 = vmatmul.mubr.msk.f32.gmra.mrb[42].mxu0 %vm19786_vm6, %v19785_v10  ;;  %v11596_v4 = vpop.trf.xlu1  ;;  %vm19795_vm6 = vmmov %vm19755_vm0  ;;  %v19813_v10 = vld [vmem:[#allocation50_spill] sm:$0xff] }
 0x56d   : > { %10574 = vmatprep.mubr.msk.f32.mxu0 %vm19755_vm0, %v19787_v27  ;;  %11013 = vmatpush3.bf16.msra.mxu0 %v11012_v11  ;;  %v11597_v9 = vunpack.i.l.bf16 %v11596_v4  ;;  %v11600_v8 = vunpack.i.h.bf16 %v11596_v4  ;;  %v2259_v20 = vpop.permute.xlu0 %2258  ;;  %v19808_v11 = vld [vmem:[#allocation47_spill] sm:$0xff]  ;;  %v19815_v4 = vld [vmem:[#allocation134_spill] sm:$0xff] }
 0x56e   : > { %2296 = vrot.lane.b32.xlu1 %v19788_v63, %s12433_s22  ;;  %11015 = vmatprep.subr.bf16.mxu0 %v11014_v46  ;;  %v19814_v46 = vld [vmem:[#allocation133_spill] sm:$0xff] }
 0x56f   : > { %v19816_v27 = vpack.i.bf16 %v19814_v46, %v19815_v4  ;;  %v19833_v4 = vld [vmem:[#allocation25_spill] sm:$0xff] }
 0x570   : > { %10575 = vmatmul.mubr.msk.f32.gmra.mrb[44].mxu0 %vm19790_vm8, %v19789_v28  ;;  %vm19799_vm8 = vmmov %vm19755_vm0  ;;  %v19820_v28 = vld [vmem:[#allocation136_spill] sm:$0xff] }
 0x571   : > { %10577 = vmatprep.mubr.msk.f32.mxu0 %vm19792_vm9, %v19791_v5  ;;  %11017 = vmatpush3.bf16.msra.mxu0 %v11016_v37  ;;  %vm19801_vm9 = vmmov %vm19755_vm0  ;;  %v19817_v37 = vld [vmem:[#allocation21_spill] sm:$0xff]  ;;  %v19822_v5 = vld [vmem:[#allocation52_spill] sm:$0xff] }
 0x572   : > { %2298 = vrot.lane.b32.xlu1 %v19793_v33, %s12433_s22  ;;  %11019 = vmatprep.subr.bf16.mxu0 %v11018_v1  ;;  %v19821_v1 = vpack.i.bf16 %v19819_v51, %v19820_v28  ;;  %v19835_v51 = vld [vmem:[#allocation143_spill] sm:$0xff] }
 0x574   : > { %10578 = vmatmul.mubr.msk.f32.gmra.mrb[46].mxu0 %vm19795_vm6, %v19794_v48  ;;  %vm19804_vm6 = vmmov %vm19755_vm0 }
 0x575   : > { %10580 = vmatprep.mubr.msk.f32.mxu0 %vm19755_vm0, %v19796_v45  ;;  %11021 = vmatpush3.bf16.msra.mxu0 %v11020_v0  ;;  %v19823_v0 = vld [vmem:[#allocation137_spill] sm:$0xff]  ;;  %v19825_v45 = vld [vmem:[#allocation23_spill] sm:$0xff] }
 0x576   : > { %2300 = vrot.lane.b32.xlu1 %v19797_v17, %s12433_s22  ;;  %v19824_v48 = vpack.i.bf16 %v19822_v5, %v19823_v0  ;;  %v19838_v5 = vld [vmem:[#allocation54_spill] sm:$0xff] }
 0x578   : > { %10581 = vmatmul.mubr.msk.f32.gmra.mrb[48].mxu0 %vm19799_vm8, %v19798_v41  ;;  %v19826_v41 = vld [vmem:[#allocation22_spill] sm:$0xff]  ;;  %vm19915_vm8 = vcmask 27648  }
 0x579   : > { %10583 = vmatprep.mubr.msk.f32.mxu0 %vm19801_vm9, %v19800_v15  ;;  %v19827_v15 = vld [vmem:[#allocation138_spill] sm:$0xff]  ;;  %vm19943_vm9 = vmmov %vm19915_vm8 }
 0x57a   : > { %2302 = vrot.lane.b32.xlu1 %v19802_v61, %s12433_s22 }
 0x57c   : > { %10584 = vmatmul.mubr.msk.f32.gmra.mrb[50].mxu0 %vm19804_vm6, %v19803_v26  ;;  %vm19948_vm6 = vmmov %vm19755_vm0 }
 0x57d   : > { %2238 = vmatprep.mubr.f32.mxu0 %v11597_v9  ;;  %v19828_v9 = vld [vmem:[#allocation139_spill] sm:$0xff] }
 0x57e   : > { %2304 = vrot.lane.b32.xlu1 %v19805_v31, %s12433_s22  ;;  %v19829_v26 = vpack.i.bf16 %v19827_v15, %v19828_v9  ;;  %v19841_v15 = vld [vmem:[#allocation26_spill] sm:$0xff]  ;;  %v19842_v9 = vld [vmem:[#allocation55_spill] sm:$0xff] }
 0x580   : > { %2239 = vmatmul.mubr.f32.vlgmr.msra.gmra.mrb[52].mxu0 %v11600_v8  ;;  %v19830_v8 = vld [vmem:[#allocation140_spill] sm:$0xff] }
 0x581   : > { %10606 = vmatprep.mubr.msk.f32.mxu0 %vm19755_vm0, %v2259_v20  ;;  %v19831_v20 = vld [vmem:[#allocation141_spill] sm:$0xff] }
 0x582   : > { %2306 = vrot.lane.b32.xlu1 %v19806_v3, %s12433_s22  ;;  %v19832_v46 = vpack.i.bf16 %v19830_v8, %v19831_v20  ;;  %v19845_v20 = vld [vmem:[#allocation144_spill] sm:$0xff] }
 0x586   : > { %2308 = vrot.lane.b32.xlu1 %v19807_v49, %s12433_s22 }
 0x58a   : > { %2310 = vrot.lane.b32.xlu1 %v19808_v11, %s12433_s22 }
 0x58e   : > { %2312 = vrot.lane.b32.xlu1 %v19809_v16, %s12433_s22 }
 0x592   : > { %2314 = vrot.lane.b32.xlu1 %v19810_v57, %s12433_s22 }
 0x596   : > { %2316 = vrot.lane.b32.xlu1 %v19811_v6, %s12433_s22 }
 0x59a   : > { %2318 = vrot.lane.b32.xlu1 %v19812_v53, %s12433_s22  ;;  %v19945_v53 = vld [vmem:[#allocation186_spill] sm:$0xff] }
 0x59e   : > { %2320 = vrot.lane.b32.xlu1 %v19813_v10, %s12433_s22  ;;  %v19944_v10 = vld [vmem:[#allocation187_spill] sm:$0xff]  ;;  %s16680_s22 = sld [smem:[#allocation9 + $0x2]] }
 0x59f   : > { %v19946_v6 = vpack.i.bf16 %v19944_v10, %v19945_v53 }
 0x5a2   : > { %11799 = vrot.lane.b32.xlu1 %v19816_v27, %s12435_s16  ;;  %v19834_v27 = vld [vmem:[#allocation142_spill] sm:$0xff] }
 0x5a3   : > { %v19836_v28 = vpack.i.bf16 %v19834_v27, %v19835_v51  ;;  %v19848_v51 = vld [vmem:[#allocation29_spill] sm:$0xff] }
 0x5a6   : > { %3889 = vrot.lane.b32.xlu1 %v19817_v37, %s12436_s20  ;;  %v2245_v37 = vstv %s9756_s15 }
 0x5aa   : > { %3891 = vrot.lane.b32.xlu1 %v19818_v55, %s12436_s20 }
 0x5ae   : > { %11804 = vrot.lane.b32.xlu1 %v19821_v1, %s12435_s16  ;;  %v19837_v1 = vld [vmem:[#allocation53_spill] sm:$0xff] }
 0x5af   : > { %v19839_v0 = vpack.i.bf16 %v19837_v1, %v19838_v5  ;;  %v19850_v1 = vld [vmem:[#allocation146_spill] sm:$0xff]  ;;  %v19851_v5 = vld [vmem:[#allocation147_spill] sm:$0xff] }
 0x5b2   : > { %11809 = vrot.lane.b32.xlu1 %v19824_v48, %s12435_s16  ;;  %v19840_v48 = vld [vmem:[#allocation27_spill] sm:$0xff] }
 0x5b6   : > { %3893 = vrot.lane.b32.xlu1 %v19825_v45, %s12436_s20 }
 0x5b8   : > { %v15980_v32 = vpop.permute.xlu1 %11632 }
 0x5ba   : > { %3895 = vrot.lane.b32.xlu1 %v19826_v41, %s12436_s20 }
 0x5be   : > { %11814 = vrot.lane.b32.xlu1 %v19829_v26, %s12435_s16  ;;  %v19843_v26 = vld [vmem:[#allocation56_spill] sm:$0xff] }
 0x5bf   : > { %v19844_v8 = vpack.i.bf16 %v19842_v9, %v19843_v26  ;;  %v19854_v9 = vld [vmem:[#allocation149_spill] sm:$0xff] }
 0x5c0   : > { %v19855_v26 = vpack.i.bf16 %v19853_v47, %v19854_v9  ;;  %v15988_v47 = vpop.permute.xlu1 %2278  ;;  %v19864_v9 = vld [vmem:[#allocation34_spill] sm:$0xff] }
 0x5c2   : > { %11819 = vrot.lane.b32.xlu1 %v19832_v46, %s12435_s16  ;;  %v19846_v46 = vld [vmem:[#allocation145_spill] sm:$0xff] }
 0x5c3   : > { %v19847_v27 = vpack.i.bf16 %v19845_v20, %v19846_v46  ;;  %v19857_v20 = vld [vmem:[#allocation57_spill] sm:$0xff]  ;;  %v19858_v46 = vld [vmem:[#allocation58_spill] sm:$0xff] }
 0x5c6   : > { %3897 = vrot.lane.b32.xlu1 %v19833_v4, %s12436_s20 }
 0x5ca   : > { %11824 = vrot.lane.b32.xlu1 %v19836_v28, %s12435_s16  ;;  %v19849_v28 = vld [vmem:[#allocation28_spill] sm:$0xff] }
 0x5ce   : > { %11829 = vrot.lane.b32.xlu1 %v19839_v0, %s12435_s16  ;;  %v19852_v0 = vpack.i.bf16 %v19850_v1, %v19851_v5  ;;  %v19861_v1 = vld [vmem:[#allocation150_spill] sm:$0xff]  ;;  %v19862_v5 = vld [vmem:[#allocation151_spill] sm:$0xff] }
 0x5d2   : > { %3901 = vrot.lane.b32.xlu1 %v19840_v48, %s12436_s20 }
 0x5d6   : > { %3903 = vrot.lane.b32.xlu1 %v19841_v15, %s12436_s20 }
 0x5da   : > { %11834 = vrot.lane.b32.xlu1 %v19844_v8, %s12435_s16  ;;  %v19856_v8 = vld [vmem:[#allocation30_spill] sm:$0xff] }
 0x5de   : > { %11839 = vrot.lane.b32.xlu1 %v19847_v27, %s12435_s16  ;;  %v19859_v27 = vpack.i.bf16 %v19857_v20, %v19858_v46  ;;  %v19865_v20 = vld [vmem:[#allocation153_spill] sm:$0xff]  ;;  %v19866_v46 = vld [vmem:[#allocation152_spill] sm:$0xff] }
 0x5e2   : > { %3905 = vrot.lane.b32.xlu1 %v19848_v51, %s12436_s20  ;;  %v19870_v51 = vpack.i.bf16 %v19868_v25, %v19869_v58  ;;  %v19880_v25 = vld [vmem:[#allocation163_spill] sm:$0xff] }
 0x5e6   : > { %3907 = vrot.lane.b32.xlu1 %v19849_v28, %s12436_s20 }
 0x5ea   : > { %11844 = vrot.lane.b32.xlu1 %v19852_v0, %s12435_s16  ;;  %v19863_v0 = vpack.i.bf16 %v19861_v1, %v19862_v5  ;;  %v19871_v5 = vld [vmem:[#allocation157_spill] sm:$0xff] }
 0x5ee   : > { %11849 = vrot.lane.b32.xlu1 %v19855_v26, %s12435_s16  ;;  %v15992_v26 = vpop.permute.xlu1 %11657 }
 0x5f2   : > { %3911 = vrot.lane.b32.xlu1 %v19856_v8, %s12436_s20  ;;  %v16002_v1 = vpop.permute.xlu1 %2282  ;;  %v19875_v8 = vld [vmem:[#allocation158_spill] sm:$0xff] }
 0x5f6   : > { %11859 = vrot.lane.b32.xlu1 %v19859_v27, %s12435_s16  ;;  %v19867_v27 = vpack.i.bf16 %v19865_v20, %v19866_v46  ;;  %v19877_v20 = vld [vmem:[#allocation161_spill] sm:$0xff]  ;;  %v19878_v46 = vld [vmem:[#allocation160_spill] sm:$0xff] }
 0x5fa   : > { %3915 = vrot.lane.b32.xlu1 %v19860_v54, %s12436_s20  ;;  %v19874_v54 = vld [vmem:[#allocation159_spill] sm:$0xff] }
 0x5fb   : > { %v19876_v28 = vpack.i.bf16 %v19874_v54, %v19875_v8  ;;  %v19886_v54 = vld [vmem:[#allocation167_spill] sm:$0xff] }
 0x5fe   : > { %11869 = vrot.lane.b32.xlu1 %v19863_v0, %s12435_s16  ;;  %v19872_v0 = vld [vmem:[#allocation156_spill] sm:$0xff] }
 0x5ff   : > { %v19873_v55 = vpack.i.bf16 %v19871_v5, %v19872_v0  ;;  %v19883_v5 = vld [vmem:[#allocation165_spill] sm:$0xff]  ;;  %v19884_v0 = vld [vmem:[#allocation164_spill] sm:$0xff] }
 0x600   : > { %v19885_v48 = vpack.i.bf16 %v19883_v5, %v19884_v0 }
 0x602   : > { %3919 = vrot.lane.b32.xlu1 %v19864_v9, %s12436_s20  ;;  %v16008_v9 = vpop.permute.xlu1 %11667 }
 0x606   : > { %11879 = vrot.lane.b32.xlu1 %v19867_v27, %s12437_s1  ;;  %v19879_v27 = vpack.i.bf16 %v19877_v20, %v19878_v46  ;;  %v16018_v58 = vpop.permute.xlu1 %2286  ;;  %v19889_v46 = vld [vmem:[#allocation169_spill] sm:$0xff] }
 0x60a   : > { %11884 = vrot.lane.b32.xlu1 %v19870_v51, %s12437_s1  ;;  %v19881_v51 = vld [vmem:[#allocation162_spill] sm:$0xff] }
 0x60b   : > { %v19882_v15 = vpack.i.bf16 %v19880_v25, %v19881_v51  ;;  %v19892_v25 = vld [vmem:[#allocation171_spill] sm:$0xff]  ;;  %v19893_v51 = vld [vmem:[#allocation170_spill] sm:$0xff] }
 0x60c   : > { %v19894_v41 = vpack.i.bf16 %v19892_v25, %v19893_v51 }
 0x60e   : > { %11889 = vrot.lane.b32.xlu1 %v19873_v55, %s12437_s1  ;;  %v16024_v55 = vpop.permute.xlu1 %11677 }
 0x612   : > { %11894 = vrot.lane.b32.xlu1 %v19876_v28, %s12437_s1  ;;  %v19887_v28 = vld [vmem:[#allocation166_spill] sm:$0xff]  ;;  %v16034_v20 = vpop.permute.xlu1 %2290 }
 0x613   : > { %v19888_v8 = vpack.i.bf16 %v19886_v54, %v19887_v28 }
 0x616   : > { %11899 = vrot.lane.b32.xlu1 %v19879_v27, %s12437_s1  ;;  %v19890_v27 = vld [vmem:[#allocation168_spill] sm:$0xff] }
 0x617   : > { %v19891_v4 = vpack.i.bf16 %v19889_v46, %v19890_v27  ;;  %v16062_v27 = vpop.permute.xlu0 %2260 }
 0x61a   : > { %11904 = vrot.lane.b32.xlu1 %v19882_v15, %s12437_s1  ;;  %v16040_v15 = vpop.permute.xlu1 %2292 }
 0x61e   : > { %11909 = vrot.lane.b32.xlu1 %v19885_v48, %s12437_s1  ;;  %v16181_v53 = vpop.permute.xlu1 %2294 }
 0x622   : > { %11914 = vrot.lane.b32.xlu1 %v19888_v8, %s12437_s1 }
 0x626   : > { %11919 = vrot.lane.b32.xlu1 %v19891_v4, %s12437_s1 }
 0x62a   : > { %11924 = vrot.lane.b32.xlu1 %v19894_v41, %s12437_s1 }
 0x62b   : > { %v16046_v48 = vpop.f32.mrb[32].mxu0 }
 0x62c   : > { %19895 = vst [vmem:[#allocation236_spill] sm:$0xff] %v16046_v48  ;;  %v16048_v5 = vpop.f32.mrb[33].mxu0 }
 0x62d   : > { %19896 = vst [vmem:[#allocation97_spill] sm:$0xff] %v16048_v5 }
 0x62f   : > { %v16050_v0 = vpop.f32.mrb[34].mxu0 }
 0x630   : > { %19897 = vst [vmem:[#allocation103_spill] sm:$0xff] %v16050_v0  ;;  %v16052_v54 = vpop.f32.mrb[35].mxu0  ;;  %v11608_v0 = vpop.permute.xlu0 %11607 }
 0x631   : > { %19898 = vst [vmem:[#allocation216_spill] sm:$0xff] %v16052_v54 }
 0x633   : > { %v16054_v28 = vpop.f32.mrb[36].mxu0 }
 0x634   : > { %19899 = vst [vmem:[#allocation218_spill] sm:$0xff] %v16054_v28  ;;  %v16056_v8 = vpop.f32.mrb[37].mxu0 }
 0x635   : > { %19900 = vst [vmem:[#allocation220_spill] sm:$0xff] %v16056_v8  ;;  %v11613_v8 = vpop.permute.xlu0 %11612 }
 0x637   : > { %v16058_v4 = vpop.f32.mrb[38].mxu0 }
 0x638   : > { %19901 = vst [vmem:[#allocation223_spill] sm:$0xff] %v16058_v4  ;;  %v16060_v46 = vpop.f32.mrb[39].mxu0 }
 0x639   : > { %19902 = vst [vmem:[#allocation221_spill] sm:$0xff] %v16060_v46 }
 0x63b   : > { %v16064_v25 = vpop.f32.mrb[40].mxu0 }
 0x63c   : > { %19903 = vst [vmem:[#allocation228_spill] sm:$0xff] %v16064_v25  ;;  %v16066_v41 = vpop.f32.mrb[41].mxu0  ;;  %v16084_v25 = vpop.permute.xlu0 %2262 }
 0x63d   : > { %19904 = vst [vmem:[#allocation114_spill] sm:$0xff] %v16066_v41 }
 0x63f   : > { %v16068_v51 = vpop.f32.mrb[42].mxu0 }
 0x640   : > { %19905 = vst [vmem:[#allocation113_spill] sm:$0xff] %v16068_v51  ;;  %v16070_v48 = vpop.f32.mrb[43].mxu0  ;;  %v16090_v41 = vpop.permute.xlu0 %2264 }
 0x641   : > { %19906 = vst [vmem:[#allocation230_spill] sm:$0xff] %v16070_v48 }
 0x643   : > { %v16072_v54 = vpop.f32.mrb[44].mxu0 }
 0x644   : > { %19907 = vst [vmem:[#allocation229_spill] sm:$0xff] %v16072_v54  ;;  %v16074_v28 = vpop.f32.mrb[45].mxu0  ;;  %v11618_v40 = vpop.permute.xlu0 %11617 }
 0x645   : > { %19908 = vst [vmem:[#allocation116_spill] sm:$0xff] %v16074_v28 }
 0x647   : > { %v16076_v5 = vpop.f32.mrb[46].mxu0 }
 0x648   : > { %19909 = vst [vmem:[#allocation115_spill] sm:$0xff] %v16076_v5  ;;  %v16078_v4 = vpop.f32.mrb[47].mxu0 }
 0x649   : > { %19910 = vst [vmem:[#allocation118_spill] sm:$0xff] %v16078_v4 }
 0x64b   : > { %v16080_v46 = vpop.f32.mrb[48].mxu0 }
 0x64c   : > { %19911 = vst [vmem:[#allocation117_spill] sm:$0xff] %v16080_v46  ;;  %v16082_v45 = vpop.f32.mrb[49].mxu0  ;;  %v11623_v46 = vpop.permute.xlu0 %11622 }
 0x64d   : > { %19912 = vst [vmem:[#allocation120_spill] sm:$0xff] %v16082_v45 }
 0x64f   : > { %v16086_v51 = vpop.f32.mrb[50].mxu0 }
 0x650   : > { %19913 = vst [vmem:[#allocation119_spill] sm:$0xff] %v16086_v51  ;;  %v16088_v48 = vpop.f32.mrb[51].mxu0  ;;  %v16093_v45 = vpop.permute.xlu0 %2266  ;;  %v19916_v51 = vld [vmem:[#allocation173_spill] sm:$0xff] }
 0x651   : > { %19914 = vst [vmem:[#allocation122_spill] sm:$0xff] %v16088_v48  ;;  %v19918_v48 = vpack.i.bf16 %v19916_v51, %v19917_v29  ;;  %v19929_v51 = vld [vmem:[#allocation178_spill] sm:$0xff] }
 0x653   : > { %v10198_v54 = vpop.f32.mrb[52].mxu0 }
 0x654   : > { %v10199_v28 = vpop.f32.mrb[53].mxu0  ;;  %v16095_v35 = vpop.permute.xlu0 %2268 }
 0x655   : > { %v10200_v43 = vadd.f32 %v10199_v28, %v10198_v54  ;;  %v19921_v54 = vpack.i.bf16 %v19919_v50, %v19920_v13  ;;  %v19923_v28 = vld [vmem:[#allocation174_spill] sm:$0xff]  ;;  %v19931_v50 = vld [vmem:[#allocation181_spill] sm:$0xff] }
 0x657   : > { %v2246_v5 = vmul.f32 %v10200_v43, %v2245_v37  ;;  %v19922_v37 = vld [vmem:[#allocation175_spill] sm:$0xff] }
 0x658   : > { %v11628_v56 = vpop.permute.xlu0 %11627 }
 0x659   : > { %v2247_v4 = vsel %vm19915_vm8, %v2246_v5, -inf  ;;  %vm19949_vm8 = vmmov %vm19755_vm0 }
 0x65a   : > { %2248 = vmax.xlane.f32.xlu0 %v2247_v4  ;;  %v19924_v4 = vpack.i.bf16 %v19922_v37, %v19923_v28  ;;  %v19934_v37 = vld [vmem:[#allocation61_spill] sm:$0xff]  ;;  %v19935_v28 = vld [vmem:[#allocation182_spill] sm:$0xff] }
 0x65c   : > { %v16105_v43 = vpop.permute.xlu0 %2270 }
 0x660   : > { %v16115_v29 = vpop.permute.xlu0 %2272 }
 0x664   : > { %v11638_v13 = vpop.permute.xlu0 %11637 }
 0x668   : > { %v11643_v14 = vpop.permute.xlu0 %11642 }
 0x66c   : > { %v16133_v7 = vpop.permute.xlu0 %2274 }
 0x670   : > { %11712 = vrot.lane.b32.xlu0 %v19918_v48, %s12434_s19  ;;  %v19928_v48 = vld [vmem:[#allocation179_spill] sm:$0xff] }
 0x671   : > { %v19930_v62 = vpack.i.bf16 %v19928_v48, %v19929_v51  ;;  %v19941_v48 = vld [vmem:[#allocation184_spill] sm:$0xff] }
 0x674   : > { %11717 = vrot.lane.b32.xlu0 %v19921_v54, %s12434_s19  ;;  %v19932_v54 = vld [vmem:[#allocation180_spill] sm:$0xff] }
 0x675   : > { %v19933_v19 = vpack.i.bf16 %v19931_v50, %v19932_v54  ;;  %v16139_v50 = vpop.permute.xlu0 %2276 }
 0x678   : > { %11722 = vrot.lane.b32.xlu0 %v19924_v4, %s12434_s19  ;;  %v19936_v4 = vpack.i.bf16 %v19934_v37, %v19935_v28 }
 0x67c   : > { %11727 = vrot.lane.b32.xlu0 %v19927_v34, %s12434_s19  ;;  %v19937_v34 = vld [vmem:[#allocation183_spill] sm:$0xff] }
 0x67d   : > { %v19939_v39 = vpack.i.bf16 %v19937_v34, %v19938_v21 }
 0x680   : > { %11732 = vrot.lane.b32.xlu0 %v19930_v62, %s12434_s19  ;;  %v19940_v62 = vld [vmem:[#allocation185_spill] sm:$0xff] }
 0x681   : > { %v19942_v51 = vpack.i.bf16 %v19940_v62, %v19941_v48 }
 0x684   : > { %11737 = vrot.lane.b32.xlu0 %v19933_v19, %s12434_s19  ;;  %v11648_v19 = vpop.permute.xlu0 %11647 }
 0x688   : > { %11742 = vrot.lane.b32.xlu0 %v19936_v4, %s12434_s19  ;;  %v11653_v54 = vpop.permute.xlu0 %11652 }
 0x68c   : > { %11747 = vrot.lane.b32.xlu0 %v19939_v39, %s12434_s19  ;;  %v16141_v30 = vpop.permute.xlu0 %2280 }
 0x690   : > { %11752 = vrot.lane.b32.xlu0 %v19942_v51, %s12434_s19  ;;  %v11663_v37 = vpop.permute.xlu0 %11662 }
 0x694   : > { %v16143_v28 = vpop.permute.xlu0 %2284 }
 0x698   : > { %v11673_v4 = vpop.permute.xlu0 %11672 }
 0x69c   : > { %v16145_v42 = vpop.permute.xlu0 %2288 }
 0x6a0   : > { %v11683_v39 = vpop.permute.xlu0 %11682 }
 0x6a4   : > { %v11688_v34 = vpop.permute.xlu0 %11687 }
 0x6a8   : > { %v16147_v21 = vpop.permute.xlu0 %11692 }
 0x6ac   : > { %v16149_v12 = vpop.permute.xlu0 %11697 }
 0x6b0   : > { %v16151_v62 = vpop.permute.xlu0 %11702 }
 0x6b4   : > { %v16153_v48 = vpop.permute.xlu0 %11707 }
 0x6e7   : > { %v2249_v51 = vpop.xlane.xlu0 %2248 }
 0x6e8   : > { %v2250_v60 = vsub.f32 %v2246_v5, %v2249_v51 }
 0x6ea   : > { %v2251_v59 = vmul.f32 1.442695, %v2250_v60 }
 0x6ec   : > { %12099 = vpow2.f32 %v2251_v59  ;;  %v16162_v59 = vpop.permute.xlu0 %11712 }
 0x6f0   : > { %v16164_v60 = vpop.permute.xlu0 %11717 }
 0x6f6   : > { %v12100_v36 = vpop.eup %12099 }
 0x6f7   : > { %v2253_v24 = vsel %vm19943_vm9, %v12100_v36, 0.0  ;;  %vm19950_vm9 = vmmov %vm19755_vm0 }
 0x6f8   : > { %2254 = vadd.xlane.f32.xlu0 %v2253_v24  ;;  %v16167_v24 = vpop.permute.xlu0 %11722 }
 0x70e   : > { %11757 = vrot.lane.b32.xlu0 %v19946_v6, %s12434_s19  ;;  %s12438_s19 = smov 84  }
 0x72c   : > { %11762 = vxpose.xlu0.b32.start [1/16] (narrow) %v15887_v22, 8 }
 0x730   : > { %11764 = vxpose.xlu0.b32.cont [2/16] (narrow) %v11608_v0, 8  ;;  %v11685_v0 = vunpack.i.h.bf16 %v11683_v39 }
 0x734   : > { %11766 = vxpose.xlu0.b32.cont [3/16] (narrow) %v11613_v8, 8 }
 0x738   : > { %11768 = vxpose.xlu0.b32.cont [4/16] (narrow) %v11618_v40, 8  ;;  %v16170_v40 = vpop.permute.xlu0 %11727 }
 0x73c   : > { %11770 = vxpose.xlu0.b32.cont [5/16] (narrow) %v11623_v46, 8 }
 0x740   : > { %11772 = vxpose.xlu0.b32.cont [6/16] (narrow) %v11628_v56, 8 }
 0x744   : > { %11774 = vxpose.xlu0.b32.cont [7/16] (narrow) %v15980_v32, 8  ;;  %v16173_v32 = vpop.permute.xlu0 %11732 }
 0x748   : > { %11776 = vxpose.xlu0.b32.cont [8/16] (narrow) %v11638_v13, 8  ;;  %v16175_v56 = vpop.permute.xlu0 %11737  ;;  %v19947_v13 = vld [vmem:[#allocation24_spill] sm:$0xff] }
 0x74c   : > { %11778 = vxpose.xlu0.b32.cont [9/16] (narrow) %v11643_v14, 8  ;;  %v16177_v22 = vpop.permute.xlu0 %11742 }
 0x750   : > { %11780 = vxpose.xlu0.b32.cont [10/16] (narrow) %v11648_v19, 8  ;;  %v16179_v6 = vpop.permute.xlu0 %11747  ;;  %v11690_v19 = vunpack.i.h.bf16 %v11688_v34 }
 0x754   : > { %11782 = vxpose.xlu0.b32.cont [11/16] (narrow) %v11653_v54, 8  ;;  %v16183_v10 = vpop.permute.xlu0 %11752  ;;  %v11689_v54 = vunpack.i.l.bf16 %v11688_v34  ;;  %v11699_v34 = vunpack.i.l.bf16 %v16149_v12 }
 0x758   : > { %11784 = vxpose.xlu0.b32.cont [12/16] (narrow) %v15992_v26, 8  ;;  %v16185_v26 = vpop.permute.xlu1 %2296 }
 0x75c   : > { %11786 = vxpose.xlu0.b32.cont [13/16] (narrow) %v11663_v37, 8  ;;  %v16187_v5 = vpop.permute.xlu1 %2298  ;;  %v11695_v37 = vunpack.i.h.bf16 %v16147_v21 }
 0x760   : > { %11788 = vxpose.xlu0.b32.cont [14/16] (narrow) %v16008_v9, 8  ;;  %v16189_v8 = vpop.permute.xlu1 %2300 }
 0x764   : > { %11790 = vxpose.xlu0.b32.cont [15/16] (narrow) %v11673_v4, 8  ;;  %v11694_v4 = vunpack.i.l.bf16 %v16147_v21  ;;  %v11704_v21 = vunpack.i.l.bf16 %v16151_v62 }
 0x768   : > { %11792 = vxpose.xlu0.b32.end [16/16] (narrow) %v16024_v55, 8  ;;  %v11684_v55 = vunpack.i.l.bf16 %v11683_v39  ;;  %v11024_v39 = vpack.c.bf16 %v11690_v19, %v11689_v54 }
 0x76a   : > { %v11022_v51 = vpack.c.bf16 %v11685_v0, %v11684_v55  ;;  %v11026_v0 = vpack.c.bf16 %v11695_v37, %v11694_v4  ;;  %v19951_v55 = vld [vmem:[#allocation188_spill] sm:$0xff]  ;;  %v11714_v37 = vunpack.i.l.bf16 %v16162_v59 }
 0x785   : > { %v2255_v9 = vpop.xlane.xlu0 %2254 }
 0x786   : > { %12101 = vrcp.f32 %v2255_v9  ;;  %v16197_v9 = vpop.permute.xlu1 %2302 }
 0x790   : > { %v12102_v46 = vpop.eup %12101 }
 0x791   : > { %3899 = vrot.lane.b32.xlu0 %v19947_v13, %s12436_s20  ;;  %v2257_v14 = vmul.f32 %v12102_v46, %v12100_v36  ;;  %v11700_v36 = vunpack.i.h.bf16 %v16149_v12  ;;  %v11705_v46 = vunpack.i.h.bf16 %v16151_v62  ;;  %v11710_v12 = vunpack.i.h.bf16 %v16153_v48  ;;  %v16215_v62 = vpop.permute.xlu1 %2304 }
 0x793   : > { %10604 = vmatprep.subr.msk.mxu0 %vm19948_vm6, %v2257_v14  ;;  %v11028_v54 = vpack.c.bf16 %v11700_v36, %v11699_v34  ;;  %vm19954_vm6 = vmmov %vm19755_vm0  ;;  %v11725_v36 = vunpack.i.h.bf16 %v16167_v24  ;;  %v19957_v34 = vld [vmem:[#allocation190_spill] sm:$0xff] }
 0x794   : > { %10605 = vmatpush3.xpose.msk.msra.mxu0 %vm19755_vm0, %v2257_v14  ;;  %v19952_v14 = vld [vmem:[#allocation189_spill] sm:$0xff] }
 0x795   : > { %3909 = vrot.lane.b32.xlu0 %v19748_v44, %s12436_s20  ;;  %11023 = vmatprep.subr.bf16.mxu0 %v11022_v51  ;;  %v19953_v19 = vpack.i.bf16 %v19951_v55, %v19952_v14  ;;  %v11709_v51 = vunpack.i.l.bf16 %v16153_v48  ;;  %v11720_v48 = vunpack.i.h.bf16 %v16164_v60  ;;  %v11734_v55 = vunpack.i.l.bf16 %v16173_v32 }
 0x797   : > { %10607 = vmatmul.mubr.msk.f32.vlgmr.msra.gmra.mrb[54].mxu0 %vm19949_vm8, %v16062_v27  ;;  %v11715_v27 = vunpack.i.h.bf16 %v16162_v59  ;;  %v11032_v4 = vpack.c.bf16 %v11710_v12, %v11709_v51  ;;  %v11724_v59 = vunpack.i.l.bf16 %v16167_v24  ;;  %vm19955_vm8 = vmmov %vm19755_vm0  ;;  %v11729_v24 = vunpack.i.l.bf16 %v16170_v40  ;;  %v19963_v51 = vld [vmem:[#allocation192_spill] sm:$0xff] }
 0x798   : > { %10609 = vmatprep.mubr.msk.f32.mxu0 %vm19950_vm9, %v16084_v25  ;;  %11025 = vmatpush3.bf16.msra.mxu0 %v11024_v39  ;;  %v11030_v25 = vpack.c.bf16 %v11705_v46, %v11704_v21  ;;  %v11719_v39 = vunpack.i.l.bf16 %v16164_v60  ;;  %vm19956_vm9 = vmmov %vm19755_vm0  ;;  %v19958_v46 = vld [vmem:[#allocation191_spill] sm:$0xff]  ;;  %v11744_v12 = vunpack.i.l.bf16 %v16177_v22 }
 0x799   : > { %11854 = vrot.lane.b32.xlu0 %v19953_v19, %s12435_s16  ;;  %11027 = vmatprep.subr.bf16.mxu0 %v11026_v0  ;;  %v19959_v21 = vpack.i.bf16 %v19957_v34, %v19958_v46  ;;  %v11730_v0 = vunpack.i.h.bf16 %v16170_v40  ;;  %v11740_v19 = vunpack.i.h.bf16 %v16175_v56  ;;  %v11739_v40 = vunpack.i.l.bf16 %v16175_v56 }
 0x79a   : > { %v11036_v60 = vpack.c.bf16 %v11720_v48, %v11719_v39 }
 0x79b   : > { %10610 = vmatmul.mubr.msk.f32.gmra.mrb[56].mxu0 %vm19954_vm6, %v16090_v41  ;;  %v11034_v41 = vpack.c.bf16 %v11715_v27, %v11714_v37  ;;  %vm19960_vm6 = vmmov %vm19755_vm0  ;;  %v11040_v14 = vpack.c.bf16 %v11730_v0, %v11729_v24  ;;  %v19964_v27 = vld [vmem:[#allocation193_spill] sm:$0xff]  ;;  %v11044_v56 = vpack.c.bf16 %v11740_v19, %v11739_v40 }
 0x79c   : > { %10612 = vmatprep.mubr.msk.f32.mxu0 %vm19755_vm0, %v16093_v45  ;;  %11029 = vmatpush3.bf16.msra.mxu0 %v11028_v54  ;;  %v16233_v45 = vpop.permute.xlu1 %2306  ;;  %v19965_v37 = vpack.i.bf16 %v19963_v51, %v19964_v27 }
 0x79d   : > { %3913 = vrot.lane.b32.xlu0 %v19752_v2, %s12436_s20  ;;  %11031 = vmatprep.subr.bf16.mxu0 %v11030_v25  ;;  %v11750_v25 = vunpack.i.h.bf16 %v16179_v6 }
 0x79f   : > { %10613 = vmatmul.mubr.msk.f32.gmra.mrb[58].mxu0 %vm19955_vm8, %v16095_v35  ;;  %v11735_v35 = vunpack.i.h.bf16 %v16173_v32  ;;  %v11745_v32 = vunpack.i.h.bf16 %v16177_v22  ;;  %vm19961_vm8 = vmmov %vm19755_vm0  ;;  %v11749_v22 = vunpack.i.l.bf16 %v16179_v6 }
 0x7a0   : > { %10615 = vmatprep.mubr.msk.f32.mxu0 %vm19956_vm9, %v16105_v43  ;;  %11033 = vmatpush3.bf16.msra.mxu0 %v11032_v4  ;;  %v11038_v43 = vpack.c.bf16 %v11725_v36, %v11724_v59  ;;  %v2309_v54 = vpop.permute.xlu1 %2308  ;;  %vm19962_vm9 = vmmov %vm19755_vm0  ;;  %v11755_v4 = vunpack.i.h.bf16 %v16183_v10 }
 0x7a1   : > { %11864 = vrot.lane.b32.xlu0 %v19959_v21, %s12435_s16  ;;  %11035 = vmatprep.subr.bf16.mxu0 %v11034_v41  ;;  %v11048_v36 = vpack.c.bf16 %v11750_v25, %v11749_v22 }
 0x7a3   : > { %10616 = vmatmul.mubr.msk.f32.gmra.mrb[60].mxu0 %vm19960_vm6, %v16115_v29  ;;  %v11042_v29 = vpack.c.bf16 %v11735_v35, %v11734_v55  ;;  %vm19966_vm6 = vmmov %vm19755_vm0 }
 0x7a4   : > { %10618 = vmatprep.mubr.msk.f32.mxu0 %vm19755_vm0, %v16133_v7  ;;  %11037 = vmatpush3.bf16.msra.mxu0 %v11036_v60  ;;  %v11758_v7 = vpop.permute.xlu0 %11757  ;;  %v2311_v39 = vpop.permute.xlu1 %2310 }
 0x7a5   : > { %3917 = vrot.lane.b32.xlu0 %v19764_v23, %s12436_s20  ;;  %11039 = vmatprep.subr.bf16.mxu0 %v11038_v43  ;;  %v11760_v6 = vunpack.i.h.bf16 %v11758_v7  ;;  %v11759_v59 = vunpack.i.l.bf16 %v11758_v7 }
 0x7a7   : > { %10619 = vmatmul.mubr.msk.f32.gmra.mrb[62].mxu0 %vm19961_vm8, %v16139_v50  ;;  %v11754_v50 = vunpack.i.l.bf16 %v16183_v10  ;;  %vm19967_vm8 = vmmov %vm19755_vm0 }
 0x7a8   : > { %10621 = vmatprep.mubr.msk.f32.mxu0 %vm19962_vm9, %v15988_v47  ;;  %11041 = vmatpush3.bf16.msra.mxu0 %v11040_v14  ;;  %v11046_v47 = vpack.c.bf16 %v11745_v32, %v11744_v12  ;;  %vm19968_vm9 = vmmov %vm19755_vm0 }
 0x7a9   : > { %11874 = vrot.lane.b32.xlu0 %v19965_v37, %s12435_s16  ;;  %11043 = vmatprep.subr.bf16.mxu0 %v11042_v29  ;;  %v11050_v10 = vpack.c.bf16 %v11755_v4, %v11754_v50  ;;  %v20003_v37 = vld [vmem:[#allocation70_spill] sm:$0xff]  ;;  %v20006_v50 = vld [vmem:[#allocation111_spill] sm:$0xff] }
 0x7aa   : > { %v6107_v2 = vadd.s32 192, %v20003_v37 }
 0x7ab   : > { %10622 = vmatmul.mubr.msk.f32.gmra.mrb[64].mxu0 %vm19966_vm6, %v16141_v30  ;;  %v11052_v30 = vpack.c.bf16 %v11760_v6, %v11759_v59  ;;  %vm19969_vm6 = vmmov %vm19755_vm0  ;;  %v20013_v59 = vld [vmem:[#allocation110_spill] sm:$0xff] }
 0x7ac   : > { %10624 = vmatprep.mubr.msk.f32.mxu0 %vm19755_vm0, %v16002_v1  ;;  %11045 = vmatpush3.bf16.msra.mxu0 %v11044_v56  ;;  %v11793_v48 = vpop.trf.xlu0  ;;  %v2313_v1 = vpop.permute.xlu1 %2312  ;;  %v6103_v56 = vadd.s32 160, %v20003_v37 }
 0x7ad   : > { %3921 = vrot.lane.b32.xlu0 %v19775_v38, %s12436_s20  ;;  %11047 = vmatprep.subr.bf16.mxu0 %v11046_v47  ;;  %v20007_v47 = vld [vmem:[#allocation71_spill] sm:$0xff]  ;;  %v20029_v38 = vld [vmem:[#allocation214_spill] sm:$0xff] }
 0x7ae   : > { %v6259_v22 = vand.u32 15, %v6103_v56 }
 0x7af   : > { %10625 = vmatmul.mubr.msk.f32.gmra.mrb[66].mxu0 %vm19967_vm8, %v16143_v28  ;;  %vm19970_vm8 = vmmov %vm19755_vm0  ;;  %v11794_v28 = vunpack.i.l.bf16 %v11793_v48 }
 0x7b0   : > { %10627 = vmatprep.mubr.msk.f32.mxu0 %vm19968_vm9, %v16018_v58  ;;  %11049 = vmatpush3.bf16.msra.mxu0 %v11048_v36  ;;  %vm19971_vm9 = vmmov %vm19755_vm0  ;;  %v2315_v58 = vpop.permute.xlu1 %2314  ;;  %v6105_v36 = vadd.s32 176, %v20003_v37 }
 0x7b1   : > { %3923 = vrot.lane.b32.xlu0 %v19779_v18, %s12436_s20  ;;  %11051 = vmatprep.subr.bf16.mxu0 %v11050_v10  ;;  %v20014_v10 = vld [vmem:[#allocation75_spill] sm:$0xff] }
 0x7b3   : > { %10628 = vmatmul.mubr.msk.f32.gmra.mrb[68].mxu0 %vm19969_vm6, %v16145_v42  ;;  %vm19973_vm6 = vmmov %vm19755_vm0 }
 0x7b4   : > { %10630 = vmatprep.mubr.msk.f32.mxu0 %vm19755_vm0, %v16034_v20  ;;  %11053 = vmatpush3.bf16.msra.mxu0 %v11052_v30  ;;  %v2317_v42 = vpop.permute.xlu1 %2316  ;;  %v6815_v30 = vmul.f32 %v20014_v10, %v20013_v59 }
 0x7b5   : > { %3925 = vrot.lane.b32.xlu0 %v19784_v52, %s12436_s20  ;;  %v20024_v52 = vld [vmem:[#allocation80_spill] sm:$0xff] }
 0x7b7   : > { %10631 = vmatmul.mubr.msk.f32.gmra.mrb[70].mxu0 %vm19970_vm8, %v16040_v15  ;;  %vm19974_vm8 = vmmov %vm19755_vm0 }
 0x7b8   : > { %10633 = vmatprep.mubr.msk.f32.mxu0 %vm19971_vm9, %v16181_v53  ;;  %vm19975_vm9 = vmmov %vm19755_vm0  ;;  %v2319_v20 = vpop.permute.xlu1 %2318 }
 0x7b9   : > { %3927 = vrot.lane.b32.xlu0 %v19788_v63, %s12436_s20 }
 0x7bb   : > { %10634 = vmatmul.mubr.msk.f32.gmra.mrb[72].mxu0 %vm19972_vm5, %v16185_v26  ;;  %vm19976_vm5 = vmmov %vm19755_vm0  ;;  %v11797_v26 = vunpack.i.h.bf16 %v11793_v48  ;;  %v6619_v48 = vmul.f32 %v20007_v47, %v20006_v50 }
 0x7bc   : > { %10636 = vmatprep.mubr.msk.f32.mxu0 %vm19973_vm6, %v16187_v5  ;;  %vm19977_vm6 = vmmov %vm19755_vm0  ;;  %v2321_v15 = vpop.permute.xlu1 %2320 }
 0x7bd   : > { %3929 = vrot.lane.b32.xlu0 %v19793_v33, %s12436_s20 }
 0x7bf   : > { %10637 = vmatmul.mubr.msk.f32.gmra.mrb[74].mxu0 %vm19755_vm0, %v16189_v8  ;;  %v19984_v8 = vld [vmem:[#allocation48_spill] sm:$0xff] }
 0x7c0   : > { %10639 = vmatprep.mubr.msk.f32.mxu0 %vm19974_vm8, %v16197_v9  ;;  %vm19979_vm8 = vmmov %vm19755_vm0  ;;  %v16317_v53 = vpop.permute.xlu1 %11799  ;;  %v19985_v9 = vld [vmem:[#allocation51_spill] sm:$0xff] }
 0x7c1   : > { %3931 = vrot.lane.b32.xlu0 %v19797_v17, %s12436_s20 }
 0x7c3   : > { %10640 = vmatmul.mubr.msk.f32.gmra.mrb[76].mxu0 %vm19975_vm9, %v16215_v62  ;;  %vm19980_vm9 = vmmov %vm19755_vm0  ;;  %v19986_v62 = vld [vmem:[#allocation50_spill] sm:$0xff] }
 0x7c4   : > { %10642 = vmatprep.mubr.msk.f32.mxu0 %vm19976_vm5, %v16233_v45  ;;  %vm19981_vm5 = vmmov %vm19755_vm0  ;;  %v3890_v5 = vpop.permute.xlu1 %3889 }
 0x7c5   : > { %3933 = vrot.lane.b32.xlu0 %v19802_v61, %s12436_s20 }
 0x7c7   : > { %10643 = vmatmul.mubr.msk.f32.gmra.mrb[78].mxu0 %vm19977_vm6, %v2309_v54  ;;  %vm19983_vm6 = vmmov %vm19755_vm0 }
 0x7c8   : > { %10645 = vmatprep.mubr.msk.f32.mxu0 %vm19978_vm1, %v2311_v39  ;;  %vm19982_vm1 = vmmov %vm19755_vm0  ;;  %v20008_v39 = vmov 0 }
 0x7c9   : > { %3935 = vrot.lane.b32.xlu0 %v19805_v31, %s12436_s20 }
 0x7cb   : > { %10646 = vmatmul.mubr.msk.f32.gmra.mrb[80].mxu0 %vm19755_vm0, %v2313_v1  ;;  %vm16396_vm0 = vcmp.ne.s32.totalorder %v6259_v22, 0  ;;  %v20019_v22 = vld [vmem:[#allocation112_spill] sm:$0xff] }
 0x7cc   : > { %10648 = vmatprep.mubr.msk.f32.mxu0 %vm19979_vm8, %v2315_v58  ;;  %v20009_v39 = vsel %vm16396_vm0, 4294967295, %v20008_v39  ;;  %vm20011_vm8 = vcmask 130048   ;;  %v6715_v1 = vsel %vm16396_vm0, %v6619_v48, 0.0  ;;  %v6273_v58 = vand.u32 15, %v6105_v36  ;;  %v20020_v48 = vld [vmem:[#allocation212_spill] sm:$0xff] }
 0x7cd   : > { %3937 = vrot.lane.b32.xlu0 %v19806_v3, %s12436_s20  ;;  %20010 = vst [vmem:[#allocation76_spill] sm:$0xff] %v20009_v39 }
 0x7cf   : > { %10649 = vmatmul.mubr.msk.f32.gmra.mrb[82].mxu0 %vm19980_vm9, %v2317_v42  ;;  %vm20012_vm9 = vmmov %vm19982_vm1 }
 0x7d0   : > { %10651 = vmatprep.mubr.msk.f32.mxu0 %vm19981_vm5, %v2319_v20  ;;  %v20015_v20 = vld [vmem:[#allocation211_spill] sm:$0xff]  ;;  %vm20016_vm5 = vmmov %vm20011_vm8 }
 0x7d1   : > { %3939 = vrot.lane.b32.xlu0 %v19807_v49, %s12436_s20 }
 0x7d3   : > { %10652 = vmatmul.mubr.msk.f32.gmra.mrb[84].mxu0 %vm19982_vm1, %v2321_v15  ;;  %v7181_v15 = vmul.f32 %v20015_v20, %v20013_v59 }
 0x7d4   : > { %3869 = vmatprep.mubr.f32.mxu0 %v11794_v28  ;;  %v6847_v28 = vadd.f32 %v6815_v30, %v6715_v1 }
 0x7d5   : > { %3941 = vrot.lane.b32.xlu0 %v19808_v11, %s12436_s20  ;;  %v7213_v50 = vadd.f32 %v7181_v15, %v20019_v22  ;;  %v20025_v22 = vmov 0.0  }
 0x7d7   : > { %3870 = vmatmul.mubr.f32.vlgmr.msra.gmra.mrb[86].mxu0 %v11797_v26  ;;  %v20017_v26 = vld [vmem:[#allocation240_spill] sm:$0xff] }
 0x7d8   : > { %10756 = vmatprep.mubr.msk.f32.mxu0 %vm19983_vm6, %v3890_v5  ;;  %v20018_v5 = vld [vmem:[#allocation81_spill] sm:$0xff]  ;;  %v7251_v36 = vmul.f32 %v20020_v48, %v20017_v26  ;;  %vm16420_vm6 = vcmp.ne.s32.totalorder %v6273_v58, 0 }
 0x7d9   : > { %3943 = vrot.lane.b32.xlu0 %v19809_v16, %s12436_s20  ;;  %v6915_v56 = vmul.f32 %v20018_v5, %v20017_v26 }
 0x7da   : > { %v7315_v44 = vadd.f32 %v7251_v36, %v7213_v50  ;;  %v20033_v50 = vld [vmem:[#allocation215_spill] sm:$0xff] }
 0x7db   : > { %v7043_v58 = vadd.f32 %v6915_v56, %v6847_v28 }
 0x7dd   : > { %3945 = vrot.lane.b32.xlu0 %v19810_v57, %s12436_s20 }
 0x7e1   : > { %3947 = vrot.lane.b32.xlu0 %v19984_v8, %s12436_s20 }
 0x7e5   : > { %3949 = vrot.lane.b32.xlu0 %v19985_v9, %s12436_s20 }
 0x7e9   : > { %3951 = vrot.lane.b32.xlu0 %v19986_v62, %s12436_s20  ;;  %s18381_s20 = scalar_lea.vmem [#allocation13], %s9685_s18  ;;  %s10063_s18 = sshll.u32 %s12503_s28, 12 }
 0x7ea   : > { %s18693_s12 = scalar_lea.hbm %s18751_s7, %s10063_s18  ;;  %s9547_s28 = scalar_lea.sflag [#allocation5], %s12694_s21 }
 0x7ed   : > { %1316 = vrot.lane.b32.xlu0 %v19793_v33, %s12430_s13 }
 0x7f1   : > { %1318 = vrot.lane.b32.xlu0 %v19797_v17, %s12430_s13 }
 0x7f5   : > { %1320 = vrot.lane.b32.xlu0 %v19802_v61, %s12430_s13  ;;  %v20021_v61 = vmov 0 }
 0x7f6   : > { %v20022_v61 = vsel %vm16420_vm6, 4294967295, %v20021_v61 }
 0x7f7   : > { %20023 = vst [vmem:[#allocation206_spill] sm:$0xff] %v20022_v61 }
 0x7f9   : > { %1322 = vrot.lane.b32.xlu0 %v19805_v31, %s12430_s13 }
 0x7fd   : > { %1324 = vrot.lane.b32.xlu0 %v19806_v3, %s12430_s13  ;;  %v16416_v3 = vld [vmem:[#allocation2 + $0xa9] sm:$0xff] }
 0x801   : > { %1326 = vrot.lane.b32.xlu0 %v19807_v49, %s12430_s13 }
 0x803   : > { %v16347_v41 = vpop.permute.xlu0 %3899 }
 0x807   : > { %v16349_v45 = vpop.permute.xlu0 %3909 }
 0x80b   : > { %v16351_v34 = vpop.permute.xlu0 %11854 }
 0x80f   : > { %v16353_v46 = vpop.permute.xlu0 %3913 }
 0x810   : > { %19987 = vst [vmem:[#allocation121_spill] sm:$0xff] %v16353_v46 }
 0x813   : > { %v16355_v21 = vpop.permute.xlu0 %11864 }
 0x817   : > { %v16357_v60 = vpop.permute.xlu0 %3917 }
 0x818   : > { %19988 = vst [vmem:[#allocation124_spill] sm:$0xff] %v16357_v60 }
 0x81b   : > { %v16359_v0 = vpop.permute.xlu0 %11874 }
 0x81f   : > { %v16361_v24 = vpop.permute.xlu0 %3921 }
 0x820   : > { %19989 = vst [vmem:[#allocation123_spill] sm:$0xff] %v16361_v24  ;;  %v20076_v24 = vld [vmem:[#allocation108_spill] sm:$0xff] }
 0x823   : > { %v16363_v35 = vpop.permute.xlu0 %3923 }
 0x824   : > { %19990 = vst [vmem:[#allocation232_spill] sm:$0xff] %v16363_v35 }
 0x827   : > { %v16365_v55 = vpop.permute.xlu0 %3925 }
 0x828   : > { %19991 = vst [vmem:[#allocation234_spill] sm:$0xff] %v16365_v55 }
 0x82b   : > { %v16367_v43 = vpop.permute.xlu0 %3927 }
 0x82c   : > { %19992 = vst [vmem:[#allocation233_spill] sm:$0xff] %v16367_v43 }
 0x82f   : > { %v16369_v14 = vpop.permute.xlu0 %3929 }
 0x830   : > { %19993 = vst [vmem:[#allocation63_spill] sm:$0xff] %v16369_v14 }
 0x833   : > { %v16371_v19 = vpop.permute.xlu0 %3931 }
 0x834   : > { %19994 = vst [vmem:[#allocation64_spill] sm:$0xff] %v16371_v19 }
 0x837   : > { %v16373_v40 = vpop.permute.xlu0 %3933 }
 0x838   : > { %19995 = vst [vmem:[#allocation66_spill] sm:$0xff] %v16373_v40 }
 0x83b   : > { %v16375_v54 = vpop.permute.xlu0 %3935 }
 0x83c   : > { %19996 = vst [vmem:[#allocation65_spill] sm:$0xff] %v16375_v54 }
 0x83f   : > { %v16377_v32 = vpop.permute.xlu0 %3937 }
 0x840   : > { %19997 = vst [vmem:[#allocation68_spill] sm:$0xff] %v16377_v32 }
 0x843   : > { %v16379_v12 = vpop.permute.xlu0 %3939 }
 0x844   : > { %19998 = vst [vmem:[#allocation67_spill] sm:$0xff] %v16379_v12 }
 0x847   : > { %v16381_v29 = vpop.permute.xlu0 %3941 }
 0x848   : > { %19999 = vst [vmem:[#allocation69_spill] sm:$0xff] %v16381_v29 }
 0x84b   : > { %v16383_v7 = vpop.permute.xlu0 %3943 }
 0x84c   : > { %20000 = vst [vmem:[#allocation72_spill] sm:$0xff] %v16383_v7 }
 0x84f   : > { %v16385_v51 = vpop.permute.xlu0 %3945 }
 0x850   : > { %20001 = vst [vmem:[#allocation73_spill] sm:$0xff] %v16385_v51 }
 0x853   : > { %v16387_v27 = vpop.permute.xlu0 %3947 }
 0x854   : > { %20002 = vst [vmem:[#allocation74_spill] sm:$0xff] %v16387_v27 }
 0x857   : > { %v16390_v25 = vpop.permute.xlu0 %3949 }
 0x858   : > { %20004 = vst [vmem:[#allocation82_spill] sm:$0xff] %v16390_v25 }
 0x85b   : > { %v16392_v4 = vpop.permute.xlu0 %3951 }
 0x85c   : > { %20005 = vst [vmem:[#allocation77_spill] sm:$0xff] %v16392_v4 }
 0x85f   : > { %v1317_v6 = vpop.permute.xlu0 %1316 }
 0x860   : > { %6070 = vst.msk [vmem:[#allocation2 + $0xb1] sm:$0xff] %vm20011_vm8, %v1317_v6  ;;  %10586 = vmatprep.mubr.msk.f32.mxu1 %vm20012_vm9, %v1317_v6  ;;  %v16414_v6 = vld [vmem:[#allocation2 + $0xa8] sm:$0xff]  ;;  %vm20026_vm8 = vmmov %vm20016_vm5 }
 0x861   : > { %vm20027_vm9 = vmmov %vm20016_vm5 }
 0x863   : > { %v1319_v42 = vpop.permute.xlu0 %1318 }
 0x864   : > { %6071 = vst.msk [vmem:[#allocation2 + $0xb9] sm:$0xff] %vm20016_vm5, %v1319_v42  ;;  %10587 = vmatmul.mubr.msk.f32.vlgmr.msra.gmra.mrb[2].mxu1 %vm19982_vm1, %v1319_v42  ;;  %vm20028_vm5 = vmmov %vm19982_vm1 }
 0x865   : > { %vm20034_vm1 = vmmov %vm20026_vm8 }
 0x867   : > { %v6585_v59 = vld [vmem:[#allocation2 + $0xb0] sm:$0xff]  ;;  %v1321_v30 = vpop.permute.xlu0 %1320 }
 0x868   : > { %v6781_v33 = vld [vmem:[#allocation2 + $0xb1] sm:$0xff]  ;;  %v6621_v1 = vmul.f32 %v20007_v47, %v6585_v59  ;;  %v7081_v15 = vmul.f32 %v20024_v52, %v6585_v59  ;;  %6072 = vst.msk [vmem:[#allocation2 + $0xc1] sm:$0xff] %vm20027_vm9, %v1321_v30  ;;  %10589 = vmatprep.mubr.msk.f32.mxu1 %vm20028_vm5, %v1321_v30  ;;  %v7353_v23 = vmul.f32 %v20029_v38, %v6585_v59  ;;  %vm20036_vm9 = vmmov %vm20028_vm5 }
 0x869   : > { %v16424_v42 = vld [vmem:[#allocation2 + $0xaa] sm:$0xff]  ;;  %v6817_v26 = vmul.f32 %v20014_v10, %v6781_v33  ;;  %v7183_v59 = vmul.f32 %v20015_v20, %v6781_v33  ;;  %v7455_v36 = vmul.f32 %v20033_v50, %v6781_v33  ;;  %vm20039_vm5 = vmmov %vm20034_vm1 }
 0x86a   : > { %8490 = vst.msk [vmem:[#allocation2 + $0xa8] sm:$0xff] %vm20026_vm8, %v20025_v22  ;;  %v6717_v9 = vsel %vm16420_vm6, %v6621_v1, 0.0  ;;  %v7113_v57 = vsel %vm16396_vm0, %v7081_v15, 0.0  ;;  %v16439_v11 = vpop.f32.mrb[54].mxu0  ;;  %v7385_v30 = vsel %vm15257_vm14, %v7353_v23, 0.0  ;;  %vm20035_vm8 = vmmov %vm20034_vm1 }
 0x86b   : > { %20030 = vst [vmem:[#allocation208_spill] sm:$0xff] %v16439_v11  ;;  %v7145_v62 = vadd.f32 %v7113_v57, %v7043_v58  ;;  %v6881_v28 = vld [vmem:[#allocation2 + $0xb2] sm:$0xff]  ;;  %v16443_v56 = vpop.f32.mrb[55].mxu0  ;;  %v1323_v25 = vpop.permute.xlu0 %1322  ;;  %v7417_v8 = vadd.f32 %v7385_v30, %v7315_v44  ;;  %v16450_v1 = vld [vmem:[%s18749_s5 + $0x8] ss:$0 sm:$0xff]  ;;  %v6849_v23 = vadd.f32 %v6817_v26, %v6717_v9  ;;  %v6287_v57 = vand.u32 15, %v6107_v2 }
 0x86c   : > { %20032 = vst [vmem:[#allocation125_spill] sm:$0xff] %v16443_v56  ;;  %v7525_v15 = vmul.f32 %v16450_v1, %v6881_v28  ;;  %8491 = vst.msk [vmem:[#allocation2 + $0xb0] sm:$0xff] %vm20034_vm1, %v20025_v22  ;;  %10590 = vmatmul.mubr.msk.f32.gmra.mrb[4].mxu1 %vm20036_vm9, %v1323_v25  ;;  %v6917_v44 = vmul.f32 %v20018_v5, %v6881_v28  ;;  %v16458_v30 = vld [vmem:[#allocation2 + $0xb8] sm:$0xff]  ;;  %v7253_v4 = vmul.f32 %v20020_v48, %v6881_v28  ;;  %v20041_v26 = vmov 0 }
 0x86d   : > { %6073 = vst.msk [vmem:[#allocation2 + $0xc9] sm:$0xff] %vm20035_vm8, %v1323_v25  ;;  %v7215_v58 = vadd.f32 %v7183_v59, %v7145_v62  ;;  %v7487_v33 = vadd.f32 %v7455_v36, %v7417_v8  ;;  %v16463_v56 = vld [vmem:[#allocation2 + $0xb9] sm:$0xff]  ;;  %vm20040_vm8 = vmmov %vm20036_vm9  ;;  %vm16477_vm9 = vcmp.ne.s32.totalorder %v6287_v57, 0 }
 0x86e   : > { %v16461_v11 = vpop.f32.mrb[56].mxu0  ;;  %v20042_v26 = vsel %vm16477_vm9, 4294967295, %v20041_v26  ;;  %v7045_v28 = vadd.f32 %v6917_v44, %v6849_v23 }
 0x86f   : > { %20037 = vst [vmem:[#allocation126_spill] sm:$0xff] %v16461_v11  ;;  %v6587_v27 = vld [vmem:[#allocation2 + $0xc0] sm:$0xff]  ;;  %v16467_v16 = vpop.f32.mrb[57].mxu0  ;;  %v1325_v25 = vpop.permute.xlu0 %1324  ;;  %v16469_v9 = vadd.f32 %v7525_v15, %v7487_v33  ;;  %20043 = vst [vmem:[#allocation128_spill] sm:$0xff] %v20042_v26  ;;  %v7317_v15 = vadd.f32 %v7253_v4, %v7215_v58 }
 0x870   : > { %v16465_v51 = vld [vmem:[#allocation2 + $0xba] sm:$0xff]  ;;  %20038 = vst [vmem:[#allocation127_spill] sm:$0xff] %v16467_v16  ;;  %v6623_v2 = vmul.f32 %v20007_v47, %v6587_v27  ;;  %v7083_v8 = vmul.f32 %v20024_v52, %v6587_v27  ;;  %6074 = vst.msk [vmem:[#allocation2 + $0xd1] sm:$0xff] %vm20034_vm1, %v1325_v25  ;;  %10592 = vmatprep.mubr.msk.f32.mxu1 %vm20040_vm8, %v1325_v25  ;;  %v7355_v59 = vmul.f32 %v20029_v38, %v6587_v27 }
 0x871   : > { %v6783_v62 = vld [vmem:[#allocation2 + $0xc1] sm:$0xff]  ;;  %8492 = vst.msk [vmem:[#allocation2 + $0xb8] sm:$0xff] %vm20039_vm5, %v20025_v22  ;;  %v16483_v36 = vmul.f32 0.70710677, %v16469_v9  ;;  %vm20046_vm5 = vmmov %vm20034_vm1 }
 0x872   : > { %v7115_v33 = vsel %vm16420_vm6, %v7083_v8, 0.0  ;;  %v16487_v11 = vpop.f32.mrb[58].mxu0  ;;  %v6819_v16 = vmul.f32 %v20014_v10, %v6783_v62  ;;  %v7387_v57 = vsel %vm16396_vm0, %v7355_v59, 0.0  ;;  %v7457_v25 = vmul.f32 %v20033_v50, %v6783_v62 }
 0x873   : > { %20044 = vst [vmem:[#allocation129_spill] sm:$0xff] %v16487_v11  ;;  %v7147_v7 = vadd.f32 %v7115_v33, %v7045_v28  ;;  %v16493_v44 = vpop.f32.mrb[59].mxu0  ;;  %v1327_v27 = vpop.permute.xlu0 %1326  ;;  %v7653_v29 = vand.u32 2147483647, %v16483_v36  ;;  %v6719_v4 = vsel %vm16477_vm9, %v6623_v2, 0.0  ;;  %v7419_v58 = vadd.f32 %v7387_v57, %v7317_v15 }
 0x874   : > { %v6883_v23 = vld [vmem:[#allocation2 + $0xc2] sm:$0xff]  ;;  %20045 = vst [vmem:[#allocation130_spill] sm:$0xff] %v16493_v44  ;;  %6075 = vst.msk [vmem:[#allocation2 + $0xd9] sm:$0xff] %vm20034_vm1, %v1327_v27  ;;  %10593 = vmatmul.mubr.msk.f32.gmra.mrb[6].mxu1 %vm20040_vm8, %v1327_v27  ;;  %v7185_v28 = vmul.f32 %v20015_v20, %v6783_v62  ;;  %v6851_v44 = vadd.f32 %v6819_v16, %v6719_v4  ;;  %v16526_v4 = vpop.permute.xlu1 %3891 }
 0x875   : > { %v7527_v8 = vmul.f32 %v16450_v1, %v6883_v23  ;;  %8493 = vst.msk [vmem:[#allocation2 + $0xc0] sm:$0xff] %vm20046_vm5, %v20025_v22  ;;  %v7685_v59 = vmul.f32 0.3275911, %v7653_v29  ;;  %v7489_v33 = vadd.f32 %v7457_v25, %v7419_v58  ;;  %v16504_v39 = vld [vmem:[#allocation2 + $0xc8] sm:$0xff]  ;;  %v6919_v57 = vmul.f32 %v20018_v5, %v6883_v23  ;;  %vm20051_vm5 = vmmov %vm20034_vm1 }
 0x876   : > { %20047 = vst [vmem:[#allocation78_spill] sm:$0xff] %v16504_v39  ;;  %v16506_v11 = vpop.f32.mrb[60].mxu0  ;;  %v7217_v2 = vadd.f32 %v7185_v28, %v7147_v7  ;;  %v16508_v15 = vld [vmem:[#allocation2 + $0xc9] sm:$0xff]  ;;  %v7255_v49 = vmul.f32 %v20020_v48, %v6883_v23 }
 0x877   : > { %20048 = vst [vmem:[#allocation210_spill] sm:$0xff] %v16506_v11  ;;  %v16512_v12 = vld [vmem:[#allocation2 + $0xd0] sm:$0xff]  ;;  %v16516_v27 = vpop.f32.mrb[61].mxu0  ;;  %v7717_v62 = vadd.f32 1.0, %v7685_v59  ;;  %v16518_v25 = vadd.f32 %v7527_v8, %v7489_v33  ;;  %v7047_v8 = vadd.f32 %v6919_v57, %v6851_v44 }
 0x878   : > { %20049 = vst [vmem:[#allocation213_spill] sm:$0xff] %v16512_v12  ;;  %v16514_v32 = vld [vmem:[#allocation2 + $0xca] sm:$0xff]  ;;  %20050 = vst [vmem:[#allocation84_spill] sm:$0xff] %v16516_v27  ;;  %v7085_v16 = vmul.f32 %v20024_v52, %v16512_v12  ;;  %v7357_v7 = vmul.f32 %v20029_v38, %v16512_v12  ;;  %v7319_v59 = vadd.f32 %v7255_v49, %v7217_v2  ;;  %v16557_v26 = vpop.permute.xlu1 %11804 }
 0x879   : > { %8494 = vst.msk [vmem:[#allocation2 + $0xc8] sm:$0xff] %vm20051_vm5, %v20025_v22  ;;  %12103 = vrcp.f32 %v7717_v62  ;;  %v16529_v23 = vmul.f32 0.70710677, %v16518_v25  ;;  %v16531_v58 = vld [vmem:[#allocation2 + $0xd1] sm:$0xff] }
 0x87a   : > { %20052 = vst [vmem:[#allocation131_spill] sm:$0xff] %v16531_v58  ;;  %v16533_v28 = vpop.f32.mrb[62].mxu0  ;;  %v7117_v33 = vsel %vm16477_vm9, %v7085_v16, 0.0  ;;  %v7389_v11 = vsel %vm16420_vm6, %v7357_v7, 0.0  ;;  %v7459_v49 = vmul.f32 %v20033_v50, %v16531_v58  ;;  %v6100_v16 = vadd.s32 136, %v20003_v37 }
 0x87b   : > { %20053 = vst [vmem:[#allocation132_spill] sm:$0xff] %v16533_v28  ;;  %v16539_v27 = vld [vmem:[#allocation2 + $0xd2] sm:$0xff]  ;;  %v7655_v12 = vand.u32 2147483647, %v16529_v23  ;;  %v16544_v62 = vpop.f32.mrb[63].mxu0  ;;  %v16546_v31 = vadd.f32 %v7117_v33, %v7047_v8  ;;  %v7421_v28 = vadd.f32 %v7389_v11, %v7319_v59  ;;  %vm8295_vm6 = vcmp.lt.f32.partialorder %v16529_v23, 0.0 }
 0x87c   : > { %20054 = vst [vmem:[#allocation85_spill] sm:$0xff] %v16539_v27  ;;  %8495 = vst.msk [vmem:[#allocation2 + $0xd0] sm:$0xff] %vm20034_vm1, %v20025_v22  ;;  %v7529_v44 = vmul.f32 %v16450_v1, %v16539_v27  ;;  %v6238_v59 = vand.u32 15, %v6100_v16  ;;  %v20066_v16 = vld [vmem:[#allocation104_spill] sm:$0xff]  ;;  %vm8293_vm1 = vcmp.lt.f32.partialorder %v16483_v36, 0.0 }
 0x87d   : > { %20055 = vst [vmem:[#allocation90_spill] sm:$0xff] %v16544_v62  ;;  %20056 = vst [vmem:[#allocation91_spill] sm:$0xff] %v16546_v31  ;;  %v7687_v2 = vmul.f32 0.3275911, %v7655_v12  ;;  %v7491_v7 = vadd.f32 %v7459_v49, %v7421_v28  ;;  %v8101_v62 = vsub.f32 0.0, %v7653_v29 }
 0x87e   : > { %v16552_v57 = vpop.f32.mrb[64].mxu0  ;;  %vm16575_vm8 = vcmp.ne.s32.totalorder %v6238_v59, 15 }
 0x87f   : > { %20057 = vst [vmem:[#allocation92_spill] sm:$0xff] %v16552_v57  ;;  %v16555_v61 = vpop.f32.mrb[65].mxu0  ;;  %v7719_v8 = vadd.f32 1.0, %v7687_v2  ;;  %v16559_v33 = vadd.f32 %v7529_v44, %v7491_v7  ;;  %v8133_v27 = vmul.f32 %v8101_v62, %v7653_v29  ;;  %v16571_v2 = vpop.permute.xlu1 %11809  ;;  %v20063_v7 = vmov 0 }
 0x880   : > { %20058 = vst [vmem:[#allocation95_spill] sm:$0xff] %v16555_v61  ;;  %v20061_v61 = vld [vmem:[#allocation238_spill] sm:$0xff]  ;;  %v20064_v7 = vsel %vm16575_vm8, 4294967295, %v20063_v7 }
 0x881   : > { %12105 = vrcp.f32 %v7719_v8  ;;  %v16564_v22 = vmul.f32 0.70710677, %v16559_v33  ;;  %v6912_v58 = vmul.f32 %v20018_v5, %v20061_v61  ;;  %20065 = vst [vmem:[#allocation100_spill] sm:$0xff] %v20064_v7  ;;  %v6616_v8 = vmul.f32 %v20007_v47, %v20066_v16 }
 0x882   : > { %v16561_v11 = vpop.f32.mrb[66].mxu0  ;;  %v8183_v40 = vmul.f32 1.442695, %v8133_v27  ;;  %v8103_v61 = vsub.f32 0.0, %v7655_v12 }
 0x883   : > { %20059 = vst [vmem:[#allocation219_spill] sm:$0xff] %v16561_v11  ;;  %v16566_v31 = vpop.f32.mrb[67].mxu0  ;;  %v12104_v57 = vpop.eup %12103  ;;  %v7657_v49 = vand.u32 2147483647, %v16564_v22  ;;  %v20067_v11 = vld [vmem:[#allocation237_spill] sm:$0xff]  ;;  %v7008_v59 = vsel %vm16575_vm8, %v6912_v58, 0.0 }
 0x884   : > { %20060 = vst [vmem:[#allocation98_spill] sm:$0xff] %v16566_v31  ;;  %v7813_v28 = vmul.f32 1.0614054, %v12104_v57  ;;  %v6812_v29 = vmul.f32 %v20014_v10, %v20067_v11  ;;  %v16593_v11 = vpop.permute.xlu1 %3893  ;;  %vm8297_vm0 = vcmp.lt.f32.partialorder %v16564_v22, 0.0  ;;  %v7356_v22 = vmul.f32 %v20029_v38, %v16504_v39 }
 0x885   : > { %v7689_v31 = vmul.f32 0.3275911, %v7657_v49 }
 0x886   : > { %v16573_v44 = vpop.f32.mrb[68].mxu0  ;;  %v10010_v62 = vadd.f32 -1.4531521, %v7813_v28  ;;  %v6844_v14 = vadd.f32 %v6812_v29, %v6616_v8  ;;  %v8135_v28 = vmul.f32 %v8103_v61, %v7655_v12 }
 0x887   : > { %20062 = vst [vmem:[#allocation224_spill] sm:$0xff] %v16573_v44  ;;  %v16583_v54 = vpop.f32.mrb[69].mxu0  ;;  %v7721_v19 = vadd.f32 1.0, %v7689_v31 }
 0x888   : > { %20068 = vst [vmem:[#allocation227_spill] sm:$0xff] %v16583_v54  ;;  %v7877_v17 = vmul.f32 %v12104_v57, %v10010_v62  ;;  %v7040_v27 = vadd.f32 %v7008_v59, %v6844_v14  ;;  %v20071_v54 = vld [vmem:[#allocation109_spill] sm:$0xff]  ;;  %v8105_v59 = vsub.f32 0.0, %v7657_v49  ;;  %v16606_v18 = vpop.permute.xlu1 %3895 }
 0x889   : > { %12107 = vrcp.f32 %v7721_v19  ;;  %v7078_v31 = vmul.f32 %v20024_v52, %v20071_v54 }
 0x88a   : > { %v16587_v44 = vpop.f32.mrb[70].mxu0  ;;  %v7909_v63 = vadd.f32 1.4214138, %v7877_v17  ;;  %12109 = vpow2.f32 %v8183_v40  ;;  %v8187_v40 = vmul.f32 1.442695, %v8135_v28 }
 0x88b   : > { %20069 = vst [vmem:[#allocation101_spill] sm:$0xff] %v16587_v44  ;;  %v16589_v16 = vpop.f32.mrb[71].mxu0  ;;  %v16591_v43 = vpop.eup %12105  ;;  %v6102_v44 = vadd.s32 152, %v20003_v37  ;;  %v7142_v12 = vadd.f32 %v7078_v31, %v7040_v27  ;;  %v6618_v27 = vmul.f32 %v20007_v47, %v20071_v54 }
 0x88c   : > { %20070 = vst [vmem:[#allocation231_spill] sm:$0xff] %v16589_v16  ;;  %v7941_v62 = vmul.f32 %v12104_v57, %v7909_v63  ;;  %v7815_v58 = vmul.f32 1.0614054, %v16591_v43  ;;  %v20074_v16 = vld [vmem:[#allocation239_spill] sm:$0xff]  ;;  %12111 = vpow2.f32 %v8187_v40 }
 0x88d   : > { %v7250_v55 = vmul.f32 %v20020_v48, %v20074_v16  ;;  %v6252_v63 = vand.u32 15, %v6102_v44  ;;  %v6814_v44 = vmul.f32 %v20014_v10, %v20076_v24 }
 0x88e   : > { %v16599_v8 = vpop.f32.mrb[72].mxu0  ;;  %v10042_v17 = vadd.f32 -0.28449672, %v7941_v62  ;;  %v10012_v19 = vadd.f32 -1.4531521, %v7815_v58  ;;  %v7180_v62 = vmul.f32 %v20015_v20, %v20076_v24 }
 0x88f   : > { %20072 = vst [vmem:[#allocation235_spill] sm:$0xff] %v16599_v8  ;;  %v16601_v29 = vpop.f32.mrb[73].mxu0  ;;  %v7282_v28 = vsel %vm16575_vm8, %v7250_v55, 0.0  ;;  %vm16625_vm5 = vcmp.ne.s32.totalorder %v6252_v63, 15  ;;  %v6846_v46 = vadd.f32 %v6814_v44, %v6618_v27  ;;  %v6816_v44 = vmul.f32 %v20014_v10, %v16416_v3 }
 0x890   : > { %20073 = vst [vmem:[#allocation105_spill] sm:$0xff] %v16601_v29  ;;  %v8005_v14 = vmul.f32 %v12104_v57, %v10042_v17  ;;  %v7879_v61 = vmul.f32 %v16591_v43, %v10012_v19  ;;  %v7212_v31 = vadd.f32 %v7180_v62, %v7142_v12  ;;  %v6914_v17 = vmul.f32 %v20018_v5, %v20074_v16  ;;  %v16634_v16 = vpop.permute.xlu1 %11814 }
 0x892   : > { %v16608_v35 = vpop.f32.mrb[74].mxu0  ;;  %v8037_v58 = vadd.f32 0.2548296, %v8005_v14  ;;  %v7911_v8 = vadd.f32 1.4214138, %v7879_v61 }
 0x893   : > { %20075 = vst [vmem:[#allocation107_spill] sm:$0xff] %v16608_v35  ;;  %v16612_v29 = vpop.f32.mrb[75].mxu0  ;;  %v16622_v19 = vpop.eup %12107  ;;  %v8137_v35 = vmul.f32 %v8105_v59, %v7657_v49  ;;  %v7352_v49 = vmul.f32 %v20029_v38, %v16414_v6 }
 0x894   : > { %20077 = vst [vmem:[#allocation133_spill] sm:$0xff] %v16612_v29  ;;  %v8069_v14 = vmul.f32 %v12104_v57, %v8037_v58  ;;  %v7943_v61 = vmul.f32 %v16591_v43, %v7911_v8  ;;  %v20078_v29 = vmov 0  ;;  %v12110_v55 = vpop.eup %12109  ;;  %v7817_v54 = vmul.f32 1.0614054, %v16622_v19 }
 0x895   : > { %v20079_v29 = vsel %vm16625_vm5, 4294967295, %v20078_v29  ;;  %v7314_v57 = vadd.f32 %v7282_v28, %v7212_v31  ;;  %v7010_v8 = vsel %vm16625_vm5, %v6914_v17, 0.0  ;;  %v8191_v58 = vmul.f32 1.442695, %v8137_v35 }
 0x896   : > { %20080 = vst [vmem:[#allocation134_spill] sm:$0xff] %v20079_v29  ;;  %v16630_v40 = vpop.f32.mrb[76].mxu0  ;;  %v8229_v12 = vmul.f32 %v12110_v55, %v8069_v14  ;;  %v10044_v24 = vadd.f32 -0.28449672, %v7943_v61  ;;  %v10014_v60 = vadd.f32 -1.4531521, %v7817_v54  ;;  %v7042_v28 = vadd.f32 %v7010_v8, %v6846_v46 }
 0x897   : > { %20081 = vst [vmem:[#allocation135_spill] sm:$0xff] %v16630_v40  ;;  %v16632_v62 = vpop.f32.mrb[77].mxu0  ;;  %v7080_v31 = vmul.f32 %v20024_v52, %v16414_v6  ;;  %v7416_v54 = vadd.f32 %v7352_v49, %v7314_v57  ;;  %v6620_v35 = vmul.f32 %v20007_v47, %v16414_v6  ;;  %12113 = vpow2.f32 %v8191_v58 }
 0x898   : > { %20082 = vst [vmem:[#allocation136_spill] sm:$0xff] %v16632_v62  ;;  %v8261_v59 = vsub.f32 1.0, %v8229_v12  ;;  %v8007_v63 = vmul.f32 %v16591_v43, %v10044_v24  ;;  %v7881_v14 = vmul.f32 %v16622_v19, %v10014_v60  ;;  %v12112_v12 = vpop.eup %12111  ;;  %v16654_v24 = vpop.permute.xlu1 %11819  ;;  %v8389_v46 = vmul.f32 0.5, %v16469_v9 }
 0x899   : > { %v7144_v6 = vadd.f32 %v7080_v31, %v7042_v28  ;;  %v7524_v28 = vmul.f32 %v16450_v1, %v16424_v42  ;;  %v7252_v31 = vmul.f32 %v20020_v48, %v16424_v42 }
 0x89a   : > { %v16642_v61 = vpop.f32.mrb[78].mxu0  ;;  %v8325_v55 = vsub.f32 0.0, %v8261_v59  ;;  %v8039_v40 = vadd.f32 0.2548296, %v8007_v63  ;;  %v7913_v17 = vadd.f32 1.4214138, %v7881_v14  ;;  %v7182_v14 = vmul.f32 %v20015_v20, %v16416_v3 }
 0x89b   : > { %20083 = vst [vmem:[#allocation52_spill] sm:$0xff] %v16642_v61  ;;  %v16644_v62 = vpop.f32.mrb[79].mxu0 }
 0x89c   : > { %20084 = vst [vmem:[#allocation137_spill] sm:$0xff] %v16644_v62  ;;  %v8357_v27 = vsel %vm8293_vm1, %v8325_v55, %v8261_v59  ;;  %v8071_v60 = vmul.f32 %v16591_v43, %v8039_v40  ;;  %v7945_v36 = vmul.f32 %v16622_v19, %v7913_v17  ;;  %v7454_v43 = vmul.f32 %v20033_v50, %v16416_v3 }
 0x89d   : > { %v8421_v8 = vadd.f32 1.0, %v8357_v27  ;;  %v6104_v40 = vadd.s32 168, %v20003_v37  ;;  %v6848_v17 = vadd.f32 %v6816_v44, %v6620_v35  ;;  %vm20087_vm1 = vcmask 130048  }
 0x89e   : > { %v16658_v63 = vpop.f32.mrb[80].mxu0  ;;  %v8231_v57 = vmul.f32 %v12112_v12, %v8071_v60  ;;  %v10046_v58 = vadd.f32 -0.28449672, %v7945_v36  ;;  %v7486_v55 = vadd.f32 %v7454_v43, %v7416_v54  ;;  %v7214_v35 = vadd.f32 %v7182_v14, %v7144_v6 }
 0x89f   : > { %20085 = vst [vmem:[#allocation138_spill] sm:$0xff] %v16658_v63  ;;  %v16660_v49 = vpop.f32.mrb[81].mxu0  ;;  %v8453_v59 = vmul.f32 %v8421_v8, %v8389_v46  ;;  %v6266_v27 = vand.u32 15, %v6104_v40  ;;  %v6916_v46 = vmul.f32 %v20018_v5, %v16424_v42  ;;  %v20090_v44 = vmov 0  ;;  %v16686_v8 = vpop.permute.xlu1 %3897 }
 0x8a0   : > { %20086 = vst [vmem:[#allocation139_spill] sm:$0xff] %v16660_v49  ;;  %v8263_v9 = vsub.f32 1.0, %v8231_v57  ;;  %v8009_v60 = vmul.f32 %v16622_v19, %v10046_v58  ;;  %v7556_v57 = vsel %vm16575_vm8, %v7524_v28, 0.0  ;;  %v7284_v42 = vsel %vm16625_vm5, %v7252_v31, 0.0 }
 0x8a1   : > { %8524 = vst.msk [vmem:[#allocation2 + $0xa1] sm:$0xff] %vm20087_vm1, %v8453_v59  ;;  %vm16682_vm1 = vcmp.ne.s32.totalorder %v6266_v27, 15  ;;  %v16694_v40 = vadd.f32 %v7556_v57, %v7486_v55  ;;  %v7316_v6 = vadd.f32 %v7284_v42, %v7214_v35  ;;  %v8391_v58 = vmul.f32 0.5, %v16518_v25  ;;  %v12114_v7 = vpop.eup %12113 }
 0x8a2   : > { %v16669_v12 = vpop.f32.mrb[82].mxu0  ;;  %v8327_v3 = vsub.f32 0.0, %v8263_v9  ;;  %v20091_v44 = vsel %vm16682_vm1, 4294967295, %v20090_v44  ;;  %v8041_v36 = vadd.f32 0.2548296, %v8009_v60  ;;  %v7012_v23 = vsel %vm16682_vm1, %v6916_v46, 0.0 }
 0x8a3   : > { %20088 = vst [vmem:[#allocation140_spill] sm:$0xff] %v16669_v12  ;;  %v16678_v54 = vpop.f32.mrb[83].mxu0  ;;  %20092 = vst [vmem:[#allocation142_spill] sm:$0xff] %v20091_v44  ;;  %v7044_v59 = vadd.f32 %v7012_v23, %v6848_v17  ;;  %v7354_v28 = vmul.f32 %v20029_v38, %v16458_v30  ;;  %v16705_v46 = vmul.f32 0.70710677, %v16694_v40  ;;  %v6106_v57 = vadd.s32 184, %v20003_v37  ;;  %v16715_v42 = vpop.permute.xlu1 %11824 }
 0x8a4   : > { %20089 = vst [vmem:[#allocation141_spill] sm:$0xff] %v16678_v54  ;;  %v8359_v43 = vsel %vm8295_vm6, %v8327_v3, %v8263_v9  ;;  %v8073_v27 = vmul.f32 %v16622_v19, %v8041_v36  ;;  %v7082_v9 = vmul.f32 %v20024_v52, %v16458_v30  ;;  %v7456_v19 = vmul.f32 %v20033_v50, %v16463_v56 }
 0x8a5   : > { %v8423_v14 = vadd.f32 1.0, %v8359_v43  ;;  %v7418_v25 = vadd.f32 %v7354_v28, %v7316_v6  ;;  %v7652_v3 = vand.u32 2147483647, %v16705_v46  ;;  %v7184_v36 = vmul.f32 %v20015_v20, %v16463_v56 }
 0x8a6   : > { %v16698_v60 = vpop.f32.mrb[84].mxu0  ;;  %v8233_v17 = vmul.f32 %v12114_v7, %v8073_v27  ;;  %v7146_v35 = vadd.f32 %v7082_v9, %v7044_v59  ;;  %vm20095_vm6 = vcmask 130048   ;;  %v7526_v6 = vmul.f32 %v16450_v1, %v16465_v51 }
 0x8a7   : > { %20093 = vst [vmem:[#allocation143_spill] sm:$0xff] %v16698_v60  ;;  %v16702_v31 = vpop.f32.mrb[85].mxu0  ;;  %v8455_v55 = vmul.f32 %v8423_v14, %v8391_v58  ;;  %v7488_v7 = vadd.f32 %v7456_v19, %v7418_v25  ;;  %v7254_v58 = vmul.f32 %v20020_v48, %v16465_v51  ;;  %v3876_v14 = vstv %s16680_s22 }
 0x8a8   : > { %20094 = vst [vmem:[#allocation53_spill] sm:$0xff] %v16702_v31  ;;  %v8265_v23 = vsub.f32 1.0, %v8233_v17  ;;  %v7684_v27 = vmul.f32 0.3275911, %v7652_v3  ;;  %v7216_v28 = vadd.f32 %v7184_v36, %v7146_v35  ;;  %v6280_v12 = vand.u32 15, %v6106_v57 }
 0x8a9   : > { %8526 = vst.msk [vmem:[#allocation2 + $0xb1] sm:$0xff] %vm20095_vm6, %v8455_v55  ;;  %v7558_v55 = vsel %vm16625_vm5, %v7526_v6, 0.0  ;;  %v7286_v17 = vsel %vm16682_vm1, %v7254_v58, 0.0  ;;  %v8393_v35 = vmul.f32 0.5, %v16559_v33  ;;  %v16738_v6 = vpop.permute.xlu1 %11829  ;;  %vm20096_vm6 = vcmask 27648  }
 0x8aa   : > { %v10332_v43 = vpop.f32.mrb[86].mxu0  ;;  %v8329_v9 = vsub.f32 0.0, %v8265_v23  ;;  %v7716_v25 = vadd.f32 1.0, %v7684_v27  ;;  %v16728_v19 = vadd.f32 %v7558_v55, %v7488_v7  ;;  %v7318_v31 = vadd.f32 %v7286_v17, %v7216_v28 }
 0x8ab   : > { %v10333_v59 = vpop.f32.mrb[87].mxu0  ;;  %v6622_v57 = vmul.f32 %v20007_v47, %v16458_v30  ;;  %v6918_v27 = vmul.f32 %v20018_v5, %v16465_v51  ;;  %v7084_v55 = vmul.f32 %v20024_v52, %v16504_v39 }
 0x8ac   : > { %v10334_v60 = vadd.f32 %v10333_v59, %v10332_v43  ;;  %v8361_v54 = vsel %vm8297_vm0, %v8329_v9, %v8265_v23  ;;  %12115 = vrcp.f32 %v7716_v25  ;;  %v16736_v43 = vmul.f32 0.70710677, %v16728_v19 }
 0x8ad   : > { %v8425_v36 = vadd.f32 1.0, %v8361_v54  ;;  %v7420_v58 = vadd.f32 %v7356_v22, %v7318_v31  ;;  %vm16747_vm0 = vcmp.ne.s32.totalorder %v6280_v12, 15  ;;  %v20097_v54 = vmov 0 }
 0x8ae   : > { %v16730_v63 = vmul.f32 %v10334_v60, %v3876_v14  ;;  %v7458_v60 = vmul.f32 %v20033_v50, %v16508_v15  ;;  %v7654_v33 = vand.u32 2147483647, %v16736_v43  ;;  %v20098_v54 = vsel %vm16747_vm0, 4294967295, %v20097_v54 }
 0x8af   : > { %v8457_v23 = vmul.f32 %v8425_v36, %v8393_v35  ;;  %20099 = vst [vmem:[#allocation54_spill] sm:$0xff] %v20098_v54  ;;  %v7528_v14 = vmul.f32 %v16450_v1, %v16514_v32  ;;  %v6818_v31 = vmul.f32 %v20014_v10, %v16463_v56  ;;  %v7014_v9 = vsel %vm16747_vm0, %v6918_v27, 0.0  ;;  %v16766_v56 = vpop.permute.xlu1 %3901 }
 0x8b0   : > { %v3878_v7 = vsel %vm20096_vm6, %v16730_v63, -inf  ;;  %v7490_v59 = vadd.f32 %v7458_v60, %v7420_v58  ;;  %vm20100_vm6 = vcmask 130048   ;;  %v7686_v30 = vmul.f32 0.3275911, %v7654_v33 }
 0x8b1   : > { %3879 = vmax.xlane.f32.xlu1 %v3878_v7  ;;  %8528 = vst.msk [vmem:[#allocation2 + $0xc1] sm:$0xff] %vm20100_vm6, %v8457_v23  ;;  %v7560_v28 = vsel %vm16682_vm1, %v7528_v14, 0.0  ;;  %v6850_v12 = vadd.f32 %v6818_v31, %v6622_v57  ;;  %v8100_v1 = vsub.f32 0.0, %v7652_v3  ;;  %v8102_v31 = vsub.f32 0.0, %v7654_v33 }
 0x8b2   : > { %v7718_v17 = vadd.f32 1.0, %v7686_v30  ;;  %v16764_v25 = vadd.f32 %v7560_v28, %v7490_v59  ;;  %vm8292_vm6 = vcmp.lt.f32.partialorder %v16705_v46, 0.0  ;;  %vm20117_vm1 = vcmask 130048  }
 0x8b3   : > { %v7046_v51 = vadd.f32 %v7014_v9, %v6850_v12  ;;  %v8132_v7 = vmul.f32 %v8100_v1, %v7652_v3  ;;  %v16774_v23 = vpop.permute.xlu1 %3903  ;;  %v8134_v9 = vmul.f32 %v8102_v31, %v7654_v33  ;;  %v20102_v3 = vld [vmem:[#allocation195_spill] sm:$0xff]  ;;  %v20103_v1 = vld [vmem:[#allocation194_spill] sm:$0xff]  ;;  %vm8294_vm5 = vcmp.lt.f32.partialorder %v16736_v43, 0.0 }
 0x8b4   : > { %12117 = vrcp.f32 %v7718_v17  ;;  %v16769_v22 = vmul.f32 0.70710677, %v16764_v25  ;;  %v20104_v17 = vpack.i.bf16 %v20102_v3, %v20103_v1  ;;  %v20109_v1 = vld [vmem:[#allocation198_spill] sm:$0xff] }
 0x8b5   : > { %v16771_v35 = vadd.f32 %v7084_v55, %v7046_v51  ;;  %v8181_v59 = vmul.f32 1.442695, %v8132_v7  ;;  %v8185_v7 = vmul.f32 1.442695, %v8134_v9 }
 0x8b6   : > { %v12116_v36 = vpop.eup %12115  ;;  %v7656_v58 = vand.u32 2147483647, %v16769_v22 }
 0x8b7   : > { %20101 = vst [vmem:[#allocation55_spill] sm:$0xff] %v16771_v35  ;;  %v7812_v60 = vmul.f32 1.0614054, %v12116_v36  ;;  %v16776_v55 = vpop.permute.xlu1 %11834 }
 0x8b8   : > { %v7688_v57 = vmul.f32 0.3275911, %v7656_v58  ;;  %v8104_v49 = vsub.f32 0.0, %v7656_v58 }
 0x8b9   : > { %v10009_v14 = vadd.f32 -1.4531521, %v7812_v60 }
 0x8ba   : > { %v7720_v27 = vadd.f32 1.0, %v7688_v57  ;;  %v20105_v57 = vld [vmem:[#allocation197_spill] sm:$0xff]  ;;  %v8136_v3 = vmul.f32 %v8104_v49, %v7656_v58 }
 0x8bb   : > { %v7876_v30 = vmul.f32 %v12116_v36, %v10009_v14  ;;  %v20106_v14 = vld [vmem:[#allocation196_spill] sm:$0xff]  ;;  %v16786_v31 = vpop.permute.xlu1 %11839 }
 0x8bc   : > { %12119 = vrcp.f32 %v7720_v27  ;;  %v20107_v27 = vpack.i.bf16 %v20105_v57, %v20106_v14 }
 0x8bd   : > { %v7908_v28 = vadd.f32 1.4214138, %v7876_v30  ;;  %12121 = vpow2.f32 %v8181_v59 }
 0x8be   : > { %v12118_v12 = vpop.eup %12117  ;;  %12123 = vpow2.f32 %v8185_v7 }
 0x8bf   : > { %v7940_v51 = vmul.f32 %v12116_v36, %v7908_v28  ;;  %v7814_v44 = vmul.f32 1.0614054, %v12118_v12  ;;  %v20108_v28 = vld [vmem:[#allocation199_spill] sm:$0xff] }
 0x8c1   : > { %v10041_v29 = vadd.f32 -0.28449672, %v7940_v51  ;;  %v10011_v60 = vadd.f32 -1.4531521, %v7814_v44  ;;  %v20110_v44 = vpack.i.bf16 %v20108_v28, %v20109_v1 }
 0x8c2   : > { %11929 = vrot.lane.b32.xlu1 %v20104_v17, %s12437_s1 }
 0x8c3   : > { %v8004_v59 = vmul.f32 %v12116_v36, %v10041_v29  ;;  %v7878_v33 = vmul.f32 %v12118_v12, %v10011_v60  ;;  %v8189_v60 = vmul.f32 1.442695, %v8136_v3 }
 0x8c5   : > { %v8036_v30 = vadd.f32 0.2548296, %v8004_v59  ;;  %v7910_v61 = vadd.f32 1.4214138, %v7878_v33  ;;  %v20111_v59 = vld [vmem:[#allocation201_spill] sm:$0xff]  ;;  %v20112_v33 = vld [vmem:[#allocation200_spill] sm:$0xff]  ;;  %12125 = vpow2.f32 %v8189_v60 }
 0x8c6   : > { %11934 = vrot.lane.b32.xlu1 %v20107_v27, %s12437_s1  ;;  %v12120_v62 = vpop.eup %12119  ;;  %v16792_v27 = vpop.permute.xlu1 %3905  ;;  %v20113_v7 = vpack.i.bf16 %v20111_v59, %v20112_v33 }
 0x8c7   : > { %v8068_v9 = vmul.f32 %v12116_v36, %v8036_v30  ;;  %v7942_v17 = vmul.f32 %v12118_v12, %v7910_v61  ;;  %v7816_v51 = vmul.f32 1.0614054, %v12120_v62  ;;  %v12122_v54 = vpop.eup %12121  ;;  %v20114_v61 = vld [vmem:[#allocation203_spill] sm:$0xff] }
 0x8c9   : > { %v8228_v57 = vmul.f32 %v12122_v54, %v8068_v9  ;;  %v10043_v14 = vadd.f32 -0.28449672, %v7942_v17  ;;  %v10013_v29 = vadd.f32 -1.4531521, %v7816_v51  ;;  %v20115_v54 = vld [vmem:[#allocation202_spill] sm:$0xff]  ;;  %v12124_v17 = vpop.eup %12123  ;;  %v8388_v51 = vmul.f32 0.5, %v16694_v40 }
 0x8ca   : > { %11939 = vrot.lane.b32.xlu1 %v20110_v44, %s12437_s1  ;;  %v20116_v30 = vpack.i.bf16 %v20114_v61, %v20115_v54  ;;  %v8390_v40 = vmul.f32 0.5, %v16728_v19 }
 0x8cb   : > { %v8260_v49 = vsub.f32 1.0, %v8228_v57  ;;  %v8006_v58 = vmul.f32 %v12118_v12, %v10043_v14  ;;  %v7880_v35 = vmul.f32 %v12120_v62, %v10013_v29  ;;  %v16804_v14 = vpop.permute.xlu1 %3907 }
 0x8cd   : > { %v8324_v28 = vsub.f32 0.0, %v8260_v49  ;;  %v8038_v1 = vadd.f32 0.2548296, %v8006_v58  ;;  %v7912_v36 = vadd.f32 1.4214138, %v7880_v35 }
 0x8ce   : > { %11944 = vrot.lane.b32.xlu1 %v20113_v7, %s12437_s1 }
 0x8cf   : > { %v8356_v3 = vsel %vm8292_vm6, %v8324_v28, %v8260_v49  ;;  %v8070_v44 = vmul.f32 %v12118_v12, %v8038_v1  ;;  %v7944_v9 = vmul.f32 %v12120_v62, %v7912_v36  ;;  %v11845_v49 = vpop.permute.xlu1 %11844  ;;  %v12126_v28 = vpop.eup %12125  ;;  %vm20118_vm6 = vmmov %vm20117_vm1 }
 0x8d0   : > { %v8420_v57 = vadd.f32 1.0, %v8356_v3 }
 0x8d1   : > { %v8230_v29 = vmul.f32 %v12124_v17, %v8070_v44  ;;  %v10045_v59 = vadd.f32 -0.28449672, %v7944_v9  ;;  %v8392_v9 = vmul.f32 0.5, %v16764_v25 }
 0x8d2   : > { %11949 = vrot.lane.b32.xlu1 %v20116_v30, %s12437_s1  ;;  %v8452_v35 = vmul.f32 %v8420_v57, %v8388_v51 }
 0x8d3   : > { %v8262_v33 = vsub.f32 1.0, %v8230_v29  ;;  %v8008_v46 = vmul.f32 %v12120_v62, %v10045_v59  ;;  %v11850_v30 = vpop.permute.xlu1 %11849 }
 0x8d4   : > { %8523 = vst.msk [vmem:[#allocation2 + $0x99] sm:$0xff] %vm20117_vm1, %v8452_v35  ;;  %vm8296_vm1 = vcmp.lt.f32.partialorder %v16769_v22, 0.0 }
 0x8d5   : > { %v8326_v60 = vsub.f32 0.0, %v8262_v33  ;;  %v8040_v7 = vadd.f32 0.2548296, %v8008_v46 }
 0x8d7   : > { %v8358_v12 = vsel %vm8294_vm5, %v8326_v60, %v8262_v33  ;;  %v8072_v58 = vmul.f32 %v12120_v62, %v8040_v7  ;;  %v16812_v17 = vpop.permute.xlu1 %3911  ;;  %vm20119_vm5 = vmmov %vm20118_vm6 }
 0x8d8   : > { %v8422_v1 = vadd.f32 1.0, %v8358_v12 }
 0x8d9   : > { %v8232_v36 = vmul.f32 %v12126_v28, %v8072_v58 }
 0x8da   : > { %v8454_v61 = vmul.f32 %v8422_v1, %v8390_v40 }
 0x8db   : > { %v8264_v54 = vsub.f32 1.0, %v8232_v36  ;;  %v11860_v19 = vpop.permute.xlu1 %11859 }
 0x8dc   : > { %8525 = vst.msk [vmem:[#allocation2 + $0xa9] sm:$0xff] %vm20118_vm6, %v8454_v61  ;;  %vm20125_vm6 = vcmask 27648  }
 0x8dd   : > { %v8328_v3 = vsub.f32 0.0, %v8264_v54 }
 0x8df   : > { %v8360_v44 = vsel %vm8296_vm1, %v8328_v3, %v8264_v54  ;;  %v16815_v51 = vpop.permute.xlu1 %3915  ;;  %vm20131_vm1 = vcmask 31744  }
 0x8e0   : > { %v8424_v43 = vadd.f32 1.0, %v8360_v44  ;;  %vm20154_vm14 = vmmov %vm20131_vm1 }
 0x8e1   : > { %vm20160_vm8 = vmmov %vm20131_vm1 }
 0x8e2   : > { %v8456_v62 = vmul.f32 %v8424_v43, %v8392_v9 }
 0x8e3   : > { %v11870_v57 = vpop.permute.xlu1 %11869 }
 0x8e4   : > { %8527 = vst.msk [vmem:[#allocation2 + $0xb9] sm:$0xff] %vm20119_vm5, %v8456_v62  ;;  %vm20133_vm5 = vmmov %vm20131_vm1 }
 0x8e7   : > { %v16817_v29 = vpop.permute.xlu1 %3919 }
 0x8eb   : > { %v11880_v59 = vpop.permute.xlu1 %11879 }
 0x8ef   : > { %v16819_v35 = vpop.permute.xlu1 %11884 }
 0x8f3   : > { %v16821_v33 = vpop.permute.xlu1 %11889 }
 0x8f7   : > { %v16823_v22 = vpop.permute.xlu1 %11894 }
 0x8fb   : > { %v16825_v25 = vpop.permute.xlu1 %11899 }
 0x8ff   : > { %v16827_v46 = vpop.permute.xlu1 %11904 }
 0x903   : > { %v16829_v60 = vpop.permute.xlu1 %11909 }
 0x907   : > { %v16831_v7 = vpop.permute.xlu1 %11914 }
 0x90b   : > { %v16833_v12 = vpop.permute.xlu1 %11919 }
 0x90f   : > { %v16839_v40 = vpop.permute.xlu1 %11924 }
 0x937   : > { %v16835_v58 = vpop.f32.mrb[2].mxu1 }
 0x938   : > { %20120 = vst [vmem:[#allocation56_spill] sm:$0xff] %v16835_v58  ;;  %v16837_v28 = vpop.f32.mrb[3].mxu1  ;;  %v20126_v58 = vld [vmem:[#allocation205_spill] sm:$0xff] }
 0x939   : > { %20121 = vst [vmem:[#allocation144_spill] sm:$0xff] %v16837_v28  ;;  %v20127_v28 = vld [vmem:[#allocation204_spill] sm:$0xff] }
 0x93a   : > { %v20128_v39 = vpack.i.bf16 %v20126_v58, %v20127_v28  ;;  %v11897_v58 = vunpack.i.h.bf16 %v16823_v22  ;;  %v11896_v28 = vunpack.i.l.bf16 %v16823_v22  ;;  %v11906_v22 = vunpack.i.l.bf16 %v16827_v46 }
 0x93e   : > { %v3880_v1 = vpop.xlane.xlu1 %3879 }
 0x93f   : > { %v3881_v36 = vsub.f32 %v16730_v63, %v3880_v1  ;;  %v16842_v61 = vpop.f32.mrb[4].mxu1  ;;  %v11881_v63 = vunpack.i.l.bf16 %v11880_v59  ;;  %v11902_v1 = vunpack.i.h.bf16 %v16825_v25 }
 0x940   : > { %20122 = vst [vmem:[#allocation145_spill] sm:$0xff] %v16842_v61  ;;  %v16844_v54 = vpop.f32.mrb[5].mxu1 }
 0x941   : > { %v3882_v3 = vmul.f32 1.442695, %v3881_v36  ;;  %v11901_v36 = vunpack.i.l.bf16 %v16825_v25  ;;  %v11911_v25 = vunpack.i.l.bf16 %v16829_v60 }
 0x943   : > { %12127 = vpow2.f32 %v3882_v3  ;;  %v11060_v3 = vpack.c.bf16 %v11897_v58, %v11896_v28  ;;  %v20149_v58 = vld [vmem:[#allocation32_spill] sm:$0xff] }
 0x947   : > { %v16846_v44 = vpop.f32.mrb[6].mxu1 }
 0x948   : > { %20123 = vst [vmem:[#allocation146_spill] sm:$0xff] %v16846_v44  ;;  %v16848_v9 = vpop.f32.mrb[7].mxu1 }
 0x949   : > { %20124 = vst [vmem:[#allocation147_spill] sm:$0xff] %v16848_v9  ;;  %v20301_v9 = vld [vmem:[#allocation231_spill] sm:$0xff] }
 0x94d   : > { %v12128_v43 = vpop.eup %12127 }
 0x94e   : > { %v3884_v62 = vsel %vm20125_vm6, %v12128_v43, 0.0  ;;  %vm20134_vm6 = vmmov %vm20131_vm1 }
 0x94f   : > { %3885 = vadd.xlane.f32.xlu1 %v3884_v62  ;;  %v11912_v62 = vunpack.i.h.bf16 %v16829_v60  ;;  %v11921_v60 = vunpack.i.l.bf16 %v16833_v12 }
 0x960   : > { %11954 = vrot.lane.b32.xlu1 %v20128_v39, %s12437_s1  ;;  %s9560_s1 = sshll.u32 %s18381_s20, 4  ;;  %s18695_s1 = int_to_ptr.vmem [resolvable:$true] %s9560_s1 }
 0x961   : > { %s12336_s22 = scalar_lea.vmem %s18695_s1, 4096 }
 0x962   : > { %p12337_p5 = scmp.ne.s32.totalorder %s18695_s1, %s12336_s22 }
 0x964   : > { %p12338_p7 = pnand %p12337_p5, %p12639_p12 }
 0x966   : > { %p12339_p13 = pneg %p12338_p7 }
 0x989   : > { %11959 = vxpose.xlu1.b32.start [1/16] (narrow) %v16317_v53, 8  ;;  %v16866_v53 = vpop.permute.xlu1 %11929 }
 0x98d   : > { %11961 = vxpose.xlu1.b32.cont [2/16] (narrow) %v16557_v26, 8  ;;  %v16869_v39 = vpop.permute.xlu1 %11934 }
 0x991   : > { %11963 = vxpose.xlu1.b32.cont [3/16] (narrow) %v16571_v2, 8  ;;  %v16871_v26 = vpop.permute.xlu1 %11939 }
 0x995   : > { %11965 = vxpose.xlu1.b32.cont [4/16] (narrow) %v16634_v16, 8  ;;  %v16873_v2 = vpop.permute.xlu1 %11944 }
 0x999   : > { %11967 = vxpose.xlu1.b32.cont [5/16] (narrow) %v16654_v24, 8  ;;  %v16875_v16 = vpop.permute.xlu1 %11949 }
 0x99d   : > { %11969 = vxpose.xlu1.b32.cont [6/16] (narrow) %v16715_v42, 8 }
 0x9a1   : > { %11971 = vxpose.xlu1.b32.cont [7/16] (narrow) %v16738_v6, 8  ;;  %v20130_v6 = vld [vmem:[#allocation23_spill] sm:$0xff] }
 0x9a5   : > { %11973 = vxpose.xlu1.b32.cont [8/16] (narrow) %v16776_v55, 8 }
 0x9a9   : > { %11975 = vxpose.xlu1.b32.cont [9/16] (narrow) %v16786_v31, 8  ;;  %v11887_v31 = vunpack.i.h.bf16 %v16819_v35 }
 0x9ad   : > { %11977 = vxpose.xlu1.b32.cont [10/16] (narrow) %v11845_v49, 8  ;;  %v11886_v49 = vunpack.i.l.bf16 %v16819_v35 }
 0x9b1   : > { %11979 = vxpose.xlu1.b32.cont [11/16] (narrow) %v11850_v30, 8  ;;  %v11892_v30 = vunpack.i.h.bf16 %v16821_v33 }
 0x9b5   : > { %11981 = vxpose.xlu1.b32.cont [12/16] (narrow) %v16351_v34, 8  ;;  %v20129_v34 = vld [vmem:[#allocation21_spill] sm:$0xff] }
 0x9b9   : > { %11983 = vxpose.xlu1.b32.cont [13/16] (narrow) %v11860_v19, 8  ;;  %v11891_v19 = vunpack.i.l.bf16 %v16821_v33  ;;  %v20135_v33 = vld [vmem:[#allocation25_spill] sm:$0xff] }
 0x9bb   : > { %v11058_v35 = vpack.c.bf16 %v11892_v30, %v11891_v19  ;;  %v20145_v19 = vld [vmem:[#allocation30_spill] sm:$0xff] }
 0x9bd   : > { %11985 = vxpose.xlu1.b32.cont [14/16] (narrow) %v16355_v21, 8  ;;  %v11882_v21 = vunpack.i.h.bf16 %v11880_v59  ;;  %v11056_v59 = vpack.c.bf16 %v11887_v31, %v11886_v49  ;;  %v11947_v31 = vunpack.i.h.bf16 %v16873_v2  ;;  %v11952_v49 = vunpack.i.h.bf16 %v16875_v16 }
 0x9bf   : > { %v11054_v55 = vpack.c.bf16 %v11882_v21, %v11881_v63  ;;  %v11927_v21 = vunpack.i.h.bf16 %v16839_v40  ;;  %v11932_v63 = vunpack.i.h.bf16 %v16866_v53 }
 0x9c1   : > { %11987 = vxpose.xlu1.b32.cont [15/16] (narrow) %v11870_v57, 8  ;;  %v20132_v57 = vld [vmem:[#allocation22_spill] sm:$0xff] }
 0x9c5   : > { %11989 = vxpose.xlu1.b32.end [16/16] (narrow) %v16359_v0, 8 }
 0x9dc   : > { %v3886_v24 = vpop.xlane.xlu1 %3885 }
 0x9dd   : > { %12129 = vrcp.f32 %v3886_v24  ;;  %v11917_v24 = vunpack.i.h.bf16 %v16831_v7 }
 0x9e0   : > { %v11955_v30 = vpop.permute.xlu1 %11954 }
 0x9e3   : > { %5227 = vrot.lane.b32.xlu1 %v20129_v34, %s12438_s19  ;;  %v11922_v34 = vunpack.i.h.bf16 %v16833_v12  ;;  %v11931_v12 = vunpack.i.l.bf16 %v16866_v53  ;;  %v11941_v53 = vunpack.i.l.bf16 %v16871_v26 }
 0x9e7   : > { %v12130_v42 = vpop.eup %12129  ;;  %5231 = vrot.lane.b32.xlu1 %v20130_v6, %s12438_s19  ;;  %v11937_v6 = vunpack.i.h.bf16 %v16869_v39 }
 0x9e8   : > { %v3888_v0 = vmul.f32 %v12130_v42, %v12128_v43  ;;  %v11907_v43 = vunpack.i.h.bf16 %v16827_v46  ;;  %v11916_v46 = vunpack.i.l.bf16 %v16831_v7  ;;  %v11926_v7 = vunpack.i.l.bf16 %v16839_v40  ;;  %v20141_v42 = vld [vmem:[#allocation26_spill] sm:$0xff] }
 0x9e9   : > { %v11936_v40 = vunpack.i.l.bf16 %v16869_v39  ;;  %v11946_v39 = vunpack.i.l.bf16 %v16873_v2  ;;  %v11956_v2 = vunpack.i.l.bf16 %v11955_v30 }
 0x9ea   : > { %10754 = vmatprep.subr.msk.mxu0 %vm20131_vm1, %v3888_v0 }
 0x9eb   : > { %5233 = vrot.lane.b32.xlu1 %v20132_v57, %s12438_s19  ;;  %10755 = vmatpush3.xpose.msk.msra.mxu0 %vm20133_vm5, %v3888_v0  ;;  %vm20136_vm5 = vmmov %vm20131_vm1  ;;  %v11942_v0 = vunpack.i.h.bf16 %v16871_v26  ;;  %v11951_v26 = vunpack.i.l.bf16 %v16875_v16  ;;  %v11080_v57 = vpack.c.bf16 %v11947_v31, %v11946_v39  ;;  %v20150_v16 = vld [vmem:[#allocation124_spill] sm:$0xff] }
 0x9ec   : > { %11055 = vmatprep.subr.bf16.mxu0 %v11054_v55  ;;  %v20143_v55 = vld [vmem:[#allocation28_spill] sm:$0xff] }
 0x9ee   : > { %10757 = vmatmul.mubr.msk.f32.vlgmr.msra.gmra.mrb[88].mxu0 %vm20134_vm6, %v16526_v4  ;;  %v11062_v4 = vpack.c.bf16 %v11902_v1, %v11901_v36  ;;  %vm20137_vm6 = vmmov %vm20131_vm1  ;;  %v20152_v1 = vld [vmem:[#allocation34_spill] sm:$0xff]  ;;  %v20153_v36 = vld [vmem:[#allocation123_spill] sm:$0xff] }
 0x9ef   : > { %5235 = vrot.lane.b32.xlu1 %v20135_v33, %s12438_s19  ;;  %10759 = vmatprep.mubr.msk.f32.mxu0 %vm20131_vm1, %v16593_v11  ;;  %v11064_v11 = vpack.c.bf16 %v11907_v43, %v11906_v22  ;;  %v20157_v33 = vld [vmem:[#allocation36_spill] sm:$0xff]  ;;  %v20159_v43 = vld [vmem:[#allocation233_spill] sm:$0xff]  ;;  %v20162_v22 = vld [vmem:[#allocation63_spill] sm:$0xff] }
 0x9f0   : > { %11057 = vmatpush3.bf16.msra.mxu0 %v11056_v59  ;;  %v11957_v59 = vunpack.i.h.bf16 %v11955_v30 }
 0x9f1   : > { %11059 = vmatprep.subr.bf16.mxu0 %v11058_v35 }
 0x9f2   : > { %10760 = vmatmul.mubr.msk.f32.gmra.mrb[90].mxu0 %vm20136_vm5, %v16606_v18  ;;  %v11066_v18 = vpack.c.bf16 %v11912_v62, %v11911_v25  ;;  %vm20139_vm5 = vmmov %vm20131_vm1  ;;  %v11084_v35 = vpack.c.bf16 %v11957_v59, %v11956_v2  ;;  %v20166_v62 = vld [vmem:[#allocation40_spill] sm:$0xff]  ;;  %v20167_v25 = vld [vmem:[#allocation66_spill] sm:$0xff] }
 0x9f3   : > { %5237 = vrot.lane.b32.xlu1 %v19947_v13, %s12438_s19  ;;  %10762 = vmatprep.mubr.msk.f32.mxu0 %vm20137_vm6, %v16686_v8  ;;  %v20138_v13 = vld [vmem:[#allocation27_spill] sm:$0xff]  ;;  %v11068_v8 = vpack.c.bf16 %v11917_v24, %v11916_v46  ;;  %vm20140_vm6 = vmmov %vm20131_vm1  ;;  %v20170_v24 = vld [vmem:[#allocation42_spill] sm:$0xff] }
 0x9f4   : > { %11061 = vmatpush3.bf16.msra.mxu0 %v11060_v3  ;;  %v20158_v3 = vld [vmem:[#allocation234_spill] sm:$0xff]  ;;  %v20171_v46 = vld [vmem:[#allocation68_spill] sm:$0xff] }
 0x9f5   : > { %11063 = vmatprep.subr.bf16.mxu0 %v11062_v4  ;;  %v20164_v4 = vld [vmem:[#allocation64_spill] sm:$0xff] }
 0x9f6   : > { %10763 = vmatmul.mubr.msk.f32.gmra.mrb[92].mxu0 %vm20131_vm1, %v16347_v41  ;;  %v11070_v41 = vpack.c.bf16 %v11922_v34, %v11921_v60  ;;  %v20175_v34 = vld [vmem:[#allocation44_spill] sm:$0xff]  ;;  %v20176_v60 = vld [vmem:[#allocation69_spill] sm:$0xff] }
 0x9f7   : > { %5239 = vrot.lane.b32.xlu1 %v20138_v13, %s12438_s19  ;;  %10765 = vmatprep.mubr.msk.f32.mxu0 %vm20139_vm5, %v16766_v56  ;;  %v11072_v56 = vpack.c.bf16 %v11927_v21, %v11926_v7  ;;  %vm20142_vm5 = vmmov %vm20131_vm1  ;;  %v20178_v13 = vld [vmem:[#allocation72_spill] sm:$0xff]  ;;  %v20181_v21 = vld [vmem:[#allocation73_spill] sm:$0xff] }
 0x9f8   : > { %11065 = vmatpush3.bf16.msra.mxu0 %v11064_v11  ;;  %v20169_v11 = vld [vmem:[#allocation65_spill] sm:$0xff]  ;;  %v20182_v7 = vld [vmem:[#allocation74_spill] sm:$0xff] }
 0x9f9   : > { %11067 = vmatprep.subr.bf16.mxu0 %v11066_v18  ;;  %v20173_v18 = vld [vmem:[#allocation67_spill] sm:$0xff] }
 0x9fa   : > { %10766 = vmatmul.mubr.msk.f32.gmra.mrb[94].mxu0 %vm20140_vm6, %v16774_v23  ;;  %v11074_v23 = vpack.c.bf16 %v11932_v63, %v11931_v12  ;;  %vm20144_vm6 = vmmov %vm20131_vm1  ;;  %v20185_v63 = vld [vmem:[#allocation82_spill] sm:$0xff] }
 0x9fb   : > { %5241 = vrot.lane.b32.xlu1 %v20141_v42, %s12438_s19  ;;  %10768 = vmatprep.mubr.msk.f32.mxu0 %vm20131_vm1, %v16792_v27  ;;  %v11076_v27 = vpack.c.bf16 %v11937_v6, %v11936_v40  ;;  %v20187_v42 = vld [vmem:[#allocation77_spill] sm:$0xff]  ;;  %v20189_v6 = vld [vmem:[#allocation50_spill] sm:$0xff] }
 0x9fc   : > { %11069 = vmatpush3.bf16.msra.mxu0 %v11068_v8  ;;  %v20180_v8 = vld [vmem:[#allocation46_spill] sm:$0xff] }
 0x9fd   : > { %11071 = vmatprep.subr.bf16.mxu0 %v11070_v41  ;;  %v20184_v41 = vld [vmem:[#allocation48_spill] sm:$0xff] }
 0x9fe   : > { %10769 = vmatmul.mubr.msk.f32.gmra.mrb[96].mxu0 %vm20142_vm5, %v16804_v14  ;;  %v11078_v14 = vpack.c.bf16 %v11942_v0, %v11941_v53  ;;  %vm20147_vm5 = vmmov %vm20131_vm1 }
 0x9ff   : > { %5245 = vrot.lane.b32.xlu1 %v20143_v55, %s12438_s19  ;;  %10771 = vmatprep.mubr.msk.f32.mxu0 %vm20144_vm6, %v16349_v45  ;;  %v20146_v45 = vld [vmem:[#allocation121_spill] sm:$0xff]  ;;  %vm20148_vm6 = vmmov %vm20131_vm1 }
 0xa00   : > { %11073 = vmatpush3.bf16.msra.mxu0 %v11072_v56 }
 0xa01   : > { %11075 = vmatprep.subr.bf16.mxu0 %v11074_v23 }
 0xa02   : > { %10772 = vmatmul.mubr.msk.f32.gmra.mrb[98].mxu0 %vm20131_vm1, %v16812_v17  ;;  %v11082_v17 = vpack.c.bf16 %v11952_v49, %v11951_v26 }
 0xa03   : > { %5249 = vrot.lane.b32.xlu1 %v20145_v19, %s12438_s19  ;;  %10774 = vmatprep.mubr.msk.f32.mxu0 %vm20147_vm5, %v20146_v45  ;;  %vm20151_vm5 = vmmov %vm20131_vm1 }
 0xa04   : > { %11077 = vmatpush3.bf16.msra.mxu0 %v11076_v27 }
 0xa05   : > { %11079 = vmatprep.subr.bf16.mxu0 %v11078_v14 }
 0xa06   : > { %10775 = vmatmul.mubr.msk.f32.gmra.mrb[100].mxu0 %vm20148_vm6, %v16815_v51  ;;  %v20155_v51 = vld [vmem:[#allocation232_spill] sm:$0xff]  ;;  %vm20156_vm6 = vmmov %vm20131_vm1 }
 0xa07   : > { %5253 = vrot.lane.b32.xlu1 %v20149_v58, %s12438_s19  ;;  %10777 = vmatprep.mubr.msk.f32.mxu0 %vm20131_vm1, %v20150_v16 }
 0xa08   : > { %11081 = vmatpush3.bf16.msra.mxu0 %v11080_v57 }
 0xa09   : > { %11083 = vmatprep.subr.bf16.mxu0 %v11082_v17  ;;  %v11990_v28 = vpop.trf.xlu1 }
 0xa0a   : > { %10778 = vmatmul.mubr.msk.f32.gmra.mrb[102].mxu0 %vm20151_vm5, %v16817_v29  ;;  %v20161_v29 = vld [vmem:[#allocation38_spill] sm:$0xff]  ;;  %vm20163_vm5 = vmmov %vm20131_vm1  ;;  %v11991_v12 = vunpack.i.l.bf16 %v11990_v28  ;;  %v11994_v56 = vunpack.i.h.bf16 %v11990_v28 }
 0xa0b   : > { %5257 = vrot.lane.b32.xlu1 %v20152_v1, %s12438_s19  ;;  %10780 = vmatprep.mubr.msk.f32.mxu0 %vm20154_vm14, %v20153_v36  ;;  %vm20165_vm14 = vmmov %vm20131_vm1 }
 0xa0c   : > { %11085 = vmatpush3.bf16.msra.mxu0 %v11084_v35 }
 0xa0e   : > { %10781 = vmatmul.mubr.msk.f32.gmra.mrb[104].mxu0 %vm20156_vm6, %v20155_v51  ;;  %vm20168_vm6 = vmmov %vm20131_vm1 }
 0xa0f   : > { %5261 = vrot.lane.b32.xlu1 %v20157_v33, %s12438_s19  ;;  %10783 = vmatprep.mubr.msk.f32.mxu0 %vm20131_vm1, %v20158_v3 }
 0xa12   : > { %10784 = vmatmul.mubr.msk.f32.gmra.mrb[106].mxu0 %vm20160_vm8, %v20159_v43  ;;  %vm20172_vm8 = vmmov %vm20131_vm1 }
 0xa13   : > { %5265 = vrot.lane.b32.xlu1 %v20161_v29, %s12438_s19  ;;  %10786 = vmatprep.mubr.msk.f32.mxu0 %vm20163_vm5, %v20162_v22  ;;  %vm20174_vm5 = vmmov %vm20131_vm1 }
 0xa16   : > { %10787 = vmatmul.mubr.msk.f32.gmra.mrb[108].mxu0 %vm20165_vm14, %v20164_v4  ;;  %vm20177_vm14 = vmmov %vm20131_vm1 }
 0xa17   : > { %5269 = vrot.lane.b32.xlu1 %v20166_v62, %s12438_s19  ;;  %10789 = vmatprep.mubr.msk.f32.mxu0 %vm20168_vm6, %v20167_v25  ;;  %vm20179_vm6 = vmmov %vm20131_vm1 }
 0xa1a   : > { %10790 = vmatmul.mubr.msk.f32.gmra.mrb[110].mxu0 %vm20131_vm1, %v20169_v11 }
 0xa1b   : > { %5273 = vrot.lane.b32.xlu1 %v20170_v24, %s12438_s19  ;;  %10792 = vmatprep.mubr.msk.f32.mxu0 %vm20172_vm8, %v20171_v46  ;;  %vm20183_vm8 = vmmov %vm20131_vm1  ;;  %v5214_v46 = vstv %s9923_s17 }
 0xa1e   : > { %10793 = vmatmul.mubr.msk.f32.gmra.mrb[112].mxu0 %vm20174_vm5, %v20173_v18  ;;  %vm20186_vm5 = vmmov %vm20131_vm1 }
 0xa1f   : > { %5277 = vrot.lane.b32.xlu1 %v20175_v34, %s12438_s19  ;;  %10795 = vmatprep.mubr.msk.f32.mxu0 %vm20177_vm14, %v20176_v60  ;;  %vm20188_vm14 = vmmov %vm20131_vm1 }
 0xa22   : > { %10796 = vmatmul.mubr.msk.f32.gmra.mrb[114].mxu0 %vm20179_vm6, %v20178_v13  ;;  %vm20190_vm6 = vmmov %vm20131_vm1  ;;  %v20224_v13 = vld [vmem:[#allocation47_spill] sm:$0xff] }
 0xa23   : > { %5281 = vrot.lane.b32.xlu1 %v20180_v8, %s12438_s19  ;;  %10798 = vmatprep.mubr.msk.f32.mxu0 %vm20131_vm1, %v20181_v21  ;;  %vm20223_vm1 = vcmask 27648   ;;  %v20225_v21 = vld [vmem:[#allocation49_spill] sm:$0xff] }
 0xa26   : > { %10799 = vmatmul.mubr.msk.f32.gmra.mrb[116].mxu0 %vm20183_vm8, %v20182_v7  ;;  %v20226_v7 = vld [vmem:[#allocation51_spill] sm:$0xff]  ;;  %vm19178_vm8 = vcmask 1043456  }
 0xa27   : > { %5285 = vrot.lane.b32.xlu1 %v20184_v41, %s12438_s19  ;;  %10801 = vmatprep.mubr.msk.f32.mxu0 %vm20186_vm5, %v20185_v63  ;;  %v17085_v63 = vld [vmem:[#allocation10] sm:$0xff] }
 0xa2a   : > { %10802 = vmatmul.mubr.msk.f32.gmra.mrb[118].mxu0 %vm20188_vm14, %v20187_v42  ;;  %vm20231_vm14 = vcmask 130048  }
 0xa2b   : > { %5289 = vrot.lane.b32.xlu1 %v20189_v6, %s12438_s19  ;;  %5207 = vmatprep.mubr.f32.mxu0 %v11991_v12  ;;  %v2615_v12 = vrot.slane %v17085_v63, 4 }
 0xa2d   : > { %10654 = vmatprep.subr.msk.mxu1 %vm19178_vm8, %v2615_v12 }
 0xa2e   : > { %5208 = vmatmul.mubr.f32.vlgmr.msra.gmra.mrb[120].mxu0 %v11994_v56  ;;  %10655 = vmatpush3.msk.msra.mxu1 %vm19178_vm8, %v2615_v12 }
 0xa2f   : > { %10704 = vmatprep.subr.msk.mxu1 %vm19178_vm8, %v17085_v63  ;;  %vm20234_vm8 = vmmov %vm20190_vm6 }
 0xa55   : > { %v5228_v40 = vpop.permute.xlu1 %5227 }
 0xa56   : > { %10856 = vmatprep.mubr.msk.f32.mxu0 %vm20190_vm6, %v5228_v40  ;;  %v20227_v40 = vld [vmem:[#allocation213_spill] sm:$0xff] }
 0xac1   : > { %v17008_v23 = vpop.f32.mrb[88].mxu0 }
 0xac2   : > { %20191 = vst [vmem:[#allocation148_spill] sm:$0xff] %v17008_v23  ;;  %v17010_v0 = vpop.f32.mrb[89].mxu0 }
 0xac3   : > { %20192 = vst [vmem:[#allocation149_spill] sm:$0xff] %v17010_v0 }
 0xac5   : > { %v17012_v53 = vpop.f32.mrb[90].mxu0 }
 0xac6   : > { %20193 = vst [vmem:[#allocation57_spill] sm:$0xff] %v17012_v53  ;;  %v17014_v55 = vpop.f32.mrb[91].mxu0  ;;  %v20272_v53 = vld [vmem:[#allocation84_spill] sm:$0xff] }
 0xac7   : > { %20194 = vst [vmem:[#allocation58_spill] sm:$0xff] %v17014_v55 }
 0xac9   : > { %v17016_v27 = vpop.f32.mrb[92].mxu0 }
 0xaca   : > { %20195 = vst [vmem:[#allocation150_spill] sm:$0xff] %v17016_v27  ;;  %v17018_v31 = vpop.f32.mrb[93].mxu0  ;;  %v20270_v27 = vld [vmem:[#allocation129_spill] sm:$0xff] }
 0xacb   : > { %20196 = vst [vmem:[#allocation151_spill] sm:$0xff] %v17018_v31 }
 0xacd   : > { %v17020_v39 = vpop.f32.mrb[94].mxu0 }
 0xace   : > { %20197 = vst [vmem:[#allocation153_spill] sm:$0xff] %v17020_v39  ;;  %v17022_v14 = vpop.f32.mrb[95].mxu0 }
 0xacf   : > { %20198 = vst [vmem:[#allocation152_spill] sm:$0xff] %v17022_v14 }
 0xad1   : > { %v17024_v49 = vpop.f32.mrb[96].mxu0 }
 0xad2   : > { %20199 = vst [vmem:[#allocation155_spill] sm:$0xff] %v17024_v49  ;;  %v17026_v26 = vpop.f32.mrb[97].mxu0 }
 0xad3   : > { %20200 = vst [vmem:[#allocation154_spill] sm:$0xff] %v17026_v26 }
 0xad5   : > { %v17028_v30 = vpop.f32.mrb[98].mxu0 }
 0xad6   : > { %20201 = vst [vmem:[#allocation157_spill] sm:$0xff] %v17028_v30  ;;  %v17030_v19 = vpop.f32.mrb[99].mxu0 }
 0xad7   : > { %20202 = vst [vmem:[#allocation156_spill] sm:$0xff] %v17030_v19 }
 0xad9   : > { %v17032_v45 = vpop.f32.mrb[100].mxu0 }
 0xada   : > { %20203 = vst [vmem:[#allocation159_spill] sm:$0xff] %v17032_v45  ;;  %v17034_v57 = vpop.f32.mrb[101].mxu0 }
 0xadb   : > { %20204 = vst [vmem:[#allocation158_spill] sm:$0xff] %v17034_v57 }
 0xadd   : > { %v17036_v59 = vpop.f32.mrb[102].mxu0 }
 0xade   : > { %20205 = vst [vmem:[#allocation161_spill] sm:$0xff] %v17036_v59  ;;  %v17038_v2 = vpop.f32.mrb[103].mxu0 }
 0xadf   : > { %20206 = vst [vmem:[#allocation160_spill] sm:$0xff] %v17038_v2 }
 0xae1   : > { %v17040_v17 = vpop.f32.mrb[104].mxu0 }
 0xae2   : > { %20207 = vst [vmem:[#allocation163_spill] sm:$0xff] %v17040_v17  ;;  %v17042_v58 = vpop.f32.mrb[105].mxu0 }
 0xae3   : > { %20208 = vst [vmem:[#allocation162_spill] sm:$0xff] %v17042_v58 }
 0xae5   : > { %v17044_v16 = vpop.f32.mrb[106].mxu0 }
 0xae6   : > { %20209 = vst [vmem:[#allocation165_spill] sm:$0xff] %v17044_v16  ;;  %v17046_v28 = vpop.f32.mrb[107].mxu0 }
 0xae7   : > { %20210 = vst [vmem:[#allocation164_spill] sm:$0xff] %v17046_v28 }
 0xae9   : > { %v17048_v35 = vpop.f32.mrb[108].mxu0 }
 0xaea   : > { %20211 = vst [vmem:[#allocation167_spill] sm:$0xff] %v17048_v35  ;;  %v17050_v1 = vpop.f32.mrb[109].mxu0 }
 0xaeb   : > { %20212 = vst [vmem:[#allocation166_spill] sm:$0xff] %v17050_v1 }
 0xaed   : > { %v17052_v36 = vpop.f32.mrb[110].mxu0 }
 0xaee   : > { %20213 = vst [vmem:[#allocation169_spill] sm:$0xff] %v17052_v36  ;;  %v17054_v51 = vpop.f32.mrb[111].mxu0 }
 0xaef   : > { %20214 = vst [vmem:[#allocation168_spill] sm:$0xff] %v17054_v51 }
 0xaf1   : > { %v17056_v33 = vpop.f32.mrb[112].mxu0 }
 0xaf2   : > { %20215 = vst [vmem:[#allocation171_spill] sm:$0xff] %v17056_v33  ;;  %v17058_v3 = vpop.f32.mrb[113].mxu0 }
 0xaf3   : > { %20216 = vst [vmem:[#allocation170_spill] sm:$0xff] %v17058_v3 }
 0xaf5   : > { %v17060_v43 = vpop.f32.mrb[114].mxu0 }
 0xaf6   : > { %20217 = vst [vmem:[#allocation173_spill] sm:$0xff] %v17060_v43  ;;  %v17062_v29 = vpop.f32.mrb[115].mxu0  ;;  %v20240_v43 = vmov 0.0  }
 0xaf7   : > { %20218 = vst [vmem:[#allocation172_spill] sm:$0xff] %v17062_v29 }
 0xaf9   : > { %v17064_v22 = vpop.f32.mrb[116].mxu0 }
 0xafa   : > { %20219 = vst [vmem:[#allocation60_spill] sm:$0xff] %v17064_v22  ;;  %v17066_v4 = vpop.f32.mrb[117].mxu0  ;;  %v17115_v22 = vld [vmem:[#allocation2 + $0xd9] sm:$0xff] }
 0xafb   : > { %20220 = vst [vmem:[#allocation59_spill] sm:$0xff] %v17066_v4 }
 0xafd   : > { %v17068_v62 = vpop.f32.mrb[118].mxu0 }
 0xafe   : > { %20221 = vst [vmem:[#allocation175_spill] sm:$0xff] %v17068_v62  ;;  %v17070_v25 = vpop.f32.mrb[119].mxu0 }
 0xaff   : > { %20222 = vst [vmem:[#allocation174_spill] sm:$0xff] %v17070_v25  ;;  %v17113_v25 = vld [vmem:[#allocation2 + $0xd8] sm:$0xff] }
 0xb01   : > { %v10433_v11 = vpop.f32.mrb[120].mxu0 }
 0xb02   : > { %v10434_v24 = vpop.f32.mrb[121].mxu0 }
 0xb03   : > { %v10435_v18 = vadd.f32 %v10434_v24, %v10433_v11  ;;  %v20228_v24 = vmov 0 }
 0xb05   : > { %v5215_v34 = vmul.f32 %v10435_v18, %v5214_v46  ;;  %v6111_v46 = vadd.s32 224, %v20003_v37 }
 0xb07   : > { %v5216_v60 = vsel %vm20223_vm1, %v5215_v34, -inf  ;;  %vm20233_vm1 = vmmov %vm20231_vm14 }
 0xb08   : > { %5217 = vmax.xlane.f32.xlu0 %v5216_v60  ;;  %v20232_v60 = vld [vmem:[#allocation131_spill] sm:$0xff] }
 0xb09   : > { %v6821_v12 = vmul.f32 %v20014_v10, %v20232_v60 }
 0xb1e   : > { %1328 = vrot.lane.b32.xlu0 %v20224_v13, %s12430_s13 }
 0xb22   : > { %1330 = vrot.lane.b32.xlu0 %v20180_v8, %s12430_s13  ;;  %v6109_v8 = vadd.s32 208, %v20003_v37 }
 0xb26   : > { %1332 = vrot.lane.b32.xlu0 %v20225_v21, %s12430_s13 }
 0xb2a   : > { %1334 = vrot.lane.b32.xlu0 %v20184_v41, %s12430_s13  ;;  %v6301_v41 = vand.u32 15, %v6109_v8  ;;  %v6315_v8 = vand.u32 15, %v6111_v46  ;;  %v20237_v46 = vmov 0 }
 0xb2c   : > { %vm17095_vm5 = vcmp.ne.s32.totalorder %v6301_v41, 0  ;;  %v7187_v41 = vmul.f32 %v20015_v20, %v20232_v60 }
 0xb2d   : > { %v20229_v24 = vsel %vm17095_vm5, 4294967295, %v20228_v24 }
 0xb2e   : > { %1336 = vrot.lane.b32.xlu0 %v20226_v7, %s12430_s13  ;;  %20230 = vst [vmem:[#allocation177_spill] sm:$0xff] %v20229_v24 }
 0xb32   : > { %1338 = vrot.lane.b32.xlu0 %v20189_v6, %s12430_s13  ;;  %v6625_v6 = vmul.f32 %v20007_v47, %v20227_v40  ;;  %v20235_v40 = vld [vmem:[#allocation85_spill] sm:$0xff] }
 0xb95   : > { %v5218_v42 = vpop.xlane.xlu0 %5217 }
 0xb96   : > { %v5219_v56 = vsub.f32 %v5215_v34, %v5218_v42  ;;  %v6721_v34 = vsel %vm17095_vm5, %v6625_v6, 0.0  ;;  %v7257_v6 = vmul.f32 %v20020_v48, %v20235_v40 }
 0xb98   : > { %v5220_v11 = vmul.f32 1.442695, %v5219_v56  ;;  %v6853_v56 = vadd.f32 %v6821_v12, %v6721_v34  ;;  %v6113_v12 = vadd.s32 240, %v20003_v37 }
 0xb99   : > { %v1329_v18 = vpop.permute.xlu0 %1328 }
 0xb9a   : > { %12131 = vpow2.f32 %v5220_v11  ;;  %6076 = vst.msk [vmem:[#allocation2 + $0xe1] sm:$0xff] %vm20231_vm14, %v1329_v18  ;;  %10595 = vmatprep.mubr.msk.f32.mxu1 %vm20190_vm6, %v1329_v18  ;;  %v6921_v11 = vmul.f32 %v20018_v5, %v20235_v40  ;;  %v20236_v18 = vld [vmem:[#allocation91_spill] sm:$0xff]  ;;  %vm17119_vm14 = vcmp.ne.s32.totalorder %v6315_v8, 0  ;;  %vm20242_vm6 = vmmov %vm20233_vm1 }
 0xb9b   : > { %v7219_v62 = vadd.f32 %v7187_v41, %v20236_v18  ;;  %v20238_v46 = vsel %vm17119_vm14, 4294967295, %v20237_v46 }
 0xb9c   : > { %20239 = vst [vmem:[#allocation176_spill] sm:$0xff] %v20238_v46  ;;  %v7049_v8 = vadd.f32 %v6921_v11, %v6853_v56 }
 0xb9d   : > { %v1331_v42 = vpop.permute.xlu0 %1330  ;;  %v7321_v3 = vadd.f32 %v7257_v6, %v7219_v62  ;;  %v17149_v6 = vld [vmem:[%s18749_s5 + $0x8] ss:$0 sm:$0xff] }
 0xb9e   : > { %6077 = vst.msk [vmem:[#allocation2 + $0xe9] sm:$0xff] %vm20233_vm1, %v1331_v42  ;;  %10596 = vmatmul.mubr.msk.f32.gmra.mrb[8].mxu1 %vm20234_vm8, %v1331_v42  ;;  %vm20241_vm8 = vmmov %vm20233_vm1  ;;  %vm20243_vm1 = vcmask 31744  }
 0xba1   : > { %v6591_v60 = vld [vmem:[#allocation2 + $0xe0] sm:$0xff]  ;;  %v1333_v34 = vpop.permute.xlu0 %1332 }
 0xba2   : > { %v6787_v4 = vld [vmem:[#allocation2 + $0xe1] sm:$0xff]  ;;  %v6627_v41 = vmul.f32 %v20007_v47, %v6591_v60  ;;  %v7087_v18 = vmul.f32 %v20024_v52, %v6591_v60  ;;  %6078 = vst.msk [vmem:[#allocation2 + $0xf1] sm:$0xff] %vm20242_vm6, %v1333_v34  ;;  %10598 = vmatprep.mubr.msk.f32.mxu1 %vm20243_vm1, %v1333_v34  ;;  %v7359_v29 = vmul.f32 %v20029_v38, %v6591_v60  ;;  %v6329_v34 = vand.u32 15, %v6113_v12  ;;  %vm20247_vm1 = vmmov %vm20242_vm6 }
 0xba3   : > { %v17123_v42 = vld [vmem:[#allocation2 + $0xda] sm:$0xff]  ;;  %v6823_v40 = vmul.f32 %v20014_v10, %v6787_v4  ;;  %v7189_v60 = vmul.f32 %v20015_v20, %v6787_v4  ;;  %v7461_v62 = vmul.f32 %v20033_v50, %v6787_v4 }
 0xba4   : > { %8496 = vst.msk [vmem:[#allocation2 + $0xd8] sm:$0xff] %vm20241_vm8, %v20240_v43  ;;  %v17134_v33 = vpop.eup %12131  ;;  %v6723_v36 = vsel %vm17119_vm14, %v6627_v41, 0.0  ;;  %v7119_v51 = vsel %vm17095_vm5, %v7087_v18, 0.0  ;;  %v7391_v16 = vsel %vm16477_vm9, %v7359_v29, 0.0  ;;  %vm20246_vm8 = vcmask 27648  }
 0xba5   : > { %20244 = vst [vmem:[#allocation179_spill] sm:$0xff] %v17134_v33  ;;  %v7151_v35 = vadd.f32 %v7119_v51, %v7049_v8  ;;  %v6887_v28 = vld [vmem:[#allocation2 + $0xe2] sm:$0xff]  ;;  %v1335_v56 = vpop.permute.xlu0 %1334  ;;  %v5222_v11 = vsel %vm20246_vm8, %v17134_v33, 0.0  ;;  %v7423_v17 = vadd.f32 %v7391_v16, %v7321_v3  ;;  %v6855_v29 = vadd.f32 %v6823_v40, %v6723_v36 }
 0xba6   : > { %v7531_v51 = vmul.f32 %v17149_v6, %v6887_v28  ;;  %8497 = vst.msk [vmem:[#allocation2 + $0xe0] sm:$0xff] %vm20242_vm6, %v20240_v43  ;;  %5223 = vadd.xlane.f32.xlu0 %v5222_v11  ;;  %v6923_v12 = vmul.f32 %v20018_v5, %v6887_v28  ;;  %vm20248_vm8 = vcmask 31744   ;;  %v17157_v4 = vld [vmem:[#allocation2 + $0xe8] sm:$0xff]  ;;  %v7259_v18 = vmul.f32 %v20020_v48, %v6887_v28 }
 0xba7   : > { %6079 = vst.msk [vmem:[#allocation2 + $0xf9] sm:$0xff] %vm20247_vm1, %v1335_v56  ;;  %10599 = vmatmul.mubr.msk.f32.gmra.mrb[10].mxu1 %vm20248_vm8, %v1335_v56  ;;  %v7221_v16 = vadd.f32 %v7189_v60, %v7151_v35  ;;  %v7493_v3 = vadd.f32 %v7461_v62, %v7423_v17  ;;  %v17159_v41 = vld [vmem:[#allocation2 + $0xe9] sm:$0xff]  ;;  %vm17166_vm6 = vcmp.ne.s32.totalorder %v6329_v34, 0  ;;  %v20249_v36 = vmov 0  ;;  %vm20252_vm8 = vmmov %vm20247_vm1 }
 0xba8   : > { %v20250_v36 = vsel %vm17166_vm6, 4294967295, %v20249_v36  ;;  %vm20253_vm9 = vcmask 31744   ;;  %v7051_v28 = vadd.f32 %v6923_v12, %v6855_v29 }
 0xba9   : > { %v6593_v8 = vld [vmem:[#allocation2 + $0xf0] sm:$0xff]  ;;  %v1337_v59 = vpop.permute.xlu0 %1336  ;;  %v17164_v2 = vadd.f32 %v7531_v51, %v7493_v3  ;;  %20251 = vst [vmem:[#allocation178_spill] sm:$0xff] %v20250_v36  ;;  %v7323_v34 = vadd.f32 %v7259_v18, %v7221_v16 }
 0xbaa   : > { %v6789_v1 = vld [vmem:[#allocation2 + $0xf1] sm:$0xff]  ;;  %v6629_v35 = vmul.f32 %v20007_v47, %v6593_v8  ;;  %v7089_v17 = vmul.f32 %v20024_v52, %v6593_v8  ;;  %6080 = vst.msk [vmem:[#allocation2 + $0x101] sm:$0xff] %vm20252_vm8, %v1337_v59  ;;  %10601 = vmatprep.mubr.msk.f32.mxu1 %vm20253_vm9, %v1337_v59  ;;  %v7361_v40 = vmul.f32 %v20029_v38, %v6593_v8  ;;  %vm20254_vm9 = vmmov %vm20247_vm1  ;;  %vm20255_vm8 = vcmask 31744  }
 0xbab   : > { %v17162_v58 = vld [vmem:[#allocation2 + $0xea] sm:$0xff]  ;;  %v17178_v56 = vmul.f32 0.70710677, %v17164_v2  ;;  %v6825_v11 = vmul.f32 %v20014_v10, %v6789_v1  ;;  %v7463_v16 = vmul.f32 %v20033_v50, %v6789_v1 }
 0xbac   : > { %8498 = vst.msk [vmem:[#allocation2 + $0xe8] sm:$0xff] %vm20247_vm1, %v20240_v43  ;;  %v7121_v60 = vsel %vm17119_vm14, %v7089_v17, 0.0  ;;  %v6725_v62 = vsel %vm17166_vm6, %v6629_v35, 0.0  ;;  %v7393_v3 = vsel %vm17095_vm5, %v7361_v40, 0.0  ;;  %v7191_v35 = vmul.f32 %v20015_v20, %v6789_v1  ;;  %v20256_v17 = vld [vmem:[#allocation125_spill] sm:$0xff]  ;;  %vm20257_vm5 = vmmov %vm20255_vm8 }
 0xbad   : > { %v7153_v51 = vadd.f32 %v7121_v60, %v7051_v28  ;;  %v1339_v29 = vpop.permute.xlu0 %1338  ;;  %v17188_v12 = vand.u32 2147483647, %v17178_v56  ;;  %v7425_v8 = vadd.f32 %v7393_v3, %v7323_v34  ;;  %v6857_v40 = vadd.f32 %v6825_v11, %v6725_v62  ;;  %v20259_v11 = vld [vmem:[#allocation208_spill] sm:$0xff] }
 0xbae   : > { %v6889_v59 = vld [vmem:[#allocation2 + $0xf2] sm:$0xff]  ;;  %6081 = vst.msk [vmem:[#allocation2 + $0x109] sm:$0xff] %vm20247_vm1, %v1339_v29  ;;  %10602 = vmatmul.mubr.msk.f32.gmra.mrb[12].mxu1 %vm20255_vm8, %v1339_v29 }
 0xbaf   : > { %v7533_v18 = vmul.f32 %v17149_v6, %v6889_v59  ;;  %8499 = vst.msk [vmem:[#allocation2 + $0xf0] sm:$0xff] %vm20254_vm9, %v20240_v43  ;;  %10656 = vmatprep.mubr.msk.f32.mxu1 %vm20257_vm5, %v20256_v17  ;;  %v7691_v28 = vmul.f32 0.3275911, %v17188_v12  ;;  %v7495_v34 = vadd.f32 %v7463_v16, %v7425_v8  ;;  %v17200_v60 = vld [vmem:[#allocation2 + $0xf8] sm:$0xff]  ;;  %v6925_v3 = vmul.f32 %v20018_v5, %v6889_v59  ;;  %vm20258_vm5 = vmmov %vm20247_vm1  ;;  %v20261_v8 = vld [vmem:[#allocation127_spill] sm:$0xff] }
 0xbb0   : > { %v7223_v24 = vadd.f32 %v7191_v35, %v7153_v51  ;;  %v17203_v45 = vld [vmem:[#allocation2 + $0xf9] sm:$0xff]  ;;  %v7261_v57 = vmul.f32 %v20020_v48, %v6889_v59  ;;  %vm20260_vm9 = vmmov %vm20255_vm8 }
 0xbb1   : > { %v17206_v30 = vld [vmem:[#allocation2 + $0xfa] sm:$0xff]  ;;  %v7723_v1 = vadd.f32 1.0, %v7691_v28  ;;  %v17208_v19 = vadd.f32 %v7533_v18, %v7495_v34  ;;  %vm20262_vm1 = vmmov %vm20255_vm8  ;;  %vm20263_vm8 = vcmask 1043456   ;;  %v7053_v16 = vadd.f32 %v6925_v3, %v6857_v40  ;;  %v7431_v18 = vld [vmem:[#allocation2 + $0x111] sm:$0xff] }
 0xbb2   : > { %v7055_v29 = vld [vmem:[#allocation2 + $0x100] sm:$0xff]  ;;  %8500 = vst.msk [vmem:[#allocation2 + $0xf8] sm:$0xff] %vm20258_vm5, %v20240_v43  ;;  %10657 = vmatmul.mubr.msk.f32.vlgmr.msra.gmra.mrb[14].mxu1 %vm20260_vm9, %v20259_v11  ;;  %v7325_v35 = vadd.f32 %v7261_v57, %v7223_v24  ;;  %v20264_v3 = vld [vmem:[#allocation126_spill] sm:$0xff]  ;;  %vm20265_vm9 = vmmov %vm20262_vm1 }
 0xbb3   : > { %v7091_v17 = vmul.f32 %v20024_v52, %v7055_v29  ;;  %v7157_v62 = vld [vmem:[#allocation2 + $0x101] sm:$0xff]  ;;  %v7363_v51 = vmul.f32 %v20029_v38, %v7055_v29  ;;  %10659 = vmatprep.mubr.msk.f32.mxu1 %vm20262_vm1, %v20261_v8  ;;  %10705 = vmatpush3.msk.msra.mxu1 %vm20263_vm8, %v17085_v63  ;;  %12133 = vrcp.f32 %v7723_v1  ;;  %v17221_v59 = vmul.f32 0.70710677, %v17208_v19  ;;  %v7501_v29 = vld [vmem:[#allocation2 + $0x112] sm:$0xff]  ;;  %vm20266_vm1 = vmmov %vm20258_vm5 }
 0xbb4   : > { %v7193_v1 = vmul.f32 %v20015_v20, %v7157_v62  ;;  %v7465_v26 = vmul.f32 %v20033_v50, %v7157_v62  ;;  %vm20267_vm8 = vmmov %vm20266_vm1  ;;  %v20268_v62 = vld [vmem:[#allocation130_spill] sm:$0xff] }
 0xbb5   : > { %v7123_v28 = vsel %vm17166_vm6, %v7091_v17, 0.0  ;;  %v7395_v34 = vsel %vm17119_vm14, %v7363_v51, 0.0  ;;  %v17227_v11 = vld [vmem:[#allocation2 + $0x108] sm:$0xff]  ;;  %v7661_v49 = vand.u32 2147483647, %v17221_v59  ;;  %v7329_v24 = vld [vmem:[#allocation2 + $0x110] sm:$0xff]  ;;  %vm20269_vm14 = vmmov %vm20265_vm9 }
 0xbb6   : > { %v7227_v8 = vld [vmem:[#allocation2 + $0x102] sm:$0xff]  ;;  %v7155_v63 = vadd.f32 %v7123_v28, %v7053_v16  ;;  %v17234_v57 = vld [vmem:[#allocation2 + $0x10a] sm:$0xff]  ;;  %10660 = vmatmul.mubr.msk.f32.gmra.mrb[16].mxu1 %vm20265_vm9, %v20264_v3  ;;  %v7427_v17 = vadd.f32 %v7395_v34, %v7325_v35  ;;  %v7365_v16 = vmul.f32 %v20029_v38, %v7329_v24  ;;  %v8107_v35 = vsub.f32 0.0, %v17188_v12 }
 0xbb7   : > { %v17232_v40 = vld [vmem:[#allocation2 + $0x109] sm:$0xff]  ;;  %8501 = vst.msk [vmem:[#allocation2 + $0x100] sm:$0xff] %vm20258_vm5, %v20240_v43  ;;  %v7263_v51 = vmul.f32 %v20020_v48, %v7227_v8  ;;  %v7535_v28 = vmul.f32 %v17149_v6, %v7227_v8  ;;  %10662 = vmatprep.mubr.msk.f32.mxu1 %vm20269_vm14, %v20268_v62  ;;  %v7693_v46 = vmul.f32 0.3275911, %v7661_v49  ;;  %v7467_v3 = vmul.f32 %v20033_v50, %v7431_v18  ;;  %vm20271_vm5 = vmmov %vm20265_vm9 }
 0xbb8   : > { %8502 = vst.msk [vmem:[#allocation2 + $0x108] sm:$0xff] %vm20266_vm1, %v20240_v43  ;;  %v7225_v39 = vadd.f32 %v7193_v1, %v7155_v63  ;;  %v7497_v14 = vadd.f32 %v7465_v26, %v7427_v17  ;;  %v7397_v8 = vsel %vm17166_vm6, %v7365_v16, 0.0  ;;  %vm20273_vm9 = vmmov %vm20271_vm5  ;;  %v7537_v26 = vmul.f32 %v17149_v6, %v7501_v29  ;;  %v20275_v17 = vld [vmem:[#allocation210_spill] sm:$0xff]  ;;  %v20279_v16 = vld [vmem:[#allocation29_spill] sm:$0xff] }
 0xbb9   : > { %8503 = vst.msk [vmem:[#allocation2 + $0x110] sm:$0xff] %vm20267_vm8, %v20240_v43  ;;  %v7725_v34 = vadd.f32 1.0, %v7693_v46  ;;  %v20274_v46 = vld [vmem:[#allocation20_spill] sm:$0xff]  ;;  %vm20276_vm14 = vmmov %vm20271_vm5  ;;  %vm20340_vm6 = vcmask 31744  }
 0xbba   : > { %v7327_v24 = vadd.f32 %v7263_v51, %v7225_v39  ;;  %10663 = vmatmul.mubr.msk.f32.gmra.mrb[18].mxu1 %vm20271_vm5, %v20270_v27  ;;  %v17255_v31 = vadd.f32 %v7535_v28, %v7497_v14  ;;  %v8139_v27 = vmul.f32 %v8107_v35, %v17188_v12  ;;  %v20277_v51 = vld [vmem:[#allocation90_spill] sm:$0xff]  ;;  %vm20278_vm1 = vmmov %vm20271_vm5  ;;  %v20280_v35 = vld [vmem:[#allocation132_spill] sm:$0xff] }
 0xbbb   : > { %10665 = vmatprep.mubr.msk.f32.mxu1 %vm20273_vm9, %v20272_v53  ;;  %12135 = vrcp.f32 %v7725_v34  ;;  %vm20281_vm8 = vmmov %vm20278_vm1 }
 0xbbc   : > { %v7429_v63 = vadd.f32 %v7397_v8, %v7327_v24  ;;  %5229 = vrot.lane.b32.xlu0 %v20274_v46, %s12438_s19  ;;  %v17263_v39 = vmul.f32 0.70710677, %v17255_v31  ;;  %v8195_v34 = vmul.f32 1.442695, %v8139_v27  ;;  %v8109_v24 = vsub.f32 0.0, %v7661_v49  ;;  %vm20283_vm5 = vmmov %vm20278_vm1  ;;  %v20284_v46 = vld [vmem:[#allocation31_spill] sm:$0xff] }
 0xbbd   : > { %v12134_v18 = vpop.eup %12133  ;;  %vm20286_vm9 = vmmov %vm20278_vm1 }
 0xbbe   : > { %v7499_v1 = vadd.f32 %v7467_v3, %v7429_v63  ;;  %10666 = vmatmul.mubr.msk.f32.gmra.mrb[20].mxu1 %vm20276_vm14, %v20275_v17  ;;  %v7819_v14 = vmul.f32 1.0614054, %v12134_v18  ;;  %v7663_v53 = vand.u32 2147483647, %v17263_v39  ;;  %v20282_v63 = vld [vmem:[#allocation95_spill] sm:$0xff]  ;;  %vm20288_vm14 = vmmov %vm20278_vm1 }
 0xbbf   : > { %10668 = vmatprep.mubr.msk.f32.mxu1 %vm20278_vm1, %v20277_v51 }
 0xbc0   : > { %v17271_v29 = vadd.f32 %v7537_v26, %v7499_v1  ;;  %5243 = vrot.lane.b32.xlu0 %v20279_v16, %s12438_s19  ;;  %v10016_v28 = vadd.f32 -1.4531521, %v7819_v14  ;;  %v7695_v62 = vmul.f32 0.3275911, %v7663_v53  ;;  %v6108_v1 = vadd.s32 200, %v20003_v37  ;;  %v20285_v16 = vld [vmem:[#allocation92_spill] sm:$0xff] }
 0xbc1   : > { %v8141_v14 = vmul.f32 %v8109_v24, %v7661_v49  ;;  %v8111_v49 = vsub.f32 0.0, %v7663_v53  ;;  %v7256_v24 = vmul.f32 %v20020_v48, %v16514_v32 }
 0xbc2   : > { %v17276_v12 = vmul.f32 0.70710677, %v17271_v29  ;;  %10669 = vmatmul.mubr.msk.f32.gmra.mrb[22].mxu1 %vm20281_vm8, %v20280_v35  ;;  %v7883_v3 = vmul.f32 %v12134_v18, %v10016_v28  ;;  %v7727_v8 = vadd.f32 1.0, %v7695_v62  ;;  %v20287_v35 = vld [vmem:[#allocation98_spill] sm:$0xff]  ;;  %vm20292_vm8 = vmmov %vm20278_vm1 }
 0xbc3   : > { %10671 = vmatprep.mubr.msk.f32.mxu1 %vm20283_vm5, %v20282_v63  ;;  %v8199_v55 = vmul.f32 1.442695, %v8141_v14  ;;  %v6920_v14 = vmul.f32 %v20018_v5, %v16514_v32  ;;  %v8143_v23 = vmul.f32 %v8111_v49, %v7663_v53  ;;  %v20298_v32 = vld [vmem:[#allocation224_spill] sm:$0xff]  ;;  %v20303_v49 = vld [vmem:[#allocation37_spill] sm:$0xff] }
 0xbc4   : > { %v7665_v26 = vand.u32 2147483647, %v17276_v12  ;;  %5247 = vrot.lane.b32.xlu0 %v20284_v46, %s12438_s19  ;;  %v7915_v27 = vadd.f32 1.4214138, %v7883_v3  ;;  %12137 = vrcp.f32 %v7727_v8  ;;  %v20289_v46 = vld [vmem:[#allocation33_spill] sm:$0xff]  ;;  %v6294_v3 = vand.u32 15, %v6108_v1 }
 0xbc5   : > { %v17286_v17 = vpop.eup %12135  ;;  %12139 = vpow2.f32 %v8195_v34  ;;  %v20290_v34 = vld [vmem:[#allocation219_spill] sm:$0xff]  ;;  %v7186_v1 = vmul.f32 %v20015_v20, %v16508_v15 }
 0xbc6   : > { %v7697_v51 = vmul.f32 0.3275911, %v7665_v26  ;;  %10672 = vmatmul.mubr.msk.f32.gmra.mrb[24].mxu1 %vm20286_vm9, %v20285_v16  ;;  %v7947_v28 = vmul.f32 %v12134_v18, %v7915_v27  ;;  %v7821_v62 = vmul.f32 1.0614054, %v17286_v17  ;;  %vm17308_vm5 = vcmp.ne.s32.totalorder %v6294_v3, 15  ;;  %vm20299_vm9 = vmmov %vm20278_vm1 }
 0xbc7   : > { %10674 = vmatprep.mubr.msk.f32.mxu1 %vm20288_vm14, %v20287_v35  ;;  %v20291_v35 = vld [vmem:[#allocation227_spill] sm:$0xff]  ;;  %v7288_v3 = vsel %vm16747_vm0, %v7256_v24, 0.0  ;;  %v8113_v44 = vsub.f32 0.0, %v7665_v26  ;;  %vm20302_vm14 = vmmov %vm20278_vm1 }
 0xbc8   : > { %v7729_v63 = vadd.f32 1.0, %v7697_v51  ;;  %5251 = vrot.lane.b32.xlu0 %v20289_v46, %s12438_s19  ;;  %v10048_v8 = vadd.f32 -0.28449672, %v7947_v28  ;;  %v10018_v36 = vadd.f32 -1.4531521, %v7821_v62  ;;  %v20293_v51 = vld [vmem:[#allocation35_spill] sm:$0xff] }
 0xbc9   : > { %v20294_v28 = vmov 0  ;;  %v20296_v62 = vld [vmem:[#allocation78_spill] sm:$0xff] }
 0xbca   : > { %12141 = vrcp.f32 %v7729_v63  ;;  %10675 = vmatmul.mubr.msk.f32.gmra.mrb[26].mxu1 %vm20278_vm1, %v20290_v34  ;;  %v8011_v27 = vmul.f32 %v12134_v18, %v10048_v8  ;;  %v7885_v16 = vmul.f32 %v17286_v17, %v10018_v36  ;;  %v20295_v28 = vsel %vm17308_vm5, 4294967295, %v20294_v28  ;;  %v20297_v34 = vld [vmem:[#allocation55_spill] sm:$0xff] }
 0xbcb   : > { %10677 = vmatprep.mubr.msk.f32.mxu1 %vm20292_vm8, %v20291_v35  ;;  %v6624_v63 = vmul.f32 %v20007_v47, %v20296_v62  ;;  %v6820_v36 = vmul.f32 %v20014_v10, %v16508_v15  ;;  %v7218_v35 = vadd.f32 %v7186_v1, %v20297_v34  ;;  %12143 = vpow2.f32 %v8199_v55  ;;  %v20304_v34 = vld [vmem:[#allocation101_spill] sm:$0xff]  ;;  %vm20306_vm8 = vmmov %vm20278_vm1 }
 0xbcc   : > { %5255 = vrot.lane.b32.xlu0 %v20293_v51, %s12438_s19  ;;  %v8043_v46 = vadd.f32 0.2548296, %v8011_v27  ;;  %v7917_v8 = vadd.f32 1.4214138, %v7885_v16  ;;  %v20300_v51 = vld [vmem:[#allocation54_spill] sm:$0xff]  ;;  %v7016_v15 = vsel %vm17308_vm5, %v6920_v14, 0.0  ;;  %v7086_v14 = vmul.f32 %v20024_v52, %v17113_v25 }
 0xbcd   : > { %v6852_v27 = vadd.f32 %v6820_v36, %v6624_v63  ;;  %v7320_v1 = vadd.f32 %v7288_v3, %v7218_v35  ;;  %v20305_v63 = vld [vmem:[#allocation105_spill] sm:$0xff]  ;;  %v7460_v35 = vmul.f32 %v20033_v50, %v17115_v22  ;;  %v6626_v3 = vmul.f32 %v20007_v47, %v17113_v25 }
 0xbce   : > { %10678 = vmatmul.mubr.msk.f32.gmra.mrb[28].mxu1 %vm20299_vm9, %v20298_v32  ;;  %v17321_v0 = vpop.eup %12137  ;;  %v8075_v33 = vmul.f32 %v12134_v18, %v8043_v46  ;;  %v7949_v62 = vmul.f32 %v17286_v17, %v7917_v8  ;;  %v7358_v18 = vmul.f32 %v20029_v38, %v17113_v25  ;;  %v8203_v8 = vmul.f32 1.442695, %v8143_v23  ;;  %v20307_v23 = vld [vmem:[#allocation39_spill] sm:$0xff] }
 0xbcf   : > { %10680 = vmatprep.mubr.msk.f32.mxu1 %vm20302_vm14, %v20301_v9  ;;  %v12140_v55 = vpop.eup %12139  ;;  %v7823_v53 = vmul.f32 1.0614054, %v17321_v0  ;;  %v7048_v9 = vadd.f32 %v7016_v15, %v6852_v27  ;;  %vm8299_vm9 = vcmp.lt.f32.partialorder %v17178_v56, 0.0  ;;  %v20308_v27 = vld [vmem:[#allocation235_spill] sm:$0xff]  ;;  %vm20309_vm14 = vmmov %vm20278_vm1 }
 0xbd0   : > { %5259 = vrot.lane.b32.xlu0 %v20303_v49, %s12438_s19  ;;  %v8235_v24 = vmul.f32 %v12140_v55, %v8075_v33  ;;  %v10050_v16 = vadd.f32 -0.28449672, %v7949_v62  ;;  %v8145_v49 = vmul.f32 %v8113_v44, %v7665_v26  ;;  %v6822_v62 = vmul.f32 %v20014_v10, %v17115_v22 }
 0xbd1   : > { %v10020_v46 = vadd.f32 -1.4531521, %v7823_v53  ;;  %v7422_v55 = vadd.f32 %v7358_v18, %v7320_v1  ;;  %12145 = vpow2.f32 %v8203_v8  ;;  %v20311_v18 = vld [vmem:[#allocation41_spill] sm:$0xff]  ;;  %v7188_v8 = vmul.f32 %v20015_v20, %v17115_v22 }
 0xbd2   : > { %10681 = vmatmul.mubr.msk.f32.gmra.mrb[30].mxu1 %vm20278_vm1, %v20304_v34  ;;  %v8267_v32 = vsub.f32 1.0, %v8235_v24  ;;  %v8013_v61 = vmul.f32 %v17286_v17, %v10050_v16  ;;  %v7150_v24 = vadd.f32 %v7086_v14, %v7048_v9  ;;  %v8207_v34 = vmul.f32 1.442695, %v8145_v49 }
 0xbd3   : > { %10683 = vmatprep.mubr.msk.f32.mxu1 %vm20306_vm8, %v20305_v63  ;;  %v7887_v36 = vmul.f32 %v17321_v0, %v10020_v46  ;;  %v20310_v63 = vld [vmem:[#allocation133_spill] sm:$0xff]  ;;  %v6110_v14 = vadd.s32 216, %v20003_v37  ;;  %vm20313_vm8 = vmmov %vm20278_vm1 }
 0xbd4   : > { %v17340_v33 = vpop.eup %12141  ;;  %5263 = vrot.lane.b32.xlu0 %v20307_v23, %s12438_s19  ;;  %v8331_v44 = vsub.f32 0.0, %v8267_v32  ;;  %v8045_v26 = vadd.f32 0.2548296, %v8013_v61  ;;  %v8395_v23 = vmul.f32 0.5, %v17164_v2  ;;  %v7492_v2 = vadd.f32 %v7460_v35, %v7422_v55 }
 0xbd5   : > { %v7825_v15 = vmul.f32 1.0614054, %v17340_v33  ;;  %v7919_v53 = vadd.f32 1.4214138, %v7887_v36  ;;  %v12144_v61 = vpop.eup %12143  ;;  %12147 = vpow2.f32 %v8207_v34  ;;  %v6308_v22 = vand.u32 15, %v6110_v14 }
 0xbd6   : > { %10684 = vmatmul.mubr.msk.f32.gmra.mrb[32].mxu1 %vm20309_vm14, %v20308_v27  ;;  %v8363_v16 = vsel %vm8299_vm9, %v8331_v44, %v8267_v32  ;;  %v8077_v46 = vmul.f32 %v17286_v17, %v8045_v26  ;;  %v6854_v32 = vadd.f32 %v6822_v62, %v6626_v3  ;;  %v20312_v44 = vld [vmem:[#allocation107_spill] sm:$0xff]  ;;  %v7220_v26 = vadd.f32 %v7188_v8, %v7150_v24  ;;  %v20314_v27 = vld [vmem:[#allocation136_spill] sm:$0xff]  ;;  %vm20315_vm9 = vmmov %vm20278_vm1 }
 0xbd7   : > { %v10022_v25 = vadd.f32 -1.4531521, %v7825_v15  ;;  %10686 = vmatprep.mubr.msk.f32.mxu1 %vm20278_vm1, %v20310_v63  ;;  %v8427_v1 = vadd.f32 1.0, %v8363_v16  ;;  %v7951_v56 = vmul.f32 %v17321_v0, %v7919_v53  ;;  %vm20316_vm14 = vcmask 130048   ;;  %v20317_v3 = vld [vmem:[#allocation43_spill] sm:$0xff] }
 0xbd8   : > { %5267 = vrot.lane.b32.xlu0 %v20311_v18, %s12438_s19  ;;  %v8237_v9 = vmul.f32 %v12144_v61, %v8077_v46  ;;  %v7530_v62 = vmul.f32 %v17149_v6, %v17123_v42  ;;  %v7258_v35 = vmul.f32 %v20020_v48, %v17123_v42  ;;  %v6922_v55 = vmul.f32 %v20018_v5, %v17123_v42  ;;  %v20320_v63 = vld [vmem:[#allocation135_spill] sm:$0xff] }
 0xbd9   : > { %v7889_v17 = vmul.f32 %v17340_v33, %v10022_v25  ;;  %v8459_v49 = vmul.f32 %v8427_v1, %v8395_v23  ;;  %v10052_v36 = vadd.f32 -0.28449672, %v7951_v56  ;;  %vm8301_vm1 = vcmp.lt.f32.partialorder %v17221_v59, 0.0  ;;  %v20321_v56 = vld [vmem:[#allocation137_spill] sm:$0xff] }
 0xbda   : > { %10687 = vmatmul.mubr.msk.f32.gmra.mrb[34].mxu1 %vm20313_vm8, %v20312_v44  ;;  %v8269_v15 = vsub.f32 1.0, %v8237_v9  ;;  %vm17382_vm8 = vcmp.ne.s32.totalorder %v6308_v22, 15  ;;  %v20318_v25 = vmov 0  ;;  %v7562_v61 = vsel %vm16747_vm0, %v7530_v62, 0.0  ;;  %v20324_v22 = vld [vmem:[#allocation52_spill] sm:$0xff]  ;;  %v20326_v62 = vld [vmem:[#allocation139_spill] sm:$0xff] }
 0xbdb   : > { %v7921_v53 = vadd.f32 1.4214138, %v7889_v17  ;;  %10689 = vmatprep.mubr.msk.f32.mxu1 %vm20315_vm9, %v20314_v27  ;;  %8530 = vst.msk [vmem:[#allocation2 + $0xd1] sm:$0xff] %vm20316_vm14, %v8459_v49  ;;  %v8015_v16 = vmul.f32 %v17321_v0, %v10052_v36  ;;  %v20319_v25 = vsel %vm17382_vm8, 4294967295, %v20318_v25  ;;  %v7290_v23 = vsel %vm17308_vm5, %v7258_v35, 0.0  ;;  %vm20322_vm14 = vmmov %vm20315_vm9  ;;  %v12146_v9 = vpop.eup %12145  ;;  %v20323_v36 = vld [vmem:[#allocation45_spill] sm:$0xff] }
 0xbdc   : > { %5271 = vrot.lane.b32.xlu0 %v20317_v3, %s12438_s19  ;;  %v8333_v24 = vsub.f32 0.0, %v8269_v15  ;;  %v7018_v42 = vsel %vm17382_vm8, %v6922_v55, 0.0  ;;  %v17396_v18 = vadd.f32 %v7562_v61, %v7492_v2  ;;  %v7322_v8 = vadd.f32 %v7290_v23, %v7220_v26 }
 0xbdd   : > { %v7953_v46 = vmul.f32 %v17340_v33, %v7921_v53  ;;  %v8047_v34 = vadd.f32 0.2548296, %v8015_v16  ;;  %v8397_v17 = vmul.f32 0.5, %v17208_v19  ;;  %v7360_v44 = vmul.f32 %v20029_v38, %v17157_v4 }
 0xbde   : > { %10690 = vmatmul.mubr.msk.f32.gmra.mrb[36].mxu1 %vm20315_vm9, %v20320_v63  ;;  %v8365_v59 = vsel %vm8301_vm1, %v8333_v24, %v8269_v15  ;;  %v17406_v53 = vmul.f32 0.70710677, %v17396_v18  ;;  %v7462_v2 = vmul.f32 %v20033_v50, %v17159_v41  ;;  %v7050_v26 = vadd.f32 %v7018_v42, %v6854_v32  ;;  %vm20325_vm1 = vmmov %vm20315_vm9 }
 0xbdf   : > { %v10054_v1 = vadd.f32 -0.28449672, %v7953_v46  ;;  %10692 = vmatprep.mubr.msk.f32.mxu1 %vm20322_vm14, %v20321_v56  ;;  %v8429_v14 = vadd.f32 1.0, %v8365_v59  ;;  %v8079_v49 = vmul.f32 %v17321_v0, %v8047_v34  ;;  %v7424_v0 = vadd.f32 %v7360_v44, %v7322_v8  ;;  %vm20327_vm9 = vmmov %vm20325_vm1  ;;  %v12148_v63 = vpop.eup %12147 }
 0xbe0   : > { %5275 = vrot.lane.b32.xlu0 %v20323_v36, %s12438_s19  ;;  %v7088_v16 = vmul.f32 %v20024_v52, %v17157_v4  ;;  %v17417_v35 = vand.u32 2147483647, %v17406_v53  ;;  %v7190_v55 = vmul.f32 %v20015_v20, %v17159_v41  ;;  %vm20328_vm14 = vcmask 130048  }
 0xbe1   : > { %v8017_v15 = vmul.f32 %v17340_v33, %v10054_v1  ;;  %v8461_v27 = vmul.f32 %v8429_v14, %v8397_v17  ;;  %v8239_v19 = vmul.f32 %v12146_v9, %v8079_v49  ;;  %v7494_v24 = vadd.f32 %v7462_v2, %v7424_v0  ;;  %v20329_v1 = vld [vmem:[#allocation138_spill] sm:$0xff]  ;;  %v20330_v17 = vld [vmem:[#allocation141_spill] sm:$0xff] }
 0xbe2   : > { %10693 = vmatmul.mubr.msk.f32.gmra.mrb[38].mxu1 %vm20325_vm1, %v20324_v22  ;;  %v7532_v46 = vmul.f32 %v17149_v6, %v17162_v58  ;;  %v7152_v34 = vadd.f32 %v7088_v16, %v7050_v26  ;;  %v7690_v23 = vmul.f32 0.3275911, %v17417_v35  ;;  %v7260_v42 = vmul.f32 %v20020_v48, %v17162_v58 }
 0xbe3   : > { %v8049_v3 = vadd.f32 0.2548296, %v8017_v15  ;;  %10695 = vmatprep.mubr.msk.f32.mxu1 %vm20327_vm9, %v20326_v62  ;;  %8532 = vst.msk [vmem:[#allocation2 + $0xe1] sm:$0xff] %vm20328_vm14, %v8461_v27  ;;  %v8271_v32 = vsub.f32 1.0, %v8239_v19  ;;  %v6112_v8 = vadd.s32 232, %v20003_v37  ;;  %vm8303_vm9 = vcmp.lt.f32.partialorder %v17263_v39, 0.0  ;;  %vm20331_vm14 = vmmov %vm20325_vm1 }
 0xbe4   : > { %5279 = vrot.lane.b32.xlu0 %v20224_v13, %s12438_s19  ;;  %v7564_v13 = vsel %vm17308_vm5, %v7532_v46, 0.0  ;;  %v7222_v56 = vadd.f32 %v7190_v55, %v7152_v34  ;;  %v7292_v36 = vsel %vm17382_vm8, %v7260_v42, 0.0  ;;  %v7362_v44 = vmul.f32 %v20029_v38, %v17200_v60  ;;  %v20332_v27 = vld [vmem:[#allocation140_spill] sm:$0xff]  ;;  %v20339_v34 = vld [vmem:[#allocation143_spill] sm:$0xff]  ;;  %v20341_v42 = vld [vmem:[#allocation97_spill] sm:$0xff] }
 0xbe5   : > { %v8081_v61 = vmul.f32 %v17340_v33, %v8049_v3  ;;  %v8335_v59 = vsub.f32 0.0, %v8271_v32  ;;  %v7722_v33 = vadd.f32 1.0, %v7690_v23  ;;  %v17438_v14 = vadd.f32 %v7564_v13, %v7494_v24  ;;  %v20333_v3 = vld [vmem:[#allocation53_spill] sm:$0xff] }
 0xbe6   : > { %10696 = vmatmul.mubr.msk.f32.gmra.mrb[40].mxu1 %vm20325_vm1, %v20329_v1  ;;  %v8399_v2 = vmul.f32 0.5, %v17255_v31  ;;  %v8401_v26 = vmul.f32 0.5, %v17271_v29  ;;  %v6322_v22 = vand.u32 15, %v6112_v8  ;;  %v6628_v31 = vmul.f32 %v20007_v47, %v17157_v4 }
 0xbe7   : > { %v8241_v9 = vmul.f32 %v12148_v63, %v8081_v61  ;;  %10698 = vmatprep.mubr.msk.f32.mxu1 %vm20331_vm14, %v20330_v17  ;;  %v8367_v49 = vsel %vm8303_vm9, %v8335_v59, %v8271_v32  ;;  %12149 = vrcp.f32 %v7722_v33  ;;  %v17451_v19 = vmul.f32 0.70710677, %v17438_v14  ;;  %vm20334_vm14 = vmmov %vm20325_vm1  ;;  %v20344_v33 = vld [vmem:[#allocation236_spill] sm:$0xff] }
 0xbe8   : > { %5283 = vrot.lane.b32.xlu0 %v20225_v21, %s12438_s19  ;;  %v8431_v39 = vadd.f32 1.0, %v8367_v49  ;;  %v7324_v21 = vadd.f32 %v7292_v36, %v7222_v56  ;;  %vm8305_vm9 = vcmp.lt.f32.partialorder %v17276_v12, 0.0  ;;  %v7464_v55 = vmul.f32 %v20033_v50, %v17203_v45 }
 0xbe9   : > { %v8273_v15 = vsub.f32 1.0, %v8241_v9  ;;  %v17461_v29 = vand.u32 2147483647, %v17451_v19  ;;  %v7534_v12 = vmul.f32 %v17149_v6, %v17206_v30  ;;  %v20336_v24 = vmov 0 }
 0xbea   : > { %10699 = vmatmul.mubr.msk.f32.gmra.mrb[42].mxu1 %vm20325_vm1, %v20332_v27  ;;  %v8463_v16 = vmul.f32 %v8431_v39, %v8399_v2  ;;  %v7426_v62 = vadd.f32 %v7362_v44, %v7324_v21  ;;  %vm20335_vm1 = vcmask 130048   ;;  %v6924_v4 = vmul.f32 %v20018_v5, %v17162_v58 }
 0xbeb   : > { %v8337_v0 = vsub.f32 0.0, %v8273_v15  ;;  %10701 = vmatprep.mubr.msk.f32.mxu1 %vm20334_vm14, %v20333_v3  ;;  %vm17468_vm14 = vcmp.ne.s32.totalorder %v6322_v22, 15  ;;  %v8106_v63 = vsub.f32 0.0, %v17417_v35  ;;  %v7692_v61 = vmul.f32 0.3275911, %v17461_v29 }
 0xbec   : > { %5287 = vrot.lane.b32.xlu0 %v20226_v7, %s12438_s19  ;;  %8534 = vst.msk [vmem:[#allocation2 + $0xf1] sm:$0xff] %vm20335_vm1, %v8463_v16  ;;  %v20337_v24 = vsel %vm17468_vm14, 4294967295, %v20336_v24  ;;  %v6824_v7 = vmul.f32 %v20014_v10, %v17159_v41  ;;  %v7496_v23 = vadd.f32 %v7464_v55, %v7426_v62  ;;  %v7566_v59 = vsel %vm17382_vm8, %v7534_v12, 0.0  ;;  %v20348_v16 = vld [vmem:[#allocation103_spill] sm:$0xff]  ;;  %v20349_v12 = vld [vmem:[#allocation220_spill] sm:$0xff]  ;;  %s12439_s19 = smov [#allocation13]  }
 0xbed   : > { %v8369_v32 = vsel %vm8305_vm9, %v8337_v0, %v8273_v15  ;;  %20338 = vst [vmem:[#allocation181_spill] sm:$0xff] %v20337_v24  ;;  %vm20342_vm9 = vmmov %vm20340_vm6  ;;  %v7020_v41 = vsel %vm17468_vm14, %v6924_v4, 0.0  ;;  %v7090_v58 = vmul.f32 %v20024_v52, %v17200_v60  ;;  %v7724_v56 = vadd.f32 1.0, %v7692_v61  ;;  %v20346_v15 = vld [vmem:[#allocation216_spill] sm:$0xff]  ;;  %s12340_s17 = sshll.u32 %s12439_s19, 4  ;;  %s12341_s17 = int_to_ptr.vmem [resolvable:$false] %s12340_s17 }
 0xbee   : > { %v8433_v46 = vadd.f32 1.0, %v8369_v32  ;;  %10702 = vmatmul.mubr.msk.f32.gmra.mrb[44].mxu1 %vm20340_vm6, %v20339_v34  ;;  %v6856_v1 = vadd.f32 %v6824_v7, %v6628_v31  ;;  %v17488_v8 = vadd.f32 %v7566_v59, %v7496_v23  ;;  %v7262_v17 = vmul.f32 %v20020_v48, %v17206_v30  ;;  %vm20343_vm6 = vmmov %vm20335_vm1  ;;  %s12342_s13 = scalar_lea.vmem %s12341_s17, 8192  ;;  %p12343_p6 = scmp.lt.s32.totalorder %s18695_s1, %s12341_s17 }
 0xbef   : > { %10706 = vmatprep.mubr.msk.f32.mxu1 %vm20342_vm9, %v20341_v42  ;;  %vm20345_vm1 = vmmov %vm20342_vm9  ;;  %v8138_v49 = vmul.f32 %v8106_v63, %v17417_v35  ;;  %12151 = vrcp.f32 %v7724_v56  ;;  %v7192_v39 = vmul.f32 %v20015_v20, %v17203_v45  ;;  %v7364_v22 = vmul.f32 %v20029_v38, %v17227_v11  ;;  %p12344_p3 = scmp.lt.s32.totalorder %s12342_s13, %s12336_s22 }
 0xbf0   : > { %v8465_v13 = vmul.f32 %v8433_v46, %v8401_v26  ;;  %v7052_v9 = vadd.f32 %v7020_v41, %v6856_v1  ;;  %v17497_v36 = vmul.f32 0.70710677, %v17488_v8  ;;  %vm20347_vm9 = vmmov %vm20345_vm1  ;;  %v7294_v35 = vsel %vm17468_vm14, %v7262_v17, 0.0  ;;  %v20355_v1 = vld [vmem:[#allocation221_spill] sm:$0xff] }
 0xbf1   : > { %v17499_v44 = vpop.eup %12149  ;;  %v6114_v0 = vadd.s32 248, %v20003_v37  ;;  %v8193_v31 = vmul.f32 1.442695, %v8138_v49  ;;  %v6630_v55 = vmul.f32 %v20007_v47, %v17200_v60  ;;  %v6826_v4 = vmul.f32 %v20014_v10, %v17203_v45  ;;  %v20354_v45 = vld [vmem:[#allocation218_spill] sm:$0xff]  ;;  %p12345_p11 = por %p12344_p3, %p12343_p6 }
 0xbf2   : > { %8536 = vst.msk [vmem:[#allocation2 + $0x101] sm:$0xff] %vm20343_vm6, %v8465_v13  ;;  %10707 = vmatmul.mubr.msk.f32.vlgmr.msra.gmra.mrb[14].mxu1 %vm20345_vm1, %v20344_v33  ;;  %v7154_v2 = vadd.f32 %v7090_v58, %v7052_v9  ;;  %v7818_v26 = vmul.f32 1.0614054, %v17499_v44  ;;  %v17507_v27 = vand.u32 2147483647, %v17497_v36  ;;  %vm19194_vm6 = vcmask 123904  }
 0xbf3   : > { %10709 = vmatprep.mubr.msk.f32.mxu1 %vm20347_vm9, %v20346_v15  ;;  %6017 = vst.msk [vmem:[#allocation2 + $0x120] sm:$0x3] %vm19194_vm6, %v20240_v43  ;;  %vm20350_vm9 = vmmov %vm20345_vm1  ;;  %v6336_v7 = vand.u32 15, %v6114_v0  ;;  %v6926_v46 = vmul.f32 %v20018_v5, %v17206_v30  ;;  %v8108_v63 = vsub.f32 0.0, %v17461_v29  ;;  %v7536_v23 = vmul.f32 %v17149_v6, %v17234_v57  ;;  %p12346_p4 = pnand %p12345_p11, %p12339_p13 }
 0xbf4   : > { %v7224_v21 = vadd.f32 %v7192_v39, %v7154_v2  ;;  %v10015_v3 = vadd.f32 -1.4531521, %v7818_v26  ;;  %v7694_v62 = vmul.f32 0.3275911, %v17507_v27  ;;  %v7466_v60 = vmul.f32 %v20033_v50, %v17232_v40  ;;  %vm20356_vm6 = vmmov %vm20350_vm9  ;;  %v20357_v2 = vld [vmem:[#allocation223_spill] sm:$0xff] }
 0xbf5   : > { %v20351_v42 = vmov 0  ;;  %v6858_v10 = vadd.f32 %v6826_v4, %v6630_v55  ;;  %v7092_v59 = vmul.f32 %v20024_v52, %v17227_v11  ;;  %v8140_v9 = vmul.f32 %v8108_v63, %v17461_v29  ;;  %v7330_v52 = vld [vmem:[#allocation2 + $0x118] sm:$0xff]  ;;  %v20360_v29 = vld [vmem:[#allocation114_spill] sm:$0xff] }
 0xbf6   : > { %10710 = vmatmul.mubr.msk.f32.gmra.mrb[16].mxu1 %vm20345_vm1, %v20348_v16  ;;  %v7326_v32 = vadd.f32 %v7294_v35, %v7224_v21  ;;  %v7882_v34 = vmul.f32 %v17499_v44, %v10015_v3  ;;  %v7726_v61 = vadd.f32 1.0, %v7694_v62  ;;  %vm17533_vm1 = vcmp.ne.s32.totalorder %v6336_v7, 15  ;;  %v20362_v55 = vld [vmem:[#allocation228_spill] sm:$0xff]  ;;  %v20364_v7 = vld [vmem:[#allocation230_spill] sm:$0xff] }
 0xbf7   : > { %10712 = vmatprep.mubr.msk.f32.mxu1 %vm20350_vm9, %v20349_v12  ;;  %v20352_v42 = vsel %vm17533_vm1, 4294967295, %v20351_v42  ;;  %v7022_v30 = vsel %vm17533_vm1, %v6926_v46, 0.0  ;;  %v7568_v17 = vsel %vm17468_vm14, %v7536_v23, 0.0  ;;  %vm20359_vm8 = vcmask 123904   ;;  %vm20361_vm14 = vmmov %vm20356_vm6 }
 0xbf8   : > { %v7428_v47 = vadd.f32 %v7364_v22, %v7326_v32  ;;  %20353 = vst [vmem:[#allocation180_spill] sm:$0xff] %v20352_v42  ;;  %v7914_v5 = vadd.f32 1.4214138, %v7882_v34  ;;  %12153 = vrcp.f32 %v7726_v61  ;;  %v7054_v58 = vadd.f32 %v7022_v30, %v6858_v10  ;;  %v17582_v61 = vld [vmem:[#allocation10 + $0x8] sm:$0xff] }
 0xbf9   : > { %12155 = vpow2.f32 %v8193_v31  ;;  %v17545_v13 = vpop.eup %12151  ;;  %v8197_v0 = vmul.f32 1.442695, %v8140_v9  ;;  %v8110_v16 = vsub.f32 0.0, %v17507_v27  ;;  %v7194_v3 = vmul.f32 %v20015_v20, %v17232_v40  ;;  %v20372_v9 = vld [vmem:[#allocation229_spill] sm:$0xff] }
 0xbfa   : > { %10713 = vmatmul.mubr.msk.f32.gmra.mrb[18].mxu1 %vm20350_vm9, %v20354_v45  ;;  %v7498_v41 = vadd.f32 %v7466_v60, %v7428_v47  ;;  %v7946_v56 = vmul.f32 %v17499_v44, %v7914_v5  ;;  %v7820_v33 = vmul.f32 1.0614054, %v17545_v13  ;;  %v7432_v11 = vld [vmem:[#allocation2 + $0x119] sm:$0xff]  ;;  %v7156_v26 = vadd.f32 %v7092_v59, %v7054_v58 }
 0xbfb   : > { %10715 = vmatprep.mubr.msk.f32.mxu1 %vm20356_vm6, %v20355_v1  ;;  %v7502_v15 = vld [vmem:[#allocation2 + $0x11a] sm:$0xff]  ;;  %vm20358_vm9 = vcmask 130048   ;;  %12157 = vpow2.f32 %v8197_v0  ;;  %v8142_v34 = vmul.f32 %v8110_v16, %v17507_v27  ;;  %v7366_v45 = vmul.f32 %v20029_v38, %v7330_v52  ;;  %v20374_v52 = vld [vmem:[#allocation118_spill] sm:$0xff] }
 0xbfc   : > { %v17552_v49 = vadd.f32 %v7568_v17, %v7498_v41  ;;  %v10047_v39 = vadd.f32 -0.28449672, %v7946_v56  ;;  %8504 = vst.msk [vmem:[#allocation2 + $0x118] sm:$0xff] %vm20358_vm9, %v20240_v43  ;;  %v10017_v35 = vadd.f32 -1.4531521, %v7820_v33  ;;  %v7226_v32 = vadd.f32 %v7194_v3, %v7156_v26  ;;  %v20366_v60 = vld [vmem:[#allocation113_spill] sm:$0xff] }
 0xbfd   : > { %8505 = vst.msk [vmem:[#allocation2 + $0x120] sm:$0x3] %vm20359_vm8, %v20240_v43  ;;  %v7264_v43 = vmul.f32 %v20020_v48, %v17234_v57  ;;  %vm20363_vm8 = vmmov %vm20356_vm6  ;;  %vm20367_vm9 = vcmask 1043456   ;;  %v20368_v5 = vld [vmem:[#allocation116_spill] sm:$0xff]  ;;  %v8201_v41 = vmul.f32 1.442695, %v8142_v34  ;;  %v7468_v33 = vmul.f32 %v20033_v50, %v7432_v11 }
 0xbfe   : > { %10716 = vmatmul.mubr.msk.f32.gmra.mrb[20].mxu1 %vm20356_vm6, %v20357_v2  ;;  %v17563_v21 = vmul.f32 0.70710677, %v17552_v49  ;;  %v8010_v22 = vmul.f32 %v17499_v44, %v10047_v39  ;;  %v7884_v31 = vmul.f32 %v17545_v13, %v10017_v35  ;;  %10804 = vmatprep.subr.msk.mxu1 %vm20367_vm9, %v17582_v61  ;;  %v7538_v26 = vmul.f32 %v17149_v6, %v7502_v15  ;;  %v20377_v11 = vld [vmem:[#allocation120_spill] sm:$0xff] }
 0xbff   : > { %10718 = vmatprep.mubr.msk.f32.mxu1 %vm20361_vm14, %v20360_v29  ;;  %vm20365_vm14 = vmmov %vm20356_vm6  ;;  %v7296_v47 = vsel %vm17533_vm1, %v7264_v43, 0.0  ;;  %v8394_v35 = vmul.f32 0.5, %v17396_v18 }
 0xc00   : > { %v17571_v62 = vand.u32 2147483647, %v17563_v21  ;;  %v8042_v12 = vadd.f32 0.2548296, %v8010_v22  ;;  %v7916_v4 = vadd.f32 1.4214138, %v7884_v31  ;;  %v7328_v27 = vadd.f32 %v7296_v47, %v7226_v32 }
 0xc01   : > { %v20375_v31 = vld [vmem:[#allocation115_spill] sm:$0xff]  ;;  %v7570_v6 = vsel %vm17533_vm1, %v7538_v26, 0.0  ;;  %v20394_v26 = vld [vmem:[#allocation146_spill] sm:$0xff] }
 0xc02   : > { %10719 = vmatmul.mubr.msk.f32.gmra.mrb[22].mxu1 %vm20363_vm8, %v20362_v55  ;;  %v7696_v46 = vmul.f32 0.3275911, %v17571_v62  ;;  %v12154_v20 = vpop.eup %12153  ;;  %v8074_v40 = vmul.f32 %v17499_v44, %v8042_v12  ;;  %v7948_v48 = vmul.f32 %v17545_v13, %v7916_v4  ;;  %v5583_v44 = vrot.slane %v17582_v61, 4  ;;  %vm20369_vm8 = vmmov %vm20356_vm6  ;;  %v20380_v12 = vld [vmem:[#allocation117_spill] sm:$0xff] }
 0xc03   : > { %10721 = vmatprep.mubr.msk.f32.mxu1 %vm20365_vm14, %v20364_v7  ;;  %v12156_v63 = vpop.eup %12155  ;;  %v7822_v57 = vmul.f32 1.0614054, %v12154_v20  ;;  %vm20370_vm14 = vmmov %vm20367_vm9  ;;  %v7430_v17 = vadd.f32 %v7366_v45, %v7328_v27  ;;  %v20382_v7 = vld [vmem:[#allocation122_spill] sm:$0xff] }
 0xc04   : > { %v7728_v23 = vadd.f32 1.0, %v7696_v46  ;;  %v8234_v10 = vmul.f32 %v12156_v63, %v8074_v40  ;;  %10805 = vmatpush3.msk.msra.mxu1 %vm20370_vm14, %v17582_v61  ;;  %v10049_v30 = vadd.f32 -0.28449672, %v7948_v48  ;;  %vm8298_vm14 = vcmp.lt.f32.partialorder %v17406_v53, 0.0  ;;  %v20454_v61 = vld [vmem:[#allocation155_spill] sm:$0xff] }
 0xc05   : > { %v10019_v59 = vadd.f32 -1.4531521, %v7822_v57  ;;  %v12158_v3 = vpop.eup %12157  ;;  %v7500_v50 = vadd.f32 %v7468_v33, %v7430_v17  ;;  %v20383_v57 = vld [vmem:[#allocation119_spill] sm:$0xff] }
 0xc06   : > { %10722 = vmatmul.mubr.msk.f32.gmra.mrb[24].mxu1 %vm20356_vm6, %v20366_v60  ;;  %12159 = vrcp.f32 %v7728_v23  ;;  %vm20371_vm6 = vmmov %vm20367_vm9  ;;  %v8266_v1 = vsub.f32 1.0, %v8234_v10  ;;  %v8012_v58 = vmul.f32 %v17545_v13, %v10049_v30  ;;  %v8396_v23 = vmul.f32 0.5, %v17438_v14  ;;  %v20385_v10 = vld [vmem:[#allocation144_spill] sm:$0xff]  ;;  %v17633_v30 = vpop.permute.xlu1 %5231 }
 0xc07   : > { %10724 = vmatprep.mubr.msk.f32.mxu1 %vm20369_vm8, %v20368_v5  ;;  %10904 = vmatprep.subr.msk.mxu1 %vm20371_vm6, %v5583_v44  ;;  %v7886_v56 = vmul.f32 %v12154_v20, %v10019_v59  ;;  %vm20373_vm9 = vmmov %vm20369_vm8  ;;  %12161 = vpow2.f32 %v8201_v41  ;;  %v17619_v32 = vadd.f32 %v7570_v6, %v7500_v50 }
 0xc08   : > { %v8330_v38 = vsub.f32 0.0, %v8266_v1  ;;  %v8044_v2 = vadd.f32 0.2548296, %v8012_v58  ;;  %vm20376_vm6 = vmmov %vm20369_vm8  ;;  %v20390_v58 = vld [vmem:[#allocation145_spill] sm:$0xff] }
 0xc09   : > { %v7918_v39 = vadd.f32 1.4214138, %v7886_v56  ;;  %v17628_v60 = vmul.f32 0.70710677, %v17619_v32  ;;  %vm20393_vm1 = vmmov %vm20376_vm6 }
 0xc0a   : > { %10725 = vmatmul.mubr.msk.f32.gmra.mrb[26].mxu1 %vm20373_vm9, %v20372_v9  ;;  %v8362_v29 = vsel %vm8298_vm14, %v8330_v38, %v8266_v1  ;;  %v8076_v0 = vmul.f32 %v17545_v13, %v8044_v2  ;;  %vm20378_vm9 = vmmov %vm20376_vm6  ;;  %v20392_v38 = vld [vmem:[#allocation147_spill] sm:$0xff]  ;;  %v5234_v17 = vpop.permute.xlu1 %5233  ;;  %v8398_v2 = vmul.f32 0.5, %v17488_v8 }
 0xc0b   : > { %10727 = vmatprep.mubr.msk.f32.mxu1 %vm20369_vm8, %v20374_v52  ;;  %v8426_v22 = vadd.f32 1.0, %v8362_v29  ;;  %v7950_v16 = vmul.f32 %v12154_v20, %v7918_v39  ;;  %vm20379_vm8 = vcmask 130048   ;;  %vm20381_vm14 = vmmov %vm20376_vm6  ;;  %v7666_v14 = vand.u32 2147483647, %v17628_v60 }
 0xc0c   : > { %v8236_v43 = vmul.f32 %v12158_v3, %v8076_v0 }
 0xc0d   : > { %v8458_v53 = vmul.f32 %v8426_v22, %v8394_v35  ;;  %v10051_v55 = vadd.f32 -0.28449672, %v7950_v16  ;;  %v7698_v9 = vmul.f32 0.3275911, %v7666_v14  ;;  %v8114_v50 = vsub.f32 0.0, %v7666_v14 }
 0xc0e   : > { %10728 = vmatmul.mubr.msk.f32.gmra.mrb[28].mxu1 %vm20376_vm6, %v20375_v31  ;;  %v8268_v18 = vsub.f32 1.0, %v8236_v43  ;;  %v5236_v22 = vpop.permute.xlu1 %5235 }
 0xc0f   : > { %10730 = vmatprep.mubr.msk.f32.mxu1 %vm20378_vm9, %v20377_v11  ;;  %8529 = vst.msk [vmem:[#allocation2 + $0xc9] sm:$0xff] %vm20379_vm8, %v8458_v53  ;;  %v8014_v13 = vmul.f32 %v12154_v20, %v10051_v55  ;;  %vm8300_vm9 = vcmp.lt.f32.partialorder %v17451_v19, 0.0  ;;  %vm20384_vm8 = vmmov %vm20376_vm6  ;;  %v8112_v19 = vsub.f32 0.0, %v17571_v62  ;;  %v8146_v6 = vmul.f32 %v8114_v50, %v7666_v14 }
 0xc10   : > { %v12160_v15 = vpop.eup %12159  ;;  %v8332_v4 = vsub.f32 0.0, %v8268_v18 }
 0xc11   : > { %v8046_v46 = vadd.f32 0.2548296, %v8014_v13  ;;  %v7824_v40 = vmul.f32 1.0614054, %v12160_v15  ;;  %v12162_v48 = vpop.eup %12161  ;;  %v8144_v41 = vmul.f32 %v8112_v19, %v17571_v62  ;;  %v7730_v62 = vadd.f32 1.0, %v7698_v9 }
 0xc12   : > { %10731 = vmatmul.mubr.msk.f32.gmra.mrb[30].mxu1 %vm20381_vm14, %v20380_v12  ;;  %v8364_v34 = vsel %vm8300_vm9, %v8332_v4, %v8268_v18  ;;  %vm20386_vm14 = vmmov %vm20376_vm6  ;;  %vm20388_vm9 = vcmask 130048   ;;  %v5238_v16 = vpop.permute.xlu1 %5237 }
 0xc13   : > { %10733 = vmatprep.mubr.msk.f32.mxu1 %vm20376_vm6, %v20382_v7  ;;  %v8078_v63 = vmul.f32 %v12154_v20, %v8046_v46  ;;  %v8428_v47 = vadd.f32 1.0, %v8364_v34  ;;  %v10021_v5 = vadd.f32 -1.4531521, %v7824_v40  ;;  %v20387_v20 = vld [vmem:[#allocation56_spill] sm:$0xff]  ;;  %v8205_v39 = vmul.f32 1.442695, %v8144_v41 }
 0xc14   : > { %v8209_v46 = vmul.f32 1.442695, %v8146_v6  ;;  %v8400_v34 = vmul.f32 0.5, %v17552_v49 }
 0xc15   : > { %v8238_v27 = vmul.f32 %v12162_v48, %v8078_v63  ;;  %v8460_v45 = vmul.f32 %v8428_v47, %v8396_v23  ;;  %v7888_v1 = vmul.f32 %v12160_v15, %v10021_v5  ;;  %12163 = vpow2.f32 %v8205_v39 }
 0xc16   : > { %10734 = vmatmul.mubr.msk.f32.gmra.mrb[32].mxu1 %vm20384_vm8, %v20383_v57  ;;  %vm20389_vm8 = vmmov %vm20376_vm6  ;;  %12165 = vrcp.f32 %v7730_v62  ;;  %v5240_v43 = vpop.permute.xlu1 %5239 }
 0xc17   : > { %10736 = vmatprep.mubr.msk.f32.mxu1 %vm20386_vm14, %v20385_v10  ;;  %8531 = vst.msk [vmem:[#allocation2 + $0xd9] sm:$0xff] %vm20388_vm9, %v8460_v45  ;;  %v8270_v59 = vsub.f32 1.0, %v8238_v27  ;;  %vm20391_vm14 = vmmov %vm20376_vm6  ;;  %v7920_v52 = vadd.f32 1.4214138, %v7888_v1 }
 0xc18   : > { %vm20395_vm9 = vmmov %vm20393_vm1 }
 0xc19   : > { %v8334_v56 = vsub.f32 0.0, %v8270_v59  ;;  %v7952_v35 = vmul.f32 %v12160_v15, %v7920_v52 }
 0xc1a   : > { %10737 = vmatmul.mubr.msk.f32.gmra.mrb[34].mxu1 %vm20376_vm6, %v20387_v20  ;;  %vm8302_vm6 = vcmp.lt.f32.partialorder %v17497_v36, 0.0  ;;  %v5242_v48 = vpop.permute.xlu1 %5241 }
 0xc1b   : > { %10739 = vmatprep.mubr.msk.f32.mxu1 %vm20389_vm8, %v16844_v54  ;;  %v8366_v33 = vsel %vm8302_vm6, %v8334_v56, %v8270_v59  ;;  %vm20396_vm8 = vcmask 130048   ;;  %v10053_v0 = vadd.f32 -0.28449672, %v7952_v35  ;;  %vm20399_vm6 = vmmov %vm20395_vm9 }
 0xc1c   : > { %v8430_v54 = vadd.f32 1.0, %v8366_v33 }
 0xc1d   : > { %v8016_v36 = vmul.f32 %v12160_v15, %v10053_v0 }
 0xc1e   : > { %10740 = vmatmul.mubr.msk.f32.gmra.mrb[36].mxu1 %vm20391_vm14, %v20390_v58  ;;  %v8462_v29 = vmul.f32 %v8430_v54, %v8398_v2  ;;  %vm20397_vm14 = vmmov %vm20396_vm8  ;;  %v5246_v5 = vpop.permute.xlu1 %5245  ;;  %v8402_v2 = vmul.f32 0.5, %v17619_v32 }
 0xc1f   : > { %10742 = vmatprep.mubr.msk.f32.mxu1 %vm20393_vm1, %v20392_v38  ;;  %v8048_v3 = vadd.f32 0.2548296, %v8016_v36  ;;  %v12164_v8 = vpop.eup %12163  ;;  %vm8304_vm1 = vcmp.lt.f32.partialorder %v17563_v21, 0.0  ;;  %v20398_v21 = vld [vmem:[#allocation179_spill] sm:$0xff] }
 0xc20   : > { %8533 = vst.msk [vmem:[#allocation2 + $0xe9] sm:$0xff] %vm20396_vm8, %v8462_v29  ;;  %v12166_v11 = vpop.eup %12165  ;;  %vm20401_vm8 = vmmov %vm20399_vm6 }
 0xc21   : > { %v8080_v31 = vmul.f32 %v12160_v15, %v8048_v3  ;;  %v7826_v13 = vmul.f32 1.0614054, %v12166_v11 }
 0xc22   : > { %10743 = vmatmul.mubr.msk.f32.gmra.mrb[38].mxu1 %vm20395_vm9, %v20394_v26  ;;  %vm20400_vm9 = vmmov %vm20399_vm6  ;;  %v5250_v41 = vpop.permute.xlu1 %5249 }
 0xc23   : > { %v8240_v53 = vmul.f32 %v12164_v8, %v8080_v31  ;;  %v10023_v7 = vadd.f32 -1.4531521, %v7826_v13 }
 0xc25   : > { %v8272_v55 = vsub.f32 1.0, %v8240_v53  ;;  %v7890_v63 = vmul.f32 %v12166_v11, %v10023_v7  ;;  %v20436_v7 = vld [vmem:[#allocation149_spill] sm:$0xff] }
 0xc26   : > { %v5254_v33 = vpop.permute.xlu1 %5253 }
 0xc27   : > { %v8336_v12 = vsub.f32 0.0, %v8272_v55  ;;  %v7922_v23 = vadd.f32 1.4214138, %v7890_v63  ;;  %v20448_v63 = vld [vmem:[#allocation152_spill] sm:$0xff] }
 0xc29   : > { %v8368_v4 = vsel %vm8304_vm1, %v8336_v12, %v8272_v55  ;;  %v7954_v10 = vmul.f32 %v12166_v11, %v7922_v23  ;;  %vm20402_vm1 = vmmov %vm20399_vm6  ;;  %v20458_v23 = vld [vmem:[#allocation157_spill] sm:$0xff] }
 0xc2a   : > { %v8432_v15 = vadd.f32 1.0, %v8368_v4  ;;  %vm20404_vm5 = vmmov %vm20402_vm1  ;;  %v5258_v26 = vpop.permute.xlu1 %5257  ;;  %v20438_v4 = vld [vmem:[#allocation148_spill] sm:$0xff] }
 0xc2b   : > { %v10055_v27 = vadd.f32 -0.28449672, %v7954_v10  ;;  %vm20409_vm0 = vmmov %vm20404_vm5  ;;  %v20462_v10 = vld [vmem:[#allocation159_spill] sm:$0xff] }
 0xc2c   : > { %v8464_v57 = vmul.f32 %v8432_v15, %v8400_v34  ;;  %vm20412_vm4 = vmmov %vm20409_vm0  ;;  %v20445_v34 = vld [vmem:[#allocation151_spill] sm:$0xff]  ;;  %v20446_v15 = vld [vmem:[#allocation150_spill] sm:$0xff] }
 0xc2d   : > { %v8018_v20 = vmul.f32 %v12166_v11, %v10055_v27  ;;  %vm20415_vm10 = vmmov %vm20409_vm0  ;;  %v20463_v27 = vld [vmem:[#allocation160_spill] sm:$0xff] }
 0xc2e   : > { %8535 = vst.msk [vmem:[#allocation2 + $0xf9] sm:$0xff] %vm20397_vm14, %v8464_v57  ;;  %vm20403_vm14 = vmmov %vm20402_vm1  ;;  %v20452_v57 = vld [vmem:[#allocation154_spill] sm:$0xff] }
 0xc2f   : > { %v8050_v49 = vadd.f32 0.2548296, %v8018_v20  ;;  %v20473_v20 = vld [vmem:[#allocation165_spill] sm:$0xff] }
 0xc31   : > { %v8082_v59 = vmul.f32 %v12166_v11, %v8050_v49  ;;  %v20477_v49 = vld [vmem:[#allocation167_spill] sm:$0xff] }
 0xc33   : > { %v5224_v18 = vpop.xlane.xlu0 %5223 }
 0xc34   : > { %12167 = vrcp.f32 %v5224_v18 }
 0xc35   : > { %12169 = vpow2.f32 %v8209_v46  ;;  %v20440_v46 = vld [vmem:[#allocation58_spill] sm:$0xff] }
 0xc37   : > { %v5230_v40 = vpop.permute.xlu0 %5229 }
 0xc3b   : > { %v5244_v47 = vpop.permute.xlu0 %5243 }
 0xc3e   : > { %v12168_v45 = vpop.eup %12167 }
 0xc3f   : > { %v5226_v19 = vmul.f32 %v12168_v45, %v20398_v21  ;;  %v5248_v14 = vpop.permute.xlu0 %5247  ;;  %v12170_v1 = vpop.eup %12169  ;;  %v20465_v45 = vld [vmem:[#allocation161_spill] sm:$0xff]  ;;  %v20469_v21 = vld [vmem:[#allocation163_spill] sm:$0xff] }
 0xc40   : > { %v8242_v58 = vmul.f32 %v12170_v1, %v8082_v59  ;;  %v20479_v59 = vld [vmem:[#allocation168_spill] sm:$0xff]  ;;  %v20480_v1 = vld [vmem:[#allocation169_spill] sm:$0xff] }
 0xc41   : > { %10854 = vmatprep.subr.msk.mxu0 %vm20399_vm6, %v5226_v19  ;;  %vm8306_vm6 = vcmp.lt.f32.partialorder %v17628_v60, 0.0  ;;  %v5262_v60 = vpop.permute.xlu1 %5261 }
 0xc42   : > { %10855 = vmatpush3.xpose.msk.msra.mxu0 %vm20400_vm9, %v5226_v19  ;;  %v8274_v9 = vsub.f32 1.0, %v8242_v58  ;;  %vm20405_vm9 = vmmov %vm20402_vm1  ;;  %v20471_v19 = vld [vmem:[#allocation164_spill] sm:$0xff]  ;;  %v20484_v58 = vld [vmem:[#allocation171_spill] sm:$0xff] }
 0xc43   : > { %v5252_v56 = vpop.permute.xlu0 %5251 }
 0xc44   : > { %v8338_v38 = vsub.f32 0.0, %v8274_v9 }
 0xc45   : > { %10857 = vmatmul.mubr.msk.f32.vlgmr.msra.gmra.mrb[122].mxu0 %vm20401_vm8, %v5230_v40  ;;  %vm20406_vm8 = vmmov %vm20402_vm1  ;;  %v5266_v62 = vpop.permute.xlu1 %5265  ;;  %v20443_v40 = vld [vmem:[#allocation57_spill] sm:$0xff] }
 0xc46   : > { %10859 = vmatprep.mubr.msk.f32.mxu0 %vm20402_vm1, %v17633_v30  ;;  %v8370_v52 = vsel %vm8306_vm6, %v8338_v38, %v8274_v9  ;;  %vm20407_vm1 = vcmask 130048   ;;  %vm20411_vm6 = vmmov %vm20409_vm0  ;;  %v20488_v9 = vld [vmem:[#allocation173_spill] sm:$0xff]  ;;  %v20490_v38 = vld [vmem:[#allocation59_spill] sm:$0xff] }
 0xc47   : > { %v8434_v54 = vadd.f32 1.0, %v8370_v52  ;;  %v5256_v39 = vpop.permute.xlu0 %5255  ;;  %v20494_v52 = vld [vmem:[#allocation174_spill] sm:$0xff] }
 0xc49   : > { %10860 = vmatmul.mubr.msk.f32.gmra.mrb[124].mxu0 %vm20403_vm14, %v5234_v17  ;;  %v8466_v30 = vmul.f32 %v8434_v54, %v8402_v2  ;;  %vm20408_vm14 = vmmov %vm20404_vm5  ;;  %v5270_v35 = vpop.permute.xlu1 %5269  ;;  %v20496_v2 = vld [vmem:[#allocation175_spill] sm:$0xff] }
 0xc4a   : > { %10862 = vmatprep.mubr.msk.f32.mxu0 %vm20404_vm5, %v5236_v22  ;;  %vm20410_vm5 = vmmov %vm20409_vm0 }
 0xc4b   : > { %8537 = vst.msk [vmem:[#allocation2 + $0x109] sm:$0xff] %vm20407_vm1, %v8466_v30  ;;  %v5260_v17 = vpop.permute.xlu0 %5259  ;;  %vm20416_vm1 = vmmov %vm20409_vm0 }
 0xc4d   : > { %10863 = vmatmul.mubr.msk.f32.gmra.mrb[126].mxu0 %vm20405_vm9, %v5238_v16  ;;  %vm20413_vm9 = vmmov %vm20409_vm0  ;;  %v5274_v0 = vpop.permute.xlu1 %5273 }
 0xc4e   : > { %10865 = vmatprep.mubr.msk.f32.mxu0 %vm20406_vm8, %v5240_v43  ;;  %vm20414_vm8 = vmmov %vm20409_vm0 }
 0xc4f   : > { %v5264_v32 = vpop.permute.xlu0 %5263 }
 0xc51   : > { %10866 = vmatmul.mubr.msk.f32.gmra.mrb[128].mxu0 %vm20408_vm14, %v5242_v48  ;;  %vm20417_vm14 = vmmov %vm20409_vm0  ;;  %v5278_v16 = vpop.permute.xlu1 %5277  ;;  %v20450_v48 = vld [vmem:[#allocation153_spill] sm:$0xff] }
 0xc52   : > { %10868 = vmatprep.mubr.msk.f32.mxu0 %vm20409_vm0, %v5244_v47  ;;  %v20460_v47 = vld [vmem:[#allocation158_spill] sm:$0xff] }
 0xc53   : > { %v5268_v29 = vpop.permute.xlu0 %5267 }
 0xc55   : > { %10869 = vmatmul.mubr.msk.f32.gmra.mrb[130].mxu0 %vm20410_vm5, %v5246_v5  ;;  %vm20418_vm5 = vmmov %vm20409_vm0  ;;  %v5282_v8 = vpop.permute.xlu1 %5281  ;;  %v20467_v5 = vld [vmem:[#allocation162_spill] sm:$0xff] }
 0xc56   : > { %10871 = vmatprep.mubr.msk.f32.mxu0 %vm20411_vm6, %v5248_v14  ;;  %vm20420_vm6 = vmmov %vm20409_vm0  ;;  %v20475_v14 = vld [vmem:[#allocation166_spill] sm:$0xff] }
 0xc57   : > { %v5272_v22 = vpop.permute.xlu0 %5271 }
 0xc59   : > { %10872 = vmatmul.mubr.msk.f32.gmra.mrb[132].mxu0 %vm20412_vm4, %v5250_v41  ;;  %vm20419_vm4 = vmmov %vm20409_vm0  ;;  %v5286_v53 = vpop.permute.xlu1 %5285  ;;  %v20482_v41 = vld [vmem:[#allocation170_spill] sm:$0xff] }
 0xc5a   : > { %10874 = vmatprep.mubr.msk.f32.mxu0 %vm20413_vm9, %v5252_v56  ;;  %vm20421_vm9 = vmmov %vm20409_vm0  ;;  %v20486_v56 = vld [vmem:[#allocation172_spill] sm:$0xff] }
 0xc5b   : > { %v5276_v36 = vpop.permute.xlu0 %5275 }
 0xc5d   : > { %10875 = vmatmul.mubr.msk.f32.gmra.mrb[134].mxu0 %vm20414_vm8, %v5254_v33  ;;  %vm20423_vm8 = vmmov %vm20409_vm0  ;;  %v5290_v18 = vpop.permute.xlu1 %5289  ;;  %v20492_v33 = vld [vmem:[#allocation60_spill] sm:$0xff] }
 0xc5e   : > { %10877 = vmatprep.mubr.msk.f32.mxu0 %vm20415_vm10, %v5256_v39  ;;  %vm20422_vm10 = vmmov %vm20409_vm0 }
 0xc5f   : > { %v5280_v3 = vpop.permute.xlu0 %5279 }
 0xc61   : > { %10878 = vmatmul.mubr.msk.f32.gmra.mrb[136].mxu0 %vm20416_vm1, %v5258_v26  ;;  %vm20424_vm1 = vmmov %vm20409_vm0 }
 0xc62   : > { %10880 = vmatprep.mubr.msk.f32.mxu0 %vm20409_vm0, %v5260_v17 }
 0xc63   : > { %v5284_v11 = vpop.permute.xlu0 %5283 }
 0xc65   : > { %10881 = vmatmul.mubr.msk.f32.gmra.mrb[138].mxu0 %vm20417_vm14, %v5262_v60  ;;  %vm20425_vm14 = vmmov %vm20409_vm0 }
 0xc66   : > { %10883 = vmatprep.mubr.msk.f32.mxu0 %vm20418_vm5, %v5264_v32  ;;  %vm20426_vm5 = vmmov %vm20409_vm0 }
 0xc67   : > { %v5288_v6 = vpop.permute.xlu0 %5287 }
 0xc69   : > { %10884 = vmatmul.mubr.msk.f32.gmra.mrb[140].mxu0 %vm20419_vm4, %v5266_v62  ;;  %vm20427_vm4 = vmmov %vm20409_vm0 }
 0xc6a   : > { %10886 = vmatprep.mubr.msk.f32.mxu0 %vm20420_vm6, %v5268_v29  ;;  %vm20428_vm6 = vmmov %vm20409_vm0 }
 0xc6d   : > { %10887 = vmatmul.mubr.msk.f32.gmra.mrb[142].mxu0 %vm20421_vm9, %v5270_v35  ;;  %vm20429_vm9 = vmmov %vm20409_vm0 }
 0xc6e   : > { %10889 = vmatprep.mubr.msk.f32.mxu0 %vm20422_vm10, %v5272_v22  ;;  %vm20430_vm10 = vmmov %vm20409_vm0 }
 0xc71   : > { %v10597_v31 = vpop.f32.mrb[8].mxu1  ;;  %10890 = vmatmul.mubr.msk.f32.gmra.mrb[144].mxu0 %vm20423_vm8, %v5274_v0  ;;  %vm20431_vm8 = vmmov %vm20409_vm0 }
 0xc72   : > { %v1603_v50 = vpop.f32.mrb[9].mxu1  ;;  %10892 = vmatprep.mubr.msk.f32.mxu0 %vm20424_vm1, %v5276_v36  ;;  %vm20432_vm1 = vmmov %vm20409_vm0 }
 0xc73   : > { %10745 = vmatprep.mubr.msk.f32.mxu1 %vm20409_vm0, %v1603_v50 }
 0xc74   : > { %10746 = vmatmul.mubr.msk.f32.gmra.mrb[40].mxu1 %vm20425_vm14, %v10597_v31  ;;  %vm20433_vm14 = vmmov %vm20409_vm0 }
 0xc75   : > { %10893 = vmatmul.mubr.msk.f32.gmra.mrb[146].mxu0 %vm20426_vm5, %v5278_v16  ;;  %vm20434_vm5 = vmmov %vm20409_vm0 }
 0xc76   : > { %10895 = vmatprep.mubr.msk.f32.mxu0 %vm20427_vm4, %v5280_v3  ;;  %vm20435_vm4 = vmmov %vm20409_vm0 }
 0xc79   : > { %10896 = vmatmul.mubr.msk.f32.gmra.mrb[148].mxu0 %vm20428_vm6, %v5282_v8  ;;  %vm20437_vm6 = vmmov %vm20409_vm0 }
 0xc7a   : > { %v10600_v43 = vpop.f32.mrb[10].mxu1  ;;  %10898 = vmatprep.mubr.msk.f32.mxu0 %vm20429_vm9, %v5284_v11  ;;  %vm20439_vm9 = vmmov %vm20409_vm0 }
 0xc7b   : > { %v1613_v55 = vpop.f32.mrb[11].mxu1 }
 0xc7c   : > { %10748 = vmatprep.mubr.msk.f32.mxu1 %vm20430_vm10, %v1613_v55  ;;  %vm20441_vm10 = vmmov %vm20409_vm0 }
 0xc7d   : > { %10749 = vmatmul.mubr.msk.f32.gmra.mrb[42].mxu1 %vm20431_vm8, %v10600_v43  ;;  %10899 = vmatmul.mubr.msk.f32.gmra.mrb[150].mxu0 %vm20432_vm1, %v5286_v53  ;;  %vm20442_vm8 = vcmask 1043456   ;;  %vm20444_vm1 = vmmov %vm20409_vm0 }
 0xc7e   : > { %10901 = vmatprep.mubr.msk.f32.mxu0 %vm20409_vm0, %v5288_v6 }
 0xc81   : > { %v10603_v13 = vpop.f32.mrb[12].mxu1  ;;  %10902 = vmatmul.mubr.msk.f32.gmra.mrb[152].mxu0 %vm20433_vm14, %v5290_v18  ;;  %vm20447_vm14 = vmmov %vm20409_vm0 }
 0xc82   : > { %v1623_v12 = vpop.f32.mrb[13].mxu1 }
 0xc83   : > { %10751 = vmatprep.mubr.msk.f32.mxu1 %vm20434_vm5, %v1623_v12  ;;  %vm20449_vm5 = vmmov %vm20409_vm0 }
 0xc84   : > { %10752 = vmatmul.mubr.msk.f32.gmra.mrb[44].mxu1 %vm20435_vm4, %v10603_v13  ;;  %vm20451_vm4 = vmmov %vm20409_vm0 }
 0xc85   : > { %10806 = vmatprep.mubr.msk.f32.mxu1 %vm20437_vm6, %v20436_v7  ;;  %vm20453_vm6 = vmmov %vm20409_vm0 }
 0xc88   : > { %10807 = vmatmul.mubr.msk.f32.vlgmr.msra.gmra.mrb[14].mxu1 %vm20439_vm9, %v20438_v4  ;;  %vm20455_vm9 = vmmov %vm20409_vm0 }
 0xc89   : > { %10809 = vmatprep.mubr.msk.f32.mxu1 %vm20441_vm10, %v20440_v46  ;;  %10905 = vmatpush3.msk.msra.mxu1 %vm20442_vm8, %v5583_v44  ;;  %v20456_v44 = vld [vmem:[#allocation156_spill] sm:$0xff]  ;;  %vm20457_vm10 = vmmov %vm20409_vm0 }
 0xc8a   : > { %vm20459_vm8 = vmmov %vm20409_vm0 }
 0xc8c   : > { %10810 = vmatmul.mubr.msk.f32.gmra.mrb[16].mxu1 %vm20444_vm1, %v20443_v40  ;;  %vm20461_vm1 = vmmov %vm20409_vm0 }
 0xc8d   : > { %10812 = vmatprep.mubr.msk.f32.mxu1 %vm20409_vm0, %v20445_v34 }
 0xc90   : > { %10813 = vmatmul.mubr.msk.f32.gmra.mrb[18].mxu1 %vm20447_vm14, %v20446_v15  ;;  %vm20464_vm14 = vmmov %vm20409_vm0 }
 0xc91   : > { %10815 = vmatprep.mubr.msk.f32.mxu1 %vm20449_vm5, %v20448_v63  ;;  %vm20466_vm5 = vmmov %vm20409_vm0  ;;  %v8467_v63 = vld [vmem:[#allocation11] sm:$0xff] }
 0xc94   : > { %10816 = vmatmul.mubr.msk.f32.gmra.mrb[20].mxu1 %vm20451_vm4, %v20450_v48  ;;  %vm20468_vm4 = vmmov %vm20409_vm0  ;;  %v20526_v48 = vsub.s32 0, %v20003_v37 }
 0xc95   : > { %10818 = vmatprep.mubr.msk.f32.mxu1 %vm20453_vm6, %v20452_v57  ;;  %vm20470_vm6 = vmmov %vm20409_vm0 }
 0xc96   : > { %v17799_v57 = vrot.slane %v8467_v63, %v20526_v48 }
 0xc98   : > { %10819 = vmatmul.mubr.msk.f32.gmra.mrb[22].mxu1 %vm20455_vm9, %v20454_v61  ;;  %vm20472_vm9 = vmmov %vm20409_vm0  ;;  %v8538_v61 = vld [vmem:[#allocation2] sm:$0xff] }
 0xc99   : > { %10821 = vmatprep.mubr.msk.f32.mxu1 %vm20457_vm10, %v20456_v44  ;;  %vm20474_vm10 = vmmov %vm20409_vm0  ;;  %v20527_v44 = vsub.s32 1, %v20003_v37 }
 0xc9c   : > { %10822 = vmatmul.mubr.msk.f32.gmra.mrb[24].mxu1 %vm20459_vm8, %v20458_v23  ;;  %vm20476_vm8 = vmmov %vm20409_vm0  ;;  %v17803_v23 = vrot.slane %v8467_v63, %v20527_v44 }
 0xc9d   : > { %10824 = vmatprep.mubr.msk.f32.mxu1 %vm20461_vm1, %v20460_v47  ;;  %vm20478_vm1 = vmmov %vm20409_vm0  ;;  %v8574_v47 = vmul.f32 %v17799_v57, %v8538_v61 }
 0xca0   : > { %10825 = vmatmul.mubr.msk.f32.gmra.mrb[26].mxu1 %vm20409_vm0, %v20462_v10  ;;  %v8670_v10 = vld [vmem:[#allocation2 + $0x1] sm:$0xff] }
 0xca1   : > { %10827 = vmatprep.mubr.msk.f32.mxu1 %vm20464_vm14, %v20463_v27  ;;  %vm20481_vm14 = vmmov %vm20409_vm0  ;;  %v20528_v27 = vsub.s32 2, %v20003_v37 }
 0xca4   : > { %10828 = vmatmul.mubr.msk.f32.gmra.mrb[28].mxu1 %vm20466_vm5, %v20465_v45  ;;  %vm20483_vm5 = vmmov %vm20409_vm0  ;;  %v17808_v45 = vrot.slane %v8467_v63, %v20528_v27 }
 0xca5   : > { %10830 = vmatprep.mubr.msk.f32.mxu1 %vm20468_vm4, %v20467_v5  ;;  %vm20485_vm4 = vmmov %vm20409_vm0  ;;  %v8706_v5 = vmul.f32 %v17803_v23, %v8670_v10  ;;  %v20537_v10 = vsub.s32 6, %v20003_v37 }
 0xca7   : > { %v17854_v27 = vrot.slane %v8467_v63, %v20537_v10 }
 0xca8   : > { %10831 = vmatmul.mubr.msk.f32.gmra.mrb[30].mxu1 %vm20470_vm6, %v20469_v21  ;;  %vm20487_vm6 = vmmov %vm20409_vm0  ;;  %v20529_v21 = vsub.s32 3, %v20003_v37 }
 0xca9   : > { %10833 = vmatprep.mubr.msk.f32.mxu1 %vm20472_vm9, %v20471_v19  ;;  %vm20489_vm9 = vmmov %vm20409_vm0 }
 0xcaa   : > { %v17813_v19 = vrot.slane %v8467_v63, %v20529_v21 }
 0xcac   : > { %10834 = vmatmul.mubr.msk.f32.gmra.mrb[32].mxu1 %vm20474_vm10, %v20473_v20  ;;  %vm20491_vm10 = vmmov %vm20409_vm0 }
 0xcad   : > { %10836 = vmatprep.mubr.msk.f32.mxu1 %vm20476_vm8, %v20475_v14  ;;  %vm20493_vm8 = vmmov %vm20409_vm0  ;;  %v8606_v14 = vsel %vm14575_vm11, %v8574_v47, 0.0 }
 0xcb0   : > { %10837 = vmatmul.mubr.msk.f32.gmra.mrb[34].mxu1 %vm20478_vm1, %v20477_v49  ;;  %vm20495_vm1 = vmmov %vm20409_vm0  ;;  %v8770_v49 = vld [vmem:[#allocation2 + $0x2] sm:$0xff] }
 0xcb1   : > { %10839 = vmatprep.mubr.msk.f32.mxu1 %vm20409_vm0, %v20479_v59  ;;  %v8540_v59 = vld [vmem:[#allocation2 + $0x10] sm:$0xff] }
 0xcb4   : > { %10840 = vmatmul.mubr.msk.f32.gmra.mrb[36].mxu1 %vm20481_vm14, %v20480_v1  ;;  %vm20497_vm14 = vmmov %vm20409_vm0  ;;  %v8539_v1 = vld [vmem:[#allocation2 + $0x8] sm:$0xff] }
 0xcb5   : > { %10842 = vmatprep.mubr.msk.f32.mxu1 %vm20483_vm5, %v20482_v41  ;;  %vm20498_vm5 = vmmov %vm20409_vm0  ;;  %v8671_v41 = vld [vmem:[#allocation2 + $0x9] sm:$0xff] }
 0xcb8   : > { %10843 = vmatmul.mubr.msk.f32.gmra.mrb[38].mxu1 %vm20485_vm4, %v20484_v58  ;;  %vm20499_vm4 = vmmov %vm20409_vm0  ;;  %v8771_v58 = vld [vmem:[#allocation2 + $0xa] sm:$0xff] }
 0xcb9   : > { %10845 = vmatprep.mubr.msk.f32.mxu1 %vm20487_vm6, %v20486_v56  ;;  %vm20500_vm6 = vmmov %vm20409_vm0  ;;  %v8738_v56 = vadd.f32 %v8706_v5, %v8606_v14  ;;  %v8542_v5 = vld [vmem:[#allocation2 + $0x20] sm:$0xff] }
 0xcbc   : > { %10846 = vmatmul.mubr.msk.f32.gmra.mrb[40].mxu1 %vm20489_vm9, %v20488_v9  ;;  %vm20501_vm9 = vmmov %vm20409_vm0  ;;  %v8806_v9 = vmul.f32 %v17808_v45, %v8770_v49  ;;  %v8676_v49 = vld [vmem:[#allocation2 + $0x31] sm:$0xff] }
 0xcbd   : > { %10848 = vmatprep.mubr.msk.f32.mxu1 %vm20491_vm10, %v20490_v38  ;;  %vm20502_vm10 = vmmov %vm20409_vm0  ;;  %v8908_v38 = vmul.f32 %v17813_v19, %v8540_v59 }
 0xcc0   : > { %10849 = vmatmul.mubr.msk.f32.gmra.mrb[42].mxu1 %vm20493_vm8, %v20492_v33  ;;  %vm20503_vm8 = vmmov %vm20409_vm0  ;;  %v8575_v33 = vmul.f32 %v17799_v57, %v8539_v1 }
 0xcc1   : > { %10851 = vmatprep.mubr.msk.f32.mxu1 %vm20495_vm1, %v20494_v52  ;;  %vm20504_vm1 = vmmov %vm20409_vm0  ;;  %v8707_v52 = vmul.f32 %v17803_v23, %v8671_v41 }
 0xcc4   : > { %10852 = vmatmul.mubr.msk.f32.gmra.mrb[44].mxu1 %vm20409_vm0, %v20496_v2  ;;  %v8807_v2 = vmul.f32 %v17808_v45, %v8771_v58 }
 0xd18   : > { %v10858_v54 = vpop.f32.mrb[122].mxu0 }
 0xd19   : > { %v5424_v39 = vpop.f32.mrb[123].mxu0 }
 0xd1a   : > { %10906 = vmatprep.mubr.msk.f32.mxu1 %vm20497_vm14, %v5424_v39  ;;  %vm20505_vm14 = vmmov %vm20409_vm0  ;;  %v8541_v39 = vld [vmem:[#allocation2 + $0x18] sm:$0xff] }
 0xd1b   : > { %10907 = vmatmul.mubr.msk.f32.vlgmr.msra.gmra.mrb[14].mxu1 %vm20498_vm5, %v10858_v54  ;;  %vm20506_vm5 = vmmov %vm20409_vm0  ;;  %v8870_v54 = vadd.f32 %v8806_v9, %v8738_v56  ;;  %v8678_v56 = vld [vmem:[#allocation2 + $0x41] sm:$0xff] }
 0xd1c   : > { %v10861_v30 = vpop.f32.mrb[124].mxu0 }
 0xd1d   : > { %v5434_v26 = vpop.f32.mrb[125].mxu0 }
 0xd1e   : > { %10909 = vmatprep.mubr.msk.f32.mxu1 %vm20499_vm4, %v5434_v26  ;;  %vm20507_vm4 = vmmov %vm20409_vm0  ;;  %v8576_v26 = vmul.f32 %v17799_v57, %v8540_v59 }
 0xd1f   : > { %10910 = vmatmul.mubr.msk.f32.gmra.mrb[16].mxu1 %vm20500_vm6, %v10861_v30  ;;  %vm20508_vm6 = vmmov %vm20409_vm0  ;;  %v8773_v30 = vld [vmem:[#allocation2 + $0x1a] sm:$0xff] }
 0xd20   : > { %v10864_v17 = vpop.f32.mrb[126].mxu0 }
 0xd21   : > { %v5444_v60 = vpop.f32.mrb[127].mxu0 }
 0xd22   : > { %10912 = vmatprep.mubr.msk.f32.mxu1 %vm20501_vm9, %v5444_v60  ;;  %vm20509_vm9 = vmmov %vm20409_vm0  ;;  %v8940_v60 = vsel %vm14575_vm11, %v8908_v38, 0.0 }
 0xd23   : > { %10913 = vmatmul.mubr.msk.f32.gmra.mrb[18].mxu1 %vm20502_vm10, %v10864_v17  ;;  %vm20510_vm10 = vmmov %vm20409_vm0  ;;  %v8672_v17 = vld [vmem:[#allocation2 + $0x11] sm:$0xff] }
 0xd24   : > { %v10867_v32 = vpop.f32.mrb[128].mxu0 }
 0xd25   : > { %v5454_v62 = vpop.f32.mrb[129].mxu0 }
 0xd26   : > { %10915 = vmatprep.mubr.msk.f32.mxu1 %vm20503_vm8, %v5454_v62  ;;  %vm20511_vm8 = vmmov %vm20409_vm0  ;;  %v8739_v62 = vadd.f32 %v8707_v52, %v8575_v33  ;;  %v17868_v33 = vld [vmem:[#allocation2 + $0x51] sm:$0xff] }
 0xd27   : > { %10916 = vmatmul.mubr.msk.f32.gmra.mrb[20].mxu1 %vm20504_vm1, %v10867_v32  ;;  %vm20512_vm1 = vmmov %vm20409_vm0  ;;  %v8673_v32 = vld [vmem:[#allocation2 + $0x19] sm:$0xff] }
 0xd28   : > { %v10870_v29 = vpop.f32.mrb[130].mxu0 }
 0xd29   : > { %v5464_v35 = vpop.f32.mrb[131].mxu0 }
 0xd2a   : > { %10918 = vmatprep.mubr.msk.f32.mxu1 %vm20409_vm0, %v5464_v35 }
 0xd2b   : > { %10919 = vmatmul.mubr.msk.f32.gmra.mrb[22].mxu1 %vm20505_vm14, %v10870_v29  ;;  %vm20513_vm14 = vmmov %vm20409_vm0  ;;  %v20531_v29 = vsub.s32 4, %v20003_v37 }
 0xd2c   : > { %v10873_v22 = vpop.f32.mrb[132].mxu0 }
 0xd2d   : > { %v5474_v0 = vpop.f32.mrb[133].mxu0  ;;  %v17827_v35 = vrot.slane %v8467_v63, %v20531_v29 }
 0xd2e   : > { %10921 = vmatprep.mubr.msk.f32.mxu1 %vm20506_vm5, %v5474_v0  ;;  %vm20514_vm5 = vmmov %vm20409_vm0  ;;  %v8839_v0 = vsel %vm14601_vm12, %v8807_v2, 0.0  ;;  %v8578_v2 = vmul.f32 %v17799_v57, %v8542_v5 }
 0xd2f   : > { %10922 = vmatmul.mubr.msk.f32.gmra.mrb[24].mxu1 %vm20507_vm4, %v10873_v22  ;;  %vm20515_vm4 = vmmov %vm20409_vm0  ;;  %v9011_v1 = vmul.f32 %v17827_v35, %v8673_v32  ;;  %v17969_v48 = vmul.f32 %v17827_v35, %v17868_v33 }
 0xd30   : > { %v10876_v36 = vpop.f32.mrb[134].mxu0 }
 0xd31   : > { %v5484_v16 = vpop.f32.mrb[135].mxu0 }
 0xd32   : > { %10924 = vmatprep.mubr.msk.f32.mxu1 %vm20508_vm6, %v5484_v16  ;;  %vm20516_vm6 = vmmov %vm20409_vm0  ;;  %v8909_v16 = vmul.f32 %v17813_v19, %v8541_v39 }
 0xd33   : > { %10925 = vmatmul.mubr.msk.f32.gmra.mrb[26].mxu1 %vm20509_vm9, %v10876_v36  ;;  %vm20517_vm9 = vmmov %vm20409_vm0  ;;  %v8809_v36 = vmul.f32 %v17808_v45, %v8773_v30 }
 0xd34   : > { %v10879_v3 = vpop.f32.mrb[136].mxu0 }
 0xd35   : > { %v5494_v31 = vpop.f32.mrb[137].mxu0  ;;  %v8841_v61 = vsel %vm14809_vm2, %v8809_v36, 0.0 }
 0xd36   : > { %10927 = vmatprep.mubr.msk.f32.mxu1 %vm20510_vm10, %v5494_v31  ;;  %vm20518_vm10 = vmmov %vm20409_vm0  ;;  %v8972_v31 = vadd.f32 %v8940_v60, %v8870_v54  ;;  %v8772_v54 = vld [vmem:[#allocation2 + $0x12] sm:$0xff]  ;;  %v17883_v60 = vmul.f32 %v17803_v23, %v8678_v56 }
 0xd37   : > { %10928 = vmatmul.mubr.msk.f32.gmra.mrb[28].mxu1 %vm20511_vm8, %v10879_v3  ;;  %vm20519_vm8 = vmmov %vm20409_vm0  ;;  %v8708_v3 = vmul.f32 %v17803_v23, %v8672_v17 }
 0xd38   : > { %v10882_v50 = vpop.f32.mrb[138].mxu0 }
 0xd39   : > { %v5504_v8 = vpop.f32.mrb[139].mxu0 }
 0xd3a   : > { %10930 = vmatprep.mubr.msk.f32.mxu1 %vm20512_vm1, %v5504_v8  ;;  %vm20520_vm1 = vmmov %vm20409_vm0  ;;  %v8709_v8 = vmul.f32 %v17803_v23, %v8673_v32  ;;  %v17886_v32 = vmul.f32 %v17827_v35, %v8678_v56 }
 0xd3b   : > { %10931 = vmatmul.mubr.msk.f32.gmra.mrb[30].mxu1 %vm20409_vm0, %v10882_v50  ;;  %v8577_v50 = vmul.f32 %v17799_v57, %v8541_v39  ;;  %v17872_v39 = vmul.f32 %v17803_v23, %v8676_v49 }
 0xd3c   : > { %v10885_v11 = vpop.f32.mrb[140].mxu0 }
 0xd3d   : > { %v5514_v53 = vpop.f32.mrb[141].mxu0  ;;  %v8741_v14 = vadd.f32 %v8709_v8, %v8577_v50  ;;  %v8774_v8 = vld [vmem:[#allocation2 + $0x22] sm:$0xff] }
 0xd3e   : > { %10933 = vmatprep.mubr.msk.f32.mxu1 %vm20513_vm14, %v5514_v53  ;;  %vm20521_vm14 = vmmov %vm20409_vm0  ;;  %v8608_v53 = vsel %vm14624_vm13, %v8576_v26, 0.0 }
 0xd3f   : > { %10934 = vmatmul.mubr.msk.f32.gmra.mrb[32].mxu1 %vm20514_vm5, %v10885_v11  ;;  %vm20522_vm5 = vmmov %vm20409_vm0  ;;  %v8740_v44 = vadd.f32 %v8708_v3, %v8608_v53  ;;  %v8873_v38 = vadd.f32 %v8841_v61, %v8741_v14  ;;  %v17898_v3 = vld [vmem:[#allocation11 + $0x8] ss:$0 sm:$0xff]  ;;  %v8808_v53 = vmul.f32 %v17808_v45, %v8772_v54  ;;  %v8610_v61 = vsel %vm14782_vm15, %v8578_v2, 0.0 }
 0xd40   : > { %v10888_v43 = vpop.f32.mrb[142].mxu0 }
 0xd41   : > { %v5524_v55 = vpop.f32.mrb[143].mxu0  ;;  %v8872_v2 = vadd.f32 %v8808_v53, %v8740_v44 }
 0xd42   : > { %10936 = vmatprep.mubr.msk.f32.mxu1 %vm20515_vm4, %v5524_v55  ;;  %vm20523_vm4 = vmmov %vm20409_vm0  ;;  %v20534_v55 = vsub.s32 7, %v20003_v37 }
 0xd43   : > { %10937 = vmatmul.mubr.msk.f32.gmra.mrb[34].mxu1 %vm20516_vm6, %v10888_v43  ;;  %vm20524_vm6 = vmmov %vm20409_vm0  ;;  %v8871_v43 = vadd.f32 %v8839_v0, %v8739_v62  ;;  %v8910_v0 = vmul.f32 %v17813_v19, %v8542_v5 }
 0xd44   : > { %v10891_v6 = vpop.f32.mrb[144].mxu0 }
 0xd45   : > { %v5534_v18 = vpop.f32.mrb[145].mxu0 }
 0xd46   : > { %10939 = vmatprep.mubr.msk.f32.mxu1 %vm20517_vm9, %v5534_v18  ;;  %vm20525_vm9 = vmmov %vm20409_vm0  ;;  %v8674_v18 = vld [vmem:[#allocation2 + $0x21] sm:$0xff] }
 0xd47   : > { %10940 = vmatmul.mubr.msk.f32.gmra.mrb[36].mxu1 %vm20518_vm10, %v10891_v6  ;;  %v17840_v6 = vrot.slane %v8467_v63, %v20534_v55  ;;  %v8710_v21 = vmul.f32 %v17803_v23, %v8674_v18  ;;  %v17860_v41 = vmul.f32 %v17827_v35, %v8674_v18  ;;  %v8544_v55 = vld [vmem:[#allocation2 + $0x30] sm:$0xff] }
 0xd48   : > { %v10894_v13 = vpop.f32.mrb[146].mxu0 }
 0xd49   : > { %v5544_v12 = vpop.f32.mrb[147].mxu0  ;;  %v17863_v58 = vmul.f32 %v17840_v6, %v8674_v18  ;;  %v17892_v36 = vmul.f32 %v17840_v6, %v8678_v56  ;;  %v8545_v56 = vld [vmem:[#allocation2 + $0x38] sm:$0xff] }
 0xd4a   : > { %10942 = vmatprep.mubr.msk.f32.mxu1 %vm20519_vm8, %v5544_v12  ;;  %v8775_v12 = vld [vmem:[#allocation2 + $0x2a] sm:$0xff]  ;;  %v8913_v22 = vmul.f32 %v17813_v19, %v8545_v56  ;;  %v9185_v20 = vmul.f32 %v17854_v27, %v8545_v56 }
 0xd4b   : > { %10943 = vmatmul.mubr.msk.f32.gmra.mrb[38].mxu1 %vm20520_vm1, %v10894_v13  ;;  %v9010_v13 = vmul.f32 %v17827_v35, %v8672_v17  ;;  %v8811_v59 = vmul.f32 %v17808_v45, %v8775_v12  ;;  %v17880_v17 = vmul.f32 %v17840_v6, %v8676_v49 }
 0xd4c   : > { %v10897_v7 = vpop.f32.mrb[148].mxu0 }
 0xd4d   : > { %v5554_v4 = vpop.f32.mrb[149].mxu0  ;;  %v8843_v29 = vsel %vm15041_vm7, %v8811_v59, 0.0  ;;  %v8810_v59 = vmul.f32 %v17808_v45, %v8774_v8 }
 0xd4e   : > { %10945 = vmatprep.mubr.msk.f32.mxu1 %vm20409_vm0, %v5554_v4 }
 0xd4f   : > { %10946 = vmatmul.mubr.msk.f32.gmra.mrb[40].mxu1 %vm20521_vm14, %v10897_v7  ;;  %v20535_v7 = vsub.s32 5, %v20003_v37 }
 0xd50   : > { %v10900_v46 = vpop.f32.mrb[150].mxu0 }
 0xd51   : > { %v5564_v40 = vpop.f32.mrb[151].mxu0  ;;  %v17845_v4 = vrot.slane %v8467_v63, %v20535_v7  ;;  %v17904_v7 = vmul.f32 %v17898_v3, %v8775_v12 }
 0xd52   : > { %10948 = vmatprep.mubr.msk.f32.mxu1 %vm20522_vm5, %v5564_v40  ;;  %v8675_v40 = vld [vmem:[#allocation2 + $0x29] sm:$0xff] }
 0xd53   : > { %10949 = vmatmul.mubr.msk.f32.gmra.mrb[42].mxu1 %vm20523_vm4, %v10900_v46  ;;  %v8543_v46 = vld [vmem:[#allocation2 + $0x28] sm:$0xff]  ;;  %v9081_v47 = vmul.f32 %v17845_v4, %v8773_v30  ;;  %v8711_v63 = vmul.f32 %v17803_v23, %v8675_v40  ;;  %v17875_v30 = vmul.f32 %v17827_v35, %v8676_v49  ;;  %v9083_v50 = vmul.f32 %v17845_v4, %v8775_v12 }
 0xd54   : > { %v10903_v34 = vpop.f32.mrb[152].mxu0  ;;  %v8579_v37 = vmul.f32 %v17799_v57, %v8543_v46  ;;  %v8911_v9 = vmul.f32 %v17813_v19, %v8543_v46  ;;  %v9013_v10 = vmul.f32 %v17827_v35, %v8675_v40  ;;  %v9285_v14 = vmul.f32 %v17840_v6, %v8675_v40 }
 0xd55   : > { %v5574_v15 = vpop.f32.mrb[153].mxu0  ;;  %v9113_v26 = vsel %vm14601_vm12, %v9081_v47, 0.0  ;;  %v9182_v49 = vmul.f32 %v17854_v27, %v8542_v5  ;;  %v8942_v12 = vsel %vm14624_vm13, %v8910_v0, 0.0  ;;  %v9387_v5 = vsel %vm14601_vm12, %v17904_v7, 0.0 }
 0xd56   : > { %10951 = vmatprep.mubr.msk.f32.mxu1 %vm20524_vm6, %v5574_v15  ;;  %v17847_v15 = vadd.f32 %v9010_v13, %v8972_v31  ;;  %v8743_v31 = vadd.f32 %v8711_v63, %v8579_v37  ;;  %v9183_v13 = vmul.f32 %v17854_v27, %v8543_v46  ;;  %v8677_v37 = vld [vmem:[#allocation2 + $0x39] sm:$0xff]  ;;  %v8912_v46 = vmul.f32 %v17813_v19, %v8544_v55 }
 0xd57   : > { %10952 = vmatmul.mubr.msk.f32.gmra.mrb[44].mxu1 %vm20525_vm9, %v10903_v34  ;;  %v8973_v34 = vadd.f32 %v8909_v16, %v8871_v43  ;;  %v17896_v16 = vmul.f32 %v17803_v23, %v17868_v33  ;;  %v8975_v43 = vadd.f32 %v8911_v9, %v8873_v38  ;;  %v8742_v63 = vadd.f32 %v8710_v21, %v8610_v61  ;;  %v8777_v9 = vld [vmem:[#allocation2 + $0x3a] sm:$0xff] }
 0xd58   : > { %v8875_v47 = vadd.f32 %v8843_v29, %v8743_v31  ;;  %v9214_v29 = vsel %vm14575_vm11, %v9182_v49, 0.0  ;;  %v8581_v21 = vmul.f32 %v17799_v57, %v8545_v56  ;;  %v8713_v0 = vmul.f32 %v17803_v23, %v8677_v37 }
 0xd59   : > { %v9043_v52 = vadd.f32 %v9011_v1, %v8973_v34  ;;  %v9080_v1 = vmul.f32 %v17845_v4, %v8772_v54  ;;  %v9045_v38 = vadd.f32 %v9013_v10, %v8975_v43  ;;  %v9082_v54 = vmul.f32 %v17845_v4, %v8774_v8  ;;  %v8546_v43 = vld [vmem:[#allocation2 + $0x40] sm:$0xff]  ;;  %v8776_v10 = vld [vmem:[#allocation2 + $0x32] sm:$0xff] }
 0xd5a   : > { %v8974_v31 = vadd.f32 %v8942_v12, %v8872_v2  ;;  %v8813_v53 = vmul.f32 %v17808_v45, %v8777_v9  ;;  %v8745_v2 = vadd.f32 %v8713_v0, %v8581_v21  ;;  %v8914_v24 = vmul.f32 %v17813_v19, %v8546_v43 }
 0xd5b   : > { %v9145_v18 = vadd.f32 %v9113_v26, %v9043_v52  ;;  %v8580_v52 = vmul.f32 %v17799_v57, %v8544_v55  ;;  %v9115_v26 = vsel %vm14809_vm2, %v9083_v50, 0.0  ;;  %v9144_v44 = vadd.f32 %v9080_v1, %v17847_v15 }
 0xd5c   : > { %v9147_v50 = vadd.f32 %v9115_v26, %v9045_v38  ;;  %v9354_v15 = vmul.f32 %v17898_v3, %v8774_v8  ;;  %v9184_v1 = vmul.f32 %v17854_v27, %v8544_v55  ;;  %v9044_v42 = vadd.f32 %v17860_v41, %v8974_v31 }
 0xd5d   : > { %v9247_v40 = vadd.f32 %v9183_v13, %v9145_v18  ;;  %v8944_v18 = vsel %vm14782_vm15, %v8912_v46, 0.0  ;;  %v8874_v13 = vadd.f32 %v8810_v59, %v8742_v63  ;;  %v8612_v61 = vsel %vm14826_vm3, %v8580_v52, 0.0  ;;  %v20541_v59 = vld [vmem:[#allocation225_spill] sm:$0xff] }
 0xd5e   : > { %v9246_v12 = vadd.f32 %v9214_v29, %v9144_v44  ;;  %vm20542_vm11 = vnez %v20541_v59  ;;  %v8744_v56 = vadd.f32 %v17872_v39, %v8612_v61  ;;  %v8812_v38 = vmul.f32 %v17808_v45, %v8776_v10  ;;  %v8548_v61 = vld [vmem:[#allocation2 + $0x50] sm:$0xff] }
 0xd5f   : > { %v9317_v49 = vadd.f32 %v9285_v14, %v9247_v40  ;;  %v8976_v46 = vadd.f32 %v8944_v18, %v8874_v13  ;;  %v8845_v63 = vsel %vm20542_vm11, %v8813_v53, 0.0  ;;  %v8977_v52 = vadd.f32 %v8913_v22, %v8875_v47  ;;  %v8547_v47 = vld [vmem:[#allocation2 + $0x48] sm:$0xff] }
 0xd60   : > { %v9015_v14 = vmul.f32 %v17827_v35, %v8677_v37  ;;  %v9085_v8 = vmul.f32 %v17845_v4, %v8777_v9  ;;  %v9249_v40 = vadd.f32 %v9185_v20, %v9147_v50  ;;  %v9357_v55 = vmul.f32 %v17898_v3, %v8777_v9 }
 0xd61   : > { %v9287_v41 = vmul.f32 %v17840_v6, %v8677_v37  ;;  %v9216_v26 = vsel %vm14624_vm13, %v9184_v1, 0.0  ;;  %v8582_v29 = vmul.f32 %v17799_v57, %v8546_v43  ;;  %v9186_v21 = vmul.f32 %v17854_v27, %v8546_v43 }
 0xd62   : > { %v9084_v39 = vmul.f32 %v17845_v4, %v8776_v10  ;;  %v9146_v0 = vadd.f32 %v9082_v54, %v9044_v42  ;;  %v9046_v31 = vadd.f32 %v17875_v30, %v8976_v46  ;;  %v8946_v44 = vsel %vm14826_vm3, %v8914_v24, 0.0  ;;  %v20543_v54 = vld [vmem:[#allocation94_spill] sm:$0xff] }
 0xd63   : > { %v9316_v9 = vadd.f32 %v17863_v58, %v9246_v12  ;;  %v8877_v53 = vadd.f32 %v8845_v63, %v8745_v2  ;;  %v8876_v37 = vadd.f32 %v8812_v38, %v8744_v56  ;;  %v9047_v22 = vadd.f32 %v9015_v14, %v8977_v52  ;;  %v8779_v46 = vld [vmem:[#allocation2 + $0x4a] sm:$0xff] }
 0xd64   : > { %v9319_v11 = vadd.f32 %v9287_v41, %v9249_v40  ;;  %v9389_v18 = vsel %vm14809_vm2, %v9357_v55, 0.0  ;;  %v9248_v13 = vadd.f32 %v9216_v26, %v9146_v0  ;;  %v9117_v43 = vsel %vm15041_vm7, %v9085_v8, 0.0  ;;  %v8679_v38 = vld [vmem:[#allocation2 + $0x49] sm:$0xff] }
 0xd65   : > { %v8915_v42 = vmul.f32 %v17813_v19, %v8547_v47  ;;  %vm20544_vm12 = vnez %v20543_v54  ;;  %v9218_v24 = vsel %vm14782_vm15, %v9186_v21, 0.0  ;;  %v8978_v58 = vadd.f32 %v8946_v44, %v8876_v37  ;;  %v8682_v44 = vld [vmem:[#allocation2 + $0x61] sm:$0xff] }
 0xd66   : > { %v8614_v30 = vsel %vm20544_vm12, %v8582_v29, 0.0  ;;  %v17965_v50 = vadd.f32 %v9387_v5, %v9317_v49  ;;  %v9148_v20 = vadd.f32 %v9084_v39, %v9046_v31  ;;  %v17973_v12 = vmul.f32 %v17840_v6, %v17868_v33  ;;  %v8778_v5 = vld [vmem:[#allocation2 + $0x42] sm:$0xff] }
 0xd67   : > { %v17975_v1 = vadd.f32 %v9354_v15, %v9316_v9  ;;  %v9356_v2 = vmul.f32 %v17898_v3, %v8776_v10  ;;  %v9149_v34 = vadd.f32 %v9117_v43, %v9047_v22  ;;  %v9187_v63 = vmul.f32 %v17854_v27, %v8547_v47  ;;  %v20545_v22 = vld [vmem:[#allocation93_spill] sm:$0xff] }
 0xd68   : > { %v17979_v49 = vadd.f32 %v9389_v18, %v9319_v11  ;;  %v9318_v56 = vadd.f32 %v17880_v17, %v9248_v13  ;;  %v8746_v52 = vadd.f32 %v17883_v60, %v8614_v30  ;;  %v9250_v14 = vadd.f32 %v9218_v24, %v9148_v20  ;;  %v8781_v13 = vld [vmem:[#allocation2 + $0x5a] sm:$0xff]  ;;  %v18054_v54 = vld [vmem:[#allocation2 + $0x62] sm:$0xff] }
 0xd69   : > { %v8979_v8 = vadd.f32 %v8915_v42, %v8877_v53  ;;  %v8916_v33 = vmul.f32 %v17813_v19, %v8548_v61  ;;  %v9048_v15 = vadd.f32 %v17886_v32, %v8978_v58  ;;  %v9188_v10 = vmul.f32 %v17854_v27, %v8548_v61  ;;  %v8549_v58 = vld [vmem:[#allocation2 + $0x58] sm:$0xff] }
 0xd6a   : > { %v8815_v40 = vmul.f32 %v17808_v45, %v8779_v46  ;;  %v9087_v55 = vmul.f32 %v17845_v4, %v8779_v46  ;;  %v8814_v41 = vmul.f32 %v17808_v45, %v8778_v5  ;;  %v9086_v26 = vmul.f32 %v17845_v4, %v8778_v5  ;;  %v8681_v20 = vld [vmem:[#allocation2 + $0x59] sm:$0xff] }
 0xd6b   : > { %v8583_v17 = vmul.f32 %v17799_v57, %v8547_v47  ;;  %v8715_v60 = vmul.f32 %v17803_v23, %v8679_v38  ;;  %v9017_v29 = vmul.f32 %v17827_v35, %v8679_v38  ;;  %v9251_v21 = vadd.f32 %v9187_v63, %v9149_v34 }
 0xd6c   : > { %v17993_v39 = vadd.f32 %v9356_v2, %v9318_v56  ;;  %v9359_v32 = vmul.f32 %v17898_v3, %v8779_v46  ;;  %v9320_v0 = vadd.f32 %v17892_v36, %v9250_v14  ;;  %v8584_v31 = vmul.f32 %v17799_v57, %v8548_v61  ;;  %v20547_v2 = vld [vmem:[#allocation217_spill] sm:$0xff] }
 0xd6d   : > { %v9289_v9 = vmul.f32 %v17840_v6, %v8679_v38  ;;  %v9049_v53 = vadd.f32 %v9017_v29, %v8979_v8  ;;  %v9220_v47 = vsel %vm14826_vm3, %v9188_v10, 0.0  ;;  %v8948_v37 = vsel %vm20544_vm12, %v8916_v33, 0.0  ;;  %v8550_v14 = vld [vmem:[#allocation2 + $0x60] sm:$0xff]  ;;  %v8780_v10 = vld [vmem:[#allocation2 + $0x52] sm:$0xff] }
 0xd6e   : > { %vm20546_vm13 = vnez %v20545_v22  ;;  %v8878_v18 = vadd.f32 %v8814_v41, %v8746_v52  ;;  %v9119_v36 = vsel %vm20542_vm11, %v9087_v55, 0.0  ;;  %v9150_v43 = vadd.f32 %v9086_v26, %v9048_v15 }
 0xd6f   : > { %v8847_v11 = vsel %vm20546_vm13, %v8815_v40, 0.0  ;;  %v8747_v42 = vadd.f32 %v8715_v60, %v8583_v17  ;;  %v9321_v30 = vadd.f32 %v9289_v9, %v9251_v21  ;;  %v9358_v24 = vmul.f32 %v17898_v3, %v8778_v5  ;;  %v8684_v17 = vld [vmem:[#allocation2 + $0x71] sm:$0xff] }
 0xd70   : > { %v8718_v7 = vmul.f32 %v17803_v23, %v8682_v44  ;;  %v9391_v61 = vsel %vm15041_vm7, %v9359_v32, 0.0  ;;  %vm20548_vm15 = vnez %v20547_v2  ;;  %v9252_v34 = vadd.f32 %v9220_v47, %v9150_v43  ;;  %v8551_v47 = vld [vmem:[#allocation2 + $0x68] sm:$0xff] }
 0xd71   : > { %v8616_v46 = vsel %vm20548_vm15, %v8584_v31, 0.0  ;;  %v8980_v63 = vadd.f32 %v8948_v37, %v8878_v18  ;;  %v8879_v56 = vadd.f32 %v8847_v11, %v8747_v42  ;;  %v8817_v38 = vmul.f32 %v17808_v45, %v8781_v13  ;;  %v20550_v31 = vld [vmem:[#allocation96_spill] sm:$0xff] }
 0xd72   : > { %v9151_v52 = vadd.f32 %v9119_v36, %v9049_v53  ;;  %v18015_v8 = vmul.f32 %v17827_v35, %v8682_v44  ;;  %v8585_v5 = vmul.f32 %v17799_v57, %v8549_v58  ;;  %v8717_v33 = vmul.f32 %v17803_v23, %v8681_v20 }
 0xd73   : > { %v8917_v62 = vmul.f32 %v17813_v19, %v8549_v58  ;;  %v9189_v15 = vmul.f32 %v17854_v27, %v8549_v58  ;;  %v18021_v40 = vadd.f32 %v9391_v61, %v9321_v30  ;;  %v18023_v55 = vadd.f32 %v9358_v24, %v9320_v0 }
 0xd74   : > { %v8748_v41 = vadd.f32 %v17896_v16, %v8616_v46  ;;  %v9292_v26 = vmul.f32 %v17840_v6, %v8682_v44  ;;  %v9322_v60 = vadd.f32 %v17973_v12, %v9252_v34  ;;  %v8918_v29 = vmul.f32 %v17813_v19, %v8550_v14  ;;  %v8783_v46 = vld [vmem:[#allocation2 + $0x6a] sm:$0xff] }
 0xd75   : > { %20549 = vst [vmem:[#allocation61_spill] sm:$0xff] %v18023_v55  ;;  %v9050_v21 = vadd.f32 %v17969_v48, %v8980_v63  ;;  %v9190_v32 = vmul.f32 %v17854_v27, %v8550_v14  ;;  %vm20551_vm2 = vnez %v20550_v31  ;;  %v8816_v53 = vmul.f32 %v17808_v45, %v8780_v10  ;;  %v20552_v34 = vld [vmem:[#allocation222_spill] sm:$0xff] }
 0xd76   : > { %v8849_v9 = vsel %vm20551_vm2, %v8817_v38, 0.0  ;;  %v9088_v0 = vmul.f32 %v17845_v4, %v8780_v10  ;;  %v8586_v16 = vmul.f32 %v17799_v57, %v8550_v14  ;;  %v8749_v44 = vadd.f32 %v8717_v33, %v8585_v5  ;;  %v8552_v38 = vld [vmem:[#allocation2 + $0x70] sm:$0xff] }
 0xd77   : > { %v9253_v37 = vadd.f32 %v9189_v15, %v9151_v52  ;;  %v8981_v11 = vadd.f32 %v8917_v62, %v8879_v56  ;;  %v18037_v12 = vmul.f32 %v17803_v23, %v8684_v17  ;;  %v9019_v48 = vmul.f32 %v17827_v35, %v8681_v20  ;;  %v8683_v14 = vld [vmem:[#allocation2 + $0x69] sm:$0xff] }
 0xd78   : > { %v9089_v18 = vmul.f32 %v17845_v4, %v8781_v13  ;;  %v9291_v36 = vmul.f32 %v17840_v6, %v8681_v20  ;;  %v9361_v43 = vmul.f32 %v17898_v3, %v8781_v13  ;;  %v8881_v42 = vadd.f32 %v8849_v9, %v8749_v44 }
 0xd79   : > { %v8919_v30 = vmul.f32 %v17813_v19, %v8551_v47  ;;  %v9222_v24 = vsel %vm20544_vm12, %v9190_v32, 0.0  ;;  %v8950_v58 = vsel %vm20548_vm15, %v8918_v29, 0.0  ;;  %v8880_v61 = vadd.f32 %v8816_v53, %v8748_v41  ;;  %v8686_v53 = vld [vmem:[#allocation2 + $0x81] sm:$0xff] }
 0xd7a   : > { %vm20553_vm3 = vnez %v20552_v34  ;;  %v9152_v56 = vadd.f32 %v9088_v0, %v9050_v21  ;;  %v18051_v20 = vmul.f32 %v17827_v35, %v8684_v17  ;;  %v9323_v13 = vadd.f32 %v9291_v36, %v9253_v37 }
 0xd7b   : > { %v8618_v63 = vsel %vm20553_vm3, %v8586_v16, 0.0  ;;  %v9360_v52 = vmul.f32 %v17898_v3, %v8780_v10  ;;  %v9051_v5 = vadd.f32 %v9019_v48, %v8981_v11  ;;  %v18057_v33 = vmul.f32 %v17840_v6, %v8684_v17 }
 0xd7c   : > { %v9393_v62 = vsel %vm20542_vm11, %v9361_v43, 0.0  ;;  %v9121_v15 = vsel %vm20546_vm13, %v9089_v18, 0.0  ;;  %v9254_v41 = vadd.f32 %v9222_v24, %v9152_v56  ;;  %v8982_v29 = vadd.f32 %v8950_v58, %v8880_v61  ;;  %v18087_v61 = vld [vmem:[#allocation2 + $0x91] sm:$0xff] }
 0xd7d   : > { %v8819_v21 = vmul.f32 %v17808_v45, %v8783_v46  ;;  %v8750_v32 = vadd.f32 %v8718_v7, %v8618_v63  ;;  %v8983_v9 = vadd.f32 %v8919_v30, %v8881_v42  ;;  %v8920_v10 = vmul.f32 %v17813_v19, %v8552_v38  ;;  %v20556_v42 = vld [vmem:[#allocation87_spill] sm:$0xff] }
 0xd7e   : > { %v8587_v0 = vmul.f32 %v17799_v57, %v8551_v47  ;;  %v8719_v17 = vmul.f32 %v17803_v23, %v8683_v14  ;;  %v9091_v16 = vmul.f32 %v17845_v4, %v8783_v46  ;;  %v8818_v59 = vmul.f32 %v17808_v45, %v18054_v54 }
 0xd7f   : > { %v18070_v44 = vadd.f32 %v9393_v62, %v9323_v13  ;;  %v18072_v37 = vadd.f32 %v9360_v52, %v9322_v60  ;;  %v9021_v11 = vmul.f32 %v17827_v35, %v8683_v14  ;;  %v9153_v7 = vadd.f32 %v9121_v15, %v9051_v5  ;;  %v8785_v13 = vld [vmem:[#allocation2 + $0x7a] sm:$0xff] }
 0xd80   : > { %v18075_v48 = vadd.f32 %v9292_v26, %v9254_v41  ;;  %v8588_v18 = vmul.f32 %v17799_v57, %v8552_v38  ;;  %v9052_v36 = vadd.f32 %v18015_v8, %v8982_v29  ;;  %v18080_v43 = vmul.f32 %v17803_v23, %v8686_v53  ;;  %v8553_v8 = vld [vmem:[#allocation2 + $0x78] sm:$0xff] }
 0xd81   : > { %20554 = vst [vmem:[#allocation182_spill] sm:$0xff] %v18070_v44  ;;  %20555 = vst [vmem:[#allocation183_spill] sm:$0xff] %v18072_v37  ;;  %vm20557_vm7 = vnez %v20556_v42  ;;  %v9053_v24 = vadd.f32 %v9021_v11, %v8983_v9  ;;  %v9192_v58 = vmul.f32 %v17854_v27, %v8552_v38  ;;  %v8952_v60 = vsel %vm20553_vm3, %v8920_v10, 0.0  ;;  %v8685_v38 = vld [vmem:[#allocation2 + $0x79] sm:$0xff] }
 0xd82   : > { %v8851_v30 = vsel %vm20557_vm7, %v8819_v21, 0.0  ;;  %v8751_v26 = vadd.f32 %v8719_v17, %v8587_v0  ;;  %v8882_v63 = vadd.f32 %v8818_v59, %v8750_v32  ;;  %v9090_v56 = vmul.f32 %v17845_v4, %v18054_v54  ;;  %v20558_v21 = vld [vmem:[#allocation226_spill] sm:$0xff]  ;;  %v20560_v44 = vld [vmem:[#allocation89_spill] sm:$0xff] }
 0xd83   : > { %v9123_v52 = vsel %vm20551_vm2, %v9091_v16, 0.0  ;;  %v9191_v5 = vmul.f32 %v17854_v27, %v8551_v47  ;;  %v9363_v62 = vmul.f32 %v17898_v3, %v8783_v46  ;;  %v18096_v15 = vmul.f32 %v17827_v35, %v8686_v53  ;;  %v8554_v16 = vld [vmem:[#allocation2 + $0x80] sm:$0xff] }
 0xd84   : > { %v18099_v41 = vmul.f32 %v17840_v6, %v8686_v53  ;;  %v8883_v29 = vadd.f32 %v8851_v30, %v8751_v26  ;;  %vm20559_vm10 = vnez %v20558_v21  ;;  %v8984_v9 = vadd.f32 %v8952_v60, %v8882_v63 }
 0xd85   : > { %v8620_v32 = vsel %vm20559_vm10, %v8588_v18, 0.0  ;;  %v18105_v10 = vmul.f32 %v17803_v23, %v18087_v61  ;;  %v8821_v47 = vmul.f32 %v17808_v45, %v8785_v13  ;;  %v9155_v0 = vadd.f32 %v9123_v52, %v9053_v24  ;;  %v8784_v18 = vld [vmem:[#allocation2 + $0x72] sm:$0xff] }
 0xd86   : > { %v9193_v46 = vmul.f32 %v17854_v27, %v8553_v8  ;;  %v9224_v17 = vsel %vm20548_vm15, %v9192_v58, 0.0  ;;  %v8589_v53 = vmul.f32 %v17799_v57, %v8553_v8  ;;  %v8721_v59 = vmul.f32 %v17803_v23, %v8685_v38 }
 0xd87   : > { %v8921_v11 = vmul.f32 %v17813_v19, %v8553_v8  ;;  %v9154_v30 = vadd.f32 %v9090_v56, %v9052_v36  ;;  %v9255_v60 = vadd.f32 %v9191_v5, %v9153_v7  ;;  %v9293_v26 = vmul.f32 %v17840_v6, %v8683_v14 }
 0xd88   : > { %v9395_v24 = vsel %vm20546_vm13, %v9363_v62, 0.0  ;;  %v8752_v63 = vadd.f32 %v18037_v12, %v8620_v32  ;;  %v9093_v2 = vmul.f32 %v17845_v4, %v8785_v13  ;;  %v9054_v52 = vadd.f32 %v18051_v20, %v8984_v9 }
 0xd89   : > { %v9256_v58 = vadd.f32 %v9224_v17, %v9154_v30  ;;  %v9194_v37 = vmul.f32 %v17854_v27, %v8554_v16  ;;  %vm20561_vm8 = vnez %v20560_v44  ;;  %v9257_v55 = vadd.f32 %v9193_v46, %v9155_v0  ;;  %v8555_v0 = vld [vmem:[#allocation2 + $0x88] sm:$0xff] }
 0xd8a   : > { %v8853_v8 = vsel %vm20561_vm8, %v8821_v47, 0.0  ;;  %v9365_v7 = vmul.f32 %v17898_v3, %v8785_v13  ;;  %v9092_v14 = vmul.f32 %v17845_v4, %v8784_v18  ;;  %v8753_v36 = vadd.f32 %v8721_v59, %v8589_v53  ;;  %v8787_v46 = vld [vmem:[#allocation2 + $0x8a] sm:$0xff] }
 0xd8b   : > { %v8820_v22 = vmul.f32 %v17808_v45, %v8784_v18  ;;  %v8985_v56 = vadd.f32 %v8921_v11, %v8883_v29  ;;  %v8922_v12 = vmul.f32 %v17813_v19, %v8554_v16  ;;  %v9325_v5 = vadd.f32 %v9293_v26, %v9255_v60  ;;  %v8687_v59 = vld [vmem:[#allocation2 + $0x89] sm:$0xff] }
 0xd8c   : > { %v9362_v20 = vmul.f32 %v17898_v3, %v18054_v54  ;;  %v9295_v62 = vmul.f32 %v17840_v6, %v8685_v38  ;;  %v8590_v32 = vmul.f32 %v17799_v57, %v8554_v16  ;;  %v8885_v9 = vadd.f32 %v8853_v8, %v8753_v36 }
 0xd8d   : > { %v9023_v47 = vmul.f32 %v17827_v35, %v8685_v38  ;;  %v9326_v13 = vadd.f32 %v18057_v33, %v9256_v58  ;;  %v9226_v29 = vsel %vm20553_vm3, %v9194_v37, 0.0  ;;  %v9397_v53 = vsel %vm20551_vm2, %v9365_v7, 0.0  ;;  %v8557_v7 = vld [vmem:[#allocation2 + $0x98] sm:$0xff] }
 0xd8e   : > { %v9327_v17 = vadd.f32 %v9295_v62, %v9257_v55  ;;  %v9364_v54 = vmul.f32 %v17898_v3, %v8784_v18  ;;  %v9156_v11 = vadd.f32 %v9092_v14, %v9054_v52  ;;  %v8884_v30 = vadd.f32 %v8820_v22, %v8752_v63  ;;  %v20562_v55 = vld [vmem:[#allocation102_spill] sm:$0xff]  ;;  %v8556_v14 = vld [vmem:[#allocation2 + $0x90] sm:$0xff] }
 0xd8f   : > { %v9055_v16 = vadd.f32 %v9023_v47, %v8985_v56  ;;  %v9125_v38 = vsel %vm20557_vm7, %v9093_v2, 0.0  ;;  %v8954_v33 = vsel %vm20559_vm10, %v8922_v12, 0.0  ;;  %v8823_v60 = vmul.f32 %v17808_v45, %v8787_v46 }
 0xd90   : > { %v8923_v34 = vmul.f32 %v17813_v19, %v8555_v0  ;;  %vm20563_vm1 = vnez %v20562_v55  ;;  %v9258_v37 = vadd.f32 %v9226_v29, %v9156_v11  ;;  %v8591_v18 = vmul.f32 %v17799_v57, %v8555_v0 }
 0xd91   : > { %v8622_v31 = vsel %vm20563_vm1, %v8590_v32, 0.0  ;;  %v8723_v26 = vmul.f32 %v17803_v23, %v8687_v59  ;;  %v18150_v63 = vmul.f32 %v17827_v35, %v18087_v61  ;;  %v18154_v2 = vmul.f32 %v17840_v6, %v18087_v61  ;;  %v20565_v32 = vld [vmem:[#allocation100_spill] sm:$0xff] }
 0xd92   : > { %v18156_v58 = vadd.f32 %v9395_v24, %v9325_v5  ;;  %v18159_v52 = vadd.f32 %v9362_v20, %v18075_v48  ;;  %v18161_v8 = vadd.f32 %v9397_v53, %v9327_v17  ;;  %v8986_v36 = vadd.f32 %v8954_v33, %v8884_v30  ;;  %v8786_v5 = vld [vmem:[#allocation2 + $0x82] sm:$0xff] }
 0xd93   : > { %v18163_v22 = vadd.f32 %v9364_v54, %v9326_v13  ;;  %v9157_v56 = vadd.f32 %v9125_v38, %v9055_v16  ;;  %v9195_v12 = vmul.f32 %v17854_v27, %v8555_v0  ;;  %v8754_v62 = vadd.f32 %v18080_v43, %v8622_v31  ;;  %v8789_v54 = vld [vmem:[#allocation2 + $0x9a] sm:$0xff] }
 0xd94   : > { %vm20566_vm0 = vnez %v20565_v32  ;;  %v9095_v24 = vmul.f32 %v17845_v4, %v8787_v46  ;;  %v9328_v48 = vadd.f32 %v18099_v41, %v9258_v37  ;;  %v8987_v20 = vadd.f32 %v8923_v34, %v8885_v9  ;;  %v8689_v38 = vld [vmem:[#allocation2 + $0x99] sm:$0xff] }
 0xd95   : > { %20564 = vst [vmem:[#allocation62_spill] sm:$0xff] %v18163_v22  ;;  %v8855_v61 = vsel %vm20566_vm0, %v8823_v60, 0.0  ;;  %v8755_v47 = vadd.f32 %v8723_v26, %v8591_v18  ;;  %v8925_v29 = vmul.f32 %v17813_v19, %v8557_v7  ;;  %v8924_v13 = vmul.f32 %v17813_v19, %v8556_v14 }
 0xd96   : > { %v9196_v17 = vmul.f32 %v17854_v27, %v8556_v14  ;;  %v9025_v0 = vmul.f32 %v17827_v35, %v8687_v59  ;;  %v9297_v43 = vmul.f32 %v17840_v6, %v8687_v59  ;;  %v9367_v53 = vmul.f32 %v17898_v3, %v8787_v46 }
 0xd97   : > { %v9056_v11 = vadd.f32 %v18096_v15, %v8986_v36  ;;  %v8887_v30 = vadd.f32 %v8855_v61, %v8755_v47  ;;  %v9259_v16 = vadd.f32 %v9195_v12, %v9157_v56  ;;  %v8822_v41 = vmul.f32 %v17808_v45, %v8786_v5 }
 0xd98   : > { %v9094_v9 = vmul.f32 %v17845_v4, %v8786_v5  ;;  %v9366_v33 = vmul.f32 %v17898_v3, %v8786_v5  ;;  %v9057_v60 = vadd.f32 %v9025_v0, %v8987_v20  ;;  %v9127_v34 = vsel %vm20561_vm8, %v9095_v24, 0.0  ;;  %v8788_v24 = vld [vmem:[#allocation2 + $0x92] sm:$0xff]  ;;  %v20569_v0 = vld [vmem:[#allocation134_spill] sm:$0xff] }
 0xd99   : > { %v8592_v59 = vmul.f32 %v17799_v57, %v8556_v14  ;;  %v8825_v46 = vmul.f32 %v17808_v45, %v8789_v54  ;;  %v9228_v15 = vsel %vm20559_vm10, %v9196_v17, 0.0  ;;  %v8989_v31 = vadd.f32 %v8925_v29, %v8887_v30  ;;  %v20567_v29 = vld [vmem:[#allocation106_spill] sm:$0xff]  ;;  %v8558_v17 = vld [vmem:[#allocation2 + $0xa0] sm:$0xff] }
 0xd9a   : > { %v8956_v37 = vsel %vm20563_vm1, %v8924_v13, 0.0  ;;  %v8593_v18 = vmul.f32 %v17799_v57, %v8557_v7  ;;  %v8725_v26 = vmul.f32 %v17803_v23, %v8689_v38  ;;  %v9097_v36 = vmul.f32 %v17845_v4, %v8789_v54 }
 0xd9b   : > { %v9197_v56 = vmul.f32 %v17854_v27, %v8557_v7  ;;  %v9329_v12 = vadd.f32 %v9297_v43, %v9259_v16  ;;  %v8886_v61 = vadd.f32 %v8822_v41, %v8754_v62  ;;  %v9027_v14 = vmul.f32 %v17827_v35, %v8689_v38  ;;  %v8559_v43 = vld [vmem:[#allocation2 + $0xa8] sm:$0xff] }
 0xd9c   : > { %v9158_v5 = vadd.f32 %v9094_v9, %v9056_v11  ;;  %v9399_v21 = vsel %vm20557_vm7, %v9367_v53, 0.0  ;;  %v18196_v20 = vadd.f32 %v9366_v33, %v9328_v48  ;;  %v9159_v47 = vadd.f32 %v9127_v34, %v9057_v60 }
 0xd9d   : > { %vm20568_vm14 = vnez %v20567_v29  ;;  %vm20570_vm5 = vnez %v20569_v0  ;;  %v9059_v62 = vadd.f32 %v9027_v14, %v8989_v31  ;;  %v8988_v16 = vadd.f32 %v8956_v37, %v8886_v61 }
 0xd9e   : > { %v8624_v13 = vsel %vm20568_vm14, %v8592_v59, 0.0  ;;  %v8857_v30 = vsel %vm20570_vm5, %v8825_v46, 0.0  ;;  %v9260_v7 = vadd.f32 %v9228_v15, %v9158_v5  ;;  %v8757_v41 = vadd.f32 %v8725_v26, %v8593_v18  ;;  %v8690_v46 = vld [vmem:[#allocation2 + $0xa1] sm:$0xff]  ;;  %v8691_v18 = vld [vmem:[#allocation2 + $0xa9] sm:$0xff]  ;;  %v20571_v5 = vld [vmem:[#allocation76_spill] sm:$0xff] }
 0xd9f   : > { %v9261_v22 = vadd.f32 %v9197_v56, %v9159_v47  ;;  %v8824_v11 = vmul.f32 %v17808_v45, %v8788_v24  ;;  %v9129_v42 = vsel %vm20566_vm0, %v9097_v36, 0.0  ;;  %v18205_v48 = vadd.f32 %v9399_v21, %v9329_v12  ;;  %v8791_v26 = vld [vmem:[#allocation2 + $0xaa] sm:$0xff] }
 0xda0   : > { %v9369_v53 = vmul.f32 %v17898_v3, %v8789_v54  ;;  %v8756_v9 = vadd.f32 %v18105_v10, %v8624_v13  ;;  %v8594_v33 = vmul.f32 %v17799_v57, %v8558_v17  ;;  %v8889_v60 = vadd.f32 %v8857_v30, %v8757_v41 }
 0xda1   : > { %v9299_v34 = vmul.f32 %v17840_v6, %v8689_v38  ;;  %v8927_v59 = vmul.f32 %v17813_v19, %v8559_v43  ;;  %v9198_v15 = vmul.f32 %v17854_v27, %v8558_v17  ;;  %v9096_v31 = vmul.f32 %v17845_v4, %v8788_v24 }
 0xda2   : > { %v9368_v37 = vmul.f32 %v17898_v3, %v8788_v24  ;;  %v9161_v36 = vadd.f32 %v9129_v42, %v9059_v62  ;;  %v9199_v54 = vmul.f32 %v17854_v27, %v8559_v43  ;;  %v8888_v56 = vadd.f32 %v8824_v11, %v8756_v9  ;;  %v8560_v42 = vld [vmem:[#allocation2 + $0xb0] sm:$0xff] }
 0xda3   : > { %v9331_v10 = vadd.f32 %v9299_v34, %v9261_v22  ;;  %v9330_v12 = vadd.f32 %v18154_v2, %v9260_v7  ;;  %v9058_v38 = vadd.f32 %v18150_v63, %v8988_v16  ;;  %v9401_v61 = vsel %vm20561_vm8, %v9369_v53, 0.0  ;;  %v8790_v22 = vld [vmem:[#allocation2 + $0xa2] sm:$0xff] }
 0xda4   : > { %v8595_v14 = vmul.f32 %v17799_v57, %v8559_v43  ;;  %vm20572_vm4 = vnez %v20571_v5  ;;  %v8726_v24 = vmul.f32 %v17803_v23, %v8690_v46  ;;  %v8727_v47 = vmul.f32 %v17803_v23, %v8691_v18  ;;  %v20574_v34 = vld [vmem:[#allocation142_spill] sm:$0xff] }
 0xda5   : > { %v8626_v21 = vsel %vm20572_vm4, %v8594_v33, 0.0  ;;  %v8827_v13 = vmul.f32 %v17808_v45, %v8791_v26  ;;  %v9230_v2 = vsel %vm20563_vm1, %v9198_v15, 0.0  ;;  %v8991_v30 = vadd.f32 %v8927_v59, %v8889_v60 }
 0xda6   : > { %v18228_v63 = vadd.f32 %v9368_v37, %v9330_v12  ;;  %v9099_v44 = vmul.f32 %v17845_v4, %v8791_v26  ;;  %v9263_v7 = vadd.f32 %v9199_v54, %v9161_v36  ;;  %v9160_v43 = vadd.f32 %v9096_v31, %v9058_v38  ;;  %v8692_v54 = vld [vmem:[#allocation2 + $0xb1] sm:$0xff]  ;;  %v8793_v38 = vld [vmem:[#allocation2 + $0xba] sm:$0xff] }
 0xda7   : > { %v18231_v62 = vadd.f32 %v9401_v61, %v9331_v10  ;;  %v9029_v16 = vmul.f32 %v17827_v35, %v8691_v18  ;;  %v9371_v41 = vmul.f32 %v17898_v3, %v8791_v26  ;;  %v8926_v11 = vmul.f32 %v17813_v19, %v8558_v17  ;;  %v8561_v26 = vld [vmem:[#allocation2 + $0xb8] sm:$0xff] }
 0xda8   : > { %20573 = vst [vmem:[#allocation185_spill] sm:$0xff] %v18228_v63  ;;  %v9301_v53 = vmul.f32 %v17840_v6, %v8691_v18  ;;  %v8758_v55 = vadd.f32 %v8726_v24, %v8626_v21  ;;  %v8826_v9 = vmul.f32 %v17808_v45, %v8790_v22  ;;  %v9262_v33 = vadd.f32 %v9230_v2, %v9160_v43 }
 0xda9   : > { %v8759_v60 = vadd.f32 %v8727_v47, %v8595_v14  ;;  %vm20575_vm6 = vnez %v20574_v34  ;;  %v9028_v15 = vmul.f32 %v17827_v35, %v8690_v46  ;;  %v9061_v31 = vadd.f32 %v9029_v16, %v8991_v30  ;;  %v20577_v16 = vld [vmem:[#allocation206_spill] sm:$0xff] }
 0xdaa   : > { %v8859_v59 = vsel %vm20575_vm6, %v8827_v13, 0.0  ;;  %v9333_v37 = vadd.f32 %v9301_v53, %v9263_v7  ;;  %v9300_v36 = vmul.f32 %v17840_v6, %v8690_v46  ;;  %v9131_v17 = vsel %vm20570_vm5, %v9099_v44, 0.0  ;;  %v8693_v13 = vld [vmem:[#allocation2 + $0xb9] sm:$0xff] }
 0xdab   : > { %v8596_v18 = vmul.f32 %v17799_v57, %v8560_v42  ;;  %v9403_v10 = vsel %vm20566_vm0, %v9371_v41, 0.0  ;;  %v9098_v12 = vmul.f32 %v17845_v4, %v8790_v22  ;;  %v8928_v61 = vmul.f32 %v17813_v19, %v8560_v42 }
 0xdac   : > { %v8958_v14 = vsel %vm20568_vm14, %v8926_v11, 0.0  ;;  %v8891_v21 = vadd.f32 %v8859_v59, %v8759_v60  ;;  %v8890_v46 = vadd.f32 %v8826_v9, %v8758_v55  ;;  %v9332_v24 = vadd.f32 %v9300_v36, %v9262_v33  ;;  %v8792_v9 = vld [vmem:[#allocation2 + $0xb2] sm:$0xff]  ;;  %v8562_v36 = vld [vmem:[#allocation2 + $0xc0] sm:$0xff] }
 0xdad   : > { %v9370_v47 = vmul.f32 %v17898_v3, %v8790_v22  ;;  %v8929_v2 = vmul.f32 %v17813_v19, %v8561_v26  ;;  %v9163_v30 = vadd.f32 %v9131_v17, %v9061_v31  ;;  %v9201_v32 = vmul.f32 %v17854_v27, %v8561_v26 }
 0xdae   : > { %v8728_v44 = vmul.f32 %v17803_v23, %v8692_v54  ;;  %v18255_v7 = vadd.f32 %v9403_v10, %v9333_v37  ;;  %v8829_v43 = vmul.f32 %v17808_v45, %v8793_v38  ;;  %vm20578_vm9 = vnez %v20577_v16 }
 0xdaf   : > { %v8628_v41 = vsel %vm20578_vm9, %v8596_v18, 0.0  ;;  %v8990_v11 = vadd.f32 %v8958_v14, %v8888_v56  ;;  %v8597_v53 = vmul.f32 %v17799_v57, %v8561_v26  ;;  %v8729_v22 = vmul.f32 %v17803_v23, %v8693_v13  ;;  %v8563_v18 = vld [vmem:[#allocation2 + $0xc8] sm:$0xff] }
 0xdb0   : > { %20576 = vst [vmem:[#allocation184_spill] sm:$0xff] %v18255_v7  ;;  %v9373_v55 = vmul.f32 %v17898_v3, %v8793_v38  ;;  %v8960_v33 = vsel %vm20572_vm4, %v8928_v61, 0.0  ;;  %v18265_v60 = vadd.f32 %v9370_v47, %v9332_v24  ;;  %v9031_v59 = vmul.f32 %v17827_v35, %v8693_v13 }
 0xdb1   : > { %v9030_v31 = vmul.f32 %v17827_v35, %v8692_v54  ;;  %v9200_v37 = vmul.f32 %v17854_v27, %v8560_v42  ;;  %v9101_v56 = vmul.f32 %v17845_v4, %v8793_v38  ;;  %v9265_v26 = vadd.f32 %v9201_v32, %v9163_v30  ;;  %v8694_v32 = vld [vmem:[#allocation2 + $0xc1] sm:$0xff] }
 0xdb2   : > { %20579 = vst [vmem:[#allocation187_spill] sm:$0xff] %v18265_v60  ;;  %v8760_v17 = vadd.f32 %v8728_v44, %v8628_v41  ;;  %v8993_v10 = vadd.f32 %v8929_v2, %v8891_v21  ;;  %vm20580_vm11 = vnez %v20300_v51  ;;  %v8828_v61 = vmul.f32 %v17808_v45, %v8792_v9  ;;  %v8795_v41 = vld [vmem:[#allocation2 + $0xca] sm:$0xff] }
 0xdb3   : > { %v8861_v14 = vsel %vm20580_vm11, %v8829_v43, 0.0  ;;  %v9060_v24 = vadd.f32 %v9028_v15, %v8990_v11  ;;  %v8992_v47 = vadd.f32 %v8960_v33, %v8890_v46  ;;  %v8761_v60 = vadd.f32 %v8729_v22, %v8597_v53  ;;  %v8695_v22 = vld [vmem:[#allocation2 + $0xc9] sm:$0xff] }
 0xdb4   : > { %v9303_v7 = vmul.f32 %v17840_v6, %v8693_v13  ;;  %v9405_v42 = vsel %vm20570_vm5, %v9373_v55, 0.0  ;;  %v8930_v63 = vmul.f32 %v17813_v19, %v8562_v36  ;;  %v9100_v38 = vmul.f32 %v17845_v4, %v8792_v9 }
 0xdb5   : > { %v9232_v21 = vsel %vm20568_vm14, %v9200_v37, 0.0  ;;  %v8931_v2 = vmul.f32 %v17813_v19, %v8563_v18  ;;  %v8598_v30 = vmul.f32 %v17799_v57, %v8562_v36  ;;  %v8893_v15 = vadd.f32 %v8861_v14, %v8761_v60  ;;  %v20581_v37 = vld [vmem:[#allocation128_spill] sm:$0xff]  ;;  %v8564_v14 = vld [vmem:[#allocation2 + $0xd0] sm:$0xff] }
 0xdb6   : > { %v9335_v46 = vadd.f32 %v9303_v7, %v9265_v26  ;;  %v9063_v44 = vadd.f32 %v9031_v59, %v8993_v10  ;;  %v9202_v13 = vmul.f32 %v17854_v27, %v8562_v36  ;;  %v8892_v43 = vadd.f32 %v8828_v61, %v8760_v17 }
 0xdb7   : > { %v9162_v0 = vadd.f32 %v9098_v12, %v9060_v24  ;;  %v9133_v11 = vsel %vm20575_vm6, %v9101_v56, 0.0  ;;  %v9062_v53 = vadd.f32 %v9030_v31, %v8992_v47  ;;  %v9302_v29 = vmul.f32 %v17840_v6, %v8692_v54 }
 0xdb8   : > { %v9203_v55 = vmul.f32 %v17854_v27, %v8563_v18  ;;  %v8730_v33 = vmul.f32 %v17803_v23, %v8694_v32  ;;  %v8962_v7 = vsel %vm20578_vm9, %v8930_v63, 0.0  ;;  %v9372_v59 = vmul.f32 %v17898_v3, %v8792_v9 }
 0xdb9   : > { %v9264_v60 = vadd.f32 %v9232_v21, %v9162_v0  ;;  %vm20582_vm12 = vnez %v20581_v37  ;;  %v8995_v36 = vadd.f32 %v8931_v2, %v8893_v15  ;;  %v18294_v26 = vadd.f32 %v9405_v42, %v9335_v46  ;;  %v8794_v21 = vld [vmem:[#allocation2 + $0xc2] sm:$0xff]  ;;  %v8696_v0 = vld [vmem:[#allocation2 + $0xd1] sm:$0xff] }
 0xdba   : > { %v8630_v12 = vsel %vm20582_vm12, %v8598_v30, 0.0  ;;  %v9103_v31 = vmul.f32 %v17845_v4, %v8795_v41  ;;  %v9165_v54 = vadd.f32 %v9133_v11, %v9063_v44  ;;  %v9234_v56 = vsel %vm20572_vm4, %v9202_v13, 0.0  ;;  %v8565_v13 = vld [vmem:[#allocation2 + $0xd8] sm:$0xff] }
 0xdbb   : > { %v9033_v17 = vmul.f32 %v17827_v35, %v8695_v22  ;;  %v9032_v10 = vmul.f32 %v17827_v35, %v8694_v32  ;;  %v9164_v63 = vadd.f32 %v9100_v38, %v9062_v53  ;;  %v8994_v61 = vadd.f32 %v8962_v7, %v8892_v43  ;;  %v8697_v7 = vld [vmem:[#allocation2 + $0xd9] sm:$0xff] }
 0xdbc   : > { %v8831_v9 = vmul.f32 %v17808_v45, %v8795_v41  ;;  %v9267_v24 = vadd.f32 %v9203_v55, %v9165_v54  ;;  %v9375_v47 = vmul.f32 %v17898_v3, %v8795_v41  ;;  %v8762_v42 = vadd.f32 %v8730_v33, %v8630_v12 }
 0xdbd   : > { %v9334_v2 = vadd.f32 %v9302_v29, %v9264_v60  ;;  %v8599_v30 = vmul.f32 %v17799_v57, %v8563_v18  ;;  %v9266_v15 = vadd.f32 %v9234_v56, %v9164_v63  ;;  %v9065_v5 = vadd.f32 %v9033_v17, %v8995_v36  ;;  %v20584_v17 = vld [vmem:[#allocation177_spill] sm:$0xff]  ;;  %v8796_v63 = vld [vmem:[#allocation2 + $0xd2] sm:$0xff] }
 0xdbe   : > { %v8731_v46 = vmul.f32 %v17803_v23, %v8695_v22  ;;  %v9305_v44 = vmul.f32 %v17840_v6, %v8695_v22  ;;  %v9135_v38 = vsel %vm20580_vm11, %v9103_v31, 0.0  ;;  %v8600_v43 = vmul.f32 %v17799_v57, %v8564_v14 }
 0xdbf   : > { %v8830_v41 = vmul.f32 %v17808_v45, %v8794_v21  ;;  %v9102_v11 = vmul.f32 %v17845_v4, %v8794_v21  ;;  %v9304_v53 = vmul.f32 %v17840_v6, %v8694_v32  ;;  %v9064_v18 = vadd.f32 %v9032_v10, %v8994_v61 }
 0xdc0   : > { %vm20583_vm13 = vnez %v20295_v28  ;;  %v9337_v55 = vadd.f32 %v9305_v44, %v9267_v24  ;;  %v9407_v22 = vsel %vm20575_vm6, %v9375_v47, 0.0  ;;  %v9374_v33 = vmul.f32 %v17898_v3, %v8794_v21  ;;  %v8797_v24 = vld [vmem:[#allocation2 + $0xda] sm:$0xff] }
 0xdc1   : > { %v8863_v29 = vsel %vm20583_vm13, %v8831_v9, 0.0  ;;  %v9167_v60 = vadd.f32 %v9135_v38, %v9065_v5  ;;  %v9205_v12 = vmul.f32 %v17854_v27, %v8565_v13  ;;  %v8732_v36 = vmul.f32 %v17803_v23, %v8696_v0  ;;  %v18331_v21 = vld [vmem:[%s18748_s4] ss:$0 sm:$0xff] }
 0xdc2   : > { %v9204_v31 = vmul.f32 %v17854_v27, %v8564_v14  ;;  %v18320_v54 = vadd.f32 %v9372_v59, %v9334_v2  ;;  %v8763_v32 = vadd.f32 %v8731_v46, %v8599_v30  ;;  %v9336_v56 = vadd.f32 %v9304_v53, %v9266_v15 }
 0xdc3   : > { %vm20585_vm15 = vnez %v20584_v17  ;;  %v18324_v34 = vadd.f32 %v8830_v41, %v8762_v42  ;;  %v8601_v61 = vmul.f32 %v17799_v57, %v8565_v13  ;;  %v8733_v9 = vmul.f32 %v17803_v23, %v8697_v7 }
 0xdc4   : > { %v8632_v10 = vsel %vm20585_vm15, %v8600_v43, 0.0  ;;  %v9166_v47 = vadd.f32 %v9102_v11, %v9064_v18  ;;  %v8895_v59 = vadd.f32 %v8863_v29, %v8763_v32  ;;  %v18333_v2 = vadd.f32 %v9407_v22, %v9337_v55 }
 0xdc5   : > { %v18335_v30 = vadd.f32 %v9374_v33, %v9336_v56  ;;  %v18338_v15 = vmul.f32 %v17813_v19, %v8564_v14  ;;  %v9269_v42 = vadd.f32 %v9205_v12, %v9167_v60  ;;  %v8764_v5 = vadd.f32 %v8732_v36, %v8632_v10  ;;  %v8566_v60 = vld [vmem:[#allocation2 + $0xe0] sm:$0xff] }
 0xdc6   : > { %v8832_v46 = vmul.f32 %v17808_v45, %v8796_v63  ;;  %v9236_v44 = vsel %vm20578_vm9, %v9204_v31, 0.0  ;;  %v8833_v43 = vmul.f32 %v17808_v45, %v8797_v24  ;;  %v8933_v41 = vmul.f32 %v17813_v19, %v8565_v13 }
 0xdc7   : > { %v9377_v11 = vmul.f32 %v17898_v3, %v8797_v24  ;;  %v18347_v53 = vmul.f32 %v17827_v35, %v8696_v0  ;;  %v8765_v29 = vadd.f32 %v8733_v9, %v8601_v61  ;;  %v9035_v55 = vmul.f32 %v17827_v35, %v8697_v7 }
 0xdc8   : > { %v9307_v16 = vmul.f32 %v17840_v6, %v8697_v7  ;;  %v9105_v33 = vmul.f32 %v17845_v4, %v8797_v24  ;;  %v18355_v13 = vmul.f32 %v17845_v4, %v8796_v63  ;;  %v9268_v3 = vadd.f32 %v9236_v44, %v9166_v47  ;;  %v12174_v24 = vld [vmem:[%s12700_s14 + $0x8] sm:$0xff]  ;;  %v12176_v44 = vld [vmem:[%s12700_s14] sm:$0xff] }
 0xdc9   : > { %v18358_v31 = vadd.f32 %v8832_v46, %v8764_v5  ;;  %v9306_v32 = vmul.f32 %v17840_v6, %v8696_v0  ;;  %vm20586_vm2 = vnez %v20319_v25  ;;  %v9409_v61 = vsel %vm20580_vm11, %v9377_v11, 0.0  ;;  %v18368_v5 = vld [vmem:[#allocation11 + $0x8] ss:$0 sm:$0xff]  ;;  %v18372_v46 = vld [vmem:[#allocation2 + $0xe1] sm:$0xff] }
 0xdca   : > { %v9339_v36 = vadd.f32 %v9307_v16, %v9269_v42  ;;  %v8865_v10 = vsel %vm20586_vm2, %v8833_v43, 0.0  ;;  %v8997_v9 = vadd.f32 %v8933_v41, %v8895_v59  ;;  %v9376_v0 = vmul.f32 %v18368_v5, %v8796_v63  ;;  %v8567_v16 = vld [vmem:[#allocation2 + $0xe8] sm:$0xff] }
 0xdcb   : > { %v9338_v43 = vadd.f32 %v9306_v32, %v9268_v3  ;;  %v8964_v59 = vsel %vm20582_vm12, %v18338_v15, 0.0  ;;  %vm20587_vm3 = vcmask 130048   ;;  %v18386_v41 = vadd.f32 %v8865_v10, %v8765_v29  ;;  %v8799_v3 = vld [vmem:[#allocation2 + $0xea] sm:$0xff] }
 0xdcc   : > { %v18388_v11 = vadd.f32 %v9409_v61, %v9339_v36  ;;  %vm20588_vm7 = vmmov %vm20587_vm3  ;;  %v18398_v29 = vmul.f32 %v17813_v19, %v8566_v60  ;;  %v12177_v36 = vld [vmem:[%s12700_s14 + $0x18] sm:$0xff]  ;;  %v8996_v10 = vadd.f32 %v8964_v59, %v18324_v34  ;;  %v12178_v61 = vld [vmem:[%s12700_s14 + $0x10] sm:$0xff]  ;;  %v9206_v59 = vmul.f32 %v17854_v27, %v8566_v60 }
 0xdcd   : > { %vm20591_vm8 = vmmov %vm20587_vm3 }
 0xdce   : > { %vm20592_vm1 = vmmov %vm20587_vm3 }
 0xdcf   : > { %vm20594_vm0 = vmmov %vm20592_vm1 }
 0xdd0   : > { %vm20598_vm5 = vmmov %vm20594_vm0 }
 0xdd1   : > { %vm20600_vm4 = vmmov %vm20594_vm0 }
 0xdd2   : > { %vm20601_vm6 = vmmov %vm20594_vm0 }
 0xdd3   : > { %vm20602_vm9 = vmmov %vm20594_vm0 }
 0xdd4   : > { %vm20603_vm11 = vmmov %vm20594_vm0 }
 0xdee   : > { %v10908_v38 = vpop.f32.mrb[14].mxu1 }
 0xdef   : > { %v5947_v14 = vadd.f32 %v10908_v38, %v18331_v21  ;;  %v5748_v18 = vpop.f32.mrb[15].mxu1 }
 0xdf0   : > { %v5946_v22 = vadd.f32 %v18331_v21, %v5748_v18 }
 0xdf1   : > { %v9451_v12 = vadd.f32 %v17965_v50, %v5947_v14  ;;  %v9137_v14 = vsel %vm20583_vm13, %v9105_v33, 0.0 }
 0xdf2   : > { %v9450_v56 = vadd.f32 %v17975_v1, %v5946_v22  ;;  %v10911_v7 = vpop.f32.mrb[16].mxu1  ;;  %v8602_v1 = vmul.f32 %v17799_v57, %v8566_v60  ;;  %v8699_v22 = vld [vmem:[#allocation2 + $0xe9] sm:$0xff] }
 0xdf3   : > { %v9483_v47 = vadd.f32 %v12174_v24, %v9451_v12  ;;  %v5949_v50 = vadd.f32 %v10911_v7, %v18331_v21  ;;  %v5758_v42 = vpop.f32.mrb[17].mxu1  ;;  %v9067_v12 = vadd.f32 %v9035_v55, %v8997_v9  ;;  %v20589_v7 = vld [vmem:[#allocation176_spill] sm:$0xff]  ;;  %v18407_v24 = vadd.f32 %v9376_v0, %v9338_v43  ;;  %v20595_v60 = vld [vmem:[#allocation182_spill] sm:$0xff] }
 0xdf4   : > { %v9482_v38 = vadd.f32 %v12176_v44, %v9450_v56  ;;  %v5948_v51 = vadd.f32 %v18331_v21, %v5758_v42  ;;  %vm20590_vm10 = vnez %v20589_v7  ;;  %v8603_v42 = vmul.f32 %v17799_v57, %v8567_v16  ;;  %v20593_v44 = vld [vmem:[#allocation61_spill] sm:$0xff] }
 0xdf5   : > { %9515 = vst.msk [vmem:[%s18381_s20 + $0x8] sm:$0xff] %vm20587_vm3, %v9483_v47  ;;  %v9453_v63 = vadd.f32 %v17979_v49, %v5949_v50  ;;  %v8734_v49 = vmul.f32 %v17803_v23, %v18372_v46  ;;  %v18411_v47 = vmul.f32 %v17827_v35, %v18372_v46  ;;  %v8735_v34 = vmul.f32 %v17803_v23, %v8699_v22  ;;  %vm20608_vm3 = vmmov %vm20594_vm0 }
 0xdf6   : > { %9514 = vst.msk [vmem:[%s18381_s20] sm:$0xff] %vm20588_vm7, %v9482_v38  ;;  %v9452_v15 = vadd.f32 %v17993_v39, %v5948_v51  ;;  %v10914_v18 = vpop.f32.mrb[18].mxu1  ;;  %v8634_v39 = vsel %vm20590_vm10, %v8602_v1, 0.0  ;;  %v8835_v1 = vmul.f32 %v17808_v45, %v8799_v3  ;;  %v9169_v51 = vadd.f32 %v9137_v14, %v9067_v12  ;;  %vm20609_vm7 = vmmov %vm20594_vm0 }
 0xdf7   : > { %v9485_v33 = vadd.f32 %v12177_v36, %v9453_v63  ;;  %v5951_v32 = vadd.f32 %v10914_v18, %v18331_v21  ;;  %v5768_v56 = vpop.f32.mrb[19].mxu1  ;;  %v18422_v43 = vadd.f32 %v8734_v49, %v8634_v39  ;;  %v12179_v63 = vld [vmem:[%s12700_s14 + $0x28] sm:$0xff]  ;;  %v9207_v36 = vmul.f32 %v17854_v27, %v8567_v16 }
 0xdf8   : > { %v9484_v55 = vadd.f32 %v12178_v61, %v9452_v15  ;;  %v5950_v9 = vadd.f32 %v18331_v21, %v5768_v56  ;;  %v8935_v14 = vmul.f32 %v17813_v19, %v8567_v16  ;;  %v9037_v12 = vmul.f32 %v17827_v35, %v8699_v22 }
 0xdf9   : > { %9517 = vst.msk [vmem:[%s18381_s20 + $0x18] sm:$0xff] %vm20591_vm8, %v9485_v33  ;;  %v9455_v50 = vadd.f32 %v18021_v40, %v5951_v32  ;;  %v9066_v33 = vadd.f32 %v18347_v53, %v8996_v10  ;;  %v12180_v32 = vld [vmem:[%s12700_s14 + $0x20] sm:$0xff]  ;;  %v8767_v39 = vadd.f32 %v8735_v34, %v8603_v42  ;;  %v18439_v53 = vmul.f32 %v17845_v4, %v8799_v3  ;;  %v12181_v34 = vld [vmem:[%s12700_s14 + $0x38] sm:$0xff] }
 0xdfa   : > { %9516 = vst.msk [vmem:[%s18381_s20 + $0x10] sm:$0xff] %vm20592_vm1, %v9484_v55  ;;  %v9454_v0 = vadd.f32 %v20593_v44, %v5950_v9  ;;  %v10917_v38 = vpop.f32.mrb[20].mxu1  ;;  %v20596_v55 = vld [vmem:[#allocation181_spill] sm:$0xff]  ;;  %v9238_v42 = vsel %vm20582_vm12, %v9206_v59, 0.0  ;;  %vm20614_vm1 = vmmov %vm20594_vm0 }
 0xdfb   : > { %v9487_v40 = vadd.f32 %v12179_v63, %v9455_v50  ;;  %v5953_v15 = vadd.f32 %v10917_v38, %v18331_v21  ;;  %v5778_v18 = vpop.f32.mrb[21].mxu1  ;;  %vm20597_vm14 = vnez %v20596_v55  ;;  %v8798_v10 = vld [vmem:[#allocation2 + $0xe2] sm:$0xff]  ;;  %v20599_v50 = vld [vmem:[#allocation183_spill] sm:$0xff]  ;;  %v9379_v38 = vmul.f32 %v18368_v5, %v8799_v3 }
 0xdfc   : > { %v9486_v56 = vadd.f32 %v12180_v32, %v9454_v0  ;;  %v5952_v61 = vadd.f32 %v18331_v21, %v5778_v18  ;;  %v8867_v9 = vsel %vm20597_vm14, %v8835_v1, 0.0  ;;  %v9309_v0 = vmul.f32 %v17840_v6, %v8699_v22  ;;  %v8568_v32 = vld [vmem:[#allocation2 + $0xf0] sm:$0xff] }
 0xdfd   : > { %9519 = vst.msk [vmem:[%s18381_s20 + $0x28] sm:$0xff] %vm20594_vm0, %v9487_v40  ;;  %v9457_v49 = vadd.f32 %v20595_v60, %v5953_v15  ;;  %v9271_v15 = vadd.f32 %v9207_v36, %v9169_v51  ;;  %v9168_v18 = vadd.f32 %v18355_v13, %v9066_v33  ;;  %v18453_v60 = vadd.f32 %v8867_v9, %v8767_v39  ;;  %v8700_v9 = vld [vmem:[#allocation2 + $0xf1] sm:$0xff] }
 0xdfe   : > { %9518 = vst.msk [vmem:[%s18381_s20 + $0x20] sm:$0xff] %vm20598_vm5, %v9486_v56  ;;  %v9456_v44 = vadd.f32 %v20599_v50, %v5952_v61  ;;  %v10920_v16 = vpop.f32.mrb[22].mxu1  ;;  %v12182_v56 = vld [vmem:[%s12700_s14 + $0x30] sm:$0xff]  ;;  %v8834_v37 = vmul.f32 %v17808_v45, %v8798_v10  ;;  %v8999_v51 = vadd.f32 %v8935_v14, %v18386_v41  ;;  %v8966_v13 = vsel %vm20585_vm15, %v18398_v29, 0.0  ;;  %v12183_v50 = vld [vmem:[%s12700_s14 + $0x48] sm:$0xff]  ;;  %vm20617_vm5 = vmmov %vm20594_vm0 }
 0xdff   : > { %v9489_v1 = vadd.f32 %v12181_v34, %v9457_v49  ;;  %v5955_v63 = vadd.f32 %v10920_v16, %v18331_v21  ;;  %v5788_v40 = vpop.f32.mrb[23].mxu1  ;;  %v9270_v59 = vadd.f32 %v9238_v42, %v9168_v18  ;;  %v9411_v49 = vsel %vm20583_vm13, %v9379_v38, 0.0  ;;  %v12184_v16 = vld [vmem:[%s12700_s14 + $0x40] sm:$0xff]  ;;  %vm20607_vm13 = vmmov %vm20594_vm0 }
 0xe00   : > { %v9488_v61 = vadd.f32 %v12182_v56, %v9456_v44  ;;  %v5954_v22 = vadd.f32 %v18331_v21, %v5788_v40  ;;  %v9106_v39 = vmul.f32 %v17845_v4, %v8798_v10  ;;  %v9341_v44 = vadd.f32 %v9309_v0, %v9271_v15 }
 0xe01   : > { %9521 = vst.msk [vmem:[%s18381_s20 + $0x38] sm:$0xff] %vm20600_vm4, %v9489_v1  ;;  %v9459_v3 = vadd.f32 %v18156_v58, %v5955_v63  ;;  %v8604_v58 = vmul.f32 %v17799_v57, %v8568_v32  ;;  %v9378_v42 = vmul.f32 %v18368_v5, %v8798_v10  ;;  %v8998_v34 = vadd.f32 %v8966_v13, %v18358_v31  ;;  %v20605_v31 = vld [vmem:[#allocation178_spill] sm:$0xff]  ;;  %v12186_v13 = vld [vmem:[%s12700_s14 + $0x50] sm:$0xff]  ;;  %vm20618_vm4 = vmmov %vm20594_vm0 }
 0xe02   : > { %9520 = vst.msk [vmem:[%s18381_s20 + $0x30] sm:$0xff] %vm20601_vm6, %v9488_v61  ;;  %v9458_v36 = vadd.f32 %v18159_v52, %v5954_v22  ;;  %v10923_v33 = vpop.f32.mrb[24].mxu1  ;;  %v9308_v52 = vmul.f32 %v17840_v6, %v18372_v46  ;;  %v9069_v40 = vadd.f32 %v9037_v12, %v8999_v51  ;;  %v8736_v0 = vmul.f32 %v17803_v23, %v8700_v9  ;;  %v20604_v46 = vld [vmem:[#allocation62_spill] sm:$0xff]  ;;  %v12185_v61 = vld [vmem:[%s12700_s14 + $0x58] sm:$0xff]  ;;  %vm20619_vm6 = vmmov %vm20594_vm0 }
 0xe03   : > { %v9491_v41 = vadd.f32 %v12183_v50, %v9459_v3  ;;  %v5957_v14 = vadd.f32 %v10923_v33, %v18331_v21  ;;  %v5798_v29 = vpop.f32.mrb[25].mxu1  ;;  %v9139_v10 = vsel %vm20586_vm2, %v18439_v53, 0.0  ;;  %vm20606_vm12 = vnez %v20605_v31  ;;  %v9004_v50 = vld [vmem:[#allocation2 + $0x101] sm:$0xff] }
 0xe04   : > { %v9490_v28 = vadd.f32 %v12184_v16, %v9458_v36  ;;  %v5956_v38 = vadd.f32 %v18331_v21, %v5798_v29  ;;  %v9340_v63 = vadd.f32 %v9308_v52, %v9270_v59  ;;  %v8636_v56 = vsel %vm20606_vm12, %v8604_v58, 0.0  ;;  %v18505_v29 = vld [vmem:[#allocation2 + $0xfa] sm:$0xff] }
 0xe05   : > { %9523 = vst.msk [vmem:[%s18381_s20 + $0x48] sm:$0xff] %vm20602_vm9, %v9491_v41  ;;  %v9461_v1 = vadd.f32 %v18161_v8, %v5957_v14  ;;  %v8936_v8 = vmul.f32 %v17813_v19, %v8568_v32  ;;  %v8898_v59 = vadd.f32 %v8834_v37, %v18422_v43  ;;  %v9208_v51 = vmul.f32 %v17854_v27, %v8568_v32  ;;  %vm20620_vm9 = vmmov %vm20594_vm0 }
 0xe06   : > { %9522 = vst.msk [vmem:[%s18381_s20 + $0x40] sm:$0xff] %vm20603_vm11, %v9490_v28  ;;  %v9460_v15 = vadd.f32 %v20604_v46, %v5956_v38  ;;  %v10926_v18 = vpop.f32.mrb[26].mxu1  ;;  %v18497_v53 = vadd.f32 %v9411_v49, %v9341_v44  ;;  %v9068_v58 = vadd.f32 %v18411_v47, %v8998_v34  ;;  %v18503_v14 = vadd.f32 %v9378_v42, %v9340_v63  ;;  %v8569_v49 = vld [vmem:[#allocation2 + $0xf8] sm:$0xff]  ;;  %v12187_v28 = vld [vmem:[%s12700_s14 + $0x68] sm:$0xff]  ;;  %vm20622_vm11 = vmmov %vm20594_vm0 }
 0xe07   : > { %v9493_v22 = vadd.f32 %v12185_v61, %v9461_v1  ;;  %v5959_v12 = vadd.f32 %v10926_v18, %v18331_v21  ;;  %v5808_v3 = vpop.f32.mrb[27].mxu1  ;;  %v18507_v43 = vadd.f32 %v9139_v10, %v9069_v40  ;;  %v18509_v32 = vadd.f32 %v8736_v0, %v8636_v56  ;;  %v18514_v44 = vld [vmem:[#allocation2 + $0xf9] sm:$0xff]  ;;  %v12188_v40 = vld [vmem:[%s12700_s14 + $0x60] sm:$0xff]  ;;  %v9278_v18 = vld [vmem:[#allocation2 + $0x111] sm:$0xff] }
 0xe08   : > { %v9492_v36 = vadd.f32 %v12186_v13, %v9460_v15  ;;  %v5958_v33 = vadd.f32 %v18331_v21, %v5808_v3  ;;  %v9038_v52 = vmul.f32 %v17827_v35, %v8700_v9  ;;  %v8968_v16 = vsel %vm20590_vm10, %v8936_v8, 0.0  ;;  %v9177_v63 = vld [vmem:[#allocation2 + $0x118] sm:$0xff]  ;;  %v20611_v61 = vld [vmem:[#allocation185_spill] sm:$0xff] }
 0xe09   : > { %9525 = vst.msk [vmem:[%s18381_s20 + $0x58] sm:$0xff] %vm20607_vm13, %v9493_v22  ;;  %v9463_v41 = vadd.f32 %v18205_v48, %v5959_v12  ;;  %v9310_v48 = vmul.f32 %v17840_v6, %v8700_v9  ;;  %v18525_v1 = vmul.f32 %v17827_v35, %v9004_v50  ;;  %v8837_v46 = vmul.f32 %v17808_v45, %v18505_v29  ;;  %v8902_v3 = vld [vmem:[#allocation2 + $0x100] sm:$0xff]  ;;  %vm20624_vm13 = vmmov %vm20594_vm0 }
 0xe0a   : > { %9524 = vst.msk [vmem:[%s18381_s20 + $0x50] sm:$0xff] %vm20608_vm3, %v9492_v36  ;;  %v9462_v37 = vadd.f32 %v18196_v20, %v5958_v33  ;;  %v10929_v47 = vpop.f32.mrb[28].mxu1  ;;  %v9240_v20 = vsel %vm20585_vm15, %v9208_v51, 0.0  ;;  %v9170_v15 = vadd.f32 %v9106_v39, %v9068_v58  ;;  %v8605_v17 = vmul.f32 %v17799_v57, %v8569_v49  ;;  %vm20610_vm15 = vmmov %vm20594_vm0  ;;  %v12189_v57 = vld [vmem:[%s12700_s14 + $0x78] sm:$0xff]  ;;  %v18549_v33 = vld [vmem:[#allocation2 + $0xf2] sm:$0xff] }
 0xe0b   : > { %v9495_v38 = vadd.f32 %v12187_v28, %v9463_v41  ;;  %v5961_v42 = vadd.f32 %v10929_v47, %v18331_v21  ;;  %v5818_v34 = vpop.f32.mrb[29].mxu1  ;;  %v8737_v56 = vmul.f32 %v17803_v23, %v18514_v44  ;;  %v8937_v8 = vmul.f32 %v17813_v19, %v8569_v49  ;;  %v20612_v47 = vld [vmem:[#allocation180_spill] sm:$0xff]  ;;  %vm20625_vm3 = vmmov %vm20594_vm0 }
 0xe0c   : > { %v9494_v0 = vadd.f32 %v12188_v40, %v9462_v37  ;;  %v5960_v9 = vadd.f32 %v18331_v21, %v5818_v34  ;;  %v9000_v39 = vadd.f32 %v8968_v16, %v8898_v59  ;;  %v18542_v51 = vmul.f32 %v17840_v6, %v9004_v50  ;;  %v12190_v59 = vld [vmem:[%s12700_s14 + $0x70] sm:$0xff] }
 0xe0d   : > { %9527 = vst.msk [vmem:[%s18381_s20 + $0x68] sm:$0xff] %vm20609_vm7, %v9495_v38  ;;  %v9465_v10 = vadd.f32 %v18231_v62, %v5961_v42  ;;  %v18545_v62 = vmul.f32 %v17854_v27, %v9177_v63  ;;  %v9272_v58 = vadd.f32 %v9240_v20, %v9170_v15  ;;  %v18552_v41 = vmul.f32 %v17840_v6, %v9278_v18  ;;  %v8903_v38 = vld [vmem:[#allocation2 + $0x108] sm:$0xff]  ;;  %v20615_v42 = vld [vmem:[#allocation184_spill] sm:$0xff]  ;;  %vm20626_vm7 = vmmov %vm20594_vm0 }
 0xe0e   : > { %9526 = vst.msk [vmem:[%s18381_s20 + $0x60] sm:$0xff] %vm20610_vm15, %v9494_v0  ;;  %v9464_v22 = vadd.f32 %v20611_v61, %v5960_v9  ;;  %v10932_v12 = vpop.f32.mrb[30].mxu1  ;;  %vm20613_vm8 = vnez %v20612_v47  ;;  %v9209_v28 = vmul.f32 %v17854_v27, %v8569_v49  ;;  %v8769_v20 = vadd.f32 %v8737_v56, %v8605_v17  ;;  %v20616_v0 = vld [vmem:[#allocation187_spill] sm:$0xff]  ;;  %vm20629_vm15 = vmmov %vm20594_vm0 }
 0xe0f   : > { %v9497_v13 = vadd.f32 %v12189_v57, %v9465_v10  ;;  %v5963_v23 = vadd.f32 %v10932_v12, %v18331_v21  ;;  %v5828_v36 = vpop.f32.mrb[31].mxu1  ;;  %v8869_v16 = vsel %vm20613_vm8, %v8837_v46, 0.0  ;;  %v9001_v63 = vadd.f32 %v8937_v8, %v18453_v60  ;;  %v12191_v10 = vld [vmem:[%s12700_s14 + $0x88] sm:$0xff] }
 0xe10   : > { %v9496_v37 = vadd.f32 %v12190_v59, %v9464_v22  ;;  %v5962_v50 = vadd.f32 %v18331_v21, %v5828_v36  ;;  %v8938_v40 = vmul.f32 %v17813_v19, %v8902_v3  ;;  %v9039_v49 = vmul.f32 %v17827_v35, %v18514_v44  ;;  %v12192_v22 = vld [vmem:[%s12700_s14 + $0x80] sm:$0xff] }
 0xe11   : > { %9529 = vst.msk [vmem:[%s18381_s20 + $0x78] sm:$0xff] %vm20614_vm1, %v9497_v13  ;;  %v9467_v34 = vadd.f32 %v20615_v42, %v5963_v23  ;;  %v9109_v46 = vmul.f32 %v17845_v4, %v18505_v29  ;;  %v8836_v18 = vmul.f32 %v17808_v45, %v18549_v33  ;;  %v8901_v8 = vadd.f32 %v8869_v16, %v8769_v20  ;;  %vm20631_vm1 = vmmov %vm20594_vm0 }
 0xe12   : > { %9528 = vst.msk [vmem:[%s18381_s20 + $0x70] sm:$0xff] %vm20594_vm0, %v9496_v37  ;;  %v9466_v9 = vadd.f32 %v20616_v0, %v5962_v50  ;;  %v10935_v15 = vpop.f32.mrb[32].mxu1  ;;  %v8939_v61 = vmul.f32 %v17813_v19, %v8903_v38  ;;  %v18578_v13 = vadd.f32 %v9310_v48, %v9272_v58  ;;  %v9070_v23 = vadd.f32 %v9038_v52, %v9000_v39  ;;  %v9005_v52 = vld [vmem:[#allocation2 + $0x109] sm:$0xff] }
 0xe13   : > { %v9499_v60 = vadd.f32 %v12191_v10, %v9467_v34  ;;  %v5965_v17 = vadd.f32 %v10935_v15, %v18331_v21  ;;  %v5838_v56 = vpop.f32.mrb[33].mxu1  ;;  %v9273_v36 = vadd.f32 %v9209_v28, %v18507_v43  ;;  %v9071_v59 = vadd.f32 %v9039_v49, %v9001_v63  ;;  %v12193_v43 = vld [vmem:[%s12700_s14 + $0x98] sm:$0xff] }
 0xe14   : > { %v9498_v12 = vadd.f32 %v12192_v22, %v9466_v9  ;;  %v5964_v57 = vadd.f32 %v18331_v21, %v5838_v56  ;;  %v8970_v37 = vsel %vm20606_vm12, %v8938_v40, 0.0  ;;  %v8900_v48 = vadd.f32 %v8836_v18, %v18509_v32  ;;  %v12194_v32 = vld [vmem:[%s12700_s14 + $0x90] sm:$0xff]  ;;  %v12196_v22 = vld [vmem:[%s12700_s14 + $0xa0] sm:$0xff] }
 0xe15   : > { %9531 = vst.msk [vmem:[%s18381_s20 + $0x88] sm:$0xff] %vm20617_vm5, %v9499_v60  ;;  %v9469_v45 = vadd.f32 %v18294_v26, %v5965_v17  ;;  %v9141_v39 = vsel %vm20597_vm14, %v9109_v46, 0.0  ;;  %v9210_v26 = vmul.f32 %v17854_v27, %v8902_v3  ;;  %v9108_v42 = vmul.f32 %v17845_v4, %v18549_v33 }
 0xe16   : > { %9530 = vst.msk [vmem:[%s18381_s20 + $0x80] sm:$0xff] %vm20618_vm4, %v9498_v12  ;;  %v9468_v19 = vadd.f32 %v18320_v54, %v5964_v57  ;;  %v10938_v50 = vpop.f32.mrb[34].mxu1  ;;  %v18597_v54 = vld [vmem:[#allocation2 + $0x10a] sm:$0xff]  ;;  %v9003_v34 = vadd.f32 %v8939_v61, %v8901_v8  ;;  %v9381_v3 = vmul.f32 %v18368_v5, %v18505_v29  ;;  %v9002_v40 = vadd.f32 %v8970_v37, %v8900_v48 }
 0xe17   : > { %v9501_v58 = vadd.f32 %v12193_v43, %v9469_v45  ;;  %v5967_v16 = vadd.f32 %v10938_v50, %v18331_v21  ;;  %v5848_v28 = vpop.f32.mrb[35].mxu1  ;;  %v9041_v9 = vmul.f32 %v17827_v35, %v9005_v52  ;;  %v9173_v15 = vadd.f32 %v9141_v39, %v9071_v59  ;;  %v9279_v39 = vld [vmem:[#allocation2 + $0x119] sm:$0xff] }
 0xe18   : > { %v9500_v20 = vadd.f32 %v12194_v32, %v9468_v19  ;;  %v5966_v63 = vadd.f32 %v18331_v21, %v5848_v28  ;;  %v9172_v49 = vadd.f32 %v9108_v42, %v9070_v23  ;;  %v9111_v10 = vmul.f32 %v17845_v4, %v18597_v54  ;;  %v9176_v23 = vld [vmem:[#allocation2 + $0x110] sm:$0xff] }
 0xe19   : > { %9533 = vst.msk [vmem:[%s18381_s20 + $0x98] sm:$0xff] %vm20619_vm6, %v9501_v58  ;;  %v9471_v0 = vadd.f32 %v18333_v2, %v5967_v16  ;;  %v9211_v29 = vmul.f32 %v17854_v27, %v8903_v38  ;;  %v9242_v60 = vsel %vm20590_vm10, %v9210_v26, 0.0  ;;  %v12195_v2 = vld [vmem:[%s12700_s14 + $0xa8] sm:$0xff]  ;;  %v9311_v8 = vmul.f32 %v17840_v6, %v18514_v44  ;;  %vm20621_vm10 = vmmov %vm20594_vm0 }
 0xe1a   : > { %9532 = vst.msk [vmem:[%s18381_s20 + $0x90] sm:$0xff] %vm20620_vm9, %v9500_v20  ;;  %v9470_v46 = vadd.f32 %v18335_v30, %v5966_v63  ;;  %v10941_v18 = vpop.f32.mrb[36].mxu1  ;;  %v9074_v30 = vld [vmem:[#allocation2 + $0x102] sm:$0xff]  ;;  %v9073_v61 = vadd.f32 %v9041_v9, %v9003_v34  ;;  %v9380_v38 = vmul.f32 %v18368_v5, %v18549_v33  ;;  %v9072_v7 = vadd.f32 %v18525_v1, %v9002_v40 }
 0xe1b   : > { %v9503_v17 = vadd.f32 %v12195_v2, %v9471_v0  ;;  %v5969_v35 = vadd.f32 %v10941_v18, %v18331_v21  ;;  %v5858_v56 = vpop.f32.mrb[37].mxu1  ;;  %v9343_v59 = vadd.f32 %v9311_v8, %v9273_v36  ;;  %v9413_v44 = vsel %vm20586_vm2, %v9381_v3, 0.0  ;;  %v12197_v36 = vld [vmem:[%s12700_s14 + $0xb8] sm:$0xff]  ;;  %vm20623_vm2 = vmmov %vm20594_vm0  ;;  %v12200_v18 = vld [vmem:[%s12700_s14 + $0xc0] sm:$0xff] }
 0xe1c   : > { %v9502_v12 = vadd.f32 %v12196_v22, %v9470_v46  ;;  %v5968_v57 = vadd.f32 %v18331_v21, %v5858_v56  ;;  %v9274_v37 = vadd.f32 %v9242_v60, %v9172_v49  ;;  %v9275_v33 = vadd.f32 %v9211_v29, %v9173_v15  ;;  %v12199_v15 = vld [vmem:[%s12700_s14 + $0xc8] sm:$0xff]  ;;  %v12201_v8 = vld [vmem:[%s12700_s14 + $0xd8] sm:$0xff] }
 0xe1d   : > { %9535 = vst.msk [vmem:[%s18381_s20 + $0xa8] sm:$0xff] %vm20621_vm10, %v9503_v17  ;;  %v9473_v45 = vadd.f32 %v18388_v11, %v5969_v35  ;;  %v9110_v1 = vmul.f32 %v17845_v4, %v9074_v30  ;;  %v9143_v48 = vsel %vm20613_vm8, %v9111_v10, 0.0  ;;  %v9349_v11 = vld [vmem:[#allocation2 + $0x11a] sm:$0xff]  ;;  %v9212_v16 = vmul.f32 %v17854_v27, %v9176_v23 }
 0xe1e   : > { %9534 = vst.msk [vmem:[%s18381_s20 + $0xa0] sm:$0xff] %vm20622_vm11, %v9502_v12  ;;  %v9472_v19 = vadd.f32 %v18407_v24, %v5968_v57  ;;  %v10944_v50 = vpop.f32.mrb[38].mxu1  ;;  %v9175_v58 = vadd.f32 %v9143_v48, %v9073_v61  ;;  %v12198_v24 = vld [vmem:[%s12700_s14 + $0xb0] sm:$0xff]  ;;  %v9313_v4 = vmul.f32 %v17840_v6, %v9005_v52  ;;  %v9444_v20 = vadd.f32 %v9380_v38, %v18578_v13 }
 0xe1f   : > { %v9505_v25 = vadd.f32 %v12197_v36, %v9473_v45  ;;  %v5971_v26 = vadd.f32 %v10944_v50, %v18331_v21  ;;  %v5868_v43 = vpop.f32.mrb[39].mxu1  ;;  %v9174_v34 = vadd.f32 %v9110_v1, %v9072_v7  ;;  %v9315_v63 = vmul.f32 %v17840_v6, %v9279_v39  ;;  %v12202_v7 = vld [vmem:[%s12700_s14 + $0xd0] sm:$0xff]  ;;  %v12204_v1 = vld [vmem:[%s12700_s14 + $0xe0] sm:$0xff] }
 0xe20   : > { %v9504_v28 = vadd.f32 %v12198_v24, %v9472_v19  ;;  %v5970_v42 = vadd.f32 %v18331_v21, %v5868_v43  ;;  %v9385_v3 = vmul.f32 %v18368_v5, %v9349_v11  ;;  %v9445_v0 = vadd.f32 %v9413_v44, %v9343_v59  ;;  %v12203_v44 = vld [vmem:[%s12700_s14 + $0xe8] sm:$0xff] }
 0xe21   : > { %9537 = vst.msk [vmem:[%s18381_s20 + $0xb8] sm:$0xff] %vm20623_vm2, %v9505_v25  ;;  %v9475_v32 = vadd.f32 %v18497_v53, %v5971_v26  ;;  %v9345_v52 = vadd.f32 %v9313_v4, %v9275_v33  ;;  %v9383_v9 = vmul.f32 %v18368_v5, %v18597_v54  ;;  %v9348_v53 = vld [vmem:[#allocation2 + $0x112] sm:$0xff]  ;;  %v9277_v46 = vadd.f32 %v18545_v62, %v9175_v58  ;;  %v12205_v25 = vld [vmem:[%s12700_s14 + $0xf8] sm:$0xff] }
 0xe22   : > { %9536 = vst.msk [vmem:[%s18381_s20 + $0xb0] sm:$0xff] %vm20624_vm13, %v9504_v28  ;;  %v9474_v27 = vadd.f32 %v18503_v14, %v5970_v42  ;;  %v10947_v40 = vpop.f32.mrb[40].mxu1  ;;  %v9244_v14 = vsel %vm20606_vm12, %v9212_v16, 0.0  ;;  %v9344_v60 = vadd.f32 %v18542_v51, %v9274_v37  ;;  %v9384_v17 = vmul.f32 %v18368_v5, %v9348_v53  ;;  %vm20628_vm12 = vmmov %vm20594_vm0 }
 0xe23   : > { %v9507_v13 = vadd.f32 %v12199_v15, %v9475_v32  ;;  %v5973_v49 = vadd.f32 %v10947_v40, %v18331_v21  ;;  %v5878_v6 = vpop.f32.mrb[41].mxu1  ;;  %v9276_v54 = vadd.f32 %v9244_v14, %v9174_v34  ;;  %v9415_v35 = vsel %vm20597_vm14, %v9383_v9, 0.0  ;;  %vm20627_vm14 = vmmov %vm20594_vm0 }
 0xe24   : > { %v9506_v10 = vadd.f32 %v12200_v18, %v9474_v27  ;;  %v5972_v29 = vadd.f32 %v18331_v21, %v5878_v6  ;;  %v9382_v56 = vmul.f32 %v18368_v5, %v9074_v30  ;;  %v9417_v51 = vsel %vm20613_vm8, %v9385_v3, 0.0  ;;  %vm20630_vm8 = vmmov %vm20594_vm0 }
 0xe25   : > { %9539 = vst.msk [vmem:[%s18381_s20 + $0xc8] sm:$0xff] %vm20625_vm3, %v9507_v13  ;;  %v9477_v2 = vadd.f32 %v9445_v0, %v5973_v49  ;;  %v9447_v12 = vadd.f32 %v9415_v35, %v9345_v52  ;;  %v9347_v38 = vadd.f32 %v9315_v63, %v9277_v46  ;;  %v9346_v5 = vadd.f32 %v18552_v41, %v9276_v54 }
 0xe26   : > { %9538 = vst.msk [vmem:[%s18381_s20 + $0xc0] sm:$0xff] %vm20626_vm7, %v9506_v10  ;;  %v9476_v62 = vadd.f32 %v9444_v20, %v5972_v29  ;;  %v10950_v31 = vpop.f32.mrb[42].mxu1  ;;  %v9446_v45 = vadd.f32 %v9382_v56, %v9344_v60 }
 0xe27   : > { %v9509_v61 = vadd.f32 %v12201_v8, %v9477_v2  ;;  %v5975_v22 = vadd.f32 %v10950_v31, %v18331_v21  ;;  %v5888_v57 = vpop.f32.mrb[43].mxu1  ;;  %v9449_v50 = vadd.f32 %v9417_v51, %v9347_v38  ;;  %v9448_v39 = vadd.f32 %v9384_v17, %v9346_v5 }
 0xe28   : > { %v9508_v23 = vadd.f32 %v12202_v7, %v9476_v62  ;;  %v5974_v55 = vadd.f32 %v18331_v21, %v5888_v57 }
 0xe29   : > { %9541 = vst.msk [vmem:[%s18381_s20 + $0xd8] sm:$0xff] %vm20627_vm14, %v9509_v61  ;;  %v9479_v47 = vadd.f32 %v9447_v12, %v5975_v22 }
 0xe2a   : > { %9540 = vst.msk [vmem:[%s18381_s20 + $0xd0] sm:$0xff] %vm20628_vm12, %v9508_v23  ;;  %v9478_v30 = vadd.f32 %v9446_v45, %v5974_v55  ;;  %v10953_v59 = vpop.f32.mrb[44].mxu1 }
 0xe2b   : > { %v9511_v37 = vadd.f32 %v12203_v44, %v9479_v47  ;;  %v5977_v19 = vadd.f32 %v10953_v59, %v18331_v21  ;;  %v5898_v33 = vpop.f32.mrb[45].mxu1 }
 0xe2c   : > { %v9510_v41 = vadd.f32 %v12204_v1, %v9478_v30  ;;  %v5976_v48 = vadd.f32 %v18331_v21, %v5898_v33  ;;  %v12206_v21 = vld [vmem:[%s12700_s14 + $0xf0] sm:$0xff] }
 0xe2d   : > { %9543 = vst.msk [vmem:[%s18381_s20 + $0xe8] sm:$0xff] %vm20629_vm15, %v9511_v37  ;;  %v9481_v11 = vadd.f32 %v9449_v50, %v5977_v19 }
 0xe2e   : > { %9542 = vst.msk [vmem:[%s18381_s20 + $0xe0] sm:$0xff] %vm20630_vm8, %v9510_v41  ;;  %v9480_v36 = vadd.f32 %v9448_v39, %v5976_v48 }
 0xe2f   : > { %v9513_v26 = vadd.f32 %v12205_v25, %v9481_v11 }
 0xe30   : > { %v9512_v43 = vadd.f32 %v12206_v21, %v9480_v36 }
 0xe31   : > { %9545 = vst.msk [vmem:[%s18381_s20 + $0xf8] sm:$0xff] %vm20631_vm1, %v9513_v26 }
 0xe32   : > { %9544 = vst.msk [vmem:[%s18381_s20 + $0xf0] sm:$0xff] %vm20594_vm0, %v9512_v43 }
 0xe33   : > { %12349 = shalt.err (!%p12346_p4)
}
 0xe34   : > { %s12350_s14 = scalar_lea.hbm %s18693_s12, 4096  ;;  %s12354_s16 = scalar_lea.hbm %s18751_s7, 8192 }
 0xe35   : > { %p12351_p8 = scmp.ne.s32.totalorder %s18693_s12, %s12350_s14  ;;  %p12355_p2 = scmp.lt.u32.totalorder %s18693_s12, %s18751_s7 }
 0xe36   : > { %p12356_p1 = scmp.lt.u32.totalorder %s12354_s16, %s12350_s14  ;;  %p12358_p5 = scmp.lt.u32.totalorder %s12350_s14, %s18693_s12 }
 0xe37   : > { %p12352_p9 = pnand %p12351_p8, %p12639_p12 }
 0xe38   : > { %p12357_p10 = por %p12356_p1, %p12355_p2 }
 0xe39   : > { %p12353_p0 = pneg %p12352_p9 }
 0xe3a   : > { %p12359_p7 = por %p12358_p5, %p12357_p10 }
 0xe3c   : > { %p12360_p13 = pnand %p12359_p7, %p12353_p0 }
 0xe3e   : > { %12363 = shalt.err (!%p12360_p13)
}
 0xe3f   : > { %s12440_s15 = smov 128   ;;  %s12441_s10 = smov 8  }
 0xe40   : > { %11202 = dma.vmem_to_hbm [thread:$0]  (%p12639_p12), %s18695_s1, 4096, %s18693_s12, %s9547_s28, %s12440_s15, %s12440_s15, %s12441_s10  }
 0xe41 PF: > { %s9575_s22 = sand.u32 1, %s12406_s24   ;;  %p20632_p6 = scmp.ne.s32.totalorder %s19215_s8, 0 }
 0xe42   : > { %p20633_p3 = scmp.ge.s32.totalorder %s12418_s27, 2  ;;  %s9576_s19 = scalar_lea.sflag [#allocation5], %s9575_s22 }
 0xe44   : > { %p11222_p11 = pnand %p20633_p3, %p20632_p6 }
 0xe46   : > { %12401 = dma.done.wait (!%p11222_p11), %s9576_s19, 4096  }
 0xe47   : > { %12403 = vsyncadd (!%p11222_p11), %s9576_s19, 4294963200  ;;  %p23_p4 = scmp.ge.s32.totalorder %s12629_s23, 4   ;;  %s20634_s24 = smov %s12410_s25 }
 0xe48   : > { %s20635_s25 = smov %s12414_s26  ;;  %s20636_s26 = smov %s12645_s29 }
 0xe49   : > { %s20637_s27 = smov %s12629_s23  ;;  %25 = sbr.rel (!%p23_p4) target bundleno = 10 (0xa), region = 110 }
 0xe50   :  { %9581 = vsyncpa [#allocation4], 1 }
 0xe51   :  { %9583 = vsyncpa [#allocation4 + $0x1], 1 }
 0xe52   :  { %9584 = vsyncpa [#allocation8], 1 }
 0xe53   :  { %9585 = vsyncpa [#allocation12], 1 }
 0xe54   :  { %9586 = vsyncpa [#allocation5], 1 }
 0xe55   :  { %9588 = vsyncpa [#allocation5 + $0x1], 1 }
 0xe56   :  { %9589 = vsyncpa [#allocation6], 1 }
 0xe57   :  { %9591 = vsyncpa [#allocation6 + $0x1], 1 }

</bundles_post_ra>
